<compile_context>
chip_gen: v7x
topology: tpu7x:2x2x1
jax: 0.10.0
libtpu: 0.0.40
codegen_flags: <defaults>
</compile_context>

<pallas_src>
import functools

import numpy as np

import jax
import jax.numpy as jnp
from jax import lax
from jax.experimental import pallas as pl
from jax.experimental.pallas import tpu as pltpu


# ----------------------------- config --------------------------------------
class Config:
    hidden_dim = 32
    latent_dim = 8
    latent_categories = 4
    kl_balance_alpha = 0.8
    free_nats = 1.0


# ----------------------------- host-side constants --------------------------
def _group_constants(latent_dim, latent_categories):
    """Group-membership mask (D,D) and within-group cyclic-shift permutation
    matrices (C-1, D, D) for per-group softmax / per-group max."""
    C = latent_categories
    D = latent_dim * C
    idx = np.arange(D)
    grp = idx // C
    mask = (grp[:, None] == grp[None, :]).astype(np.float32)       # (D, D)
    perms = np.zeros((C - 1, D, D), np.float32)
    for d in range(1, C):
        src = grp * C + (idx % C + d) % C                          # sigma_d(j)
        perms[d - 1, src, idx] = 1.0                               # P[i,j]=1 iff i==sigma_d(j)
    return jnp.asarray(mask), jnp.asarray(perms)


# ----------------------------- fused MLPEncoder kernel ----------------------
def _encoder_kernel(x_ref, gamma_ref, beta_ref, w1_ref, b1_ref, w2_ref, b2_ref,
                    o_ref, *, eps):
    x = x_ref[...]
    mu = jnp.mean(x, axis=-1, keepdims=True)
    var = jnp.mean(jnp.square(x - mu), axis=-1, keepdims=True)
    xn = (x - mu) * lax.rsqrt(var + eps) * gamma_ref[...] + beta_ref[...]
    h1 = jnp.maximum(
        jnp.dot(xn, w1_ref[...], preferred_element_type=jnp.float32) + b1_ref[...], 0.0)
    h2 = jnp.maximum(
        jnp.dot(h1, w2_ref[...], preferred_element_type=jnp.float32) + b2_ref[...], 0.0)
    o_ref[...] = h2


def mlp_encoder(x, params, block_rows=256):
    N, obs_dim = x.shape
    H = params["enc_w1"].shape[1]
    bn = min(N, block_rows)
    full = lambda shape: pl.BlockSpec(shape, lambda i: (0,) * len(shape))
    return pl.pallas_call(
        functools.partial(_encoder_kernel, eps=1e-5),
        out_shape=jax.ShapeDtypeStruct((N, H), jnp.float32),
        grid=(pl.cdiv(N, bn),),
        in_specs=[pl.BlockSpec((bn, obs_dim), lambda i: (i, 0)),
                  full((1, obs_dim)), full((1, obs_dim)),
                  full((obs_dim, H)), full((1, H)),
                  full((H, H)), full((1, H))],
        out_specs=pl.BlockSpec((bn, H), lambda i: (i, 0)),
        compiler_params=pltpu.CompilerParams(dimension_semantics=("parallel",)),
    )(x, params["ln_gamma"].reshape(1, -1), params["ln_beta"].reshape(1, -1),
      params["enc_w1"], params["enc_b1"].reshape(1, -1),
      params["enc_w2"], params["enc_b2"].reshape(1, -1))


# ----------------------------- fused heads kernel ---------------------------
def _heads_kernel(h_ref, s_ref, w1h_ref, w1s_ref, b1_ref, w2_ref, b2_ref,
                  o_ref, *, sig_col):
    # first layer of all three heads at once; [h | sample] concat avoided by split matmul
    hid = (jnp.dot(h_ref[...], w1h_ref[...], preferred_element_type=jnp.float32)
           + jnp.dot(s_ref[...], w1s_ref[...], preferred_element_type=jnp.float32)
           + b1_ref[...])
    hid = jnp.maximum(hid, 0.0)
    # block-diagonal second layer -> one (N, obs_dim+2) output slab
    out = jnp.dot(hid, w2_ref[...], preferred_element_type=jnp.float32) + b2_ref[...]
    col = lax.broadcasted_iota(jnp.int32, out.shape, 1)
    o_ref[...] = jnp.where(col == sig_col, jax.nn.sigmoid(out), out)   # sigmoid only on discount col


def fused_heads(h_flat, s_flat, params, block_rows=256):
    N, H = h_flat.shape
    D = s_flat.shape[1]
    W = params["head_w2"].shape[1]
    bn = min(N, block_rows)
    full = lambda shape: pl.BlockSpec(shape, lambda i: (0,) * len(shape))
    return pl.pallas_call(
        functools.partial(_heads_kernel, sig_col=W - 1),
        out_shape=jax.ShapeDtypeStruct((N, W), jnp.float32),
        grid=(pl.cdiv(N, bn),),
        in_specs=[pl.BlockSpec((bn, H), lambda i: (i, 0)),
                  pl.BlockSpec((bn, D), lambda i: (i, 0)),
                  full(params["head_w1_h"].shape), full(params["head_w1_s"].shape),
                  full((1, params["head_b1"].shape[0])),
                  full(params["head_w2"].shape), full((1, W))],
        out_specs=pl.BlockSpec((bn, W), lambda i: (i, 0)),
        compiler_params=pltpu.CompilerParams(dimension_semantics=("parallel",)),
    )(h_flat, s_flat, params["head_w1_h"], params["head_w1_s"],
      params["head_b1"].reshape(1, -1), params["head_w2"],
      params["head_b2"].reshape(1, -1))


# ----------------------------- RSSM + KL kernel ------------------------------
def _rssm_kernel(invtau_ref, obs_ref, act_ref, gum_ref, mask_ref, perm_ref,
                 wpost_h_ref, wpost_o_ref, bpost_ref,
                 wih_s_ref, wih_a_ref, bih_ref,
                 whh_ref, bhh_ref,
                 wprior_ref, bprior_ref,
                 sample_out, h_out, kl_out,
                 *, hidden_dim, free_nats):
    T, B, _ = obs_ref.shape
    H = hidden_dim
    n_shift = perm_ref.shape[0]

    inv_tau = invtau_ref[...]                          # (1, 1), broadcasts
    mask = mask_ref[...]                               # (D, D) 0/1 same-group
    perms = [perm_ref[d] for d in range(n_shift)]      # within-group cyclic shifts

    # hoisted weight loads (resident across the whole unrolled loop)
    wpost_h = wpost_h_ref[...]; wpost_o = wpost_o_ref[...]; bpost = bpost_ref[...]
    wih_s = wih_s_ref[...]; wih_a = wih_a_ref[...]; bih = bih_ref[...]
    whh = whh_ref[...]; bhh = bhh_ref[...]
    wprior = wprior_ref[...]; bprior = bprior_ref[...]

    def group_max(x):                                  # exact per-group max -> (B, D)
        m = x
        for p in perms:
            m = jnp.maximum(m, jnp.dot(x, p, preferred_element_type=jnp.float32))
        return m

    def grouped_log_softmax(x):                        # log-softmax within each latent group
        gmax = group_max(x)
        e = jnp.exp(x - gmax)
        s = jnp.dot(e, mask, preferred_element_type=jnp.float32)
        return x - gmax - jnp.log(s)

    def step(t, carry):
        h, kl_sum = carry                              # (B, H), (1, 1)
        obs = obs_ref[t]                               # (B, H)
        act = act_ref[t]                               # (B, A)
        g = gum_ref[t]                                 # (B, D)

        # posterior_net(cat([h, obs_enc_t])) -- split matmul, no concat
        post_logits = (jnp.dot(h, wpost_h, preferred_element_type=jnp.float32)
                       + jnp.dot(obs, wpost_o, preferred_element_type=jnp.float32)
                       + bpost)

        # gumbel_softmax(logits.view(B,L,C), tau, hard=False): per-group softmax
        z = (post_logits + g) * inv_tau
        e = jnp.exp(z - group_max(z))
        denom = jnp.dot(e, mask, preferred_element_type=jnp.float32)
        sample = e * pl.reciprocal(denom, approx=True)

        # GRU cell (PyTorch gate order r, z, n); rnn_input = cat([sample, act]) split
        gi = (jnp.dot(sample, wih_s, preferred_element_type=jnp.float32)
              + jnp.dot(act, wih_a, preferred_element_type=jnp.float32) + bih)
        gh = jnp.dot(h, whh, preferred_element_type=jnp.float32) + bhh
        r = jax.nn.sigmoid(gi[:, 0:H] + gh[:, 0:H])
        u = jax.nn.sigmoid(gi[:, H:2 * H] + gh[:, H:2 * H])
        n = jnp.tanh(gi[:, 2 * H:3 * H] + r * gh[:, 2 * H:3 * H])
        h_new = (1.0 - u) * n + u * h

        prior_logits = jnp.dot(h_new, wprior, preferred_element_type=jnp.float32) + bprior

        # categorical KL(q || p), summed over latents; kl_balance is forward-equal to
        # plain KL (alpha*dyn + (1-alpha)*rep with dyn == rep numerically), so the dead
        # arithmetic is dropped.  free-nats clamp is applied per (batch,time) row.
        logp = grouped_log_softmax(prior_logits)
        logq = grouped_log_softmax(post_logits)
        kl_row = jnp.sum(jnp.exp(logq) * (logq - logp), axis=-1, keepdims=True)   # (B, 1)
        kl_row = jnp.maximum(kl_row - free_nats, 0.0)
        kl_sum = kl_sum + jnp.sum(kl_row, axis=0, keepdims=True)                  # (1, 1)

        sample_out[t] = sample
        h_out[t] = h_new
        return h_new, kl_sum

    h0 = jnp.zeros((B, H), jnp.float32)
    kl0 = jnp.zeros((1, 1), jnp.float32)
    _, kl_sum = lax.fori_loop(0, T, step, (h0, kl0), unroll=True)
    kl_out[...] = kl_sum * (1.0 / (T * B))


def rssm_rollout(inv_tau, obs_tbh, act_tba, gum_tbd, params, cfg):
    T, B, H = obs_tbh.shape
    A = act_tba.shape[-1]
    D = gum_tbd.shape[-1]
    mask = params["group_mask"]
    perms = params["group_perms"]

    kernel = functools.partial(_rssm_kernel, hidden_dim=H,
                               free_nats=float(cfg.free_nats))
    full = lambda shape: pl.BlockSpec(shape, lambda i: (0,) * len(shape))
    in_specs = [full((1, 1)),
                full((T, B, H)), full((T, B, A)), full((T, B, D)),
                full((D, D)), full(perms.shape),
                full((H, D)), full((H, D)), full((1, D)),
                full((D, 3 * H)), full((A, 3 * H)), full((1, 3 * H)),
                full((H, 3 * H)), full((1, 3 * H)),
                full((H, D)), full((1, D))]
    out_specs = (full((T, B, D)), full((T, B, H)), full((1, 1)))
    out_shape = (jax.ShapeDtypeStruct((T, B, D), jnp.float32),   # posterior samples
                 jax.ShapeDtypeStruct((T, B, H), jnp.float32),   # h sequence
                 jax.ShapeDtypeStruct((1, 1), jnp.float32))      # kl loss
    return pl.pallas_call(
        kernel, out_shape=out_shape, grid=(1,),
        in_specs=in_specs, out_specs=out_specs,
        compiler_params=pltpu.CompilerParams(dimension_semantics=("arbitrary",)),
    )(inv_tau, obs_tbh, act_tba, gum_tbd, mask, perms,
      params["wpost_h"], params["wpost_o"], params["bpost"].reshape(1, -1),
      params["wih_s"], params["wih_a"], params["bih"].reshape(1, -1),
      params["whh"], params["bhh"].reshape(1, -1),
      params["wprior"], params["bprior"].reshape(1, -1))


# ----------------------------- parameters -----------------------------------
def _linear_init(key, fan_in, fan_out):
    kw, kb = jax.random.split(key)
    bound = 1.0 / float(fan_in) ** 0.5
    w = jax.random.uniform(kw, (fan_in, fan_out), jnp.float32, -bound, bound)
    b = jax.random.uniform(kb, (fan_out,), jnp.float32, -bound, bound)
    return w, b


def init_params(key, obs_dim, act_dim, cfg):
    H = cfg.hidden_dim
    D = cfg.latent_dim * cfg.latent_categories
    keys = jax.random.split(key, 12)
    p = {}
    # MLPEncoder: LayerNorm -> Linear -> ReLU -> Linear -> ReLU
    p["ln_gamma"] = jnp.ones((obs_dim,), jnp.float32)
    p["ln_beta"] = jnp.zeros((obs_dim,), jnp.float32)
    p["enc_w1"], p["enc_b1"] = _linear_init(keys[0], obs_dim, H)
    p["enc_w2"], p["enc_b2"] = _linear_init(keys[1], H, H)
    # posterior_net(2H -> D) split along input (h part, obs part); prior_net(H -> D)
    wpost, bpost = _linear_init(keys[2], 2 * H, D)
    p["wpost_h"], p["wpost_o"], p["bpost"] = wpost[:H], wpost[H:], bpost
    p["wprior"], p["bprior"] = _linear_init(keys[3], H, D)
    # GRU: W_ih split (sample part, action part), W_hh, biases (gate order r,z,n)
    wih, bih = _linear_init(keys[4], D + act_dim, 3 * H)
    p["wih_s"], p["wih_a"], p["bih"] = wih[:D], wih[D:], bih
    p["whh"], p["bhh"] = _linear_init(keys[5], H, 3 * H)
    # heads: MLPDecoder / reward / discount, initialised per-layer then fused
    dec_w1, dec_b1 = _linear_init(keys[6], H + D, H)
    dec_w2, dec_b2 = _linear_init(keys[7], H, obs_dim)
    rew_w1, rew_b1 = _linear_init(keys[8], H + D, H)
    rew_w2, rew_b2 = _linear_init(keys[9], H, 1)
    dis_w1, dis_b1 = _linear_init(keys[10], H + D, H)
    dis_w2, dis_b2 = _linear_init(keys[11], H, 1)
    # fused first layer: split input (h part (H,3H), sample part (D,3H)), bias (3H,)
    p["head_w1_h"] = jnp.concatenate([dec_w1[:H], rew_w1[:H], dis_w1[:H]], axis=1)
    p["head_w1_s"] = jnp.concatenate([dec_w1[H:], rew_w1[H:], dis_w1[H:]], axis=1)
    p["head_b1"] = jnp.concatenate([dec_b1, rew_b1, dis_b1])
    # fused block-diagonal second layer (3H, obs_dim+2): [recon | reward | discount]
    w2 = jnp.zeros((3 * H, obs_dim + 2), jnp.float32)
    w2 = w2.at[0:H, 0:obs_dim].set(dec_w2)
    w2 = w2.at[H:2 * H, obs_dim].set(rew_w2[:, 0])
    w2 = w2.at[2 * H:3 * H, obs_dim + 1].set(dis_w2[:, 0])
    p["head_w2"] = w2
    p["head_b2"] = jnp.concatenate([dec_b2, rew_b2, dis_b2])
    # RSSM constants (hoisted out of the kernel loop)
    p["group_mask"], p["group_perms"] = _group_constants(cfg.latent_dim,
                                                         cfg.latent_categories)
    return p


# ----------------------------- forward --------------------------------------
def world_model_forward(params, obs_seq, act_seq, tau, gumbel_key, cfg, act_dim):
    B, T, obs_dim = obs_seq.shape
    H = cfg.hidden_dim
    L, C = cfg.latent_dim, cfg.latent_categories
    D = L * C

    # --- go time-major once; everything downstream stays (T, B, .) ---
    obs_tb = jnp.transpose(obs_seq, (1, 0, 2)).astype(jnp.float32)        # (T,B,obs)
    act_tb = jnp.transpose(act_seq, (1, 0)).astype(jnp.int32)             # (T,B)

    # --- fused MLPEncoder over flattened (T*B, obs_dim) ---
    obs_enc = mlp_encoder(obs_tb.reshape(T * B, obs_dim), params).reshape(T, B, H)

    # --- one-hot actions (is_discrete=True) ---
    act_onehot = jax.nn.one_hot(act_tb, act_dim, dtype=jnp.float32)       # (T,B,A)

    # --- gumbel noise for gumbel_softmax(logits, tau, hard=False) ---
    u = jax.random.uniform(gumbel_key, (T, B, L, C), jnp.float32,
                           minval=1e-6, maxval=1.0 - 1e-6)
    gumbel = (-jnp.log(-jnp.log(u))).reshape(T, B, D)

    inv_tau = jnp.asarray(1.0 / jnp.asarray(tau, jnp.float32),
                          jnp.float32).reshape(1, 1)

    # --- fused RSSM rollout + KL (single Pallas kernel, in-kernel T loop) ---
    sample_t, h_t, kl = rssm_rollout(inv_tau, obs_enc, act_onehot, gumbel, params, cfg)

    # NOTE: kl_balance stop-gradient structure (KL(sg(q)||p) vs KL(q||sg(p))) is not
    # represented: forward value is identical, gradients would differ.

    # --- fused decoder / reward / discount heads on (T*B, .) inputs ---
    slab = fused_heads(h_t.reshape(T * B, H), sample_t.reshape(T * B, D), params)
    slab = jnp.transpose(slab.reshape(T, B, obs_dim + 2), (1, 0, 2))      # (B,T,obs+2)

    recon_obs = slab[..., :obs_dim]
    pred_reward = slab[..., obs_dim]
    pred_discount = slab[..., obs_dim + 1]

    return {"recon_obs": recon_obs,
            "pred_reward": pred_reward,
            "pred_discount": pred_discount,
            "kl_loss": kl[0, 0],
            "rnn_h": jnp.transpose(h_t, (1, 0, 2)),
            "posterior_sample": jnp.transpose(sample_t, (1, 0, 2))}


# TODO(synk): ConvEncoder/ConvDecoder (is_image=True branch) not implemented; this
# script covers the non-image (MLPEncoder/MLPDecoder) WorldModel path only.

# ----------------------------- main ------------------------------------------
if __name__ == "__main__":
    cfg = Config()
    # batch chosen as 8 (full sublane) per perf review; seq=8, obs_dim=16, act_dim=6
    B, T = 8, 8
    obs_dim, act_dim = 16, 6

    key = jax.random.PRNGKey(0)
    k_param, k_obs, k_act, k_gum = jax.random.split(key, 4)

    params = init_params(k_param, obs_dim, act_dim, cfg)
    obs_seq = jax.random.normal(k_obs, (B, T, obs_dim), jnp.float32)
    act_seq = jax.random.randint(k_act, (B, T), 0, act_dim)
    tau = 1.0

    fwd = jax.jit(functools.partial(world_model_forward, cfg=cfg, act_dim=act_dim))
    outputs = fwd(params, obs_seq, act_seq, tau, k_gum)
    outputs = jax.block_until_ready(outputs)

    D = cfg.latent_dim * cfg.latent_categories
    assert outputs["recon_obs"].shape == (B, T, obs_dim)
    assert outputs["pred_reward"].shape == (B, T)
    assert outputs["pred_discount"].shape == (B, T)
    assert outputs["rnn_h"].shape == (B, T, cfg.hidden_dim)
    assert outputs["posterior_sample"].shape == (B, T, D)
    assert outputs["kl_loss"].shape == ()
    assert bool(jnp.all(jnp.isfinite(outputs["recon_obs"])))
    assert bool(jnp.isfinite(outputs["kl_loss"]))

    print("KERNEL_OK")
</pallas_src>

<mosaic_0001>
module attributes {stable_mosaic.version = 11 : i64} {
  func.func @_encoder_kernel(%arg0: i32, %arg1: memref<64x16xf32, #tpu.memory_space<vmem>>, %arg2: memref<1x16xf32, #tpu.memory_space<vmem>>, %arg3: memref<1x16xf32, #tpu.memory_space<vmem>>, %arg4: memref<16x32xf32, #tpu.memory_space<vmem>>, %arg5: memref<1x32xf32, #tpu.memory_space<vmem>>, %arg6: memref<32x32xf32, #tpu.memory_space<vmem>>, %arg7: memref<1x32xf32, #tpu.memory_space<vmem>>, %arg8: memref<64x32xf32, #tpu.memory_space<vmem>>) attributes {dimension_semantics = [#tpu.dimension_semantics<parallel>], iteration_bounds = array<i64: 1>, scalar_prefetch = 0 : i64, scratch_operands = 0 : i64, tpu.core_type = #tpu.core_type<tc>, window_params = [{transform_indices = @transform_0, window_bounds = array<i64: 64, 16>}, {pipeline_mode = #tpu.pipeline_mode<synchronous>, transform_indices = @transform_1, window_bounds = array<i64: 1, 16>}, {pipeline_mode = #tpu.pipeline_mode<synchronous>, transform_indices = @transform_2, window_bounds = array<i64: 1, 16>}, {pipeline_mode = #tpu.pipeline_mode<synchronous>, transform_indices = @transform_3, window_bounds = array<i64: 16, 32>}, {pipeline_mode = #tpu.pipeline_mode<synchronous>, transform_indices = @transform_4, window_bounds = array<i64: 1, 32>}, {pipeline_mode = #tpu.pipeline_mode<synchronous>, transform_indices = @transform_5, window_bounds = array<i64: 32, 32>}, {pipeline_mode = #tpu.pipeline_mode<synchronous>, transform_indices = @transform_6, window_bounds = array<i64: 1, 32>}, {transform_indices = @transform_7, window_bounds = array<i64: 64, 32>}]} {
    %c0 = arith.constant 0 : index
    %c0_0 = arith.constant 0 : index
    %0 = vector.load %arg1[%c0, %c0_0] : memref<64x16xf32, #tpu.memory_space<vmem>>, vector<64x16xf32>
    %cst = arith.constant dense<0.000000e+00> : vector<64xf32>
    %1 = vector.multi_reduction <add>, %0, %cst [1] : vector<64x16xf32> to vector<64xf32>
    %2 = vector.shape_cast %1 : vector<64xf32> to vector<64x1xf32>
    %cst_1 = arith.constant 1.600000e+01 : f32
    %3 = vector.broadcast %cst_1 : f32 to vector<64x1xf32>
    %4 = arith.divf %2, %3 : vector<64x1xf32>
    %5 = vector.broadcast %4 : vector<64x1xf32> to vector<64x16xf32>
    %6 = arith.subf %0, %5 : vector<64x16xf32>
    %7 = arith.mulf %6, %6 : vector<64x16xf32>
    %cst_2 = arith.constant dense<0.000000e+00> : vector<64xf32>
    %8 = vector.multi_reduction <add>, %7, %cst_2 [1] : vector<64x16xf32> to vector<64xf32>
    %9 = vector.shape_cast %8 : vector<64xf32> to vector<64x1xf32>
    %cst_3 = arith.constant 1.600000e+01 : f32
    %10 = vector.broadcast %cst_3 : f32 to vector<64x1xf32>
    %11 = arith.divf %9, %10 : vector<64x1xf32>
    %12 = vector.broadcast %4 : vector<64x1xf32> to vector<64x16xf32>
    %13 = arith.subf %0, %12 : vector<64x16xf32>
    %cst_4 = arith.constant 9.99999974E-6 : f32
    %14 = vector.broadcast %cst_4 : f32 to vector<64x1xf32>
    %15 = arith.addf %11, %14 : vector<64x1xf32>
    %16 = math.rsqrt %15 : vector<64x1xf32>
    %17 = vector.broadcast %16 : vector<64x1xf32> to vector<64x16xf32>
    %18 = arith.mulf %13, %17 : vector<64x16xf32>
    %c0_5 = arith.constant 0 : index
    %c0_6 = arith.constant 0 : index
    %19 = vector.load %arg2[%c0_5, %c0_6] : memref<1x16xf32, #tpu.memory_space<vmem>>, vector<1x16xf32>
    %20 = vector.broadcast %19 : vector<1x16xf32> to vector<64x16xf32>
    %21 = arith.mulf %18, %20 : vector<64x16xf32>
    %c0_7 = arith.constant 0 : index
    %c0_8 = arith.constant 0 : index
    %22 = vector.load %arg3[%c0_7, %c0_8] : memref<1x16xf32, #tpu.memory_space<vmem>>, vector<1x16xf32>
    %23 = vector.broadcast %22 : vector<1x16xf32> to vector<64x16xf32>
    %24 = arith.addf %21, %23 : vector<64x16xf32>
    %c0_9 = arith.constant 0 : index
    %c0_10 = arith.constant 0 : index
    %25 = vector.load %arg4[%c0_9, %c0_10] : memref<16x32xf32, #tpu.memory_space<vmem>>, vector<16x32xf32>
    %cst_11 = arith.constant dense<0.000000e+00> : vector<64x32xf32>
    %26 = tpu.matmul %24, %25, %cst_11 {dimension_numbers = #tpu.dot_dimension_numbers<[1], [0], [0], [1], [0, 0, 1, 1], [], []>} : vector<64x16xf32>, vector<16x32xf32>, vector<64x32xf32> -> vector<64x32xf32>
    %c0_12 = arith.constant 0 : index
    %c0_13 = arith.constant 0 : index
    %27 = vector.load %arg5[%c0_12, %c0_13] : memref<1x32xf32, #tpu.memory_space<vmem>>, vector<1x32xf32>
    %28 = vector.broadcast %27 : vector<1x32xf32> to vector<64x32xf32>
    %29 = arith.addf %26, %28 : vector<64x32xf32>
    %cst_14 = arith.constant 0.000000e+00 : f32
    %30 = vector.broadcast %cst_14 : f32 to vector<64x32xf32>
    %31 = arith.maximumf %29, %30 : vector<64x32xf32>
    %c0_15 = arith.constant 0 : index
    %c0_16 = arith.constant 0 : index
    %32 = vector.load %arg6[%c0_15, %c0_16] : memref<32x32xf32, #tpu.memory_space<vmem>>, vector<32x32xf32>
    %cst_17 = arith.constant dense<0.000000e+00> : vector<64x32xf32>
    %33 = tpu.matmul %31, %32, %cst_17 {dimension_numbers = #tpu.dot_dimension_numbers<[1], [0], [0], [1], [0, 0, 1, 1], [], []>} : vector<64x32xf32>, vector<32x32xf32>, vector<64x32xf32> -> vector<64x32xf32>
    %c0_18 = arith.constant 0 : index
    %c0_19 = arith.constant 0 : index
    %34 = vector.load %arg7[%c0_18, %c0_19] : memref<1x32xf32, #tpu.memory_space<vmem>>, vector<1x32xf32>
    %35 = vector.broadcast %34 : vector<1x32xf32> to vector<64x32xf32>
    %36 = arith.addf %33, %35 : vector<64x32xf32>
    %cst_20 = arith.constant 0.000000e+00 : f32
    %37 = vector.broadcast %cst_20 : f32 to vector<64x32xf32>
    %38 = arith.maximumf %36, %37 : vector<64x32xf32>
    %c0_21 = arith.constant 0 : index
    %c0_22 = arith.constant 0 : index
    %39 = vector.load %arg8[%c0_21, %c0_22] : memref<64x32xf32, #tpu.memory_space<vmem>>, vector<64x32xf32>
    tpu.vector_store %arg8[%c0_21, %c0_22], %38 {strides = array<i32>} : memref<64x32xf32, #tpu.memory_space<vmem>>, vector<64x32xf32>,
    return
  }
  func.func @transform_0(%arg0: i32) -> (i32, i32) {
    %c0_i32 = arith.constant 0 : i32
    %c0_i32_0 = arith.constant 0 : i32
    return %arg0, %c0_i32 : i32, i32
  }
  func.func @transform_1(%arg0: i32) -> (i32, i32) {
    %c0_i32 = arith.constant 0 : i32
    %c0_i32_0 = arith.constant 0 : i32
    %c0_i32_1 = arith.constant 0 : i32
    return %c0_i32, %c0_i32_0 : i32, i32
  }
  func.func @transform_2(%arg0: i32) -> (i32, i32) {
    %c0_i32 = arith.constant 0 : i32
    %c0_i32_0 = arith.constant 0 : i32
    %c0_i32_1 = arith.constant 0 : i32
    return %c0_i32, %c0_i32_0 : i32, i32
  }
  func.func @transform_3(%arg0: i32) -> (i32, i32) {
    %c0_i32 = arith.constant 0 : i32
    %c0_i32_0 = arith.constant 0 : i32
    %c0_i32_1 = arith.constant 0 : i32
    return %c0_i32, %c0_i32_0 : i32, i32
  }
  func.func @transform_4(%arg0: i32) -> (i32, i32) {
    %c0_i32 = arith.constant 0 : i32
    %c0_i32_0 = arith.constant 0 : i32
    %c0_i32_1 = arith.constant 0 : i32
    return %c0_i32, %c0_i32_0 : i32, i32
  }
  func.func @transform_5(%arg0: i32) -> (i32, i32) {
    %c0_i32 = arith.constant 0 : i32
    %c0_i32_0 = arith.constant 0 : i32
    %c0_i32_1 = arith.constant 0 : i32
    return %c0_i32, %c0_i32_0 : i32, i32
  }
  func.func @transform_6(%arg0: i32) -> (i32, i32) {
    %c0_i32 = arith.constant 0 : i32
    %c0_i32_0 = arith.constant 0 : i32
    %c0_i32_1 = arith.constant 0 : i32
    return %c0_i32, %c0_i32_0 : i32, i32
  }
  func.func @transform_7(%arg0: i32) -> (i32, i32) {
    %c0_i32 = arith.constant 0 : i32
    %c0_i32_0 = arith.constant 0 : i32
    return %arg0, %c0_i32 : i32, i32
  }
}

module attributes {stable_mosaic.version = 11 : i64} {
  func.func @_rssm_kernel(%arg0: i32, %arg1: memref<1x1xf32, #tpu.memory_space<vmem>>, %arg2: memref<8x8x32xf32, #tpu.memory_space<vmem>>, %arg3: memref<8x8x6xf32, #tpu.memory_space<vmem>>, %arg4: memref<8x8x32xf32, #tpu.memory_space<vmem>>, %arg5: memref<32x32xf32, #tpu.memory_space<vmem>>, %arg6: memref<3x32x32xf32, #tpu.memory_space<vmem>>, %arg7: memref<32x32xf32, #tpu.memory_space<vmem>>, %arg8: memref<32x32xf32, #tpu.memory_space<vmem>>, %arg9: memref<1x32xf32, #tpu.memory_space<vmem>>, %arg10: memref<32x96xf32, #tpu.memory_space<vmem>>, %arg11: memref<6x96xf32, #tpu.memory_space<vmem>>, %arg12: memref<1x96xf32, #tpu.memory_space<vmem>>, %arg13: memref<32x96xf32, #tpu.memory_space<vmem>>, %arg14: memref<1x96xf32, #tpu.memory_space<vmem>>, %arg15: memref<32x32xf32, #tpu.memory_space<vmem>>, %arg16: memref<1x32xf32, #tpu.memory_space<vmem>>, %arg17: memref<8x8x32xf32, #tpu.memory_space<vmem>>, %arg18: memref<8x8x32xf32, #tpu.memory_space<vmem>>, %arg19: memref<1x1xf32, #tpu.memory_space<vmem>>) attributes {dimension_semantics = [#tpu.dimension_semantics<arbitrary>], iteration_bounds = array<i64: 1>, scalar_prefetch = 0 : i64, scratch_operands = 0 : i64, tpu.core_type = #tpu.core_type<tc>, window_params = [{pipeline_mode = #tpu.pipeline_mode<synchronous>, transform_indices = @transform_0, window_bounds = array<i64: 1, 1>}, {pipeline_mode = #tpu.pipeline_mode<synchronous>, transform_indices = @transform_1, window_bounds = array<i64: 8, 8, 32>}, {pipeline_mode = #tpu.pipeline_mode<synchronous>, transform_indices = @transform_2, window_bounds = array<i64: 8, 8, 6>}, {pipeline_mode = #tpu.pipeline_mode<synchronous>, transform_indices = @transform_3, window_bounds = array<i64: 8, 8, 32>}, {pipeline_mode = #tpu.pipeline_mode<synchronous>, transform_indices = @transform_4, window_bounds = array<i64: 32, 32>}, {pipeline_mode = #tpu.pipeline_mode<synchronous>, transform_indices = @transform_5, window_bounds = array<i64: 3, 32, 32>}, {pipeline_mode = #tpu.pipeline_mode<synchronous>, transform_indices = @transform_6, window_bounds = array<i64: 32, 32>}, {pipeline_mode = #tpu.pipeline_mode<synchronous>, transform_indices = @transform_7, window_bounds = array<i64: 32, 32>}, {pipeline_mode = #tpu.pipeline_mode<synchronous>, transform_indices = @transform_8, window_bounds = array<i64: 1, 32>}, {pipeline_mode = #tpu.pipeline_mode<synchronous>, transform_indices = @transform_9, window_bounds = array<i64: 32, 96>}, {pipeline_mode = #tpu.pipeline_mode<synchronous>, transform_indices = @transform_10, window_bounds = array<i64: 6, 96>}, {pipeline_mode = #tpu.pipeline_mode<synchronous>, transform_indices = @transform_11, window_bounds = array<i64: 1, 96>}, {pipeline_mode = #tpu.pipeline_mode<synchronous>, transform_indices = @transform_12, window_bounds = array<i64: 32, 96>}, {pipeline_mode = #tpu.pipeline_mode<synchronous>, transform_indices = @transform_13, window_bounds = array<i64: 1, 96>}, {pipeline_mode = #tpu.pipeline_mode<synchronous>, transform_indices = @transform_14, window_bounds = array<i64: 32, 32>}, {pipeline_mode = #tpu.pipeline_mode<synchronous>, transform_indices = @transform_15, window_bounds = array<i64: 1, 32>}, {pipeline_mode = #tpu.pipeline_mode<synchronous>, transform_indices = @transform_16, window_bounds = array<i64: 8, 8, 32>}, {pipeline_mode = #tpu.pipeline_mode<synchronous>, transform_indices = @transform_17, window_bounds = array<i64: 8, 8, 32>}, {pipeline_mode = #tpu.pipeline_mode<synchronous>, transform_indices = @transform_18, window_bounds = array<i64: 1, 1>}]} {
    %c0 = arith.constant 0 : index
    %c0_0 = arith.constant 0 : index
    %0 = vector.load %arg1[%c0, %c0_0] : memref<1x1xf32, #tpu.memory_space<vmem>>, vector<1x1xf32>
    %c0_1 = arith.constant 0 : index
    %c0_2 = arith.constant 0 : index
    %1 = vector.load %arg5[%c0_1, %c0_2] : memref<32x32xf32, #tpu.memory_space<vmem>>, vector<32x32xf32>
    %c0_3 = arith.constant 0 : index
    %c0_4 = arith.constant 0 : index
    %c0_5 = arith.constant 0 : index
    %2 = vector.load %arg6[%c0_3, %c0_4, %c0_5] : memref<3x32x32xf32, #tpu.memory_space<vmem>>, vector<1x32x32xf32>
    %3 = vector.shape_cast %2 : vector<1x32x32xf32> to vector<32x32xf32>
    %c1 = arith.constant 1 : index
    %c0_6 = arith.constant 0 : index
    %c0_7 = arith.constant 0 : index
    %4 = vector.load %arg6[%c1, %c0_6, %c0_7] : memref<3x32x32xf32, #tpu.memory_space<vmem>>, vector<1x32x32xf32>
    %5 = vector.shape_cast %4 : vector<1x32x32xf32> to vector<32x32xf32>
    %c2 = arith.constant 2 : index
    %c0_8 = arith.constant 0 : index
    %c0_9 = arith.constant 0 : index
    %6 = vector.load %arg6[%c2, %c0_8, %c0_9] : memref<3x32x32xf32, #tpu.memory_space<vmem>>, vector<1x32x32xf32>
    %7 = vector.shape_cast %6 : vector<1x32x32xf32> to vector<32x32xf32>
    %c0_10 = arith.constant 0 : index
    %c0_11 = arith.constant 0 : index
    %8 = vector.load %arg7[%c0_10, %c0_11] : memref<32x32xf32, #tpu.memory_space<vmem>>, vector<32x32xf32>
    %c0_12 = arith.constant 0 : index
    %c0_13 = arith.constant 0 : index
    %9 = vector.load %arg8[%c0_12, %c0_13] : memref<32x32xf32, #tpu.memory_space<vmem>>, vector<32x32xf32>
    %c0_14 = arith.constant 0 : index
    %c0_15 = arith.constant 0 : index
    %10 = vector.load %arg9[%c0_14, %c0_15] : memref<1x32xf32, #tpu.memory_space<vmem>>, vector<1x32xf32>
    %c0_16 = arith.constant 0 : index
    %c0_17 = arith.constant 0 : index
    %11 = vector.load %arg10[%c0_16, %c0_17] : memref<32x96xf32, #tpu.memory_space<vmem>>, vector<32x96xf32>
    %c0_18 = arith.constant 0 : index
    %c0_19 = arith.constant 0 : index
    %12 = vector.load %arg11[%c0_18, %c0_19] : memref<6x96xf32, #tpu.memory_space<vmem>>, vector<6x96xf32>
    %c0_20 = arith.constant 0 : index
    %c0_21 = arith.constant 0 : index
    %13 = vector.load %arg12[%c0_20, %c0_21] : memref<1x96xf32, #tpu.memory_space<vmem>>, vector<1x96xf32>
    %c0_22 = arith.constant 0 : index
    %c0_23 = arith.constant 0 : index
    %14 = vector.load %arg13[%c0_22, %c0_23] : memref<32x96xf32, #tpu.memory_space<vmem>>, vector<32x96xf32>
    %c0_24 = arith.constant 0 : index
    %c0_25 = arith.constant 0 : index
    %15 = vector.load %arg14[%c0_24, %c0_25] : memref<1x96xf32, #tpu.memory_space<vmem>>, vector<1x96xf32>
    %c0_26 = arith.constant 0 : index
    %c0_27 = arith.constant 0 : index
    %16 = vector.load %arg15[%c0_26, %c0_27] : memref<32x32xf32, #tpu.memory_space<vmem>>, vector<32x32xf32>
    %c0_28 = arith.constant 0 : index
    %c0_29 = arith.constant 0 : index
    %17 = vector.load %arg16[%c0_28, %c0_29] : memref<1x32xf32, #tpu.memory_space<vmem>>, vector<1x32xf32>
    %cst = arith.constant 0.000000e+00 : f32
    %18 = vector.broadcast %cst : f32 to vector<8x32xf32>
    %cst_30 = arith.constant 0.000000e+00 : f32
    %19 = vector.broadcast %cst_30 : f32 to vector<1x1xf32>
    %c0_i32 = arith.constant 0 : i32
    %20 = arith.index_cast %c0_i32 : i32 to index
    %c0_31 = arith.constant 0 : index
    %c0_32 = arith.constant 0 : index
    %21 = vector.load %arg2[%20, %c0_31, %c0_32] : memref<8x8x32xf32, #tpu.memory_space<vmem>>, vector<1x8x32xf32>
    %22 = vector.shape_cast %21 : vector<1x8x32xf32> to vector<8x32xf32>
    %23 = arith.index_cast %c0_i32 : i32 to index
    %c0_33 = arith.constant 0 : index
    %c0_34 = arith.constant 0 : index
    %24 = vector.load %arg3[%23, %c0_33, %c0_34] : memref<8x8x6xf32, #tpu.memory_space<vmem>>, vector<1x8x6xf32>
    %25 = vector.shape_cast %24 : vector<1x8x6xf32> to vector<8x6xf32>
    %26 = arith.index_cast %c0_i32 : i32 to index
    %c0_35 = arith.constant 0 : index
    %c0_36 = arith.constant 0 : index
    %27 = vector.load %arg4[%26, %c0_35, %c0_36] : memref<8x8x32xf32, #tpu.memory_space<vmem>>, vector<1x8x32xf32>
    %28 = vector.shape_cast %27 : vector<1x8x32xf32> to vector<8x32xf32>
    %cst_37 = arith.constant dense<0.000000e+00> : vector<8x32xf32>
    %29 = tpu.matmul %18, %8, %cst_37 {dimension_numbers = #tpu.dot_dimension_numbers<[1], [0], [0], [1], [0, 0, 1, 1], [], []>} : vector<8x32xf32>, vector<32x32xf32>, vector<8x32xf32> -> vector<8x32xf32>
    %cst_38 = arith.constant dense<0.000000e+00> : vector<8x32xf32>
    %30 = tpu.matmul %22, %9, %cst_38 {dimension_numbers = #tpu.dot_dimension_numbers<[1], [0], [0], [1], [0, 0, 1, 1], [], []>} : vector<8x32xf32>, vector<32x32xf32>, vector<8x32xf32> -> vector<8x32xf32>
    %31 = arith.addf %29, %30 : vector<8x32xf32>
    %32 = vector.broadcast %10 : vector<1x32xf32> to vector<8x32xf32>
    %33 = arith.addf %31, %32 : vector<8x32xf32>
    %34 = arith.addf %33, %28 : vector<8x32xf32>
    %35 = vector.broadcast %0 : vector<1x1xf32> to vector<8x32xf32>
    %36 = arith.mulf %34, %35 : vector<8x32xf32>
    %cst_39 = arith.constant dense<0.000000e+00> : vector<8x32xf32>
    %37 = tpu.matmul %36, %3, %cst_39 {dimension_numbers = #tpu.dot_dimension_numbers<[1], [0], [0], [1], [0, 0, 1, 1], [], []>} : vector<8x32xf32>, vector<32x32xf32>, vector<8x32xf32> -> vector<8x32xf32>
    %38 = arith.maximumf %36, %37 : vector<8x32xf32>
    %cst_40 = arith.constant dense<0.000000e+00> : vector<8x32xf32>
    %39 = tpu.matmul %36, %5, %cst_40 {dimension_numbers = #tpu.dot_dimension_numbers<[1], [0], [0], [1], [0, 0, 1, 1], [], []>} : vector<8x32xf32>, vector<32x32xf32>, vector<8x32xf32> -> vector<8x32xf32>
    %40 = arith.maximumf %38, %39 : vector<8x32xf32>
    %cst_41 = arith.constant dense<0.000000e+00> : vector<8x32xf32>
    %41 = tpu.matmul %36, %7, %cst_41 {dimension_numbers = #tpu.dot_dimension_numbers<[1], [0], [0], [1], [0, 0, 1, 1], [], []>} : vector<8x32xf32>, vector<32x32xf32>, vector<8x32xf32> -> vector<8x32xf32>
    %42 = arith.maximumf %40, %41 : vector<8x32xf32>
    %43 = arith.subf %36, %42 : vector<8x32xf32>
    %44 = math.exp %43 : vector<8x32xf32>
    %cst_42 = arith.constant dense<0.000000e+00> : vector<8x32xf32>
    %45 = tpu.matmul %44, %1, %cst_42 {dimension_numbers = #tpu.dot_dimension_numbers<[1], [0], [0], [1], [0, 0, 1, 1], [], []>} : vector<8x32xf32>, vector<32x32xf32>, vector<8x32xf32> -> vector<8x32xf32>
    %46 = tpu.reciprocal %45 {approx = true} : vector<8x32xf32> -> vector<8x32xf32>
    %47 = arith.mulf %44, %46 : vector<8x32xf32>
    %cst_43 = arith.constant dense<0.000000e+00> : vector<8x96xf32>
    %48 = tpu.matmul %47, %11, %cst_43 {dimension_numbers = #tpu.dot_dimension_numbers<[1], [0], [0], [1], [0, 0, 1, 1], [], []>} : vector<8x32xf32>, vector<32x96xf32>, vector<8x96xf32> -> vector<8x96xf32>
    %cst_44 = arith.constant dense<0.000000e+00> : vector<8x96xf32>
    %49 = tpu.matmul %25, %12, %cst_44 {dimension_numbers = #tpu.dot_dimension_numbers<[1], [0], [0], [1], [0, 0, 1, 1], [], []>} : vector<8x6xf32>, vector<6x96xf32>, vector<8x96xf32> -> vector<8x96xf32>
    %50 = arith.addf %48, %49 : vector<8x96xf32>
    %51 = vector.broadcast %13 : vector<1x96xf32> to vector<8x96xf32>
    %52 = arith.addf %50, %51 : vector<8x96xf32>
    %cst_45 = arith.constant dense<0.000000e+00> : vector<8x96xf32>
    %53 = tpu.matmul %18, %14, %cst_45 {dimension_numbers = #tpu.dot_dimension_numbers<[1], [0], [0], [1], [0, 0, 1, 1], [], []>} : vector<8x32xf32>, vector<32x96xf32>, vector<8x96xf32> -> vector<8x96xf32>
    %54 = vector.broadcast %15 : vector<1x96xf32> to vector<8x96xf32>
    %55 = arith.addf %53, %54 : vector<8x96xf32>
    %56 = vector.extract_strided_slice %52 {offsets = [0, 0], sizes = [8, 32], strides = [1, 1]} : vector<8x96xf32> to vector<8x32xf32>
    %57 = vector.extract_strided_slice %55 {offsets = [0, 0], sizes = [8, 32], strides = [1, 1]} : vector<8x96xf32> to vector<8x32xf32>
    %58 = arith.addf %56, %57 : vector<8x32xf32>
    %59 = arith.negf %58 : vector<8x32xf32>
    %60 = math.exp %59 : vector<8x32xf32>
    %cst_46 = arith.constant 1.000000e+00 : f32
    %61 = vector.broadcast %cst_46 : f32 to vector<8x32xf32>
    %62 = arith.addf %61, %60 : vector<8x32xf32>
    %63 = arith.divf %61, %62 : vector<8x32xf32>
    %64 = vector.extract_strided_slice %52 {offsets = [0, 32], sizes = [8, 32], strides = [1, 1]} : vector<8x96xf32> to vector<8x32xf32>
    %65 = vector.extract_strided_slice %55 {offsets = [0, 32], sizes = [8, 32], strides = [1, 1]} : vector<8x96xf32> to vector<8x32xf32>
    %66 = arith.addf %64, %65 : vector<8x32xf32>
    %67 = arith.negf %66 : vector<8x32xf32>
    %68 = math.exp %67 : vector<8x32xf32>
    %cst_47 = arith.constant 1.000000e+00 : f32
    %69 = vector.broadcast %cst_47 : f32 to vector<8x32xf32>
    %70 = arith.addf %69, %68 : vector<8x32xf32>
    %71 = arith.divf %69, %70 : vector<8x32xf32>
    %72 = vector.extract_strided_slice %52 {offsets = [0, 64], sizes = [8, 32], strides = [1, 1]} : vector<8x96xf32> to vector<8x32xf32>
    %73 = vector.extract_strided_slice %55 {offsets = [0, 64], sizes = [8, 32], strides = [1, 1]} : vector<8x96xf32> to vector<8x32xf32>
    %74 = arith.mulf %63, %73 : vector<8x32xf32>
    %75 = arith.addf %72, %74 : vector<8x32xf32>
    %76 = math.tanh %75 : vector<8x32xf32>
    %cst_48 = arith.constant 1.000000e+00 : f32
    %77 = vector.broadcast %cst_48 : f32 to vector<8x32xf32>
    %78 = arith.subf %77, %71 : vector<8x32xf32>
    %79 = arith.mulf %78, %76 : vector<8x32xf32>
    %80 = arith.mulf %71, %18 : vector<8x32xf32>
    %81 = arith.addf %79, %80 : vector<8x32xf32>
    %cst_49 = arith.constant dense<0.000000e+00> : vector<8x32xf32>
    %82 = tpu.matmul %81, %16, %cst_49 {dimension_numbers = #tpu.dot_dimension_numbers<[1], [0], [0], [1], [0, 0, 1, 1], [], []>} : vector<8x32xf32>, vector<32x32xf32>, vector<8x32xf32> -> vector<8x32xf32>
    %83 = vector.broadcast %17 : vector<1x32xf32> to vector<8x32xf32>
    %84 = arith.addf %82, %83 : vector<8x32xf32>
    %cst_50 = arith.constant dense<0.000000e+00> : vector<8x32xf32>
    %85 = tpu.matmul %84, %3, %cst_50 {dimension_numbers = #tpu.dot_dimension_numbers<[1], [0], [0], [1], [0, 0, 1, 1], [], []>} : vector<8x32xf32>, vector<32x32xf32>, vector<8x32xf32> -> vector<8x32xf32>
    %86 = arith.maximumf %84, %85 : vector<8x32xf32>
    %cst_51 = arith.constant dense<0.000000e+00> : vector<8x32xf32>
    %87 = tpu.matmul %84, %5, %cst_51 {dimension_numbers = #tpu.dot_dimension_numbers<[1], [0], [0], [1], [0, 0, 1, 1], [], []>} : vector<8x32xf32>, vector<32x32xf32>, vector<8x32xf32> -> vector<8x32xf32>
    %88 = arith.maximumf %86, %87 : vector<8x32xf32>
    %cst_52 = arith.constant dense<0.000000e+00> : vector<8x32xf32>
    %89 = tpu.matmul %84, %7, %cst_52 {dimension_numbers = #tpu.dot_dimension_numbers<[1], [0], [0], [1], [0, 0, 1, 1], [], []>} : vector<8x32xf32>, vector<32x32xf32>, vector<8x32xf32> -> vector<8x32xf32>
    %90 = arith.maximumf %88, %89 : vector<8x32xf32>
    %91 = arith.subf %84, %90 : vector<8x32xf32>
    %92 = math.exp %91 : vector<8x32xf32>
    %cst_53 = arith.constant dense<0.000000e+00> : vector<8x32xf32>
    %93 = tpu.matmul %92, %1, %cst_53 {dimension_numbers = #tpu.dot_dimension_numbers<[1], [0], [0], [1], [0, 0, 1, 1], [], []>} : vector<8x32xf32>, vector<32x32xf32>, vector<8x32xf32> -> vector<8x32xf32>
    %94 = arith.subf %84, %90 : vector<8x32xf32>
    %95 = math.log %93 : vector<8x32xf32>
    %96 = arith.subf %94, %95 : vector<8x32xf32>
    %cst_54 = arith.constant dense<0.000000e+00> : vector<8x32xf32>
    %97 = tpu.matmul %33, %3, %cst_54 {dimension_numbers = #tpu.dot_dimension_numbers<[1], [0], [0], [1], [0, 0, 1, 1], [], []>} : vector<8x32xf32>, vector<32x32xf32>, vector<8x32xf32> -> vector<8x32xf32>
    %98 = arith.maximumf %33, %97 : vector<8x32xf32>
    %cst_55 = arith.constant dense<0.000000e+00> : vector<8x32xf32>
    %99 = tpu.matmul %33, %5, %cst_55 {dimension_numbers = #tpu.dot_dimension_numbers<[1], [0], [0], [1], [0, 0, 1, 1], [], []>} : vector<8x32xf32>, vector<32x32xf32>, vector<8x32xf32> -> vector<8x32xf32>
    %100 = arith.maximumf %98, %99 : vector<8x32xf32>
    %cst_56 = arith.constant dense<0.000000e+00> : vector<8x32xf32>
    %101 = tpu.matmul %33, %7, %cst_56 {dimension_numbers = #tpu.dot_dimension_numbers<[1], [0], [0], [1], [0, 0, 1, 1], [], []>} : vector<8x32xf32>, vector<32x32xf32>, vector<8x32xf32> -> vector<8x32xf32>
    %102 = arith.maximumf %100, %101 : vector<8x32xf32>
    %103 = arith.subf %33, %102 : vector<8x32xf32>
    %104 = math.exp %103 : vector<8x32xf32>
    %cst_57 = arith.constant dense<0.000000e+00> : vector<8x32xf32>
    %105 = tpu.matmul %104, %1, %cst_57 {dimension_numbers = #tpu.dot_dimension_numbers<[1], [0], [0], [1], [0, 0, 1, 1], [], []>} : vector<8x32xf32>, vector<32x32xf32>, vector<8x32xf32> -> vector<8x32xf32>
    %106 = arith.subf %33, %102 : vector<8x32xf32>
    %107 = math.log %105 : vector<8x32xf32>
    %108 = arith.subf %106, %107 : vector<8x32xf32>
    %109 = math.exp %108 : vector<8x32xf32>
    %110 = arith.subf %108, %96 : vector<8x32xf32>
    %111 = arith.mulf %109, %110 : vector<8x32xf32>
    %cst_58 = arith.constant dense<0.000000e+00> : vector<8xf32>
    %112 = vector.multi_reduction <add>, %111, %cst_58 [1] : vector<8x32xf32> to vector<8xf32>
    %113 = vector.shape_cast %112 : vector<8xf32> to vector<8x1xf32>
    %cst_59 = arith.constant 1.000000e+00 : f32
    %114 = vector.broadcast %cst_59 : f32 to vector<8x1xf32>
    %115 = arith.subf %113, %114 : vector<8x1xf32>
    %cst_60 = arith.constant 0.000000e+00 : f32
    %116 = vector.broadcast %cst_60 : f32 to vector<8x1xf32>
    %117 = arith.maximumf %115, %116 : vector<8x1xf32>
    %cst_61 = arith.constant dense<0.000000e+00> : vector<1xf32>
    %118 = vector.multi_reduction <add>, %117, %cst_61 [0] : vector<8x1xf32> to vector<1xf32>
    %119 = vector.shape_cast %118 : vector<1xf32> to vector<1x1xf32>
    %120 = arith.addf %19, %119 : vector<1x1xf32>
    %121 = arith.index_cast %c0_i32 : i32 to index
    %c0_62 = arith.constant 0 : index
    %c0_63 = arith.constant 0 : index
    %122 = vector.load %arg17[%121, %c0_62, %c0_63] : memref<8x8x32xf32, #tpu.memory_space<vmem>>, vector<1x8x32xf32>
    %123 = vector.shape_cast %122 : vector<1x8x32xf32> to vector<8x32xf32>
    %124 = vector.shape_cast %47 : vector<8x32xf32> to vector<1x8x32xf32>
    tpu.vector_store %arg17[%121, %c0_62, %c0_63], %124 {strides = array<i32>} : memref<8x8x32xf32, #tpu.memory_space<vmem>>, vector<1x8x32xf32>,
    %125 = arith.index_cast %c0_i32 : i32 to index
    %c0_64 = arith.constant 0 : index
    %c0_65 = arith.constant 0 : index
    %126 = vector.load %arg18[%125, %c0_64, %c0_65] : memref<8x8x32xf32, #tpu.memory_space<vmem>>, vector<1x8x32xf32>
    %127 = vector.shape_cast %126 : vector<1x8x32xf32> to vector<8x32xf32>
    %128 = vector.shape_cast %81 : vector<8x32xf32> to vector<1x8x32xf32>
    tpu.vector_store %arg18[%125, %c0_64, %c0_65], %128 {strides = array<i32>} : memref<8x8x32xf32, #tpu.memory_space<vmem>>, vector<1x8x32xf32>,
    %c1_i32 = arith.constant 1 : i32
    %129 = arith.index_cast %c1_i32 : i32 to index
    %c0_66 = arith.constant 0 : index
    %c0_67 = arith.constant 0 : index
    %130 = vector.load %arg2[%129, %c0_66, %c0_67] : memref<8x8x32xf32, #tpu.memory_space<vmem>>, vector<1x8x32xf32>
    %131 = vector.shape_cast %130 : vector<1x8x32xf32> to vector<8x32xf32>
    %132 = arith.index_cast %c1_i32 : i32 to index
    %c0_68 = arith.constant 0 : index
    %c0_69 = arith.constant 0 : index
    %133 = vector.load %arg3[%132, %c0_68, %c0_69] : memref<8x8x6xf32, #tpu.memory_space<vmem>>, vector<1x8x6xf32>
    %134 = vector.shape_cast %133 : vector<1x8x6xf32> to vector<8x6xf32>
    %135 = arith.index_cast %c1_i32 : i32 to index
    %c0_70 = arith.constant 0 : index
    %c0_71 = arith.constant 0 : index
    %136 = vector.load %arg4[%135, %c0_70, %c0_71] : memref<8x8x32xf32, #tpu.memory_space<vmem>>, vector<1x8x32xf32>
    %137 = vector.shape_cast %136 : vector<1x8x32xf32> to vector<8x32xf32>
    %cst_72 = arith.constant dense<0.000000e+00> : vector<8x32xf32>
    %138 = tpu.matmul %81, %8, %cst_72 {dimension_numbers = #tpu.dot_dimension_numbers<[1], [0], [0], [1], [0, 0, 1, 1], [], []>} : vector<8x32xf32>, vector<32x32xf32>, vector<8x32xf32> -> vector<8x32xf32>
    %cst_73 = arith.constant dense<0.000000e+00> : vector<8x32xf32>
    %139 = tpu.matmul %131, %9, %cst_73 {dimension_numbers = #tpu.dot_dimension_numbers<[1], [0], [0], [1], [0, 0, 1, 1], [], []>} : vector<8x32xf32>, vector<32x32xf32>, vector<8x32xf32> -> vector<8x32xf32>
    %140 = arith.addf %138, %139 : vector<8x32xf32>
    %141 = vector.broadcast %10 : vector<1x32xf32> to vector<8x32xf32>
    %142 = arith.addf %140, %141 : vector<8x32xf32>
    %143 = arith.addf %142, %137 : vector<8x32xf32>
    %144 = vector.broadcast %0 : vector<1x1xf32> to vector<8x32xf32>
    %145 = arith.mulf %143, %144 : vector<8x32xf32>
    %cst_74 = arith.constant dense<0.000000e+00> : vector<8x32xf32>
    %146 = tpu.matmul %145, %3, %cst_74 {dimension_numbers = #tpu.dot_dimension_numbers<[1], [0], [0], [1], [0, 0, 1, 1], [], []>} : vector<8x32xf32>, vector<32x32xf32>, vector<8x32xf32> -> vector<8x32xf32>
    %147 = arith.maximumf %145, %146 : vector<8x32xf32>
    %cst_75 = arith.constant dense<0.000000e+00> : vector<8x32xf32>
    %148 = tpu.matmul %145, %5, %cst_75 {dimension_numbers = #tpu.dot_dimension_numbers<[1], [0], [0], [1], [0, 0, 1, 1], [], []>} : vector<8x32xf32>, vector<32x32xf32>, vector<8x32xf32> -> vector<8x32xf32>
    %149 = arith.maximumf %147, %148 : vector<8x32xf32>
    %cst_76 = arith.constant dense<0.000000e+00> : vector<8x32xf32>
    %150 = tpu.matmul %145, %7, %cst_76 {dimension_numbers = #tpu.dot_dimension_numbers<[1], [0], [0], [1], [0, 0, 1, 1], [], []>} : vector<8x32xf32>, vector<32x32xf32>, vector<8x32xf32> -> vector<8x32xf32>
    %151 = arith.maximumf %149, %150 : vector<8x32xf32>
    %152 = arith.subf %145, %151 : vector<8x32xf32>
    %153 = math.exp %152 : vector<8x32xf32>
    %cst_77 = arith.constant dense<0.000000e+00> : vector<8x32xf32>
    %154 = tpu.matmul %153, %1, %cst_77 {dimension_numbers = #tpu.dot_dimension_numbers<[1], [0], [0], [1], [0, 0, 1, 1], [], []>} : vector<8x32xf32>, vector<32x32xf32>, vector<8x32xf32> -> vector<8x32xf32>
    %155 = tpu.reciprocal %154 {approx = true} : vector<8x32xf32> -> vector<8x32xf32>
    %156 = arith.mulf %153, %155 : vector<8x32xf32>
    %cst_78 = arith.constant dense<0.000000e+00> : vector<8x96xf32>
    %157 = tpu.matmul %156, %11, %cst_78 {dimension_numbers = #tpu.dot_dimension_numbers<[1], [0], [0], [1], [0, 0, 1, 1], [], []>} : vector<8x32xf32>, vector<32x96xf32>, vector<8x96xf32> -> vector<8x96xf32>
    %cst_79 = arith.constant dense<0.000000e+00> : vector<8x96xf32>
    %158 = tpu.matmul %134, %12, %cst_79 {dimension_numbers = #tpu.dot_dimension_numbers<[1], [0], [0], [1], [0, 0, 1, 1], [], []>} : vector<8x6xf32>, vector<6x96xf32>, vector<8x96xf32> -> vector<8x96xf32>
    %159 = arith.addf %157, %158 : vector<8x96xf32>
    %160 = vector.broadcast %13 : vector<1x96xf32> to vector<8x96xf32>
    %161 = arith.addf %159, %160 : vector<8x96xf32>
    %cst_80 = arith.constant dense<0.000000e+00> : vector<8x96xf32>
    %162 = tpu.matmul %81, %14, %cst_80 {dimension_numbers = #tpu.dot_dimension_numbers<[1], [0], [0], [1], [0, 0, 1, 1], [], []>} : vector<8x32xf32>, vector<32x96xf32>, vector<8x96xf32> -> vector<8x96xf32>
    %163 = vector.broadcast %15 : vector<1x96xf32> to vector<8x96xf32>
    %164 = arith.addf %162, %163 : vector<8x96xf32>
    %165 = vector.extract_strided_slice %161 {offsets = [0, 0], sizes = [8, 32], strides = [1, 1]} : vector<8x96xf32> to vector<8x32xf32>
    %166 = vector.extract_strided_slice %164 {offsets = [0, 0], sizes = [8, 32], strides = [1, 1]} : vector<8x96xf32> to vector<8x32xf32>
    %167 = arith.addf %165, %166 : vector<8x32xf32>
    %168 = arith.negf %167 : vector<8x32xf32>
    %169 = math.exp %168 : vector<8x32xf32>
    %cst_81 = arith.constant 1.000000e+00 : f32
    %170 = vector.broadcast %cst_81 : f32 to vector<8x32xf32>
    %171 = arith.addf %170, %169 : vector<8x32xf32>
    %172 = arith.divf %170, %171 : vector<8x32xf32>
    %173 = vector.extract_strided_slice %161 {offsets = [0, 32], sizes = [8, 32], strides = [1, 1]} : vector<8x96xf32> to vector<8x32xf32>
    %174 = vector.extract_strided_slice %164 {offsets = [0, 32], sizes = [8, 32], strides = [1, 1]} : vector<8x96xf32> to vector<8x32xf32>
    %175 = arith.addf %173, %174 : vector<8x32xf32>
    %176 = arith.negf %175 : vector<8x32xf32>
    %177 = math.exp %176 : vector<8x32xf32>
    %cst_82 = arith.constant 1.000000e+00 : f32
    %178 = vector.broadcast %cst_82 : f32 to vector<8x32xf32>
    %179 = arith.addf %178, %177 : vector<8x32xf32>
    %180 = arith.divf %178, %179 : vector<8x32xf32>
    %181 = vector.extract_strided_slice %161 {offsets = [0, 64], sizes = [8, 32], strides = [1, 1]} : vector<8x96xf32> to vector<8x32xf32>
    %182 = vector.extract_strided_slice %164 {offsets = [0, 64], sizes = [8, 32], strides = [1, 1]} : vector<8x96xf32> to vector<8x32xf32>
    %183 = arith.mulf %172, %182 : vector<8x32xf32>
    %184 = arith.addf %181, %183 : vector<8x32xf32>
    %185 = math.tanh %184 : vector<8x32xf32>
    %cst_83 = arith.constant 1.000000e+00 : f32
    %186 = vector.broadcast %cst_83 : f32 to vector<8x32xf32>
    %187 = arith.subf %186, %180 : vector<8x32xf32>
    %188 = arith.mulf %187, %185 : vector<8x32xf32>
    %189 = arith.mulf %180, %81 : vector<8x32xf32>
    %190 = arith.addf %188, %189 : vector<8x32xf32>
    %cst_84 = arith.constant dense<0.000000e+00> : vector<8x32xf32>
    %191 = tpu.matmul %190, %16, %cst_84 {dimension_numbers = #tpu.dot_dimension_numbers<[1], [0], [0], [1], [0, 0, 1, 1], [], []>} : vector<8x32xf32>, vector<32x32xf32>, vector<8x32xf32> -> vector<8x32xf32>
    %192 = vector.broadcast %17 : vector<1x32xf32> to vector<8x32xf32>
    %193 = arith.addf %191, %192 : vector<8x32xf32>
    %cst_85 = arith.constant dense<0.000000e+00> : vector<8x32xf32>
    %194 = tpu.matmul %193, %3, %cst_85 {dimension_numbers = #tpu.dot_dimension_numbers<[1], [0], [0], [1], [0, 0, 1, 1], [], []>} : vector<8x32xf32>, vector<32x32xf32>, vector<8x32xf32> -> vector<8x32xf32>
    %195 = arith.maximumf %193, %194 : vector<8x32xf32>
    %cst_86 = arith.constant dense<0.000000e+00> : vector<8x32xf32>
    %196 = tpu.matmul %193, %5, %cst_86 {dimension_numbers = #tpu.dot_dimension_numbers<[1], [0], [0], [1], [0, 0, 1, 1], [], []>} : vector<8x32xf32>, vector<32x32xf32>, vector<8x32xf32> -> vector<8x32xf32>
    %197 = arith.maximumf %195, %196 : vector<8x32xf32>
    %cst_87 = arith.constant dense<0.000000e+00> : vector<8x32xf32>
    %198 = tpu.matmul %193, %7, %cst_87 {dimension_numbers = #tpu.dot_dimension_numbers<[1], [0], [0], [1], [0, 0, 1, 1], [], []>} : vector<8x32xf32>, vector<32x32xf32>, vector<8x32xf32> -> vector<8x32xf32>
    %199 = arith.maximumf %197, %198 : vector<8x32xf32>
    %200 = arith.subf %193, %199 : vector<8x32xf32>
    %201 = math.exp %200 : vector<8x32xf32>
    %cst_88 = arith.constant dense<0.000000e+00> : vector<8x32xf32>
    %202 = tpu.matmul %201, %1, %cst_88 {dimension_numbers = #tpu.dot_dimension_numbers<[1], [0], [0], [1], [0, 0, 1, 1], [], []>} : vector<8x32xf32>, vector<32x32xf32>, vector<8x32xf32> -> vector<8x32xf32>
    %203 = arith.subf %193, %199 : vector<8x32xf32>
    %204 = math.log %202 : vector<8x32xf32>
    %205 = arith.subf %203, %204 : vector<8x32xf32>
    %cst_89 = arith.constant dense<0.000000e+00> : vector<8x32xf32>
    %206 = tpu.matmul %142, %3, %cst_89 {dimension_numbers = #tpu.dot_dimension_numbers<[1], [0], [0], [1], [0, 0, 1, 1], [], []>} : vector<8x32xf32>, vector<32x32xf32>, vector<8x32xf32> -> vector<8x32xf32>
    %207 = arith.maximumf %142, %206 : vector<8x32xf32>
    %cst_90 = arith.constant dense<0.000000e+00> : vector<8x32xf32>
    %208 = tpu.matmul %142, %5, %cst_90 {dimension_numbers = #tpu.dot_dimension_numbers<[1], [0], [0], [1], [0, 0, 1, 1], [], []>} : vector<8x32xf32>, vector<32x32xf32>, vector<8x32xf32> -> vector<8x32xf32>
    %209 = arith.maximumf %207, %208 : vector<8x32xf32>
    %cst_91 = arith.constant dense<0.000000e+00> : vector<8x32xf32>
    %210 = tpu.matmul %142, %7, %cst_91 {dimension_numbers = #tpu.dot_dimension_numbers<[1], [0], [0], [1], [0, 0, 1, 1], [], []>} : vector<8x32xf32>, vector<32x32xf32>, vector<8x32xf32> -> vector<8x32xf32>
    %211 = arith.maximumf %209, %210 : vector<8x32xf32>
    %212 = arith.subf %142, %211 : vector<8x32xf32>
    %213 = math.exp %212 : vector<8x32xf32>
    %cst_92 = arith.constant dense<0.000000e+00> : vector<8x32xf32>
    %214 = tpu.matmul %213, %1, %cst_92 {dimension_numbers = #tpu.dot_dimension_numbers<[1], [0], [0], [1], [0, 0, 1, 1], [], []>} : vector<8x32xf32>, vector<32x32xf32>, vector<8x32xf32> -> vector<8x32xf32>
    %215 = arith.subf %142, %211 : vector<8x32xf32>
    %216 = math.log %214 : vector<8x32xf32>
    %217 = arith.subf %215, %216 : vector<8x32xf32>
    %218 = math.exp %217 : vector<8x32xf32>
    %219 = arith.subf %217, %205 : vector<8x32xf32>
    %220 = arith.mulf %218, %219 : vector<8x32xf32>
    %cst_93 = arith.constant dense<0.000000e+00> : vector<8xf32>
    %221 = vector.multi_reduction <add>, %220, %cst_93 [1] : vector<8x32xf32> to vector<8xf32>
    %222 = vector.shape_cast %221 : vector<8xf32> to vector<8x1xf32>
    %cst_94 = arith.constant 1.000000e+00 : f32
    %223 = vector.broadcast %cst_94 : f32 to vector<8x1xf32>
    %224 = arith.subf %222, %223 : vector<8x1xf32>
    %cst_95 = arith.constant 0.000000e+00 : f32
    %225 = vector.broadcast %cst_95 : f32 to vector<8x1xf32>
    %226 = arith.maximumf %224, %225 : vector<8x1xf32>
    %cst_96 = arith.constant dense<0.000000e+00> : vector<1xf32>
    %227 = vector.multi_reduction <add>, %226, %cst_96 [0] : vector<8x1xf32> to vector<1xf32>
    %228 = vector.shape_cast %227 : vector<1xf32> to vector<1x1xf32>
    %229 = arith.addf %120, %228 : vector<1x1xf32>
    %230 = arith.index_cast %c1_i32 : i32 to index
    %c0_97 = arith.constant 0 : index
    %c0_98 = arith.constant 0 : index
    %231 = vector.load %arg17[%230, %c0_97, %c0_98] : memref<8x8x32xf32, #tpu.memory_space<vmem>>, vector<1x8x32xf32>
    %232 = vector.shape_cast %231 : vector<1x8x32xf32> to vector<8x32xf32>
    %233 = vector.shape_cast %156 : vector<8x32xf32> to vector<1x8x32xf32>
    tpu.vector_store %arg17[%230, %c0_97, %c0_98], %233 {strides = array<i32>} : memref<8x8x32xf32, #tpu.memory_space<vmem>>, vector<1x8x32xf32>,
    %234 = arith.index_cast %c1_i32 : i32 to index
    %c0_99 = arith.constant 0 : index
    %c0_100 = arith.constant 0 : index
    %235 = vector.load %arg18[%234, %c0_99, %c0_100] : memref<8x8x32xf32, #tpu.memory_space<vmem>>, vector<1x8x32xf32>
    %236 = vector.shape_cast %235 : vector<1x8x32xf32> to vector<8x32xf32>
    %237 = vector.shape_cast %190 : vector<8x32xf32> to vector<1x8x32xf32>
    tpu.vector_store %arg18[%234, %c0_99, %c0_100], %237 {strides = array<i32>} : memref<8x8x32xf32, #tpu.memory_space<vmem>>, vector<1x8x32xf32>,
    %c2_i32 = arith.constant 2 : i32
    %238 = arith.index_cast %c2_i32 : i32 to index
    %c0_101 = arith.constant 0 : index
    %c0_102 = arith.constant 0 : index
    %239 = vector.load %arg2[%238, %c0_101, %c0_102] : memref<8x8x32xf32, #tpu.memory_space<vmem>>, vector<1x8x32xf32>
    %240 = vector.shape_cast %239 : vector<1x8x32xf32> to vector<8x32xf32>
    %241 = arith.index_cast %c2_i32 : i32 to index
    %c0_103 = arith.constant 0 : index
    %c0_104 = arith.constant 0 : index
    %242 = vector.load %arg3[%241, %c0_103, %c0_104] : memref<8x8x6xf32, #tpu.memory_space<vmem>>, vector<1x8x6xf32>
    %243 = vector.shape_cast %242 : vector<1x8x6xf32> to vector<8x6xf32>
    %244 = arith.index_cast %c2_i32 : i32 to index
    %c0_105 = arith.constant 0 : index
    %c0_106 = arith.constant 0 : index
    %245 = vector.load %arg4[%244, %c0_105, %c0_106] : memref<8x8x32xf32, #tpu.memory_space<vmem>>, vector<1x8x32xf32>
    %246 = vector.shape_cast %245 : vector<1x8x32xf32> to vector<8x32xf32>
    %cst_107 = arith.constant dense<0.000000e+00> : vector<8x32xf32>
    %247 = tpu.matmul %190, %8, %cst_107 {dimension_numbers = #tpu.dot_dimension_numbers<[1], [0], [0], [1], [0, 0, 1, 1], [], []>} : vector<8x32xf32>, vector<32x32xf32>, vector<8x32xf32> -> vector<8x32xf32>
    %cst_108 = arith.constant dense<0.000000e+00> : vector<8x32xf32>
    %248 = tpu.matmul %240, %9, %cst_108 {dimension_numbers = #tpu.dot_dimension_numbers<[1], [0], [0], [1], [0, 0, 1, 1], [], []>} : vector<8x32xf32>, vector<32x32xf32>, vector<8x32xf32> -> vector<8x32xf32>
    %249 = arith.addf %247, %248 : vector<8x32xf32>
    %250 = vector.broadcast %10 : vector<1x32xf32> to vector<8x32xf32>
    %251 = arith.addf %249, %250 : vector<8x32xf32>
    %252 = arith.addf %251, %246 : vector<8x32xf32>
    %253 = vector.broadcast %0 : vector<1x1xf32> to vector<8x32xf32>
    %254 = arith.mulf %252, %253 : vector<8x32xf32>
    %cst_109 = arith.constant dense<0.000000e+00> : vector<8x32xf32>
    %255 = tpu.matmul %254, %3, %cst_109 {dimension_numbers = #tpu.dot_dimension_numbers<[1], [0], [0], [1], [0, 0, 1, 1], [], []>} : vector<8x32xf32>, vector<32x32xf32>, vector<8x32xf32> -> vector<8x32xf32>
    %256 = arith.maximumf %254, %255 : vector<8x32xf32>
    %cst_110 = arith.constant dense<0.000000e+00> : vector<8x32xf32>
    %257 = tpu.matmul %254, %5, %cst_110 {dimension_numbers = #tpu.dot_dimension_numbers<[1], [0], [0], [1], [0, 0, 1, 1], [], []>} : vector<8x32xf32>, vector<32x32xf32>, vector<8x32xf32> -> vector<8x32xf32>
    %258 = arith.maximumf %256, %257 : vector<8x32xf32>
    %cst_111 = arith.constant dense<0.000000e+00> : vector<8x32xf32>
    %259 = tpu.matmul %254, %7, %cst_111 {dimension_numbers = #tpu.dot_dimension_numbers<[1], [0], [0], [1], [0, 0, 1, 1], [], []>} : vector<8x32xf32>, vector<32x32xf32>, vector<8x32xf32> -> vector<8x32xf32>
    %260 = arith.maximumf %258, %259 : vector<8x32xf32>
    %261 = arith.subf %254, %260 : vector<8x32xf32>
    %262 = math.exp %261 : vector<8x32xf32>
    %cst_112 = arith.constant dense<0.000000e+00> : vector<8x32xf32>
    %263 = tpu.matmul %262, %1, %cst_112 {dimension_numbers = #tpu.dot_dimension_numbers<[1], [0], [0], [1], [0, 0, 1, 1], [], []>} : vector<8x32xf32>, vector<32x32xf32>, vector<8x32xf32> -> vector<8x32xf32>
    %264 = tpu.reciprocal %263 {approx = true} : vector<8x32xf32> -> vector<8x32xf32>
    %265 = arith.mulf %262, %264 : vector<8x32xf32>
    %cst_113 = arith.constant dense<0.000000e+00> : vector<8x96xf32>
    %266 = tpu.matmul %265, %11, %cst_113 {dimension_numbers = #tpu.dot_dimension_numbers<[1], [0], [0], [1], [0, 0, 1, 1], [], []>} : vector<8x32xf32>, vector<32x96xf32>, vector<8x96xf32> -> vector<8x96xf32>
    %cst_114 = arith.constant dense<0.000000e+00> : vector<8x96xf32>
    %267 = tpu.matmul %243, %12, %cst_114 {dimension_numbers = #tpu.dot_dimension_numbers<[1], [0], [0], [1], [0, 0, 1, 1], [], []>} : vector<8x6xf32>, vector<6x96xf32>, vector<8x96xf32> -> vector<8x96xf32>
    %268 = arith.addf %266, %267 : vector<8x96xf32>
    %269 = vector.broadcast %13 : vector<1x96xf32> to vector<8x96xf32>
    %270 = arith.addf %268, %269 : vector<8x96xf32>
    %cst_115 = arith.constant dense<0.000000e+00> : vector<8x96xf32>
    %271 = tpu.matmul %190, %14, %cst_115 {dimension_numbers = #tpu.dot_dimension_numbers<[1], [0], [0], [1], [0, 0, 1, 1], [], []>} : vector<8x32xf32>, vector<32x96xf32>, vector<8x96xf32> -> vector<8x96xf32>
    %272 = vector.broadcast %15 : vector<1x96xf32> to vector<8x96xf32>
    %273 = arith.addf %271, %272 : vector<8x96xf32>
    %274 = vector.extract_strided_slice %270 {offsets = [0, 0], sizes = [8, 32], strides = [1, 1]} : vector<8x96xf32> to vector<8x32xf32>
    %275 = vector.extract_strided_slice %273 {offsets = [0, 0], sizes = [8, 32], strides = [1, 1]} : vector<8x96xf32> to vector<8x32xf32>
    %276 = arith.addf %274, %275 : vector<8x32xf32>
    %277 = arith.negf %276 : vector<8x32xf32>
    %278 = math.exp %277 : vector<8x32xf32>
    %cst_116 = arith.constant 1.000000e+00 : f32
    %279 = vector.broadcast %cst_116 : f32 to vector<8x32xf32>
    %280 = arith.addf %279, %278 : vector<8x32xf32>
    %281 = arith.divf %279, %280 : vector<8x32xf32>
    %282 = vector.extract_strided_slice %270 {offsets = [0, 32], sizes = [8, 32], strides = [1, 1]} : vector<8x96xf32> to vector<8x32xf32>
    %283 = vector.extract_strided_slice %273 {offsets = [0, 32], sizes = [8, 32], strides = [1, 1]} : vector<8x96xf32> to vector<8x32xf32>
    %284 = arith.addf %282, %283 : vector<8x32xf32>
    %285 = arith.negf %284 : vector<8x32xf32>
    %286 = math.exp %285 : vector<8x32xf32>
    %cst_117 = arith.constant 1.000000e+00 : f32
    %287 = vector.broadcast %cst_117 : f32 to vector<8x32xf32>
    %288 = arith.addf %287, %286 : vector<8x32xf32>
    %289 = arith.divf %287, %288 : vector<8x32xf32>
    %290 = vector.extract_strided_slice %270 {offsets = [0, 64], sizes = [8, 32], strides = [1, 1]} : vector<8x96xf32> to vector<8x32xf32>
    %291 = vector.extract_strided_slice %273 {offsets = [0, 64], sizes = [8, 32], strides = [1, 1]} : vector<8x96xf32> to vector<8x32xf32>
    %292 = arith.mulf %281, %291 : vector<8x32xf32>
    %293 = arith.addf %290, %292 : vector<8x32xf32>
    %294 = math.tanh %293 : vector<8x32xf32>
    %cst_118 = arith.constant 1.000000e+00 : f32
    %295 = vector.broadcast %cst_118 : f32 to vector<8x32xf32>
    %296 = arith.subf %295, %289 : vector<8x32xf32>
    %297 = arith.mulf %296, %294 : vector<8x32xf32>
    %298 = arith.mulf %289, %190 : vector<8x32xf32>
    %299 = arith.addf %297, %298 : vector<8x32xf32>
    %cst_119 = arith.constant dense<0.000000e+00> : vector<8x32xf32>
    %300 = tpu.matmul %299, %16, %cst_119 {dimension_numbers = #tpu.dot_dimension_numbers<[1], [0], [0], [1], [0, 0, 1, 1], [], []>} : vector<8x32xf32>, vector<32x32xf32>, vector<8x32xf32> -> vector<8x32xf32>
    %301 = vector.broadcast %17 : vector<1x32xf32> to vector<8x32xf32>
    %302 = arith.addf %300, %301 : vector<8x32xf32>
    %cst_120 = arith.constant dense<0.000000e+00> : vector<8x32xf32>
    %303 = tpu.matmul %302, %3, %cst_120 {dimension_numbers = #tpu.dot_dimension_numbers<[1], [0], [0], [1], [0, 0, 1, 1], [], []>} : vector<8x32xf32>, vector<32x32xf32>, vector<8x32xf32> -> vector<8x32xf32>
    %304 = arith.maximumf %302, %303 : vector<8x32xf32>
    %cst_121 = arith.constant dense<0.000000e+00> : vector<8x32xf32>
    %305 = tpu.matmul %302, %5, %cst_121 {dimension_numbers = #tpu.dot_dimension_numbers<[1], [0], [0], [1], [0, 0, 1, 1], [], []>} : vector<8x32xf32>, vector<32x32xf32>, vector<8x32xf32> -> vector<8x32xf32>
    %306 = arith.maximumf %304, %305 : vector<8x32xf32>
    %cst_122 = arith.constant dense<0.000000e+00> : vector<8x32xf32>
    %307 = tpu.matmul %302, %7, %cst_122 {dimension_numbers = #tpu.dot_dimension_numbers<[1], [0], [0], [1], [0, 0, 1, 1], [], []>} : vector<8x32xf32>, vector<32x32xf32>, vector<8x32xf32> -> vector<8x32xf32>
    %308 = arith.maximumf %306, %307 : vector<8x32xf32>
    %309 = arith.subf %302, %308 : vector<8x32xf32>
    %310 = math.exp %309 : vector<8x32xf32>
    %cst_123 = arith.constant dense<0.000000e+00> : vector<8x32xf32>
    %311 = tpu.matmul %310, %1, %cst_123 {dimension_numbers = #tpu.dot_dimension_numbers<[1], [0], [0], [1], [0, 0, 1, 1], [], []>} : vector<8x32xf32>, vector<32x32xf32>, vector<8x32xf32> -> vector<8x32xf32>
    %312 = arith.subf %302, %308 : vector<8x32xf32>
    %313 = math.log %311 : vector<8x32xf32>
    %314 = arith.subf %312, %313 : vector<8x32xf32>
    %cst_124 = arith.constant dense<0.000000e+00> : vector<8x32xf32>
    %315 = tpu.matmul %251, %3, %cst_124 {dimension_numbers = #tpu.dot_dimension_numbers<[1], [0], [0], [1], [0, 0, 1, 1], [], []>} : vector<8x32xf32>, vector<32x32xf32>, vector<8x32xf32> -> vector<8x32xf32>
    %316 = arith.maximumf %251, %315 : vector<8x32xf32>
    %cst_125 = arith.constant dense<0.000000e+00> : vector<8x32xf32>
    %317 = tpu.matmul %251, %5, %cst_125 {dimension_numbers = #tpu.dot_dimension_numbers<[1], [0], [0], [1], [0, 0, 1, 1], [], []>} : vector<8x32xf32>, vector<32x32xf32>, vector<8x32xf32> -> vector<8x32xf32>
    %318 = arith.maximumf %316, %317 : vector<8x32xf32>
    %cst_126 = arith.constant dense<0.000000e+00> : vector<8x32xf32>
    %319 = tpu.matmul %251, %7, %cst_126 {dimension_numbers = #tpu.dot_dimension_numbers<[1], [0], [0], [1], [0, 0, 1, 1], [], []>} : vector<8x32xf32>, vector<32x32xf32>, vector<8x32xf32> -> vector<8x32xf32>
    %320 = arith.maximumf %318, %319 : vector<8x32xf32>
    %321 = arith.subf %251, %320 : vector<8x32xf32>
    %322 = math.exp %321 : vector<8x32xf32>
    %cst_127 = arith.constant dense<0.000000e+00> : vector<8x32xf32>
    %323 = tpu.matmul %322, %1, %cst_127 {dimension_numbers = #tpu.dot_dimension_numbers<[1], [0], [0], [1], [0, 0, 1, 1], [], []>} : vector<8x32xf32>, vector<32x32xf32>, vector<8x32xf32> -> vector<8x32xf32>
    %324 = arith.subf %251, %320 : vector<8x32xf32>
    %325 = math.log %323 : vector<8x32xf32>
    %326 = arith.subf %324, %325 : vector<8x32xf32>
    %327 = math.exp %326 : vector<8x32xf32>
    %328 = arith.subf %326, %314 : vector<8x32xf32>
    %329 = arith.mulf %327, %328 : vector<8x32xf32>
    %cst_128 = arith.constant dense<0.000000e+00> : vector<8xf32>
    %330 = vector.multi_reduction <add>, %329, %cst_128 [1] : vector<8x32xf32> to vector<8xf32>
    %331 = vector.shape_cast %330 : vector<8xf32> to vector<8x1xf32>
    %cst_129 = arith.constant 1.000000e+00 : f32
    %332 = vector.broadcast %cst_129 : f32 to vector<8x1xf32>
    %333 = arith.subf %331, %332 : vector<8x1xf32>
    %cst_130 = arith.constant 0.000000e+00 : f32
    %334 = vector.broadcast %cst_130 : f32 to vector<8x1xf32>
    %335 = arith.maximumf %333, %334 : vector<8x1xf32>
    %cst_131 = arith.constant dense<0.000000e+00> : vector<1xf32>
    %336 = vector.multi_reduction <add>, %335, %cst_131 [0] : vector<8x1xf32> to vector<1xf32>
    %337 = vector.shape_cast %336 : vector<1xf32> to vector<1x1xf32>
    %338 = arith.addf %229, %337 : vector<1x1xf32>
    %339 = arith.index_cast %c2_i32 : i32 to index
    %c0_132 = arith.constant 0 : index
    %c0_133 = arith.constant 0 : index
    %340 = vector.load %arg17[%339, %c0_132, %c0_133] : memref<8x8x32xf32, #tpu.memory_space<vmem>>, vector<1x8x32xf32>
    %341 = vector.shape_cast %340 : vector<1x8x32xf32> to vector<8x32xf32>
    %342 = vector.shape_cast %265 : vector<8x32xf32> to vector<1x8x32xf32>
    tpu.vector_store %arg17[%339, %c0_132, %c0_133], %342 {strides = array<i32>} : memref<8x8x32xf32, #tpu.memory_space<vmem>>, vector<1x8x32xf32>,
    %343 = arith.index_cast %c2_i32 : i32 to index
    %c0_134 = arith.constant 0 : index
    %c0_135 = arith.constant 0 : index
    %344 = vector.load %arg18[%343, %c0_134, %c0_135] : memref<8x8x32xf32, #tpu.memory_space<vmem>>, vector<1x8x32xf32>
    %345 = vector.shape_cast %344 : vector<1x8x32xf32> to vector<8x32xf32>
    %346 = vector.shape_cast %299 : vector<8x32xf32> to vector<1x8x32xf32>
    tpu.vector_store %arg18[%343, %c0_134, %c0_135], %346 {strides = array<i32>} : memref<8x8x32xf32, #tpu.memory_space<vmem>>, vector<1x8x32xf32>,
    %c3_i32 = arith.constant 3 : i32
    %347 = arith.index_cast %c3_i32 : i32 to index
    %c0_136 = arith.constant 0 : index
    %c0_137 = arith.constant 0 : index
    %348 = vector.load %arg2[%347, %c0_136, %c0_137] : memref<8x8x32xf32, #tpu.memory_space<vmem>>, vector<1x8x32xf32>
    %349 = vector.shape_cast %348 : vector<1x8x32xf32> to vector<8x32xf32>
    %350 = arith.index_cast %c3_i32 : i32 to index
    %c0_138 = arith.constant 0 : index
    %c0_139 = arith.constant 0 : index
    %351 = vector.load %arg3[%350, %c0_138, %c0_139] : memref<8x8x6xf32, #tpu.memory_space<vmem>>, vector<1x8x6xf32>
    %352 = vector.shape_cast %351 : vector<1x8x6xf32> to vector<8x6xf32>
    %353 = arith.index_cast %c3_i32 : i32 to index
    %c0_140 = arith.constant 0 : index
    %c0_141 = arith.constant 0 : index
    %354 = vector.load %arg4[%353, %c0_140, %c0_141] : memref<8x8x32xf32, #tpu.memory_space<vmem>>, vector<1x8x32xf32>
    %355 = vector.shape_cast %354 : vector<1x8x32xf32> to vector<8x32xf32>
    %cst_142 = arith.constant dense<0.000000e+00> : vector<8x32xf32>
    %356 = tpu.matmul %299, %8, %cst_142 {dimension_numbers = #tpu.dot_dimension_numbers<[1], [0], [0], [1], [0, 0, 1, 1], [], []>} : vector<8x32xf32>, vector<32x32xf32>, vector<8x32xf32> -> vector<8x32xf32>
    %cst_143 = arith.constant dense<0.000000e+00> : vector<8x32xf32>
    %357 = tpu.matmul %349, %9, %cst_143 {dimension_numbers = #tpu.dot_dimension_numbers<[1], [0], [0], [1], [0, 0, 1, 1], [], []>} : vector<8x32xf32>, vector<32x32xf32>, vector<8x32xf32> -> vector<8x32xf32>
    %358 = arith.addf %356, %357 : vector<8x32xf32>
    %359 = vector.broadcast %10 : vector<1x32xf32> to vector<8x32xf32>
    %360 = arith.addf %358, %359 : vector<8x32xf32>
    %361 = arith.addf %360, %355 : vector<8x32xf32>
    %362 = vector.broadcast %0 : vector<1x1xf32> to vector<8x32xf32>
    %363 = arith.mulf %361, %362 : vector<8x32xf32>
    %cst_144 = arith.constant dense<0.000000e+00> : vector<8x32xf32>
    %364 = tpu.matmul %363, %3, %cst_144 {dimension_numbers = #tpu.dot_dimension_numbers<[1], [0], [0], [1], [0, 0, 1, 1], [], []>} : vector<8x32xf32>, vector<32x32xf32>, vector<8x32xf32> -> vector<8x32xf32>
    %365 = arith.maximumf %363, %364 : vector<8x32xf32>
    %cst_145 = arith.constant dense<0.000000e+00> : vector<8x32xf32>
    %366 = tpu.matmul %363, %5, %cst_145 {dimension_numbers = #tpu.dot_dimension_numbers<[1], [0], [0], [1], [0, 0, 1, 1], [], []>} : vector<8x32xf32>, vector<32x32xf32>, vector<8x32xf32> -> vector<8x32xf32>
    %367 = arith.maximumf %365, %366 : vector<8x32xf32>
    %cst_146 = arith.constant dense<0.000000e+00> : vector<8x32xf32>
    %368 = tpu.matmul %363, %7, %cst_146 {dimension_numbers = #tpu.dot_dimension_numbers<[1], [0], [0], [1], [0, 0, 1, 1], [], []>} : vector<8x32xf32>, vector<32x32xf32>, vector<8x32xf32> -> vector<8x32xf32>
    %369 = arith.maximumf %367, %368 : vector<8x32xf32>
    %370 = arith.subf %363, %369 : vector<8x32xf32>
    %371 = math.exp %370 : vector<8x32xf32>
    %cst_147 = arith.constant dense<0.000000e+00> : vector<8x32xf32>
    %372 = tpu.matmul %371, %1, %cst_147 {dimension_numbers = #tpu.dot_dimension_numbers<[1], [0], [0], [1], [0, 0, 1, 1], [], []>} : vector<8x32xf32>, vector<32x32xf32>, vector<8x32xf32> -> vector<8x32xf32>
    %373 = tpu.reciprocal %372 {approx = true} : vector<8x32xf32> -> vector<8x32xf32>
    %374 = arith.mulf %371, %373 : vector<8x32xf32>
    %cst_148 = arith.constant dense<0.000000e+00> : vector<8x96xf32>
    %375 = tpu.matmul %374, %11, %cst_148 {dimension_numbers = #tpu.dot_dimension_numbers<[1], [0], [0], [1], [0, 0, 1, 1], [], []>} : vector<8x32xf32>, vector<32x96xf32>, vector<8x96xf32> -> vector<8x96xf32>
    %cst_149 = arith.constant dense<0.000000e+00> : vector<8x96xf32>
    %376 = tpu.matmul %352, %12, %cst_149 {dimension_numbers = #tpu.dot_dimension_numbers<[1], [0], [0], [1], [0, 0, 1, 1], [], []>} : vector<8x6xf32>, vector<6x96xf32>, vector<8x96xf32> -> vector<8x96xf32>
    %377 = arith.addf %375, %376 : vector<8x96xf32>
    %378 = vector.broadcast %13 : vector<1x96xf32> to vector<8x96xf32>
    %379 = arith.addf %377, %378 : vector<8x96xf32>
    %cst_150 = arith.constant dense<0.000000e+00> : vector<8x96xf32>
    %380 = tpu.matmul %299, %14, %cst_150 {dimension_numbers = #tpu.dot_dimension_numbers<[1], [0], [0], [1], [0, 0, 1, 1], [], []>} : vector<8x32xf32>, vector<32x96xf32>, vector<8x96xf32> -> vector<8x96xf32>
    %381 = vector.broadcast %15 : vector<1x96xf32> to vector<8x96xf32>
    %382 = arith.addf %380, %381 : vector<8x96xf32>
    %383 = vector.extract_strided_slice %379 {offsets = [0, 0], sizes = [8, 32], strides = [1, 1]} : vector<8x96xf32> to vector<8x32xf32>
    %384 = vector.extract_strided_slice %382 {offsets = [0, 0], sizes = [8, 32], strides = [1, 1]} : vector<8x96xf32> to vector<8x32xf32>
    %385 = arith.addf %383, %384 : vector<8x32xf32>
    %386 = arith.negf %385 : vector<8x32xf32>
    %387 = math.exp %386 : vector<8x32xf32>
    %cst_151 = arith.constant 1.000000e+00 : f32
    %388 = vector.broadcast %cst_151 : f32 to vector<8x32xf32>
    %389 = arith.addf %388, %387 : vector<8x32xf32>
    %390 = arith.divf %388, %389 : vector<8x32xf32>
    %391 = vector.extract_strided_slice %379 {offsets = [0, 32], sizes = [8, 32], strides = [1, 1]} : vector<8x96xf32> to vector<8x32xf32>
    %392 = vector.extract_strided_slice %382 {offsets = [0, 32], sizes = [8, 32], strides = [1, 1]} : vector<8x96xf32> to vector<8x32xf32>
    %393 = arith.addf %391, %392 : vector<8x32xf32>
    %394 = arith.negf %393 : vector<8x32xf32>
    %395 = math.exp %394 : vector<8x32xf32>
    %cst_152 = arith.constant 1.000000e+00 : f32
    %396 = vector.broadcast %cst_152 : f32 to vector<8x32xf32>
    %397 = arith.addf %396, %395 : vector<8x32xf32>
    %398 = arith.divf %396, %397 : vector<8x32xf32>
    %399 = vector.extract_strided_slice %379 {offsets = [0, 64], sizes = [8, 32], strides = [1, 1]} : vector<8x96xf32> to vector<8x32xf32>
    %400 = vector.extract_strided_slice %382 {offsets = [0, 64], sizes = [8, 32], strides = [1, 1]} : vector<8x96xf32> to vector<8x32xf32>
    %401 = arith.mulf %390, %400 : vector<8x32xf32>
    %402 = arith.addf %399, %401 : vector<8x32xf32>
    %403 = math.tanh %402 : vector<8x32xf32>
    %cst_153 = arith.constant 1.000000e+00 : f32
    %404 = vector.broadcast %cst_153 : f32 to vector<8x32xf32>
    %405 = arith.subf %404, %398 : vector<8x32xf32>
    %406 = arith.mulf %405, %403 : vector<8x32xf32>
    %407 = arith.mulf %398, %299 : vector<8x32xf32>
    %408 = arith.addf %406, %407 : vector<8x32xf32>
    %cst_154 = arith.constant dense<0.000000e+00> : vector<8x32xf32>
    %409 = tpu.matmul %408, %16, %cst_154 {dimension_numbers = #tpu.dot_dimension_numbers<[1], [0], [0], [1], [0, 0, 1, 1], [], []>} : vector<8x32xf32>, vector<32x32xf32>, vector<8x32xf32> -> vector<8x32xf32>
    %410 = vector.broadcast %17 : vector<1x32xf32> to vector<8x32xf32>
    %411 = arith.addf %409, %410 : vector<8x32xf32>
    %cst_155 = arith.constant dense<0.000000e+00> : vector<8x32xf32>
    %412 = tpu.matmul %411, %3, %cst_155 {dimension_numbers = #tpu.dot_dimension_numbers<[1], [0], [0], [1], [0, 0, 1, 1], [], []>} : vector<8x32xf32>, vector<32x32xf32>, vector<8x32xf32> -> vector<8x32xf32>
    %413 = arith.maximumf %411, %412 : vector<8x32xf32>
    %cst_156 = arith.constant dense<0.000000e+00> : vector<8x32xf32>
    %414 = tpu.matmul %411, %5, %cst_156 {dimension_numbers = #tpu.dot_dimension_numbers<[1], [0], [0], [1], [0, 0, 1, 1], [], []>} : vector<8x32xf32>, vector<32x32xf32>, vector<8x32xf32> -> vector<8x32xf32>
    %415 = arith.maximumf %413, %414 : vector<8x32xf32>
    %cst_157 = arith.constant dense<0.000000e+00> : vector<8x32xf32>
    %416 = tpu.matmul %411, %7, %cst_157 {dimension_numbers = #tpu.dot_dimension_numbers<[1], [0], [0], [1], [0, 0, 1, 1], [], []>} : vector<8x32xf32>, vector<32x32xf32>, vector<8x32xf32> -> vector<8x32xf32>
    %417 = arith.maximumf %415, %416 : vector<8x32xf32>
    %418 = arith.subf %411, %417 : vector<8x32xf32>
    %419 = math.exp %418 : vector<8x32xf32>
    %cst_158 = arith.constant dense<0.000000e+00> : vector<8x32xf32>
    %420 = tpu.matmul %419, %1, %cst_158 {dimension_numbers = #tpu.dot_dimension_numbers<[1], [0], [0], [1], [0, 0, 1, 1], [], []>} : vector<8x32xf32>, vector<32x32xf32>, vector<8x32xf32> -> vector<8x32xf32>
    %421 = arith.subf %411, %417 : vector<8x32xf32>
    %422 = math.log %420 : vector<8x32xf32>
    %423 = arith.subf %421, %422 : vector<8x32xf32>
    %cst_159 = arith.constant dense<0.000000e+00> : vector<8x32xf32>
    %424 = tpu.matmul %360, %3, %cst_159 {dimension_numbers = #tpu.dot_dimension_numbers<[1], [0], [0], [1], [0, 0, 1, 1], [], []>} : vector<8x32xf32>, vector<32x32xf32>, vector<8x32xf32> -> vector<8x32xf32>
    %425 = arith.maximumf %360, %424 : vector<8x32xf32>
    %cst_160 = arith.constant dense<0.000000e+00> : vector<8x32xf32>
    %426 = tpu.matmul %360, %5, %cst_160 {dimension_numbers = #tpu.dot_dimension_numbers<[1], [0], [0], [1], [0, 0, 1, 1], [], []>} : vector<8x32xf32>, vector<32x32xf32>, vector<8x32xf32> -> vector<8x32xf32>
    %427 = arith.maximumf %425, %426 : vector<8x32xf32>
    %cst_161 = arith.constant dense<0.000000e+00> : vector<8x32xf32>
    %428 = tpu.matmul %360, %7, %cst_161 {dimension_numbers = #tpu.dot_dimension_numbers<[1], [0], [0], [1], [0, 0, 1, 1], [], []>} : vector<8x32xf32>, vector<32x32xf32>, vector<8x32xf32> -> vector<8x32xf32>
    %429 = arith.maximumf %427, %428 : vector<8x32xf32>
    %430 = arith.subf %360, %429 : vector<8x32xf32>
    %431 = math.exp %430 : vector<8x32xf32>
    %cst_162 = arith.constant dense<0.000000e+00> : vector<8x32xf32>
    %432 = tpu.matmul %431, %1, %cst_162 {dimension_numbers = #tpu.dot_dimension_numbers<[1], [0], [0], [1], [0, 0, 1, 1], [], []>} : vector<8x32xf32>, vector<32x32xf32>, vector<8x32xf32> -> vector<8x32xf32>
    %433 = arith.subf %360, %429 : vector<8x32xf32>
    %434 = math.log %432 : vector<8x32xf32>
    %435 = arith.subf %433, %434 : vector<8x32xf32>
    %436 = math.exp %435 : vector<8x32xf32>
    %437 = arith.subf %435, %423 : vector<8x32xf32>
    %438 = arith.mulf %436, %437 : vector<8x32xf32>
    %cst_163 = arith.constant dense<0.000000e+00> : vector<8xf32>
    %439 = vector.multi_reduction <add>, %438, %cst_163 [1] : vector<8x32xf32> to vector<8xf32>
    %440 = vector.shape_cast %439 : vector<8xf32> to vector<8x1xf32>
    %cst_164 = arith.constant 1.000000e+00 : f32
    %441 = vector.broadcast %cst_164 : f32 to vector<8x1xf32>
    %442 = arith.subf %440, %441 : vector<8x1xf32>
    %cst_165 = arith.constant 0.000000e+00 : f32
    %443 = vector.broadcast %cst_165 : f32 to vector<8x1xf32>
    %444 = arith.maximumf %442, %443 : vector<8x1xf32>
    %cst_166 = arith.constant dense<0.000000e+00> : vector<1xf32>
    %445 = vector.multi_reduction <add>, %444, %cst_166 [0] : vector<8x1xf32> to vector<1xf32>
    %446 = vector.shape_cast %445 : vector<1xf32> to vector<1x1xf32>
    %447 = arith.addf %338, %446 : vector<1x1xf32>
    %448 = arith.index_cast %c3_i32 : i32 to index
    %c0_167 = arith.constant 0 : index
    %c0_168 = arith.constant 0 : index
    %449 = vector.load %arg17[%448, %c0_167, %c0_168] : memref<8x8x32xf32, #tpu.memory_space<vmem>>, vector<1x8x32xf32>
    %450 = vector.shape_cast %449 : vector<1x8x32xf32> to vector<8x32xf32>
    %451 = vector.shape_cast %374 : vector<8x32xf32> to vector<1x8x32xf32>
    tpu.vector_store %arg17[%448, %c0_167, %c0_168], %451 {strides = array<i32>} : memref<8x8x32xf32, #tpu.memory_space<vmem>>, vector<1x8x32xf32>,
    %452 = arith.index_cast %c3_i32 : i32 to index
    %c0_169 = arith.constant 0 : index
    %c0_170 = arith.constant 0 : index
    %453 = vector.load %arg18[%452, %c0_169, %c0_170] : memref<8x8x32xf32, #tpu.memory_space<vmem>>, vector<1x8x32xf32>
    %454 = vector.shape_cast %453 : vector<1x8x32xf32> to vector<8x32xf32>
    %455 = vector.shape_cast %408 : vector<8x32xf32> to vector<1x8x32xf32>
    tpu.vector_store %arg18[%452, %c0_169, %c0_170], %455 {strides = array<i32>} : memref<8x8x32xf32, #tpu.memory_space<vmem>>, vector<1x8x32xf32>,
    %c4_i32 = arith.constant 4 : i32
    %456 = arith.index_cast %c4_i32 : i32 to index
    %c0_171 = arith.constant 0 : index
    %c0_172 = arith.constant 0 : index
    %457 = vector.load %arg2[%456, %c0_171, %c0_172] : memref<8x8x32xf32, #tpu.memory_space<vmem>>, vector<1x8x32xf32>
    %458 = vector.shape_cast %457 : vector<1x8x32xf32> to vector<8x32xf32>
    %459 = arith.index_cast %c4_i32 : i32 to index
    %c0_173 = arith.constant 0 : index
    %c0_174 = arith.constant 0 : index
    %460 = vector.load %arg3[%459, %c0_173, %c0_174] : memref<8x8x6xf32, #tpu.memory_space<vmem>>, vector<1x8x6xf32>
    %461 = vector.shape_cast %460 : vector<1x8x6xf32> to vector<8x6xf32>
    %462 = arith.index_cast %c4_i32 : i32 to index
    %c0_175 = arith.constant 0 : index
    %c0_176 = arith.constant 0 : index
    %463 = vector.load %arg4[%462, %c0_175, %c0_176] : memref<8x8x32xf32, #tpu.memory_space<vmem>>, vector<1x8x32xf32>
    %464 = vector.shape_cast %463 : vector<1x8x32xf32> to vector<8x32xf32>
    %cst_177 = arith.constant dense<0.000000e+00> : vector<8x32xf32>
    %465 = tpu.matmul %408, %8, %cst_177 {dimension_numbers = #tpu.dot_dimension_numbers<[1], [0], [0], [1], [0, 0, 1, 1], [], []>} : vector<8x32xf32>, vector<32x32xf32>, vector<8x32xf32> -> vector<8x32xf32>
    %cst_178 = arith.constant dense<0.000000e+00> : vector<8x32xf32>
    %466 = tpu.matmul %458, %9, %cst_178 {dimension_numbers = #tpu.dot_dimension_numbers<[1], [0], [0], [1], [0, 0, 1, 1], [], []>} : vector<8x32xf32>, vector<32x32xf32>, vector<8x32xf32> -> vector<8x32xf32>
    %467 = arith.addf %465, %466 : vector<8x32xf32>
    %468 = vector.broadcast %10 : vector<1x32xf32> to vector<8x32xf32>
    %469 = arith.addf %467, %468 : vector<8x32xf32>
    %470 = arith.addf %469, %464 : vector<8x32xf32>
    %471 = vector.broadcast %0 : vector<1x1xf32> to vector<8x32xf32>
    %472 = arith.mulf %470, %471 : vector<8x32xf32>
    %cst_179 = arith.constant dense<0.000000e+00> : vector<8x32xf32>
    %473 = tpu.matmul %472, %3, %cst_179 {dimension_numbers = #tpu.dot_dimension_numbers<[1], [0], [0], [1], [0, 0, 1, 1], [], []>} : vector<8x32xf32>, vector<32x32xf32>, vector<8x32xf32> -> vector<8x32xf32>
    %474 = arith.maximumf %472, %473 : vector<8x32xf32>
    %cst_180 = arith.constant dense<0.000000e+00> : vector<8x32xf32>
    %475 = tpu.matmul %472, %5, %cst_180 {dimension_numbers = #tpu.dot_dimension_numbers<[1], [0], [0], [1], [0, 0, 1, 1], [], []>} : vector<8x32xf32>, vector<32x32xf32>, vector<8x32xf32> -> vector<8x32xf32>
    %476 = arith.maximumf %474, %475 : vector<8x32xf32>
    %cst_181 = arith.constant dense<0.000000e+00> : vector<8x32xf32>
    %477 = tpu.matmul %472, %7, %cst_181 {dimension_numbers = #tpu.dot_dimension_numbers<[1], [0], [0], [1], [0, 0, 1, 1], [], []>} : vector<8x32xf32>, vector<32x32xf32>, vector<8x32xf32> -> vector<8x32xf32>
    %478 = arith.maximumf %476, %477 : vector<8x32xf32>
    %479 = arith.subf %472, %478 : vector<8x32xf32>
    %480 = math.exp %479 : vector<8x32xf32>
    %cst_182 = arith.constant dense<0.000000e+00> : vector<8x32xf32>
    %481 = tpu.matmul %480, %1, %cst_182 {dimension_numbers = #tpu.dot_dimension_numbers<[1], [0], [0], [1], [0, 0, 1, 1], [], []>} : vector<8x32xf32>, vector<32x32xf32>, vector<8x32xf32> -> vector<8x32xf32>
    %482 = tpu.reciprocal %481 {approx = true} : vector<8x32xf32> -> vector<8x32xf32>
    %483 = arith.mulf %480, %482 : vector<8x32xf32>
    %cst_183 = arith.constant dense<0.000000e+00> : vector<8x96xf32>
    %484 = tpu.matmul %483, %11, %cst_183 {dimension_numbers = #tpu.dot_dimension_numbers<[1], [0], [0], [1], [0, 0, 1, 1], [], []>} : vector<8x32xf32>, vector<32x96xf32>, vector<8x96xf32> -> vector<8x96xf32>
    %cst_184 = arith.constant dense<0.000000e+00> : vector<8x96xf32>
    %485 = tpu.matmul %461, %12, %cst_184 {dimension_numbers = #tpu.dot_dimension_numbers<[1], [0], [0], [1], [0, 0, 1, 1], [], []>} : vector<8x6xf32>, vector<6x96xf32>, vector<8x96xf32> -> vector<8x96xf32>
    %486 = arith.addf %484, %485 : vector<8x96xf32>
    %487 = vector.broadcast %13 : vector<1x96xf32> to vector<8x96xf32>
    %488 = arith.addf %486, %487 : vector<8x96xf32>
    %cst_185 = arith.constant dense<0.000000e+00> : vector<8x96xf32>
    %489 = tpu.matmul %408, %14, %cst_185 {dimension_numbers = #tpu.dot_dimension_numbers<[1], [0], [0], [1], [0, 0, 1, 1], [], []>} : vector<8x32xf32>, vector<32x96xf32>, vector<8x96xf32> -> vector<8x96xf32>
    %490 = vector.broadcast %15 : vector<1x96xf32> to vector<8x96xf32>
    %491 = arith.addf %489, %490 : vector<8x96xf32>
    %492 = vector.extract_strided_slice %488 {offsets = [0, 0], sizes = [8, 32], strides = [1, 1]} : vector<8x96xf32> to vector<8x32xf32>
    %493 = vector.extract_strided_slice %491 {offsets = [0, 0], sizes = [8, 32], strides = [1, 1]} : vector<8x96xf32> to vector<8x32xf32>
    %494 = arith.addf %492, %493 : vector<8x32xf32>
    %495 = arith.negf %494 : vector<8x32xf32>
    %496 = math.exp %495 : vector<8x32xf32>
    %cst_186 = arith.constant 1.000000e+00 : f32
    %497 = vector.broadcast %cst_186 : f32 to vector<8x32xf32>
    %498 = arith.addf %497, %496 : vector<8x32xf32>
    %499 = arith.divf %497, %498 : vector<8x32xf32>
    %500 = vector.extract_strided_slice %488 {offsets = [0, 32], sizes = [8, 32], strides = [1, 1]} : vector<8x96xf32> to vector<8x32xf32>
    %501 = vector.extract_strided_slice %491 {offsets = [0, 32], sizes = [8, 32], strides = [1, 1]} : vector<8x96xf32> to vector<8x32xf32>
    %502 = arith.addf %500, %501 : vector<8x32xf32>
    %503 = arith.negf %502 : vector<8x32xf32>
    %504 = math.exp %503 : vector<8x32xf32>
    %cst_187 = arith.constant 1.000000e+00 : f32
    %505 = vector.broadcast %cst_187 : f32 to vector<8x32xf32>
    %506 = arith.addf %505, %504 : vector<8x32xf32>
    %507 = arith.divf %505, %506 : vector<8x32xf32>
    %508 = vector.extract_strided_slice %488 {offsets = [0, 64], sizes = [8, 32], strides = [1, 1]} : vector<8x96xf32> to vector<8x32xf32>
    %509 = vector.extract_strided_slice %491 {offsets = [0, 64], sizes = [8, 32], strides = [1, 1]} : vector<8x96xf32> to vector<8x32xf32>
    %510 = arith.mulf %499, %509 : vector<8x32xf32>
    %511 = arith.addf %508, %510 : vector<8x32xf32>
    %512 = math.tanh %511 : vector<8x32xf32>
    %cst_188 = arith.constant 1.000000e+00 : f32
    %513 = vector.broadcast %cst_188 : f32 to vector<8x32xf32>
    %514 = arith.subf %513, %507 : vector<8x32xf32>
    %515 = arith.mulf %514, %512 : vector<8x32xf32>
    %516 = arith.mulf %507, %408 : vector<8x32xf32>
    %517 = arith.addf %515, %516 : vector<8x32xf32>
    %cst_189 = arith.constant dense<0.000000e+00> : vector<8x32xf32>
    %518 = tpu.matmul %517, %16, %cst_189 {dimension_numbers = #tpu.dot_dimension_numbers<[1], [0], [0], [1], [0, 0, 1, 1], [], []>} : vector<8x32xf32>, vector<32x32xf32>, vector<8x32xf32> -> vector<8x32xf32>
    %519 = vector.broadcast %17 : vector<1x32xf32> to vector<8x32xf32>
    %520 = arith.addf %518, %519 : vector<8x32xf32>
    %cst_190 = arith.constant dense<0.000000e+00> : vector<8x32xf32>
    %521 = tpu.matmul %520, %3, %cst_190 {dimension_numbers = #tpu.dot_dimension_numbers<[1], [0], [0], [1], [0, 0, 1, 1], [], []>} : vector<8x32xf32>, vector<32x32xf32>, vector<8x32xf32> -> vector<8x32xf32>
    %522 = arith.maximumf %520, %521 : vector<8x32xf32>
    %cst_191 = arith.constant dense<0.000000e+00> : vector<8x32xf32>
    %523 = tpu.matmul %520, %5, %cst_191 {dimension_numbers = #tpu.dot_dimension_numbers<[1], [0], [0], [1], [0, 0, 1, 1], [], []>} : vector<8x32xf32>, vector<32x32xf32>, vector<8x32xf32> -> vector<8x32xf32>
    %524 = arith.maximumf %522, %523 : vector<8x32xf32>
    %cst_192 = arith.constant dense<0.000000e+00> : vector<8x32xf32>
    %525 = tpu.matmul %520, %7, %cst_192 {dimension_numbers = #tpu.dot_dimension_numbers<[1], [0], [0], [1], [0, 0, 1, 1], [], []>} : vector<8x32xf32>, vector<32x32xf32>, vector<8x32xf32> -> vector<8x32xf32>
    %526 = arith.maximumf %524, %525 : vector<8x32xf32>
    %527 = arith.subf %520, %526 : vector<8x32xf32>
    %528 = math.exp %527 : vector<8x32xf32>
    %cst_193 = arith.constant dense<0.000000e+00> : vector<8x32xf32>
    %529 = tpu.matmul %528, %1, %cst_193 {dimension_numbers = #tpu.dot_dimension_numbers<[1], [0], [0], [1], [0, 0, 1, 1], [], []>} : vector<8x32xf32>, vector<32x32xf32>, vector<8x32xf32> -> vector<8x32xf32>
    %530 = arith.subf %520, %526 : vector<8x32xf32>
    %531 = math.log %529 : vector<8x32xf32>
    %532 = arith.subf %530, %531 : vector<8x32xf32>
    %cst_194 = arith.constant dense<0.000000e+00> : vector<8x32xf32>
    %533 = tpu.matmul %469, %3, %cst_194 {dimension_numbers = #tpu.dot_dimension_numbers<[1], [0], [0], [1], [0, 0, 1, 1], [], []>} : vector<8x32xf32>, vector<32x32xf32>, vector<8x32xf32> -> vector<8x32xf32>
    %534 = arith.maximumf %469, %533 : vector<8x32xf32>
    %cst_195 = arith.constant dense<0.000000e+00> : vector<8x32xf32>
    %535 = tpu.matmul %469, %5, %cst_195 {dimension_numbers = #tpu.dot_dimension_numbers<[1], [0], [0], [1], [0, 0, 1, 1], [], []>} : vector<8x32xf32>, vector<32x32xf32>, vector<8x32xf32> -> vector<8x32xf32>
    %536 = arith.maximumf %534, %535 : vector<8x32xf32>
    %cst_196 = arith.constant dense<0.000000e+00> : vector<8x32xf32>
    %537 = tpu.matmul %469, %7, %cst_196 {dimension_numbers = #tpu.dot_dimension_numbers<[1], [0], [0], [1], [0, 0, 1, 1], [], []>} : vector<8x32xf32>, vector<32x32xf32>, vector<8x32xf32> -> vector<8x32xf32>
    %538 = arith.maximumf %536, %537 : vector<8x32xf32>
    %539 = arith.subf %469, %538 : vector<8x32xf32>
    %540 = math.exp %539 : vector<8x32xf32>
    %cst_197 = arith.constant dense<0.000000e+00> : vector<8x32xf32>
    %541 = tpu.matmul %540, %1, %cst_197 {dimension_numbers = #tpu.dot_dimension_numbers<[1], [0], [0], [1], [0, 0, 1, 1], [], []>} : vector<8x32xf32>, vector<32x32xf32>, vector<8x32xf32> -> vector<8x32xf32>
    %542 = arith.subf %469, %538 : vector<8x32xf32>
    %543 = math.log %541 : vector<8x32xf32>
    %544 = arith.subf %542, %543 : vector<8x32xf32>
    %545 = math.exp %544 : vector<8x32xf32>
    %546 = arith.subf %544, %532 : vector<8x32xf32>
    %547 = arith.mulf %545, %546 : vector<8x32xf32>
    %cst_198 = arith.constant dense<0.000000e+00> : vector<8xf32>
    %548 = vector.multi_reduction <add>, %547, %cst_198 [1] : vector<8x32xf32> to vector<8xf32>
    %549 = vector.shape_cast %548 : vector<8xf32> to vector<8x1xf32>
    %cst_199 = arith.constant 1.000000e+00 : f32
    %550 = vector.broadcast %cst_199 : f32 to vector<8x1xf32>
    %551 = arith.subf %549, %550 : vector<8x1xf32>
    %cst_200 = arith.constant 0.000000e+00 : f32
    %552 = vector.broadcast %cst_200 : f32 to vector<8x1xf32>
    %553 = arith.maximumf %551, %552 : vector<8x1xf32>
    %cst_201 = arith.constant dense<0.000000e+00> : vector<1xf32>
    %554 = vector.multi_reduction <add>, %553, %cst_201 [0] : vector<8x1xf32> to vector<1xf32>
    %555 = vector.shape_cast %554 : vector<1xf32> to vector<1x1xf32>
    %556 = arith.addf %447, %555 : vector<1x1xf32>
    %557 = arith.index_cast %c4_i32 : i32 to index
    %c0_202 = arith.constant 0 : index
    %c0_203 = arith.constant 0 : index
    %558 = vector.load %arg17[%557, %c0_202, %c0_203] : memref<8x8x32xf32, #tpu.memory_space<vmem>>, vector<1x8x32xf32>
    %559 = vector.shape_cast %558 : vector<1x8x32xf32> to vector<8x32xf32>
    %560 = vector.shape_cast %483 : vector<8x32xf32> to vector<1x8x32xf32>
    tpu.vector_store %arg17[%557, %c0_202, %c0_203], %560 {strides = array<i32>} : memref<8x8x32xf32, #tpu.memory_space<vmem>>, vector<1x8x32xf32>,
    %561 = arith.index_cast %c4_i32 : i32 to index
    %c0_204 = arith.constant 0 : index
    %c0_205 = arith.constant 0 : index
    %562 = vector.load %arg18[%561, %c0_204, %c0_205] : memref<8x8x32xf32, #tpu.memory_space<vmem>>, vector<1x8x32xf32>
    %563 = vector.shape_cast %562 : vector<1x8x32xf32> to vector<8x32xf32>
    %564 = vector.shape_cast %517 : vector<8x32xf32> to vector<1x8x32xf32>
    tpu.vector_store %arg18[%561, %c0_204, %c0_205], %564 {strides = array<i32>} : memref<8x8x32xf32, #tpu.memory_space<vmem>>, vector<1x8x32xf32>,
    %c5_i32 = arith.constant 5 : i32
    %565 = arith.index_cast %c5_i32 : i32 to index
    %c0_206 = arith.constant 0 : index
    %c0_207 = arith.constant 0 : index
    %566 = vector.load %arg2[%565, %c0_206, %c0_207] : memref<8x8x32xf32, #tpu.memory_space<vmem>>, vector<1x8x32xf32>
    %567 = vector.shape_cast %566 : vector<1x8x32xf32> to vector<8x32xf32>
    %568 = arith.index_cast %c5_i32 : i32 to index
    %c0_208 = arith.constant 0 : index
    %c0_209 = arith.constant 0 : index
    %569 = vector.load %arg3[%568, %c0_208, %c0_209] : memref<8x8x6xf32, #tpu.memory_space<vmem>>, vector<1x8x6xf32>
    %570 = vector.shape_cast %569 : vector<1x8x6xf32> to vector<8x6xf32>
    %571 = arith.index_cast %c5_i32 : i32 to index
    %c0_210 = arith.constant 0 : index
    %c0_211 = arith.constant 0 : index
    %572 = vector.load %arg4[%571, %c0_210, %c0_211] : memref<8x8x32xf32, #tpu.memory_space<vmem>>, vector<1x8x32xf32>
    %573 = vector.shape_cast %572 : vector<1x8x32xf32> to vector<8x32xf32>
    %cst_212 = arith.constant dense<0.000000e+00> : vector<8x32xf32>
    %574 = tpu.matmul %517, %8, %cst_212 {dimension_numbers = #tpu.dot_dimension_numbers<[1], [0], [0], [1], [0, 0, 1, 1], [], []>} : vector<8x32xf32>, vector<32x32xf32>, vector<8x32xf32> -> vector<8x32xf32>
    %cst_213 = arith.constant dense<0.000000e+00> : vector<8x32xf32>
    %575 = tpu.matmul %567, %9, %cst_213 {dimension_numbers = #tpu.dot_dimension_numbers<[1], [0], [0], [1], [0, 0, 1, 1], [], []>} : vector<8x32xf32>, vector<32x32xf32>, vector<8x32xf32> -> vector<8x32xf32>
    %576 = arith.addf %574, %575 : vector<8x32xf32>
    %577 = vector.broadcast %10 : vector<1x32xf32> to vector<8x32xf32>
    %578 = arith.addf %576, %577 : vector<8x32xf32>
    %579 = arith.addf %578, %573 : vector<8x32xf32>
    %580 = vector.broadcast %0 : vector<1x1xf32> to vector<8x32xf32>
    %581 = arith.mulf %579, %580 : vector<8x32xf32>
    %cst_214 = arith.constant dense<0.000000e+00> : vector<8x32xf32>
    %582 = tpu.matmul %581, %3, %cst_214 {dimension_numbers = #tpu.dot_dimension_numbers<[1], [0], [0], [1], [0, 0, 1, 1], [], []>} : vector<8x32xf32>, vector<32x32xf32>, vector<8x32xf32> -> vector<8x32xf32>
    %583 = arith.maximumf %581, %582 : vector<8x32xf32>
    %cst_215 = arith.constant dense<0.000000e+00> : vector<8x32xf32>
    %584 = tpu.matmul %581, %5, %cst_215 {dimension_numbers = #tpu.dot_dimension_numbers<[1], [0], [0], [1], [0, 0, 1, 1], [], []>} : vector<8x32xf32>, vector<32x32xf32>, vector<8x32xf32> -> vector<8x32xf32>
    %585 = arith.maximumf %583, %584 : vector<8x32xf32>
    %cst_216 = arith.constant dense<0.000000e+00> : vector<8x32xf32>
    %586 = tpu.matmul %581, %7, %cst_216 {dimension_numbers = #tpu.dot_dimension_numbers<[1], [0], [0], [1], [0, 0, 1, 1], [], []>} : vector<8x32xf32>, vector<32x32xf32>, vector<8x32xf32> -> vector<8x32xf32>
    %587 = arith.maximumf %585, %586 : vector<8x32xf32>
    %588 = arith.subf %581, %587 : vector<8x32xf32>
    %589 = math.exp %588 : vector<8x32xf32>
    %cst_217 = arith.constant dense<0.000000e+00> : vector<8x32xf32>
    %590 = tpu.matmul %589, %1, %cst_217 {dimension_numbers = #tpu.dot_dimension_numbers<[1], [0], [0], [1], [0, 0, 1, 1], [], []>} : vector<8x32xf32>, vector<32x32xf32>, vector<8x32xf32> -> vector<8x32xf32>
    %591 = tpu.reciprocal %590 {approx = true} : vector<8x32xf32> -> vector<8x32xf32>
    %592 = arith.mulf %589, %591 : vector<8x32xf32>
    %cst_218 = arith.constant dense<0.000000e+00> : vector<8x96xf32>
    %593 = tpu.matmul %592, %11, %cst_218 {dimension_numbers = #tpu.dot_dimension_numbers<[1], [0], [0], [1], [0, 0, 1, 1], [], []>} : vector<8x32xf32>, vector<32x96xf32>, vector<8x96xf32> -> vector<8x96xf32>
    %cst_219 = arith.constant dense<0.000000e+00> : vector<8x96xf32>
    %594 = tpu.matmul %570, %12, %cst_219 {dimension_numbers = #tpu.dot_dimension_numbers<[1], [0], [0], [1], [0, 0, 1, 1], [], []>} : vector<8x6xf32>, vector<6x96xf32>, vector<8x96xf32> -> vector<8x96xf32>
    %595 = arith.addf %593, %594 : vector<8x96xf32>
    %596 = vector.broadcast %13 : vector<1x96xf32> to vector<8x96xf32>
    %597 = arith.addf %595, %596 : vector<8x96xf32>
    %cst_220 = arith.constant dense<0.000000e+00> : vector<8x96xf32>
    %598 = tpu.matmul %517, %14, %cst_220 {dimension_numbers = #tpu.dot_dimension_numbers<[1], [0], [0], [1], [0, 0, 1, 1], [], []>} : vector<8x32xf32>, vector<32x96xf32>, vector<8x96xf32> -> vector<8x96xf32>
    %599 = vector.broadcast %15 : vector<1x96xf32> to vector<8x96xf32>
    %600 = arith.addf %598, %599 : vector<8x96xf32>
    %601 = vector.extract_strided_slice %597 {offsets = [0, 0], sizes = [8, 32], strides = [1, 1]} : vector<8x96xf32> to vector<8x32xf32>
    %602 = vector.extract_strided_slice %600 {offsets = [0, 0], sizes = [8, 32], strides = [1, 1]} : vector<8x96xf32> to vector<8x32xf32>
    %603 = arith.addf %601, %602 : vector<8x32xf32>
    %604 = arith.negf %603 : vector<8x32xf32>
    %605 = math.exp %604 : vector<8x32xf32>
    %cst_221 = arith.constant 1.000000e+00 : f32
    %606 = vector.broadcast %cst_221 : f32 to vector<8x32xf32>
    %607 = arith.addf %606, %605 : vector<8x32xf32>
    %608 = arith.divf %606, %607 : vector<8x32xf32>
    %609 = vector.extract_strided_slice %597 {offsets = [0, 32], sizes = [8, 32], strides = [1, 1]} : vector<8x96xf32> to vector<8x32xf32>
    %610 = vector.extract_strided_slice %600 {offsets = [0, 32], sizes = [8, 32], strides = [1, 1]} : vector<8x96xf32> to vector<8x32xf32>
    %611 = arith.addf %609, %610 : vector<8x32xf32>
    %612 = arith.negf %611 : vector<8x32xf32>
    %613 = math.exp %612 : vector<8x32xf32>
    %cst_222 = arith.constant 1.000000e+00 : f32
    %614 = vector.broadcast %cst_222 : f32 to vector<8x32xf32>
    %615 = arith.addf %614, %613 : vector<8x32xf32>
    %616 = arith.divf %614, %615 : vector<8x32xf32>
    %617 = vector.extract_strided_slice %597 {offsets = [0, 64], sizes = [8, 32], strides = [1, 1]} : vector<8x96xf32> to vector<8x32xf32>
    %618 = vector.extract_strided_slice %600 {offsets = [0, 64], sizes = [8, 32], strides = [1, 1]} : vector<8x96xf32> to vector<8x32xf32>
    %619 = arith.mulf %608, %618 : vector<8x32xf32>
    %620 = arith.addf %617, %619 : vector<8x32xf32>
    %621 = math.tanh %620 : vector<8x32xf32>
    %cst_223 = arith.constant 1.000000e+00 : f32
    %622 = vector.broadcast %cst_223 : f32 to vector<8x32xf32>
    %623 = arith.subf %622, %616 : vector<8x32xf32>
    %624 = arith.mulf %623, %621 : vector<8x32xf32>
    %625 = arith.mulf %616, %517 : vector<8x32xf32>
    %626 = arith.addf %624, %625 : vector<8x32xf32>
    %cst_224 = arith.constant dense<0.000000e+00> : vector<8x32xf32>
    %627 = tpu.matmul %626, %16, %cst_224 {dimension_numbers = #tpu.dot_dimension_numbers<[1], [0], [0], [1], [0, 0, 1, 1], [], []>} : vector<8x32xf32>, vector<32x32xf32>, vector<8x32xf32> -> vector<8x32xf32>
    %628 = vector.broadcast %17 : vector<1x32xf32> to vector<8x32xf32>
    %629 = arith.addf %627, %628 : vector<8x32xf32>
    %cst_225 = arith.constant dense<0.000000e+00> : vector<8x32xf32>
    %630 = tpu.matmul %629, %3, %cst_225 {dimension_numbers = #tpu.dot_dimension_numbers<[1], [0], [0], [1], [0, 0, 1, 1], [], []>} : vector<8x32xf32>, vector<32x32xf32>, vector<8x32xf32> -> vector<8x32xf32>
    %631 = arith.maximumf %629, %630 : vector<8x32xf32>
    %cst_226 = arith.constant dense<0.000000e+00> : vector<8x32xf32>
    %632 = tpu.matmul %629, %5, %cst_226 {dimension_numbers = #tpu.dot_dimension_numbers<[1], [0], [0], [1], [0, 0, 1, 1], [], []>} : vector<8x32xf32>, vector<32x32xf32>, vector<8x32xf32> -> vector<8x32xf32>
    %633 = arith.maximumf %631, %632 : vector<8x32xf32>
    %cst_227 = arith.constant dense<0.000000e+00> : vector<8x32xf32>
    %634 = tpu.matmul %629, %7, %cst_227 {dimension_numbers = #tpu.dot_dimension_numbers<[1], [0], [0], [1], [0, 0, 1, 1], [], []>} : vector<8x32xf32>, vector<32x32xf32>, vector<8x32xf32> -> vector<8x32xf32>
    %635 = arith.maximumf %633, %634 : vector<8x32xf32>
    %636 = arith.subf %629, %635 : vector<8x32xf32>
    %637 = math.exp %636 : vector<8x32xf32>
    %cst_228 = arith.constant dense<0.000000e+00> : vector<8x32xf32>
    %638 = tpu.matmul %637, %1, %cst_228 {dimension_numbers = #tpu.dot_dimension_numbers<[1], [0], [0], [1], [0, 0, 1, 1], [], []>} : vector<8x32xf32>, vector<32x32xf32>, vector<8x32xf32> -> vector<8x32xf32>
    %639 = arith.subf %629, %635 : vector<8x32xf32>
    %640 = math.log %638 : vector<8x32xf32>
    %641 = arith.subf %639, %640 : vector<8x32xf32>
    %cst_229 = arith.constant dense<0.000000e+00> : vector<8x32xf32>
    %642 = tpu.matmul %578, %3, %cst_229 {dimension_numbers = #tpu.dot_dimension_numbers<[1], [0], [0], [1], [0, 0, 1, 1], [], []>} : vector<8x32xf32>, vector<32x32xf32>, vector<8x32xf32> -> vector<8x32xf32>
    %643 = arith.maximumf %578, %642 : vector<8x32xf32>
    %cst_230 = arith.constant dense<0.000000e+00> : vector<8x32xf32>
    %644 = tpu.matmul %578, %5, %cst_230 {dimension_numbers = #tpu.dot_dimension_numbers<[1], [0], [0], [1], [0, 0, 1, 1], [], []>} : vector<8x32xf32>, vector<32x32xf32>, vector<8x32xf32> -> vector<8x32xf32>
    %645 = arith.maximumf %643, %644 : vector<8x32xf32>
    %cst_231 = arith.constant dense<0.000000e+00> : vector<8x32xf32>
    %646 = tpu.matmul %578, %7, %cst_231 {dimension_numbers = #tpu.dot_dimension_numbers<[1], [0], [0], [1], [0, 0, 1, 1], [], []>} : vector<8x32xf32>, vector<32x32xf32>, vector<8x32xf32> -> vector<8x32xf32>
    %647 = arith.maximumf %645, %646 : vector<8x32xf32>
    %648 = arith.subf %578, %647 : vector<8x32xf32>
    %649 = math.exp %648 : vector<8x32xf32>
    %cst_232 = arith.constant dense<0.000000e+00> : vector<8x32xf32>
    %650 = tpu.matmul %649, %1, %cst_232 {dimension_numbers = #tpu.dot_dimension_numbers<[1], [0], [0], [1], [0, 0, 1, 1], [], []>} : vector<8x32xf32>, vector<32x32xf32>, vector<8x32xf32> -> vector<8x32xf32>
    %651 = arith.subf %578, %647 : vector<8x32xf32>
    %652 = math.log %650 : vector<8x32xf32>
    %653 = arith.subf %651, %652 : vector<8x32xf32>
    %654 = math.exp %653 : vector<8x32xf32>
    %655 = arith.subf %653, %641 : vector<8x32xf32>
    %656 = arith.mulf %654, %655 : vector<8x32xf32>
    %cst_233 = arith.constant dense<0.000000e+00> : vector<8xf32>
    %657 = vector.multi_reduction <add>, %656, %cst_233 [1] : vector<8x32xf32> to vector<8xf32>
    %658 = vector.shape_cast %657 : vector<8xf32> to vector<8x1xf32>
    %cst_234 = arith.constant 1.000000e+00 : f32
    %659 = vector.broadcast %cst_234 : f32 to vector<8x1xf32>
    %660 = arith.subf %658, %659 : vector<8x1xf32>
    %cst_235 = arith.constant 0.000000e+00 : f32
    %661 = vector.broadcast %cst_235 : f32 to vector<8x1xf32>
    %662 = arith.maximumf %660, %661 : vector<8x1xf32>
    %cst_236 = arith.constant dense<0.000000e+00> : vector<1xf32>
    %663 = vector.multi_reduction <add>, %662, %cst_236 [0] : vector<8x1xf32> to vector<1xf32>
    %664 = vector.shape_cast %663 : vector<1xf32> to vector<1x1xf32>
    %665 = arith.addf %556, %664 : vector<1x1xf32>
    %666 = arith.index_cast %c5_i32 : i32 to index
    %c0_237 = arith.constant 0 : index
    %c0_238 = arith.constant 0 : index
    %667 = vector.load %arg17[%666, %c0_237, %c0_238] : memref<8x8x32xf32, #tpu.memory_space<vmem>>, vector<1x8x32xf32>
    %668 = vector.shape_cast %667 : vector<1x8x32xf32> to vector<8x32xf32>
    %669 = vector.shape_cast %592 : vector<8x32xf32> to vector<1x8x32xf32>
    tpu.vector_store %arg17[%666, %c0_237, %c0_238], %669 {strides = array<i32>} : memref<8x8x32xf32, #tpu.memory_space<vmem>>, vector<1x8x32xf32>,
    %670 = arith.index_cast %c5_i32 : i32 to index
    %c0_239 = arith.constant 0 : index
    %c0_240 = arith.constant 0 : index
    %671 = vector.load %arg18[%670, %c0_239, %c0_240] : memref<8x8x32xf32, #tpu.memory_space<vmem>>, vector<1x8x32xf32>
    %672 = vector.shape_cast %671 : vector<1x8x32xf32> to vector<8x32xf32>
    %673 = vector.shape_cast %626 : vector<8x32xf32> to vector<1x8x32xf32>
    tpu.vector_store %arg18[%670, %c0_239, %c0_240], %673 {strides = array<i32>} : memref<8x8x32xf32, #tpu.memory_space<vmem>>, vector<1x8x32xf32>,
    %c6_i32 = arith.constant 6 : i32
    %674 = arith.index_cast %c6_i32 : i32 to index
    %c0_241 = arith.constant 0 : index
    %c0_242 = arith.constant 0 : index
    %675 = vector.load %arg2[%674, %c0_241, %c0_242] : memref<8x8x32xf32, #tpu.memory_space<vmem>>, vector<1x8x32xf32>
    %676 = vector.shape_cast %675 : vector<1x8x32xf32> to vector<8x32xf32>
    %677 = arith.index_cast %c6_i32 : i32 to index
    %c0_243 = arith.constant 0 : index
    %c0_244 = arith.constant 0 : index
    %678 = vector.load %arg3[%677, %c0_243, %c0_244] : memref<8x8x6xf32, #tpu.memory_space<vmem>>, vector<1x8x6xf32>
    %679 = vector.shape_cast %678 : vector<1x8x6xf32> to vector<8x6xf32>
    %680 = arith.index_cast %c6_i32 : i32 to index
    %c0_245 = arith.constant 0 : index
    %c0_246 = arith.constant 0 : index
    %681 = vector.load %arg4[%680, %c0_245, %c0_246] : memref<8x8x32xf32, #tpu.memory_space<vmem>>, vector<1x8x32xf32>
    %682 = vector.shape_cast %681 : vector<1x8x32xf32> to vector<8x32xf32>
    %cst_247 = arith.constant dense<0.000000e+00> : vector<8x32xf32>
    %683 = tpu.matmul %626, %8, %cst_247 {dimension_numbers = #tpu.dot_dimension_numbers<[1], [0], [0], [1], [0, 0, 1, 1], [], []>} : vector<8x32xf32>, vector<32x32xf32>, vector<8x32xf32> -> vector<8x32xf32>
    %cst_248 = arith.constant dense<0.000000e+00> : vector<8x32xf32>
    %684 = tpu.matmul %676, %9, %cst_248 {dimension_numbers = #tpu.dot_dimension_numbers<[1], [0], [0], [1], [0, 0, 1, 1], [], []>} : vector<8x32xf32>, vector<32x32xf32>, vector<8x32xf32> -> vector<8x32xf32>
    %685 = arith.addf %683, %684 : vector<8x32xf32>
    %686 = vector.broadcast %10 : vector<1x32xf32> to vector<8x32xf32>
    %687 = arith.addf %685, %686 : vector<8x32xf32>
    %688 = arith.addf %687, %682 : vector<8x32xf32>
    %689 = vector.broadcast %0 : vector<1x1xf32> to vector<8x32xf32>
    %690 = arith.mulf %688, %689 : vector<8x32xf32>
    %cst_249 = arith.constant dense<0.000000e+00> : vector<8x32xf32>
    %691 = tpu.matmul %690, %3, %cst_249 {dimension_numbers = #tpu.dot_dimension_numbers<[1], [0], [0], [1], [0, 0, 1, 1], [], []>} : vector<8x32xf32>, vector<32x32xf32>, vector<8x32xf32> -> vector<8x32xf32>
    %692 = arith.maximumf %690, %691 : vector<8x32xf32>
    %cst_250 = arith.constant dense<0.000000e+00> : vector<8x32xf32>
    %693 = tpu.matmul %690, %5, %cst_250 {dimension_numbers = #tpu.dot_dimension_numbers<[1], [0], [0], [1], [0, 0, 1, 1], [], []>} : vector<8x32xf32>, vector<32x32xf32>, vector<8x32xf32> -> vector<8x32xf32>
    %694 = arith.maximumf %692, %693 : vector<8x32xf32>
    %cst_251 = arith.constant dense<0.000000e+00> : vector<8x32xf32>
    %695 = tpu.matmul %690, %7, %cst_251 {dimension_numbers = #tpu.dot_dimension_numbers<[1], [0], [0], [1], [0, 0, 1, 1], [], []>} : vector<8x32xf32>, vector<32x32xf32>, vector<8x32xf32> -> vector<8x32xf32>
    %696 = arith.maximumf %694, %695 : vector<8x32xf32>
    %697 = arith.subf %690, %696 : vector<8x32xf32>
    %698 = math.exp %697 : vector<8x32xf32>
    %cst_252 = arith.constant dense<0.000000e+00> : vector<8x32xf32>
    %699 = tpu.matmul %698, %1, %cst_252 {dimension_numbers = #tpu.dot_dimension_numbers<[1], [0], [0], [1], [0, 0, 1, 1], [], []>} : vector<8x32xf32>, vector<32x32xf32>, vector<8x32xf32> -> vector<8x32xf32>
    %700 = tpu.reciprocal %699 {approx = true} : vector<8x32xf32> -> vector<8x32xf32>
    %701 = arith.mulf %698, %700 : vector<8x32xf32>
    %cst_253 = arith.constant dense<0.000000e+00> : vector<8x96xf32>
    %702 = tpu.matmul %701, %11, %cst_253 {dimension_numbers = #tpu.dot_dimension_numbers<[1], [0], [0], [1], [0, 0, 1, 1], [], []>} : vector<8x32xf32>, vector<32x96xf32>, vector<8x96xf32> -> vector<8x96xf32>
    %cst_254 = arith.constant dense<0.000000e+00> : vector<8x96xf32>
    %703 = tpu.matmul %679, %12, %cst_254 {dimension_numbers = #tpu.dot_dimension_numbers<[1], [0], [0], [1], [0, 0, 1, 1], [], []>} : vector<8x6xf32>, vector<6x96xf32>, vector<8x96xf32> -> vector<8x96xf32>
    %704 = arith.addf %702, %703 : vector<8x96xf32>
    %705 = vector.broadcast %13 : vector<1x96xf32> to vector<8x96xf32>
    %706 = arith.addf %704, %705 : vector<8x96xf32>
    %cst_255 = arith.constant dense<0.000000e+00> : vector<8x96xf32>
    %707 = tpu.matmul %626, %14, %cst_255 {dimension_numbers = #tpu.dot_dimension_numbers<[1], [0], [0], [1], [0, 0, 1, 1], [], []>} : vector<8x32xf32>, vector<32x96xf32>, vector<8x96xf32> -> vector<8x96xf32>
    %708 = vector.broadcast %15 : vector<1x96xf32> to vector<8x96xf32>
    %709 = arith.addf %707, %708 : vector<8x96xf32>
    %710 = vector.extract_strided_slice %706 {offsets = [0, 0], sizes = [8, 32], strides = [1, 1]} : vector<8x96xf32> to vector<8x32xf32>
    %711 = vector.extract_strided_slice %709 {offsets = [0, 0], sizes = [8, 32], strides = [1, 1]} : vector<8x96xf32> to vector<8x32xf32>
    %712 = arith.addf %710, %711 : vector<8x32xf32>
    %713 = arith.negf %712 : vector<8x32xf32>
    %714 = math.exp %713 : vector<8x32xf32>
    %cst_256 = arith.constant 1.000000e+00 : f32
    %715 = vector.broadcast %cst_256 : f32 to vector<8x32xf32>
    %716 = arith.addf %715, %714 : vector<8x32xf32>
    %717 = arith.divf %715, %716 : vector<8x32xf32>
    %718 = vector.extract_strided_slice %706 {offsets = [0, 32], sizes = [8, 32], strides = [1, 1]} : vector<8x96xf32> to vector<8x32xf32>
    %719 = vector.extract_strided_slice %709 {offsets = [0, 32], sizes = [8, 32], strides = [1, 1]} : vector<8x96xf32> to vector<8x32xf32>
    %720 = arith.addf %718, %719 : vector<8x32xf32>
    %721 = arith.negf %720 : vector<8x32xf32>
    %722 = math.exp %721 : vector<8x32xf32>
    %cst_257 = arith.constant 1.000000e+00 : f32
    %723 = vector.broadcast %cst_257 : f32 to vector<8x32xf32>
    %724 = arith.addf %723, %722 : vector<8x32xf32>
    %725 = arith.divf %723, %724 : vector<8x32xf32>
    %726 = vector.extract_strided_slice %706 {offsets = [0, 64], sizes = [8, 32], strides = [1, 1]} : vector<8x96xf32> to vector<8x32xf32>
    %727 = vector.extract_strided_slice %709 {offsets = [0, 64], sizes = [8, 32], strides = [1, 1]} : vector<8x96xf32> to vector<8x32xf32>
    %728 = arith.mulf %717, %727 : vector<8x32xf32>
    %729 = arith.addf %726, %728 : vector<8x32xf32>
    %730 = math.tanh %729 : vector<8x32xf32>
    %cst_258 = arith.constant 1.000000e+00 : f32
    %731 = vector.broadcast %cst_258 : f32 to vector<8x32xf32>
    %732 = arith.subf %731, %725 : vector<8x32xf32>
    %733 = arith.mulf %732, %730 : vector<8x32xf32>
    %734 = arith.mulf %725, %626 : vector<8x32xf32>
    %735 = arith.addf %733, %734 : vector<8x32xf32>
    %cst_259 = arith.constant dense<0.000000e+00> : vector<8x32xf32>
    %736 = tpu.matmul %735, %16, %cst_259 {dimension_numbers = #tpu.dot_dimension_numbers<[1], [0], [0], [1], [0, 0, 1, 1], [], []>} : vector<8x32xf32>, vector<32x32xf32>, vector<8x32xf32> -> vector<8x32xf32>
    %737 = vector.broadcast %17 : vector<1x32xf32> to vector<8x32xf32>
    %738 = arith.addf %736, %737 : vector<8x32xf32>
    %cst_260 = arith.constant dense<0.000000e+00> : vector<8x32xf32>
    %739 = tpu.matmul %738, %3, %cst_260 {dimension_numbers = #tpu.dot_dimension_numbers<[1], [0], [0], [1], [0, 0, 1, 1], [], []>} : vector<8x32xf32>, vector<32x32xf32>, vector<8x32xf32> -> vector<8x32xf32>
    %740 = arith.maximumf %738, %739 : vector<8x32xf32>
    %cst_261 = arith.constant dense<0.000000e+00> : vector<8x32xf32>
    %741 = tpu.matmul %738, %5, %cst_261 {dimension_numbers = #tpu.dot_dimension_numbers<[1], [0], [0], [1], [0, 0, 1, 1], [], []>} : vector<8x32xf32>, vector<32x32xf32>, vector<8x32xf32> -> vector<8x32xf32>
    %742 = arith.maximumf %740, %741 : vector<8x32xf32>
    %cst_262 = arith.constant dense<0.000000e+00> : vector<8x32xf32>
    %743 = tpu.matmul %738, %7, %cst_262 {dimension_numbers = #tpu.dot_dimension_numbers<[1], [0], [0], [1], [0, 0, 1, 1], [], []>} : vector<8x32xf32>, vector<32x32xf32>, vector<8x32xf32> -> vector<8x32xf32>
    %744 = arith.maximumf %742, %743 : vector<8x32xf32>
    %745 = arith.subf %738, %744 : vector<8x32xf32>
    %746 = math.exp %745 : vector<8x32xf32>
    %cst_263 = arith.constant dense<0.000000e+00> : vector<8x32xf32>
    %747 = tpu.matmul %746, %1, %cst_263 {dimension_numbers = #tpu.dot_dimension_numbers<[1], [0], [0], [1], [0, 0, 1, 1], [], []>} : vector<8x32xf32>, vector<32x32xf32>, vector<8x32xf32> -> vector<8x32xf32>
    %748 = arith.subf %738, %744 : vector<8x32xf32>
    %749 = math.log %747 : vector<8x32xf32>
    %750 = arith.subf %748, %749 : vector<8x32xf32>
    %cst_264 = arith.constant dense<0.000000e+00> : vector<8x32xf32>
    %751 = tpu.matmul %687, %3, %cst_264 {dimension_numbers = #tpu.dot_dimension_numbers<[1], [0], [0], [1], [0, 0, 1, 1], [], []>} : vector<8x32xf32>, vector<32x32xf32>, vector<8x32xf32> -> vector<8x32xf32>
    %752 = arith.maximumf %687, %751 : vector<8x32xf32>
    %cst_265 = arith.constant dense<0.000000e+00> : vector<8x32xf32>
    %753 = tpu.matmul %687, %5, %cst_265 {dimension_numbers = #tpu.dot_dimension_numbers<[1], [0], [0], [1], [0, 0, 1, 1], [], []>} : vector<8x32xf32>, vector<32x32xf32>, vector<8x32xf32> -> vector<8x32xf32>
    %754 = arith.maximumf %752, %753 : vector<8x32xf32>
    %cst_266 = arith.constant dense<0.000000e+00> : vector<8x32xf32>
    %755 = tpu.matmul %687, %7, %cst_266 {dimension_numbers = #tpu.dot_dimension_numbers<[1], [0], [0], [1], [0, 0, 1, 1], [], []>} : vector<8x32xf32>, vector<32x32xf32>, vector<8x32xf32> -> vector<8x32xf32>
    %756 = arith.maximumf %754, %755 : vector<8x32xf32>
    %757 = arith.subf %687, %756 : vector<8x32xf32>
    %758 = math.exp %757 : vector<8x32xf32>
    %cst_267 = arith.constant dense<0.000000e+00> : vector<8x32xf32>
    %759 = tpu.matmul %758, %1, %cst_267 {dimension_numbers = #tpu.dot_dimension_numbers<[1], [0], [0], [1], [0, 0, 1, 1], [], []>} : vector<8x32xf32>, vector<32x32xf32>, vector<8x32xf32> -> vector<8x32xf32>
    %760 = arith.subf %687, %756 : vector<8x32xf32>
    %761 = math.log %759 : vector<8x32xf32>
    %762 = arith.subf %760, %761 : vector<8x32xf32>
    %763 = math.exp %762 : vector<8x32xf32>
    %764 = arith.subf %762, %750 : vector<8x32xf32>
    %765 = arith.mulf %763, %764 : vector<8x32xf32>
    %cst_268 = arith.constant dense<0.000000e+00> : vector<8xf32>
    %766 = vector.multi_reduction <add>, %765, %cst_268 [1] : vector<8x32xf32> to vector<8xf32>
    %767 = vector.shape_cast %766 : vector<8xf32> to vector<8x1xf32>
    %cst_269 = arith.constant 1.000000e+00 : f32
    %768 = vector.broadcast %cst_269 : f32 to vector<8x1xf32>
    %769 = arith.subf %767, %768 : vector<8x1xf32>
    %cst_270 = arith.constant 0.000000e+00 : f32
    %770 = vector.broadcast %cst_270 : f32 to vector<8x1xf32>
    %771 = arith.maximumf %769, %770 : vector<8x1xf32>
    %cst_271 = arith.constant dense<0.000000e+00> : vector<1xf32>
    %772 = vector.multi_reduction <add>, %771, %cst_271 [0] : vector<8x1xf32> to vector<1xf32>
    %773 = vector.shape_cast %772 : vector<1xf32> to vector<1x1xf32>
    %774 = arith.addf %665, %773 : vector<1x1xf32>
    %775 = arith.index_cast %c6_i32 : i32 to index
    %c0_272 = arith.constant 0 : index
    %c0_273 = arith.constant 0 : index
    %776 = vector.load %arg17[%775, %c0_272, %c0_273] : memref<8x8x32xf32, #tpu.memory_space<vmem>>, vector<1x8x32xf32>
    %777 = vector.shape_cast %776 : vector<1x8x32xf32> to vector<8x32xf32>
    %778 = vector.shape_cast %701 : vector<8x32xf32> to vector<1x8x32xf32>
    tpu.vector_store %arg17[%775, %c0_272, %c0_273], %778 {strides = array<i32>} : memref<8x8x32xf32, #tpu.memory_space<vmem>>, vector<1x8x32xf32>,
    %779 = arith.index_cast %c6_i32 : i32 to index
    %c0_274 = arith.constant 0 : index
    %c0_275 = arith.constant 0 : index
    %780 = vector.load %arg18[%779, %c0_274, %c0_275] : memref<8x8x32xf32, #tpu.memory_space<vmem>>, vector<1x8x32xf32>
    %781 = vector.shape_cast %780 : vector<1x8x32xf32> to vector<8x32xf32>
    %782 = vector.shape_cast %735 : vector<8x32xf32> to vector<1x8x32xf32>
    tpu.vector_store %arg18[%779, %c0_274, %c0_275], %782 {strides = array<i32>} : memref<8x8x32xf32, #tpu.memory_space<vmem>>, vector<1x8x32xf32>,
    %c7_i32 = arith.constant 7 : i32
    %783 = arith.index_cast %c7_i32 : i32 to index
    %c0_276 = arith.constant 0 : index
    %c0_277 = arith.constant 0 : index
    %784 = vector.load %arg2[%783, %c0_276, %c0_277] : memref<8x8x32xf32, #tpu.memory_space<vmem>>, vector<1x8x32xf32>
    %785 = vector.shape_cast %784 : vector<1x8x32xf32> to vector<8x32xf32>
    %786 = arith.index_cast %c7_i32 : i32 to index
    %c0_278 = arith.constant 0 : index
    %c0_279 = arith.constant 0 : index
    %787 = vector.load %arg3[%786, %c0_278, %c0_279] : memref<8x8x6xf32, #tpu.memory_space<vmem>>, vector<1x8x6xf32>
    %788 = vector.shape_cast %787 : vector<1x8x6xf32> to vector<8x6xf32>
    %789 = arith.index_cast %c7_i32 : i32 to index
    %c0_280 = arith.constant 0 : index
    %c0_281 = arith.constant 0 : index
    %790 = vector.load %arg4[%789, %c0_280, %c0_281] : memref<8x8x32xf32, #tpu.memory_space<vmem>>, vector<1x8x32xf32>
    %791 = vector.shape_cast %790 : vector<1x8x32xf32> to vector<8x32xf32>
    %cst_282 = arith.constant dense<0.000000e+00> : vector<8x32xf32>
    %792 = tpu.matmul %735, %8, %cst_282 {dimension_numbers = #tpu.dot_dimension_numbers<[1], [0], [0], [1], [0, 0, 1, 1], [], []>} : vector<8x32xf32>, vector<32x32xf32>, vector<8x32xf32> -> vector<8x32xf32>
    %cst_283 = arith.constant dense<0.000000e+00> : vector<8x32xf32>
    %793 = tpu.matmul %785, %9, %cst_283 {dimension_numbers = #tpu.dot_dimension_numbers<[1], [0], [0], [1], [0, 0, 1, 1], [], []>} : vector<8x32xf32>, vector<32x32xf32>, vector<8x32xf32> -> vector<8x32xf32>
    %794 = arith.addf %792, %793 : vector<8x32xf32>
    %795 = vector.broadcast %10 : vector<1x32xf32> to vector<8x32xf32>
    %796 = arith.addf %794, %795 : vector<8x32xf32>
    %797 = arith.addf %796, %791 : vector<8x32xf32>
    %798 = vector.broadcast %0 : vector<1x1xf32> to vector<8x32xf32>
    %799 = arith.mulf %797, %798 : vector<8x32xf32>
    %cst_284 = arith.constant dense<0.000000e+00> : vector<8x32xf32>
    %800 = tpu.matmul %799, %3, %cst_284 {dimension_numbers = #tpu.dot_dimension_numbers<[1], [0], [0], [1], [0, 0, 1, 1], [], []>} : vector<8x32xf32>, vector<32x32xf32>, vector<8x32xf32> -> vector<8x32xf32>
    %801 = arith.maximumf %799, %800 : vector<8x32xf32>
    %cst_285 = arith.constant dense<0.000000e+00> : vector<8x32xf32>
    %802 = tpu.matmul %799, %5, %cst_285 {dimension_numbers = #tpu.dot_dimension_numbers<[1], [0], [0], [1], [0, 0, 1, 1], [], []>} : vector<8x32xf32>, vector<32x32xf32>, vector<8x32xf32> -> vector<8x32xf32>
    %803 = arith.maximumf %801, %802 : vector<8x32xf32>
    %cst_286 = arith.constant dense<0.000000e+00> : vector<8x32xf32>
    %804 = tpu.matmul %799, %7, %cst_286 {dimension_numbers = #tpu.dot_dimension_numbers<[1], [0], [0], [1], [0, 0, 1, 1], [], []>} : vector<8x32xf32>, vector<32x32xf32>, vector<8x32xf32> -> vector<8x32xf32>
    %805 = arith.maximumf %803, %804 : vector<8x32xf32>
    %806 = arith.subf %799, %805 : vector<8x32xf32>
    %807 = math.exp %806 : vector<8x32xf32>
    %cst_287 = arith.constant dense<0.000000e+00> : vector<8x32xf32>
    %808 = tpu.matmul %807, %1, %cst_287 {dimension_numbers = #tpu.dot_dimension_numbers<[1], [0], [0], [1], [0, 0, 1, 1], [], []>} : vector<8x32xf32>, vector<32x32xf32>, vector<8x32xf32> -> vector<8x32xf32>
    %809 = tpu.reciprocal %808 {approx = true} : vector<8x32xf32> -> vector<8x32xf32>
    %810 = arith.mulf %807, %809 : vector<8x32xf32>
    %cst_288 = arith.constant dense<0.000000e+00> : vector<8x96xf32>
    %811 = tpu.matmul %810, %11, %cst_288 {dimension_numbers = #tpu.dot_dimension_numbers<[1], [0], [0], [1], [0, 0, 1, 1], [], []>} : vector<8x32xf32>, vector<32x96xf32>, vector<8x96xf32> -> vector<8x96xf32>
    %cst_289 = arith.constant dense<0.000000e+00> : vector<8x96xf32>
    %812 = tpu.matmul %788, %12, %cst_289 {dimension_numbers = #tpu.dot_dimension_numbers<[1], [0], [0], [1], [0, 0, 1, 1], [], []>} : vector<8x6xf32>, vector<6x96xf32>, vector<8x96xf32> -> vector<8x96xf32>
    %813 = arith.addf %811, %812 : vector<8x96xf32>
    %814 = vector.broadcast %13 : vector<1x96xf32> to vector<8x96xf32>
    %815 = arith.addf %813, %814 : vector<8x96xf32>
    %cst_290 = arith.constant dense<0.000000e+00> : vector<8x96xf32>
    %816 = tpu.matmul %735, %14, %cst_290 {dimension_numbers = #tpu.dot_dimension_numbers<[1], [0], [0], [1], [0, 0, 1, 1], [], []>} : vector<8x32xf32>, vector<32x96xf32>, vector<8x96xf32> -> vector<8x96xf32>
    %817 = vector.broadcast %15 : vector<1x96xf32> to vector<8x96xf32>
    %818 = arith.addf %816, %817 : vector<8x96xf32>
    %819 = vector.extract_strided_slice %815 {offsets = [0, 0], sizes = [8, 32], strides = [1, 1]} : vector<8x96xf32> to vector<8x32xf32>
    %820 = vector.extract_strided_slice %818 {offsets = [0, 0], sizes = [8, 32], strides = [1, 1]} : vector<8x96xf32> to vector<8x32xf32>
    %821 = arith.addf %819, %820 : vector<8x32xf32>
    %822 = arith.negf %821 : vector<8x32xf32>
    %823 = math.exp %822 : vector<8x32xf32>
    %cst_291 = arith.constant 1.000000e+00 : f32
    %824 = vector.broadcast %cst_291 : f32 to vector<8x32xf32>
    %825 = arith.addf %824, %823 : vector<8x32xf32>
    %826 = arith.divf %824, %825 : vector<8x32xf32>
    %827 = vector.extract_strided_slice %815 {offsets = [0, 32], sizes = [8, 32], strides = [1, 1]} : vector<8x96xf32> to vector<8x32xf32>
    %828 = vector.extract_strided_slice %818 {offsets = [0, 32], sizes = [8, 32], strides = [1, 1]} : vector<8x96xf32> to vector<8x32xf32>
    %829 = arith.addf %827, %828 : vector<8x32xf32>
    %830 = arith.negf %829 : vector<8x32xf32>
    %831 = math.exp %830 : vector<8x32xf32>
    %cst_292 = arith.constant 1.000000e+00 : f32
    %832 = vector.broadcast %cst_292 : f32 to vector<8x32xf32>
    %833 = arith.addf %832, %831 : vector<8x32xf32>
    %834 = arith.divf %832, %833 : vector<8x32xf32>
    %835 = vector.extract_strided_slice %815 {offsets = [0, 64], sizes = [8, 32], strides = [1, 1]} : vector<8x96xf32> to vector<8x32xf32>
    %836 = vector.extract_strided_slice %818 {offsets = [0, 64], sizes = [8, 32], strides = [1, 1]} : vector<8x96xf32> to vector<8x32xf32>
    %837 = arith.mulf %826, %836 : vector<8x32xf32>
    %838 = arith.addf %835, %837 : vector<8x32xf32>
    %839 = math.tanh %838 : vector<8x32xf32>
    %cst_293 = arith.constant 1.000000e+00 : f32
    %840 = vector.broadcast %cst_293 : f32 to vector<8x32xf32>
    %841 = arith.subf %840, %834 : vector<8x32xf32>
    %842 = arith.mulf %841, %839 : vector<8x32xf32>
    %843 = arith.mulf %834, %735 : vector<8x32xf32>
    %844 = arith.addf %842, %843 : vector<8x32xf32>
    %cst_294 = arith.constant dense<0.000000e+00> : vector<8x32xf32>
    %845 = tpu.matmul %844, %16, %cst_294 {dimension_numbers = #tpu.dot_dimension_numbers<[1], [0], [0], [1], [0, 0, 1, 1], [], []>} : vector<8x32xf32>, vector<32x32xf32>, vector<8x32xf32> -> vector<8x32xf32>
    %846 = vector.broadcast %17 : vector<1x32xf32> to vector<8x32xf32>
    %847 = arith.addf %845, %846 : vector<8x32xf32>
    %cst_295 = arith.constant dense<0.000000e+00> : vector<8x32xf32>
    %848 = tpu.matmul %847, %3, %cst_295 {dimension_numbers = #tpu.dot_dimension_numbers<[1], [0], [0], [1], [0, 0, 1, 1], [], []>} : vector<8x32xf32>, vector<32x32xf32>, vector<8x32xf32> -> vector<8x32xf32>
    %849 = arith.maximumf %847, %848 : vector<8x32xf32>
    %cst_296 = arith.constant dense<0.000000e+00> : vector<8x32xf32>
    %850 = tpu.matmul %847, %5, %cst_296 {dimension_numbers = #tpu.dot_dimension_numbers<[1], [0], [0], [1], [0, 0, 1, 1], [], []>} : vector<8x32xf32>, vector<32x32xf32>, vector<8x32xf32> -> vector<8x32xf32>
    %851 = arith.maximumf %849, %850 : vector<8x32xf32>
    %cst_297 = arith.constant dense<0.000000e+00> : vector<8x32xf32>
    %852 = tpu.matmul %847, %7, %cst_297 {dimension_numbers = #tpu.dot_dimension_numbers<[1], [0], [0], [1], [0, 0, 1, 1], [], []>} : vector<8x32xf32>, vector<32x32xf32>, vector<8x32xf32> -> vector<8x32xf32>
    %853 = arith.maximumf %851, %852 : vector<8x32xf32>
    %854 = arith.subf %847, %853 : vector<8x32xf32>
    %855 = math.exp %854 : vector<8x32xf32>
    %cst_298 = arith.constant dense<0.000000e+00> : vector<8x32xf32>
    %856 = tpu.matmul %855, %1, %cst_298 {dimension_numbers = #tpu.dot_dimension_numbers<[1], [0], [0], [1], [0, 0, 1, 1], [], []>} : vector<8x32xf32>, vector<32x32xf32>, vector<8x32xf32> -> vector<8x32xf32>
    %857 = arith.subf %847, %853 : vector<8x32xf32>
    %858 = math.log %856 : vector<8x32xf32>
    %859 = arith.subf %857, %858 : vector<8x32xf32>
    %cst_299 = arith.constant dense<0.000000e+00> : vector<8x32xf32>
    %860 = tpu.matmul %796, %3, %cst_299 {dimension_numbers = #tpu.dot_dimension_numbers<[1], [0], [0], [1], [0, 0, 1, 1], [], []>} : vector<8x32xf32>, vector<32x32xf32>, vector<8x32xf32> -> vector<8x32xf32>
    %861 = arith.maximumf %796, %860 : vector<8x32xf32>
    %cst_300 = arith.constant dense<0.000000e+00> : vector<8x32xf32>
    %862 = tpu.matmul %796, %5, %cst_300 {dimension_numbers = #tpu.dot_dimension_numbers<[1], [0], [0], [1], [0, 0, 1, 1], [], []>} : vector<8x32xf32>, vector<32x32xf32>, vector<8x32xf32> -> vector<8x32xf32>
    %863 = arith.maximumf %861, %862 : vector<8x32xf32>
    %cst_301 = arith.constant dense<0.000000e+00> : vector<8x32xf32>
    %864 = tpu.matmul %796, %7, %cst_301 {dimension_numbers = #tpu.dot_dimension_numbers<[1], [0], [0], [1], [0, 0, 1, 1], [], []>} : vector<8x32xf32>, vector<32x32xf32>, vector<8x32xf32> -> vector<8x32xf32>
    %865 = arith.maximumf %863, %864 : vector<8x32xf32>
    %866 = arith.subf %796, %865 : vector<8x32xf32>
    %867 = math.exp %866 : vector<8x32xf32>
    %cst_302 = arith.constant dense<0.000000e+00> : vector<8x32xf32>
    %868 = tpu.matmul %867, %1, %cst_302 {dimension_numbers = #tpu.dot_dimension_numbers<[1], [0], [0], [1], [0, 0, 1, 1], [], []>} : vector<8x32xf32>, vector<32x32xf32>, vector<8x32xf32> -> vector<8x32xf32>
    %869 = arith.subf %796, %865 : vector<8x32xf32>
    %870 = math.log %868 : vector<8x32xf32>
    %871 = arith.subf %869, %870 : vector<8x32xf32>
    %872 = math.exp %871 : vector<8x32xf32>
    %873 = arith.subf %871, %859 : vector<8x32xf32>
    %874 = arith.mulf %872, %873 : vector<8x32xf32>
    %cst_303 = arith.constant dense<0.000000e+00> : vector<8xf32>
    %875 = vector.multi_reduction <add>, %874, %cst_303 [1] : vector<8x32xf32> to vector<8xf32>
    %876 = vector.shape_cast %875 : vector<8xf32> to vector<8x1xf32>
    %cst_304 = arith.constant 1.000000e+00 : f32
    %877 = vector.broadcast %cst_304 : f32 to vector<8x1xf32>
    %878 = arith.subf %876, %877 : vector<8x1xf32>
    %cst_305 = arith.constant 0.000000e+00 : f32
    %879 = vector.broadcast %cst_305 : f32 to vector<8x1xf32>
    %880 = arith.maximumf %878, %879 : vector<8x1xf32>
    %cst_306 = arith.constant dense<0.000000e+00> : vector<1xf32>
    %881 = vector.multi_reduction <add>, %880, %cst_306 [0] : vector<8x1xf32> to vector<1xf32>
    %882 = vector.shape_cast %881 : vector<1xf32> to vector<1x1xf32>
    %883 = arith.addf %774, %882 : vector<1x1xf32>
    %884 = arith.index_cast %c7_i32 : i32 to index
    %c0_307 = arith.constant 0 : index
    %c0_308 = arith.constant 0 : index
    %885 = vector.load %arg17[%884, %c0_307, %c0_308] : memref<8x8x32xf32, #tpu.memory_space<vmem>>, vector<1x8x32xf32>
    %886 = vector.shape_cast %885 : vector<1x8x32xf32> to vector<8x32xf32>
    %887 = vector.shape_cast %810 : vector<8x32xf32> to vector<1x8x32xf32>
    tpu.vector_store %arg17[%884, %c0_307, %c0_308], %887 {strides = array<i32>} : memref<8x8x32xf32, #tpu.memory_space<vmem>>, vector<1x8x32xf32>,
    %888 = arith.index_cast %c7_i32 : i32 to index
    %c0_309 = arith.constant 0 : index
    %c0_310 = arith.constant 0 : index
    %889 = vector.load %arg18[%888, %c0_309, %c0_310] : memref<8x8x32xf32, #tpu.memory_space<vmem>>, vector<1x8x32xf32>
    %890 = vector.shape_cast %889 : vector<1x8x32xf32> to vector<8x32xf32>
    %891 = vector.shape_cast %844 : vector<8x32xf32> to vector<1x8x32xf32>
    tpu.vector_store %arg18[%888, %c0_309, %c0_310], %891 {strides = array<i32>} : memref<8x8x32xf32, #tpu.memory_space<vmem>>, vector<1x8x32xf32>,
    %c8_i32 = arith.constant 8 : i32
    %cst_311 = arith.constant 1.562500e-02 : f32
    %892 = vector.broadcast %cst_311 : f32 to vector<1x1xf32>
    %893 = arith.mulf %883, %892 : vector<1x1xf32>
    %c0_312 = arith.constant 0 : index
    %c0_313 = arith.constant 0 : index
    %894 = vector.load %arg19[%c0_312, %c0_313] : memref<1x1xf32, #tpu.memory_space<vmem>>, vector<1x1xf32>
    tpu.vector_store %arg19[%c0_312, %c0_313], %893 {strides = array<i32>} : memref<1x1xf32, #tpu.memory_space<vmem>>, vector<1x1xf32>,
    return
  }
  func.func @transform_0(%arg0: i32) -> (i32, i32) {
    %c0_i32 = arith.constant 0 : i32
    %c0_i32_0 = arith.constant 0 : i32
    %c0_i32_1 = arith.constant 0 : i32
    return %c0_i32, %c0_i32_0 : i32, i32
  }
  func.func @transform_1(%arg0: i32) -> (i32, i32, i32) {
    %c0_i32 = arith.constant 0 : i32
    %c0_i32_0 = arith.constant 0 : i32
    %c0_i32_1 = arith.constant 0 : i32
    %c0_i32_2 = arith.constant 0 : i32
    return %c0_i32, %c0_i32_0, %c0_i32_1 : i32, i32, i32
  }
  func.func @transform_2(%arg0: i32) -> (i32, i32, i32) {
    %c0_i32 = arith.constant 0 : i32
    %c0_i32_0 = arith.constant 0 : i32
    %c0_i32_1 = arith.constant 0 : i32
    %c0_i32_2 = arith.constant 0 : i32
    return %c0_i32, %c0_i32_0, %c0_i32_1 : i32, i32, i32
  }
  func.func @transform_3(%arg0: i32) -> (i32, i32, i32) {
    %c0_i32 = arith.constant 0 : i32
    %c0_i32_0 = arith.constant 0 : i32
    %c0_i32_1 = arith.constant 0 : i32
    %c0_i32_2 = arith.constant 0 : i32
    return %c0_i32, %c0_i32_0, %c0_i32_1 : i32, i32, i32
  }
  func.func @transform_4(%arg0: i32) -> (i32, i32) {
    %c0_i32 = arith.constant 0 : i32
    %c0_i32_0 = arith.constant 0 : i32
    %c0_i32_1 = arith.constant 0 : i32
    return %c0_i32, %c0_i32_0 : i32, i32
  }
  func.func @transform_5(%arg0: i32) -> (i32, i32, i32) {
    %c0_i32 = arith.constant 0 : i32
    %c0_i32_0 = arith.constant 0 : i32
    %c0_i32_1 = arith.constant 0 : i32
    %c0_i32_2 = arith.constant 0 : i32
    return %c0_i32, %c0_i32_0, %c0_i32_1 : i32, i32, i32
  }
  func.func @transform_6(%arg0: i32) -> (i32, i32) {
    %c0_i32 = arith.constant 0 : i32
    %c0_i32_0 = arith.constant 0 : i32
    %c0_i32_1 = arith.constant 0 : i32
    return %c0_i32, %c0_i32_0 : i32, i32
  }
  func.func @transform_7(%arg0: i32) -> (i32, i32) {
    %c0_i32 = arith.constant 0 : i32
    %c0_i32_0 = arith.constant 0 : i32
    %c0_i32_1 = arith.constant 0 : i32
    return %c0_i32, %c0_i32_0 : i32, i32
  }
  func.func @transform_8(%arg0: i32) -> (i32, i32) {
    %c0_i32 = arith.constant 0 : i32
    %c0_i32_0 = arith.constant 0 : i32
    %c0_i32_1 = arith.constant 0 : i32
    return %c0_i32, %c0_i32_0 : i32, i32
  }
  func.func @transform_9(%arg0: i32) -> (i32, i32) {
    %c0_i32 = arith.constant 0 : i32
    %c0_i32_0 = arith.constant 0 : i32
    %c0_i32_1 = arith.constant 0 : i32
    return %c0_i32, %c0_i32_0 : i32, i32
  }
  func.func @transform_10(%arg0: i32) -> (i32, i32) {
    %c0_i32 = arith.constant 0 : i32
    %c0_i32_0 = arith.constant 0 : i32
    %c0_i32_1 = arith.constant 0 : i32
    return %c0_i32, %c0_i32_0 : i32, i32
  }
  func.func @transform_11(%arg0: i32) -> (i32, i32) {
    %c0_i32 = arith.constant 0 : i32
    %c0_i32_0 = arith.constant 0 : i32
    %c0_i32_1 = arith.constant 0 : i32
    return %c0_i32, %c0_i32_0 : i32, i32
  }
  func.func @transform_12(%arg0: i32) -> (i32, i32) {
    %c0_i32 = arith.constant 0 : i32
    %c0_i32_0 = arith.constant 0 : i32
    %c0_i32_1 = arith.constant 0 : i32
    return %c0_i32, %c0_i32_0 : i32, i32
  }
  func.func @transform_13(%arg0: i32) -> (i32, i32) {
    %c0_i32 = arith.constant 0 : i32
    %c0_i32_0 = arith.constant 0 : i32
    %c0_i32_1 = arith.constant 0 : i32
    return %c0_i32, %c0_i32_0 : i32, i32
  }
  func.func @transform_14(%arg0: i32) -> (i32, i32) {
    %c0_i32 = arith.constant 0 : i32
    %c0_i32_0 = arith.constant 0 : i32
    %c0_i32_1 = arith.constant 0 : i32
    return %c0_i32, %c0_i32_0 : i32, i32
  }
  func.func @transform_15(%arg0: i32) -> (i32, i32) {
    %c0_i32 = arith.constant 0 : i32
    %c0_i32_0 = arith.constant 0 : i32
    %c0_i32_1 = arith.constant 0 : i32
    return %c0_i32, %c0_i32_0 : i32, i32
  }
  func.func @transform_16(%arg0: i32) -> (i32, i32, i32) {
    %c0_i32 = arith.constant 0 : i32
    %c0_i32_0 = arith.constant 0 : i32
    %c0_i32_1 = arith.constant 0 : i32
    %c0_i32_2 = arith.constant 0 : i32
    return %c0_i32, %c0_i32_0, %c0_i32_1 : i32, i32, i32
  }
  func.func @transform_17(%arg0: i32) -> (i32, i32, i32) {
    %c0_i32 = arith.constant 0 : i32
    %c0_i32_0 = arith.constant 0 : i32
    %c0_i32_1 = arith.constant 0 : i32
    %c0_i32_2 = arith.constant 0 : i32
    return %c0_i32, %c0_i32_0, %c0_i32_1 : i32, i32, i32
  }
  func.func @transform_18(%arg0: i32) -> (i32, i32) {
    %c0_i32 = arith.constant 0 : i32
    %c0_i32_0 = arith.constant 0 : i32
    %c0_i32_1 = arith.constant 0 : i32
    return %c0_i32, %c0_i32_0 : i32, i32
  }
}

module attributes {stable_mosaic.version = 11 : i64} {
  func.func @_heads_kernel(%arg0: i32, %arg1: memref<64x32xf32, #tpu.memory_space<vmem>>, %arg2: memref<64x32xf32, #tpu.memory_space<vmem>>, %arg3: memref<32x96xf32, #tpu.memory_space<vmem>>, %arg4: memref<32x96xf32, #tpu.memory_space<vmem>>, %arg5: memref<1x96xf32, #tpu.memory_space<vmem>>, %arg6: memref<96x18xf32, #tpu.memory_space<vmem>>, %arg7: memref<1x18xf32, #tpu.memory_space<vmem>>, %arg8: memref<64x18xf32, #tpu.memory_space<vmem>>) attributes {dimension_semantics = [#tpu.dimension_semantics<parallel>], iteration_bounds = array<i64: 1>, scalar_prefetch = 0 : i64, scratch_operands = 0 : i64, tpu.core_type = #tpu.core_type<tc>, window_params = [{transform_indices = @transform_0, window_bounds = array<i64: 64, 32>}, {transform_indices = @transform_1, window_bounds = array<i64: 64, 32>}, {pipeline_mode = #tpu.pipeline_mode<synchronous>, transform_indices = @transform_2, window_bounds = array<i64: 32, 96>}, {pipeline_mode = #tpu.pipeline_mode<synchronous>, transform_indices = @transform_3, window_bounds = array<i64: 32, 96>}, {pipeline_mode = #tpu.pipeline_mode<synchronous>, transform_indices = @transform_4, window_bounds = array<i64: 1, 96>}, {pipeline_mode = #tpu.pipeline_mode<synchronous>, transform_indices = @transform_5, window_bounds = array<i64: 96, 18>}, {pipeline_mode = #tpu.pipeline_mode<synchronous>, transform_indices = @transform_6, window_bounds = array<i64: 1, 18>}, {transform_indices = @transform_7, window_bounds = array<i64: 64, 18>}]} {
    %c0 = arith.constant 0 : index
    %c0_0 = arith.constant 0 : index
    %0 = vector.load %arg1[%c0, %c0_0] : memref<64x32xf32, #tpu.memory_space<vmem>>, vector<64x32xf32>
    %c0_1 = arith.constant 0 : index
    %c0_2 = arith.constant 0 : index
    %1 = vector.load %arg3[%c0_1, %c0_2] : memref<32x96xf32, #tpu.memory_space<vmem>>, vector<32x96xf32>
    %cst = arith.constant dense<0.000000e+00> : vector<64x96xf32>
    %2 = tpu.matmul %0, %1, %cst {dimension_numbers = #tpu.dot_dimension_numbers<[1], [0], [0], [1], [0, 0, 1, 1], [], []>} : vector<64x32xf32>, vector<32x96xf32>, vector<64x96xf32> -> vector<64x96xf32>
    %c0_3 = arith.constant 0 : index
    %c0_4 = arith.constant 0 : index
    %3 = vector.load %arg2[%c0_3, %c0_4] : memref<64x32xf32, #tpu.memory_space<vmem>>, vector<64x32xf32>
    %c0_5 = arith.constant 0 : index
    %c0_6 = arith.constant 0 : index
    %4 = vector.load %arg4[%c0_5, %c0_6] : memref<32x96xf32, #tpu.memory_space<vmem>>, vector<32x96xf32>
    %cst_7 = arith.constant dense<0.000000e+00> : vector<64x96xf32>
    %5 = tpu.matmul %3, %4, %cst_7 {dimension_numbers = #tpu.dot_dimension_numbers<[1], [0], [0], [1], [0, 0, 1, 1], [], []>} : vector<64x32xf32>, vector<32x96xf32>, vector<64x96xf32> -> vector<64x96xf32>
    %6 = arith.addf %2, %5 : vector<64x96xf32>
    %c0_8 = arith.constant 0 : index
    %c0_9 = arith.constant 0 : index
    %7 = vector.load %arg5[%c0_8, %c0_9] : memref<1x96xf32, #tpu.memory_space<vmem>>, vector<1x96xf32>
    %8 = vector.broadcast %7 : vector<1x96xf32> to vector<64x96xf32>
    %9 = arith.addf %6, %8 : vector<64x96xf32>
    %cst_10 = arith.constant 0.000000e+00 : f32
    %10 = vector.broadcast %cst_10 : f32 to vector<64x96xf32>
    %11 = arith.maximumf %9, %10 : vector<64x96xf32>
    %c0_11 = arith.constant 0 : index
    %c0_12 = arith.constant 0 : index
    %12 = vector.load %arg6[%c0_11, %c0_12] : memref<96x18xf32, #tpu.memory_space<vmem>>, vector<96x18xf32>
    %cst_13 = arith.constant dense<0.000000e+00> : vector<64x18xf32>
    %13 = tpu.matmul %11, %12, %cst_13 {dimension_numbers = #tpu.dot_dimension_numbers<[1], [0], [0], [1], [0, 0, 1, 1], [], []>} : vector<64x96xf32>, vector<96x18xf32>, vector<64x18xf32> -> vector<64x18xf32>
    %c0_14 = arith.constant 0 : index
    %c0_15 = arith.constant 0 : index
    %14 = vector.load %arg7[%c0_14, %c0_15] : memref<1x18xf32, #tpu.memory_space<vmem>>, vector<1x18xf32>
    %15 = vector.broadcast %14 : vector<1x18xf32> to vector<64x18xf32>
    %16 = arith.addf %13, %15 : vector<64x18xf32>
    %17 = tpu.iota {dimensions = array<i32: 1>} : vector<64x18xi32>
    %c17_i32 = arith.constant 17 : i32
    %18 = vector.broadcast %c17_i32 : i32 to vector<64x18xi32>
    %19 = arith.cmpi eq, %17, %18 : vector<64x18xi32>
    %20 = arith.negf %16 : vector<64x18xf32>
    %21 = math.exp %20 : vector<64x18xf32>
    %cst_16 = arith.constant 1.000000e+00 : f32
    %22 = vector.broadcast %cst_16 : f32 to vector<64x18xf32>
    %23 = arith.addf %22, %21 : vector<64x18xf32>
    %24 = arith.divf %22, %23 : vector<64x18xf32>
    %25 = arith.select %19, %24, %16 : vector<64x18xi1>, vector<64x18xf32>
    %c0_17 = arith.constant 0 : index
    %c0_18 = arith.constant 0 : index
    %26 = vector.load %arg8[%c0_17, %c0_18] : memref<64x18xf32, #tpu.memory_space<vmem>>, vector<64x18xf32>
    tpu.vector_store %arg8[%c0_17, %c0_18], %25 {strides = array<i32>} : memref<64x18xf32, #tpu.memory_space<vmem>>, vector<64x18xf32>,
    return
  }
  func.func @transform_0(%arg0: i32) -> (i32, i32) {
    %c0_i32 = arith.constant 0 : i32
    %c0_i32_0 = arith.constant 0 : i32
    return %arg0, %c0_i32 : i32, i32
  }
  func.func @transform_1(%arg0: i32) -> (i32, i32) {
    %c0_i32 = arith.constant 0 : i32
    %c0_i32_0 = arith.constant 0 : i32
    return %arg0, %c0_i32 : i32, i32
  }
  func.func @transform_2(%arg0: i32) -> (i32, i32) {
    %c0_i32 = arith.constant 0 : i32
    %c0_i32_0 = arith.constant 0 : i32
    %c0_i32_1 = arith.constant 0 : i32
    return %c0_i32, %c0_i32_0 : i32, i32
  }
  func.func @transform_3(%arg0: i32) -> (i32, i32) {
    %c0_i32 = arith.constant 0 : i32
    %c0_i32_0 = arith.constant 0 : i32
    %c0_i32_1 = arith.constant 0 : i32
    return %c0_i32, %c0_i32_0 : i32, i32
  }
  func.func @transform_4(%arg0: i32) -> (i32, i32) {
    %c0_i32 = arith.constant 0 : i32
    %c0_i32_0 = arith.constant 0 : i32
    %c0_i32_1 = arith.constant 0 : i32
    return %c0_i32, %c0_i32_0 : i32, i32
  }
  func.func @transform_5(%arg0: i32) -> (i32, i32) {
    %c0_i32 = arith.constant 0 : i32
    %c0_i32_0 = arith.constant 0 : i32
    %c0_i32_1 = arith.constant 0 : i32
    return %c0_i32, %c0_i32_0 : i32, i32
  }
  func.func @transform_6(%arg0: i32) -> (i32, i32) {
    %c0_i32 = arith.constant 0 : i32
    %c0_i32_0 = arith.constant 0 : i32
    %c0_i32_1 = arith.constant 0 : i32
    return %c0_i32, %c0_i32_0 : i32, i32
  }
  func.func @transform_7(%arg0: i32) -> (i32, i32) {
    %c0_i32 = arith.constant 0 : i32
    %c0_i32_0 = arith.constant 0 : i32
    return %arg0, %c0_i32 : i32, i32
  }
}

</mosaic_0001>

<bundles_post_ra>
// kernel: world_model_forward.3
= control target key start
LH: loop header
LB: loop body
LE: loop exit
PB: predicated region body
PF: predicated region fallthrough
CT: control target
= control target key end

     0   :  { %vm34_vm0 = vcmask 130048   ;;  %vm327_vm1 = vcmask 261120   ;;  %s781_s0 = inlined_call_operand.vmem [shape: f32[64,16], index: 0, kind: input, shape index: {}]   ;;  %s782_s3 = inlined_call_operand.vmem [shape: f32[16,32], index: 3, kind: input, shape index: {}]   ;;  %s783_s5 = inlined_call_operand.vmem [shape: f32[32,32], index: 5, kind: input, shape index: {}]   ;;  %s784_s1 = inlined_call_operand.vmem [shape: f32[1,16], index: 1, kind: input, shape index: {}]   ;;  %s785_s2 = inlined_call_operand.vmem [shape: f32[1,16], index: 2, kind: input, shape index: {}]   ;;  %s786_s4 = inlined_call_operand.vmem [shape: f32[1,32], index: 4, kind: input, shape index: {}]   ;;  %s787_s6 = inlined_call_operand.vmem [shape: f32[1,32], index: 6, kind: input, shape index: {}]   ;;  %s788_s7 = inlined_call_operand.vmem [shape: f32[64,32], index: 7, kind: output, shape index: {}]  }
   0x1   :  { %v26_v0 = vld [vmem:[%s781_s0] sm:$0xff]  ;;  %v28_v1 = vld [vmem:[%s781_s0 + $0x10] sm:$0xff]  ;;  %v27_v2 = vld [vmem:[%s781_s0 + $0x8] sm:$0xff] }
   0x2   :  { %v35_v3 = vsel %vm34_vm0, %v26_v0, 0.0  ;;  %v41_v4 = vsel %vm34_vm0, %v28_v1, 0.0  ;;  %v29_v5 = vld [vmem:[%s781_s0 + $0x18] sm:$0xff]  ;;  %v38_v6 = vsel %vm34_vm0, %v27_v2, 0.0  ;;  %v30_v8 = vld [vmem:[%s781_s0 + $0x20] sm:$0xff]  ;;  %v31_v9 = vld [vmem:[%s781_s0 + $0x28] sm:$0xff] }
   0x3   :  { %36 = vadd.xlane.f32.xlu0 %v35_v3  ;;  %42 = vadd.xlane.f32.xlu1 %v41_v4  ;;  %v44_v7 = vsel %vm34_vm0, %v29_v5, 0.0  ;;  %v47_v10 = vsel %vm34_vm0, %v30_v8, 0.0  ;;  %v50_v11 = vsel %vm34_vm0, %v31_v9, 0.0  ;;  %v32_v12 = vld [vmem:[%s781_s0 + $0x30] sm:$0xff]  ;;  %v33_v13 = vld [vmem:[%s781_s0 + $0x38] sm:$0xff]  ;;  %v170_v56 = vld [vmem:[%s782_s3] sm:$0xff] }
   0x4   :  { %v53_v14 = vsel %vm34_vm0, %v32_v12, 0.0  ;;  %v56_v15 = vsel %vm34_vm0, %v33_v13, 0.0  ;;  %v171_v57 = vld [vmem:[%s782_s3 + $0x8] sm:$0xff]  ;;  %v316_v59 = vld [vmem:[%s783_s5] sm:$0xff] }
   0x5   :  { %v555_v58 = vpack.c.bf16 %v171_v57, %v170_v56  ;;  %v317_v60 = vld [vmem:[%s783_s5 + $0x8] sm:$0xff] }
   0x6   :  { %v559_v61 = vpack.c.bf16 %v317_v60, %v316_v59 }
   0x7   :  { %39 = vadd.xlane.f32.xlu0 %v38_v6  ;;  %45 = vadd.xlane.f32.xlu1 %v44_v7 }
   0x8   :  { %556 = vmatprep.subr.bf16.mxu0 %v555_v58  ;;  %560 = vmatprep.subr.bf16.mxu1 %v559_v61 }
   0x9   :  { %558 = vmatpush3.bf16.msra.mxu0 %v555_v58  ;;  %562 = vmatpush3.bf16.msra.mxu1 %v559_v61  ;;  %v319_v58 = vld [vmem:[%s783_s5 + $0x18] sm:$0xff] }
   0xb   :  { %48 = vadd.xlane.f32.xlu0 %v47_v10  ;;  %51 = vadd.xlane.f32.xlu1 %v50_v11 }
   0xf   :  { %54 = vadd.xlane.f32.xlu0 %v53_v14  ;;  %57 = vadd.xlane.f32.xlu1 %v56_v15 }
  0x90   :  { %v37_v16 = vpop.xlane.xlu0 %36  ;;  %v43_v17 = vpop.xlane.xlu1 %42 }
  0x91   :  { %v60_v18 = vmul.f32 0.0625, %v37_v16  ;;  %v62_v19 = vmul.f32 0.0625, %v43_v17 }
  0x93   :  { %v655_v20 = vsub.f32 %v26_v0, %v60_v18  ;;  %v657_v21 = vsub.f32 %v28_v1, %v62_v19 }
  0x94   :  { %v40_v22 = vpop.xlane.xlu0 %39  ;;  %v46_v23 = vpop.xlane.xlu1 %45 }
  0x95   :  { %v61_v24 = vmul.f32 0.0625, %v40_v22  ;;  %v63_v25 = vmul.f32 0.0625, %v46_v23  ;;  %v76_v26 = vmul.f32 %v655_v20, %v655_v20  ;;  %v78_v27 = vmul.f32 %v657_v21, %v657_v21  ;;  %v477_v22 = vld [vmem:[%s784_s1] ss:$0 sm:$0xff] }
  0x97   :  { %v663_v28 = vsub.f32 %v27_v2, %v61_v24  ;;  %v665_v29 = vsub.f32 %v29_v5, %v63_v25  ;;  %v84_v30 = vsel %vm34_vm0, %v76_v26, 0.0  ;;  %v90_v33 = vsel %vm34_vm0, %v78_v27, 0.0  ;;  %v478_v26 = vld [vmem:[%s785_s2] ss:$0 sm:$0xff] }
  0x98   :  { %85 = vadd.xlane.f32.xlu0 %v84_v30  ;;  %v49_v31 = vpop.xlane.xlu0 %48  ;;  %v52_v32 = vpop.xlane.xlu1 %51 }
  0x99   :  { %v64_v34 = vmul.f32 0.0625, %v49_v31  ;;  %v65_v35 = vmul.f32 0.0625, %v52_v32  ;;  %v77_v36 = vmul.f32 %v663_v28, %v663_v28  ;;  %v79_v37 = vmul.f32 %v665_v29, %v665_v29 }
  0x9b   :  { %v673_v38 = vsub.f32 %v30_v8, %v64_v34  ;;  %v675_v39 = vsub.f32 %v31_v9, %v65_v35  ;;  %v87_v40 = vsel %vm34_vm0, %v77_v36, 0.0  ;;  %v93_v43 = vsel %vm34_vm0, %v79_v37, 0.0 }
  0x9c   :  { %91 = vadd.xlane.f32.xlu0 %v90_v33  ;;  %88 = vadd.xlane.f32.xlu1 %v87_v40  ;;  %v55_v41 = vpop.xlane.xlu0 %54  ;;  %v58_v42 = vpop.xlane.xlu1 %57 }
  0x9d   :  { %v66_v44 = vmul.f32 0.0625, %v55_v41  ;;  %v67_v45 = vmul.f32 0.0625, %v58_v42  ;;  %v80_v46 = vmul.f32 %v673_v38, %v673_v38  ;;  %v81_v47 = vmul.f32 %v675_v39, %v675_v39 }
  0x9f   :  { %v683_v48 = vsub.f32 %v32_v12, %v66_v44  ;;  %v685_v49 = vsub.f32 %v33_v13, %v67_v45  ;;  %v96_v50 = vsel %vm34_vm0, %v80_v46, 0.0  ;;  %v99_v51 = vsel %vm34_vm0, %v81_v47, 0.0 }
  0xa0   :  { %94 = vadd.xlane.f32.xlu1 %v93_v43  ;;  %97 = vadd.xlane.f32.xlu0 %v96_v50 }
  0xa1   :  { %v82_v52 = vmul.f32 %v683_v48, %v683_v48  ;;  %v83_v53 = vmul.f32 %v685_v49, %v685_v49 }
  0xa3   :  { %v102_v54 = vsel %vm34_vm0, %v82_v52, 0.0  ;;  %v105_v55 = vsel %vm34_vm0, %v83_v53, 0.0 }
  0xa4   :  { %100 = vadd.xlane.f32.xlu1 %v99_v51  ;;  %103 = vadd.xlane.f32.xlu0 %v102_v54 }
  0xa8   :  { %106 = vadd.xlane.f32.xlu1 %v105_v55 }
 0x125   :  { %v86_v62 = vpop.xlane.xlu0 %85 }
 0x126   :  { %v108_v63 = vmul.f32 0.0625, %v86_v62 }
 0x128   :  { %v116_v0 = vadd.f32 1e-05, %v108_v63 }
 0x129   :  { %v89_v1 = vpop.xlane.xlu1 %88  ;;  %v92_v2 = vpop.xlane.xlu0 %91 }
 0x12a   :  { %567 = vrsqrt.f32 %v116_v0  ;;  %v109_v3 = vmul.f32 0.0625, %v89_v1  ;;  %v110_v4 = vmul.f32 0.0625, %v92_v2 }
 0x12c   :  { %v117_v5 = vadd.f32 1e-05, %v109_v3  ;;  %v118_v6 = vadd.f32 1e-05, %v110_v4 }
 0x12d   :  { %v95_v7 = vpop.xlane.xlu1 %94  ;;  %v98_v8 = vpop.xlane.xlu0 %97 }
 0x12e   :  { %569 = vrsqrt.f32 %v117_v5  ;;  %v111_v9 = vmul.f32 0.0625, %v95_v7  ;;  %v112_v10 = vmul.f32 0.0625, %v98_v8 }
 0x12f   :  { %571 = vrsqrt.f32 %v118_v6 }
 0x130   :  { %v119_v11 = vadd.f32 1e-05, %v111_v9  ;;  %v120_v12 = vadd.f32 1e-05, %v112_v10 }
 0x131   :  { %v101_v13 = vpop.xlane.xlu1 %100  ;;  %v104_v14 = vpop.xlane.xlu0 %103 }
 0x132   :  { %573 = vrsqrt.f32 %v119_v11  ;;  %v113_v15 = vmul.f32 0.0625, %v101_v13  ;;  %v114_v16 = vmul.f32 0.0625, %v104_v14 }
 0x133   :  { %575 = vrsqrt.f32 %v120_v12 }
 0x134   :  { %v568_v17 = vpop.eup %567  ;;  %v121_v18 = vadd.f32 1e-05, %v113_v15  ;;  %v122_v19 = vadd.f32 1e-05, %v114_v16 }
 0x135   :  { %v107_v23 = vpop.xlane.xlu1 %106  ;;  %v132_v24 = vmul.f32 %v568_v17, %v655_v20 }
 0x136   :  { %577 = vrsqrt.f32 %v121_v18  ;;  %v115_v25 = vmul.f32 0.0625, %v107_v23 }
 0x137   :  { %579 = vrsqrt.f32 %v122_v19  ;;  %v147_v27 = vmul.f32 %v477_v22, %v132_v24 }
 0x138   :  { %v570_v30 = vpop.eup %569  ;;  %v123_v31 = vadd.f32 1e-05, %v115_v25 }
 0x139   :  { %v572_v32 = vpop.eup %571  ;;  %v162_v33 = vadd.f32 %v478_v26, %v147_v27  ;;  %v133_v34 = vmul.f32 %v570_v30, %v663_v28 }
 0x13a   :  { %581 = vrsqrt.f32 %v123_v31  ;;  %v134_v35 = vmul.f32 %v572_v32, %v657_v21 }
 0x13b   :  { %523 = vmatprep.mubr.msk.f32.mxu0 %vm34_vm0, %v162_v33  ;;  %v148_v20 = vmul.f32 %v477_v22, %v133_v34 }
 0x13c   :  { %v574_v36 = vpop.eup %573  ;;  %v149_v37 = vmul.f32 %v477_v22, %v134_v35 }
 0x13d   :  { %v576_v40 = vpop.eup %575  ;;  %v163_v41 = vadd.f32 %v478_v26, %v148_v20  ;;  %v135_v42 = vmul.f32 %v574_v36, %v665_v29 }
 0x13e   :  { %v164_v43 = vadd.f32 %v478_v26, %v149_v37  ;;  %v136_v44 = vmul.f32 %v576_v40, %v673_v38 }
 0x13f   :  { %524 = vmatmul.mubr.msk.f32.vlgmr.msra.gmra.mrb[0].mxu0 %vm34_vm0, %v163_v41  ;;  %v150_v45 = vmul.f32 %v477_v22, %v135_v42 }
 0x140   :  { %v578_v46 = vpop.eup %577  ;;  %526 = vmatprep.mubr.msk.f32.mxu0 %vm34_vm0, %v164_v43  ;;  %v151_v28 = vmul.f32 %v477_v22, %v136_v44 }
 0x141   :  { %v580_v21 = vpop.eup %579  ;;  %v165_v47 = vadd.f32 %v478_v26, %v150_v45  ;;  %v137_v50 = vmul.f32 %v578_v46, %v675_v39 }
 0x142   :  { %v166_v51 = vadd.f32 %v478_v26, %v151_v28  ;;  %v138_v52 = vmul.f32 %v580_v21, %v683_v48  ;;  %v318_v48 = vld [vmem:[%s783_s5 + $0x10] sm:$0xff] }
 0x143   :  { %527 = vmatmul.mubr.msk.f32.gmra.mrb[2].mxu0 %vm34_vm0, %v165_v47  ;;  %v152_v29 = vmul.f32 %v477_v22, %v137_v50  ;;  %v563_v59 = vpack.c.bf16 %v319_v58, %v318_v48 }
 0x144   :  { %v582_v53 = vpop.eup %581  ;;  %529 = vmatprep.mubr.msk.f32.mxu0 %vm34_vm0, %v166_v51  ;;  %v153_v38 = vmul.f32 %v477_v22, %v138_v52 }
 0x145   :  { %v167_v54 = vadd.f32 %v478_v26, %v152_v29  ;;  %v139_v55 = vmul.f32 %v582_v53, %v685_v49  ;;  %564 = vmatprep.subr.bf16.mxu1 %v563_v59  ;;  %v479_v49 = vld [vmem:[%s786_s4] ss:$0 sm:$0xff] }
 0x146   :  { %v168_v56 = vadd.f32 %v478_v26, %v153_v38  ;;  %566 = vmatpush3.bf16.msra.mxu1 %v563_v59 }
 0x147   :  { %530 = vmatmul.mubr.msk.f32.gmra.mrb[4].mxu0 %vm34_vm0, %v167_v54  ;;  %v154_v57 = vmul.f32 %v477_v22, %v139_v55  ;;  %v488_v22 = vld [vmem:[%s787_s6] ss:$0 sm:$0xff] }
 0x148   :  { %532 = vmatprep.mubr.msk.f32.mxu0 %vm34_vm0, %v168_v56 }
 0x149   :  { %v169_v39 = vadd.f32 %v478_v26, %v154_v57 }
 0x14b   :  { %533 = vmatmul.mubr.msk.f32.gmra.mrb[6].mxu0 %vm34_vm0, %v169_v39 }
 0x212   :  { %v525_v60 = vpop.f32.mrb[0].mxu0 }
 0x213   :  { %v275_v61 = vadd.f32 %v525_v60, %v479_v49  ;;  %v269_v62 = vpop.f32.mrb[1].mxu0 }
 0x214   :  { %v270_v63 = vadd.f32 %v479_v49, %v269_v62 }
 0x215   :  { %v309_v2 = vmax.f32 %v275_v61, 0.0 }
 0x216   :  { %v308_v0 = vmax.f32 %v270_v63, 0.0  ;;  %v528_v1 = vpop.f32.mrb[2].mxu0 }
 0x217   :  { %v285_v3 = vadd.f32 %v528_v1, %v479_v49  ;;  %v279_v4 = vpop.f32.mrb[3].mxu0 }
 0x218   :  { %v280_v5 = vadd.f32 %v479_v49, %v279_v4  ;;  %543 = vmatprep.mubr.msk.f32.mxu1 %vm327_vm1, %v308_v0 }
 0x219   :  { %544 = vmatmul.mubr.msk.f32.vlgmr.msra.gmra.mrb[0].mxu1 %vm327_vm1, %v309_v2  ;;  %v311_v8 = vmax.f32 %v285_v3, 0.0 }
 0x21a   :  { %v310_v6 = vmax.f32 %v280_v5, 0.0  ;;  %v531_v7 = vpop.f32.mrb[4].mxu0 }
 0x21b   :  { %v295_v9 = vadd.f32 %v531_v7, %v479_v49  ;;  %v289_v10 = vpop.f32.mrb[5].mxu0 }
 0x21c   :  { %v290_v11 = vadd.f32 %v479_v49, %v289_v10  ;;  %546 = vmatprep.mubr.msk.f32.mxu1 %vm327_vm1, %v310_v6 }
 0x21d   :  { %547 = vmatmul.mubr.msk.f32.gmra.mrb[2].mxu1 %vm327_vm1, %v311_v8  ;;  %v313_v14 = vmax.f32 %v295_v9, 0.0 }
 0x21e   :  { %v312_v12 = vmax.f32 %v290_v11, 0.0  ;;  %v534_v13 = vpop.f32.mrb[6].mxu0 }
 0x21f   :  { %v305_v15 = vadd.f32 %v534_v13, %v479_v49  ;;  %v299_v16 = vpop.f32.mrb[7].mxu0 }
 0x220   :  { %v300_v17 = vadd.f32 %v479_v49, %v299_v16  ;;  %549 = vmatprep.mubr.msk.f32.mxu1 %vm327_vm1, %v312_v12 }
 0x221   :  { %550 = vmatmul.mubr.msk.f32.gmra.mrb[4].mxu1 %vm327_vm1, %v313_v14  ;;  %v315_v19 = vmax.f32 %v305_v15, 0.0 }
 0x222   :  { %v314_v18 = vmax.f32 %v300_v17, 0.0 }
 0x224   :  { %552 = vmatprep.mubr.msk.f32.mxu1 %vm327_vm1, %v314_v18 }
 0x225   :  { %553 = vmatmul.mubr.msk.f32.gmra.mrb[6].mxu1 %vm327_vm1, %v315_v19 }
 0x2ec   :  { %v545_v23 = vpop.f32.mrb[0].mxu1 }
 0x2ed   :  { %v424_v24 = vadd.f32 %v545_v23, %v488_v22  ;;  %v418_v25 = vpop.f32.mrb[1].mxu1 }
 0x2ee   :  { %v419_v26 = vadd.f32 %v488_v22, %v418_v25 }
 0x2ef   :  { %v458_v27 = vmax.f32 %v424_v24, 0.0 }
 0x2f0   :  { %v457_v30 = vmax.f32 %v419_v26, 0.0  ;;  %v548_v31 = vpop.f32.mrb[2].mxu1 }
 0x2f1   :  { %466 = vst.msk [vmem:[%s788_s7 + $0x8] sm:$0xff] %vm327_vm1, %v458_v27  ;;  %v434_v32 = vadd.f32 %v548_v31, %v488_v22  ;;  %v428_v33 = vpop.f32.mrb[3].mxu1 }
 0x2f2   :  { %465 = vst.msk [vmem:[%s788_s7] sm:$0xff] %vm327_vm1, %v457_v30  ;;  %v429_v34 = vadd.f32 %v488_v22, %v428_v33 }
 0x2f3   :  { %v460_v35 = vmax.f32 %v434_v32, 0.0 }
 0x2f4   :  { %v459_v20 = vmax.f32 %v429_v34, 0.0  ;;  %v551_v36 = vpop.f32.mrb[4].mxu1 }
 0x2f5   :  { %468 = vst.msk [vmem:[%s788_s7 + $0x18] sm:$0xff] %vm327_vm1, %v460_v35  ;;  %v444_v37 = vadd.f32 %v551_v36, %v488_v22  ;;  %v438_v40 = vpop.f32.mrb[5].mxu1 }
 0x2f6   :  { %467 = vst.msk [vmem:[%s788_s7 + $0x10] sm:$0xff] %vm327_vm1, %v459_v20  ;;  %v439_v41 = vadd.f32 %v488_v22, %v438_v40 }
 0x2f7   :  { %v462_v42 = vmax.f32 %v444_v37, 0.0 }
 0x2f8   :  { %v461_v43 = vmax.f32 %v439_v41, 0.0  ;;  %v554_v44 = vpop.f32.mrb[6].mxu1 }
 0x2f9   :  { %470 = vst.msk [vmem:[%s788_s7 + $0x28] sm:$0xff] %vm327_vm1, %v462_v42  ;;  %v454_v45 = vadd.f32 %v554_v44, %v488_v22  ;;  %v448_v46 = vpop.f32.mrb[7].mxu1 }
 0x2fa   :  { %469 = vst.msk [vmem:[%s788_s7 + $0x20] sm:$0xff] %vm327_vm1, %v461_v43  ;;  %v449_v28 = vadd.f32 %v488_v22, %v448_v46 }
 0x2fb   :  { %v464_v21 = vmax.f32 %v454_v45, 0.0 }
 0x2fc   :  { %v463_v47 = vmax.f32 %v449_v28, 0.0 }
 0x2fd   :  { %472 = vst.msk [vmem:[%s788_s7 + $0x38] sm:$0xff] %vm327_vm1, %v464_v21 }
 0x2fe   :  { %471 = vst.msk [vmem:[%s788_s7 + $0x30] sm:$0xff] %vm327_vm1, %v463_v47 }

// kernel: world_model_forward.5
= control target key start
LH: loop header
LB: loop body
LE: loop exit
PB: predicated region body
PF: predicated region fallthrough
CT: control target
= control target key end

     0   :  { %vm50_vm0 = vcmask 261120   ;;  %vm351_vm1 = vcmask 785408   ;;  %vm540_vm3 = vcmask 146432   ;;  %s1005_s3 = inlined_call_operand.vmem [shape: f32[32,96], index: 3, kind: input, shape index: {}]   ;;  %s1006_s1 = inlined_call_operand.vmem [shape: f32[64,32], index: 1, kind: input, shape index: {}]   ;;  %s1007_s2 = inlined_call_operand.vmem [shape: f32[32,96], index: 2, kind: input, shape index: {}]   ;;  %s1008_s5 = inlined_call_operand.vmem [shape: f32[96,18], index: 5, kind: input, shape index: {}]   ;;  %s1009_s0 = inlined_call_operand.vmem [shape: f32[64,32], index: 0, kind: input, shape index: {}]   ;;  %s1010_s4 = inlined_call_operand.vmem [shape: f32[1,96], index: 4, kind: input, shape index: {}]   ;;  %s1011_s6 = inlined_call_operand.vmem [shape: f32[1,18], index: 6, kind: input, shape index: {}]   ;;  %s1012_s7 = inlined_call_operand.vmem [shape: f32[64,18], index: 7, kind: output, shape index: {}]  }
   0x1   :  { %v46_v0 = vld [vmem:[%s1005_s3] sm:$0xff]  ;;  %v47_v1 = vld [vmem:[%s1005_s3 + $0x8] sm:$0xff]  ;;  %v48_v2 = vld [vmem:[%s1005_s3 + $0x10] sm:$0xff] }
   0x2   :  { %v707_v3 = vpack.c.bf16 %v47_v1, %v46_v0  ;;  %v49_v4 = vld [vmem:[%s1005_s3 + $0x18] sm:$0xff]  ;;  %v38_v5 = vld [vmem:[%s1006_s1] sm:$0xff]  ;;  %v35_v8 = vld [vmem:[%s1007_s2 + $0x8] sm:$0xff] }
   0x3   :  { %v711_v6 = vpack.c.bf16 %v49_v4, %v48_v2  ;;  %639 = vmatprep.mubr.msk.f32.mxu0 %vm50_vm0, %v38_v5  ;;  %v34_v7 = vld [vmem:[%s1007_s2] sm:$0xff]  ;;  %v36_v10 = vld [vmem:[%s1007_s2 + $0x10] sm:$0xff]  ;;  %v37_v11 = vld [vmem:[%s1007_s2 + $0x18] sm:$0xff] }
   0x4   :  { %708 = vmatprep.subr.bf16.mxu0 %v707_v3  ;;  %v715_v9 = vpack.c.bf16 %v35_v8, %v34_v7  ;;  %v39_v12 = vld [vmem:[%s1006_s1 + $0x8] sm:$0xff]  ;;  %v332_v13 = vld [vmem:[%s1008_s5] sm:$0xff]  ;;  %v334_v15 = vld [vmem:[%s1008_s5 + $0x10] sm:$0xff]  ;;  %v719_v17 = vpack.c.bf16 %v37_v11, %v36_v10 }
   0x5   :  { %710 = vmatpush3.bf16.msra.mxu0 %v707_v3  ;;  %v333_v14 = vld [vmem:[%s1008_s5 + $0x8] sm:$0xff]  ;;  %v40_v16 = vld [vmem:[%s1006_s1 + $0x10] sm:$0xff]  ;;  %v335_v19 = vld [vmem:[%s1008_s5 + $0x18] sm:$0xff] }
   0x6   :  { %712 = vmatprep.subr.bf16.mxu0 %v711_v6  ;;  %v723_v18 = vpack.c.bf16 %v333_v14, %v332_v13  ;;  %v727_v20 = vpack.c.bf16 %v335_v19, %v334_v15  ;;  %v336_v21 = vld [vmem:[%s1008_s5 + $0x20] sm:$0xff]  ;;  %v337_v22 = vld [vmem:[%s1008_s5 + $0x28] sm:$0xff]  ;;  %v41_v23 = vld [vmem:[%s1006_s1 + $0x18] sm:$0xff] }
   0x7   :  { %v42_v24 = vld [vmem:[%s1006_s1 + $0x20] sm:$0xff]  ;;  %v731_v25 = vpack.c.bf16 %v337_v22, %v336_v21  ;;  %v338_v26 = vld [vmem:[%s1008_s5 + $0x30] sm:$0xff]  ;;  %v339_v27 = vld [vmem:[%s1008_s5 + $0x38] sm:$0xff] }
   0x8   :  { %724 = vmatprep.subr.bf16.mxu1 %v723_v18  ;;  %v43_v28 = vld [vmem:[%s1006_s1 + $0x28] sm:$0xff]  ;;  %v44_v29 = vld [vmem:[%s1006_s1 + $0x30] sm:$0xff]  ;;  %v735_v30 = vpack.c.bf16 %v339_v27, %v338_v26  ;;  %v340_v31 = vld [vmem:[%s1008_s5 + $0x40] sm:$0xff] }
   0x9   :  { %714 = vmatpush3.bf16.msra.mxu0 %v711_v6  ;;  %726 = vmatpush3.bf16.msra.mxu1 %v723_v18  ;;  %v341_v32 = vld [vmem:[%s1008_s5 + $0x48] sm:$0xff]  ;;  %v45_v33 = vld [vmem:[%s1006_s1 + $0x38] sm:$0xff]  ;;  %v26_v34 = vld [vmem:[%s1009_s0] sm:$0xff] }
   0xa   :  { %716 = vmatprep.subr.bf16.mxu0 %v715_v9  ;;  %728 = vmatprep.subr.bf16.mxu1 %v727_v20  ;;  %v739_v35 = vpack.c.bf16 %v341_v32, %v340_v31  ;;  %v27_v36 = vld [vmem:[%s1009_s0 + $0x8] sm:$0xff]  ;;  %v28_v37 = vld [vmem:[%s1009_s0 + $0x10] sm:$0xff]  ;;  %v29_v38 = vld [vmem:[%s1009_s0 + $0x18] sm:$0xff] }
   0xb   :  { %v30_v39 = vld [vmem:[%s1009_s0 + $0x20] sm:$0xff]  ;;  %v31_v40 = vld [vmem:[%s1009_s0 + $0x28] sm:$0xff]  ;;  %v32_v41 = vld [vmem:[%s1009_s0 + $0x30] sm:$0xff] }
   0xc   :  { %640 = vmatmul.mubr.msk.f32.vlgmr.msra.gmra.mrb[0].mxu0 %vm50_vm0, %v39_v12  ;;  %v33_v42 = vld [vmem:[%s1009_s0 + $0x38] sm:$0xff]  ;;  %v342_v43 = vld [vmem:[%s1008_s5 + $0x50] sm:$0xff]  ;;  %v569_v46 = vld [vmem:[%s1010_s4] ss:$0 sm:$0xff] }
   0xd   :  { %718 = vmatpush3.bf16.msra.mxu0 %v715_v9  ;;  %642 = vmatprep.mubr.msk.f32.mxu0 %vm50_vm0, %v40_v16  ;;  %v343_v44 = vld [vmem:[%s1008_s5 + $0x58] sm:$0xff]  ;;  %v570_v7 = vld [vmem:[%s1011_s6] ss:$0 sm:$0xff] }
   0xe   :  { %720 = vmatprep.subr.bf16.mxu0 %v719_v17  ;;  %730 = vmatpush3.bf16.msra.mxu1 %v727_v20  ;;  %v743_v45 = vpack.c.bf16 %v343_v44, %v342_v43 }
   0xf   :  { %732 = vmatprep.subr.bf16.mxu1 %v731_v25 }
  0x10   :  { %643 = vmatmul.mubr.msk.f32.gmra.mrb[2].mxu0 %vm50_vm0, %v41_v23 }
  0x11   :  { %645 = vmatprep.mubr.msk.f32.mxu0 %vm50_vm0, %v42_v24  ;;  %722 = vmatpush3.bf16.msra.mxu0 %v719_v17 }
  0x12   :  { %734 = vmatpush3.bf16.msra.mxu1 %v731_v25 }
  0x13   :  { %736 = vmatprep.subr.bf16.mxu1 %v735_v30 }
  0x14   :  { %646 = vmatmul.mubr.msk.f32.gmra.mrb[4].mxu0 %vm50_vm0, %v43_v28 }
  0x15   :  { %648 = vmatprep.mubr.msk.f32.mxu0 %vm50_vm0, %v44_v29 }
  0x16   :  { %738 = vmatpush3.bf16.msra.mxu1 %v735_v30 }
  0x17   :  { %740 = vmatprep.subr.bf16.mxu1 %v739_v35 }
  0x18   :  { %649 = vmatmul.mubr.msk.f32.gmra.mrb[6].mxu0 %vm50_vm0, %v45_v33 }
  0x19   :  { %659 = vmatprep.mubr.msk.f32.mxu0 %vm50_vm0, %v26_v34 }
  0x1a   :  { %742 = vmatpush3.bf16.msra.mxu1 %v739_v35 }
  0x1b   :  { %744 = vmatprep.subr.bf16.mxu1 %v743_v45 }
  0x1c   :  { %660 = vmatmul.mubr.msk.f32.vlgmr.msra.gmra.mrb[0].mxu0 %vm50_vm0, %v27_v36  ;;  %v481_v36 = vlaneseq }
  0x1d   :  { %662 = vmatprep.mubr.msk.f32.mxu0 %vm50_vm0, %v28_v37 }
  0x1e   :  { %746 = vmatpush3.bf16.msra.mxu1 %v743_v45 }
  0x20   :  { %663 = vmatmul.mubr.msk.f32.gmra.mrb[2].mxu0 %vm50_vm0, %v29_v38 }
  0x21   :  { %665 = vmatprep.mubr.msk.f32.mxu0 %vm50_vm0, %v30_v39 }
  0x24   :  { %666 = vmatmul.mubr.msk.f32.gmra.mrb[4].mxu0 %vm50_vm0, %v31_v40 }
  0x25   :  { %668 = vmatprep.mubr.msk.f32.mxu0 %vm50_vm0, %v32_v41  ;;  %v482_v41 = vand.u32 127, %v481_v36 }
  0x27   :  { %vm483_vm2 = vcmp.eq.s32.totalorder %v482_v41, 17 }
  0x28   :  { %669 = vmatmul.mubr.msk.f32.gmra.mrb[6].mxu0 %vm50_vm0, %v33_v42 }
  0xef   :  { %v661_v47 = vpop.f32.mrb[0].mxu0 }
  0xf0   :  { %v317_v48 = vadd.f32 %v661_v47, %v569_v46  ;;  %v270_v49 = vpop.f32.mrb[1].mxu0 }
  0xf1   :  { %v316_v50 = vadd.f32 %v569_v46, %v270_v49 }
  0xf2   :  { %v325_v53 = vmax.f32 %v317_v48, 0.0 }
  0xf3   :  { %v324_v51 = vmax.f32 %v316_v50, 0.0  ;;  %v664_v52 = vpop.f32.mrb[2].mxu0 }
  0xf4   :  { %v319_v54 = vadd.f32 %v664_v52, %v569_v46  ;;  %v280_v55 = vpop.f32.mrb[3].mxu0 }
  0xf5   :  { %v318_v56 = vadd.f32 %v569_v46, %v280_v55  ;;  %695 = vmatprep.mubr.msk.f32.mxu1 %vm351_vm1, %v324_v51 }
  0xf6   :  { %696 = vmatmul.mubr.msk.f32.vlgmr.msra.gmra.mrb[0].mxu1 %vm351_vm1, %v325_v53  ;;  %v327_v59 = vmax.f32 %v319_v54, 0.0 }
  0xf7   :  { %v326_v57 = vmax.f32 %v318_v56, 0.0  ;;  %v667_v58 = vpop.f32.mrb[4].mxu0 }
  0xf8   :  { %v321_v60 = vadd.f32 %v667_v58, %v569_v46  ;;  %v290_v61 = vpop.f32.mrb[5].mxu0 }
  0xf9   :  { %v320_v62 = vadd.f32 %v569_v46, %v290_v61  ;;  %698 = vmatprep.mubr.msk.f32.mxu1 %vm351_vm1, %v326_v57 }
  0xfa   :  { %699 = vmatmul.mubr.msk.f32.gmra.mrb[2].mxu1 %vm351_vm1, %v327_v59  ;;  %v329_v1 = vmax.f32 %v321_v60, 0.0 }
  0xfb   :  { %v328_v63 = vmax.f32 %v320_v62, 0.0  ;;  %v670_v0 = vpop.f32.mrb[6].mxu0 }
  0xfc   :  { %v323_v2 = vadd.f32 %v670_v0, %v569_v46  ;;  %v300_v3 = vpop.f32.mrb[7].mxu0 }
  0xfd   :  { %v322_v4 = vadd.f32 %v569_v46, %v300_v3  ;;  %701 = vmatprep.mubr.msk.f32.mxu1 %vm351_vm1, %v328_v63 }
  0xfe   :  { %702 = vmatmul.mubr.msk.f32.gmra.mrb[4].mxu1 %vm351_vm1, %v329_v1  ;;  %v331_v6 = vmax.f32 %v323_v2, 0.0 }
  0xff   :  { %v330_v5 = vmax.f32 %v322_v4, 0.0 }
 0x101   :  { %704 = vmatprep.mubr.msk.f32.mxu1 %vm351_vm1, %v330_v5 }
 0x102   :  { %705 = vmatmul.mubr.msk.f32.gmra.mrb[6].mxu1 %vm351_vm1, %v331_v6 }
 0x1c9   :  { %v697_v8 = vpop.f32.mrb[0].mxu1 }
 0x1ca   :  { %v448_v9 = vadd.f32 %v697_v8, %v570_v7  ;;  %v442_v10 = vpop.f32.mrb[1].mxu1 }
 0x1cb   :  { %v443_v11 = vadd.f32 %v570_v7, %v442_v10 }
 0x1cc   :  { %v580_v12 = vmul.f32 -1.442695, %v448_v9 }
 0x1cd   :  { %v579_v13 = vmul.f32 -1.442695, %v443_v11  ;;  %v700_v14 = vpop.f32.mrb[2].mxu1 }
 0x1ce   :  { %755 = vpow2.f32 %v580_v12  ;;  %v458_v15 = vadd.f32 %v700_v14, %v570_v7  ;;  %v452_v16 = vpop.f32.mrb[3].mxu1 }
 0x1cf   :  { %757 = vpow2.f32 %v579_v13  ;;  %v453_v17 = vadd.f32 %v570_v7, %v452_v16 }
 0x1d0   :  { %v582_v18 = vmul.f32 -1.442695, %v458_v15 }
 0x1d1   :  { %v581_v19 = vmul.f32 -1.442695, %v453_v17  ;;  %v703_v20 = vpop.f32.mrb[4].mxu1 }
 0x1d2   :  { %759 = vpow2.f32 %v582_v18  ;;  %v468_v21 = vadd.f32 %v703_v20, %v570_v7  ;;  %v462_v22 = vpop.f32.mrb[5].mxu1 }
 0x1d3   :  { %761 = vpow2.f32 %v581_v19  ;;  %v463_v23 = vadd.f32 %v570_v7, %v462_v22 }
 0x1d4   :  { %v584_v24 = vmul.f32 -1.442695, %v468_v21 }
 0x1d5   :  { %v583_v25 = vmul.f32 -1.442695, %v463_v23  ;;  %v706_v26 = vpop.f32.mrb[6].mxu1 }
 0x1d6   :  { %763 = vpow2.f32 %v584_v24  ;;  %v478_v27 = vadd.f32 %v706_v26, %v570_v7  ;;  %v472_v28 = vpop.f32.mrb[7].mxu1 }
 0x1d7   :  { %765 = vpow2.f32 %v583_v25  ;;  %v473_v29 = vadd.f32 %v570_v7, %v472_v28 }
 0x1d8   :  { %v756_v30 = vpop.eup %755  ;;  %v586_v31 = vmul.f32 -1.442695, %v478_v27 }
 0x1d9   :  { %v758_v32 = vpop.eup %757  ;;  %v509_v33 = vadd.f32 1.0, %v756_v30  ;;  %v585_v34 = vmul.f32 -1.442695, %v473_v29 }
 0x1da   :  { %v508_v35 = vadd.f32 1.0, %v758_v32  ;;  %767 = vpow2.f32 %v586_v31 }
 0x1db   :  { %769 = vrcp.f32 %v509_v33 }
 0x1dc   :  { %v760_v37 = vpop.eup %759  ;;  %771 = vrcp.f32 %v508_v35 }
 0x1dd   :  { %v762_v38 = vpop.eup %761  ;;  %v511_v39 = vadd.f32 1.0, %v760_v37  ;;  %773 = vpow2.f32 %v585_v34 }
 0x1de   :  { %v510_v40 = vadd.f32 1.0, %v762_v38 }
 0x1df   :  { %775 = vrcp.f32 %v511_v39 }
 0x1e0   :  { %v764_v42 = vpop.eup %763  ;;  %777 = vrcp.f32 %v510_v40 }
 0x1e1   :  { %v766_v43 = vpop.eup %765  ;;  %v513_v44 = vadd.f32 1.0, %v764_v42 }
 0x1e2   :  { %v512_v45 = vadd.f32 1.0, %v766_v43 }
 0x1e3   :  { %779 = vrcp.f32 %v513_v44 }
 0x1e4   :  { %v768_v46 = vpop.eup %767  ;;  %781 = vrcp.f32 %v512_v45 }
 0x1e5   :  { %v770_v47 = vpop.eup %769  ;;  %v515_v48 = vadd.f32 1.0, %v768_v46 }
 0x1e6   :  { %v772_v49 = vpop.eup %771  ;;  %v533_v50 = vsel %vm483_vm2, %v770_v47, %v448_v9 }
 0x1e7   :  { %v774_v51 = vpop.eup %773  ;;  %542 = vst.msk [vmem:[%s1012_s7 + $0x8] sm:$0xff] %vm540_vm3, %v533_v50  ;;  %v532_v52 = vsel %vm483_vm2, %v772_v49, %v443_v11  ;;  %783 = vrcp.f32 %v515_v48 }
 0x1e8   :  { %541 = vst.msk [vmem:[%s1012_s7] sm:$0xff] %vm540_vm3, %v532_v52  ;;  %v514_v53 = vadd.f32 1.0, %v774_v51 }
 0x1e9   :  { %v776_v54 = vpop.eup %775 }
 0x1ea   :  { %v778_v55 = vpop.eup %777  ;;  %v535_v56 = vsel %vm483_vm2, %v776_v54, %v458_v15  ;;  %785 = vrcp.f32 %v514_v53 }
 0x1eb   :  { %544 = vst.msk [vmem:[%s1012_s7 + $0x18] sm:$0xff] %vm540_vm3, %v535_v56  ;;  %v534_v57 = vsel %vm483_vm2, %v778_v55, %v453_v17 }
 0x1ec   :  { %543 = vst.msk [vmem:[%s1012_s7 + $0x10] sm:$0xff] %vm540_vm3, %v534_v57 }
 0x1ed   :  { %v780_v58 = vpop.eup %779 }
 0x1ee   :  { %v782_v59 = vpop.eup %781  ;;  %v537_v60 = vsel %vm483_vm2, %v780_v58, %v468_v21 }
 0x1ef   :  { %546 = vst.msk [vmem:[%s1012_s7 + $0x28] sm:$0xff] %vm540_vm3, %v537_v60  ;;  %v536_v61 = vsel %vm483_vm2, %v782_v59, %v463_v23 }
 0x1f0   :  { %545 = vst.msk [vmem:[%s1012_s7 + $0x20] sm:$0xff] %vm540_vm3, %v536_v61 }
 0x1f1   :  { %v784_v62 = vpop.eup %783 }
 0x1f2   :  { %v539_v63 = vsel %vm483_vm2, %v784_v62, %v478_v27 }
 0x1f3   :  { %548 = vst.msk [vmem:[%s1012_s7 + $0x38] sm:$0xff] %vm540_vm3, %v539_v63 }
 0x1f4   :  { %v786_v0 = vpop.eup %785 }
 0x1f5   :  { %v538_v1 = vsel %vm483_vm2, %v786_v0, %v473_v29 }
 0x1f6   :  { %547 = vst.msk [vmem:[%s1012_s7 + $0x30] sm:$0xff] %vm540_vm3, %v538_v1 }

// kernel: world_model_forward.4
= control target key start
LH: loop header
LB: loop body
LE: loop exit
PB: predicated region body
PF: predicated region fallthrough
CT: control target
= control target key end

     0   :  { %s16366_s0 = inlined_call_operand.<no memory space> [shape: f32[1,1], index: 0, kind: input, shape index: {}]   ;;  %s16367_s1 = inlined_call_operand.vmem [shape: f32[8,8,32], index: 1, kind: input, shape index: {}]   ;;  %s16368_s2 = inlined_call_operand.vmem [shape: f32[8,8,6], index: 2, kind: input, shape index: {}]   ;;  %s16369_s3 = inlined_call_operand.vmem [shape: f32[8,8,32], index: 3, kind: input, shape index: {}]   ;;  %s16370_s4 = inlined_call_operand.vmem [shape: f32[32,32], index: 4, kind: input, shape index: {}]   ;;  %s16371_s5 = inlined_call_operand.vmem [shape: f32[3,32,32], index: 5, kind: input, shape index: {}]   ;;  %s16372_s6 = inlined_call_operand.vmem [shape: f32[32,32], index: 6, kind: input, shape index: {}]   ;;  %s16373_s7 = inlined_call_operand.vmem [shape: f32[32,32], index: 7, kind: input, shape index: {}]   ;;  %s16374_s8 = inlined_call_operand.vmem [shape: f32[1,32], index: 8, kind: input, shape index: {}]   ;;  %s16375_s9 = inlined_call_operand.vmem [shape: f32[32,96], index: 9, kind: input, shape index: {}]   ;;  %s16376_s10 = inlined_call_operand.vmem [shape: f32[6,96], index: 10, kind: input, shape index: {}]   ;;  %s16377_s11 = inlined_call_operand.vmem [shape: f32[1,96], index: 11, kind: input, shape index: {}]   ;;  %s16378_s12 = inlined_call_operand.vmem [shape: f32[32,96], index: 12, kind: input, shape index: {}]   ;;  %s16379_s13 = inlined_call_operand.vmem [shape: f32[1,96], index: 13, kind: input, shape index: {}]   ;;  %s16380_s14 = inlined_call_operand.vmem [shape: f32[32,32], index: 14, kind: input, shape index: {}]   ;;  %s16381_s15 = inlined_call_operand.vmem [shape: f32[1,32], index: 15, kind: input, shape index: {}]   ;;  %s16382_s16 = inlined_call_operand.vmem [shape: f32[8,8,32], index: 16, kind: output, shape index: {0}]   ;;  %s16383_s17 = inlined_call_operand.vmem [shape: f32[8,8,32], index: 17, kind: output, shape index: {1}]   ;;  %s16384_s18 = inlined_call_operand.hbm [shape: f32[1,1], index: 18, kind: output, shape index: {2}]  }
   0x1   :  { %16387 = sst [smem:[#allocation6_spill]] %s16366_s0 }
   0x2   :  { %16388 = sst [smem:[#allocation7_spill]] %s16367_s1  ;;  %s16390_s29 = sld [smem:[#allocation6_spill]] }
   0x3   :  { %16389 = sst [smem:[#allocation8_spill]] %s16368_s2 }
   0x8   :  { %v24_v0 = vstv %s16390_s29 }
   0x9   :  { %25 = vst [vmem:[#allocation2] sm:$0x1] %v24_v0 }
   0xa   :  { %v82_v1 = vld [vmem:[%s16373_s7] sm:$0xff]  ;;  %v83_v2 = vld [vmem:[%s16373_s7 + $0x8] sm:$0xff]  ;;  %v14629_v4 = vmov 0.0|0.0   ;;  %v84_v7 = vld [vmem:[%s16373_s7 + $0x10] sm:$0xff]  ;;  %vm14630_vm0 = vmmov 0   ;;  %v14631_v12 = vmov 0.0  }
   0xb   :  { %v78_v3 = vld [vmem:[%s16372_s6] sm:$0xff]  ;;  %13611 = vmatprep.subr.bf16.mxu0 %v14629_v4  ;;  %13617 = vmatprep.subr.bf16.mxu1 %v14629_v4  ;;  %v14745_v5 = vpack.c.bf16 %v83_v2, %v82_v1  ;;  %v79_v6 = vld [vmem:[%s16372_s6 + $0x8] sm:$0xff]  ;;  %v85_v8 = vld [vmem:[%s16373_s7 + $0x18] sm:$0xff]  ;;  %v14632_v14 = vmov 0  }
   0xc   :  { %v14756_v9 = vpack.c.bf16 %v79_v6, %v78_v3  ;;  %v80_v10 = vld [vmem:[%s16372_s6 + $0x10] sm:$0xff]  ;;  %v81_v11 = vld [vmem:[%s16372_s6 + $0x18] sm:$0xff]  ;;  %12083 = vmatprep.mubr.msk.f32.mxu0 %vm14630_vm0, %v14631_v12  ;;  %12094 = vmatprep.mubr.msk.f32.mxu1 %vm14630_vm0, %v14631_v12  ;;  %v14769_v13 = vpack.c.bf16 %v85_v8, %v84_v7 }
   0xd   :  { %13613 = vmatpush3.bf16.msra.mxu0 %v14745_v5  ;;  %14434 = vset.pattern.permute.xlu0 %v14632_v14 }
  0x10   :  { %v11175_v15 = vld [vmem:[#allocation2] ss:$0 sm:$0xff] }
  0x11   :  { %26 = vsyncpa [#allocation4], 0  ;;  %13619 = vmatpush3.bf16.msra.mxu1 %v14756_v9  ;;  %13614 = vmatprep.subr.bf16.mxu0 %v14629_v4  ;;  %v14773_v16 = vpack.c.bf16 %v81_v11, %v80_v10  ;;  %s16391_s0 = sld [smem:[#allocation7_spill]]  ;;  %vm106_vm1 = vcmask 261120   ;;  %v64_v18 = vld [vmem:[%s16371_s5] sm:$0xff]  ;;  %v65_v19 = vld [vmem:[%s16371_s5 + $0x8] sm:$0xff] }
  0x12   :  { %13620 = vmatprep.subr.bf16.mxu1 %v14629_v4  ;;  %267 = vperm.xlu0 %14434, %v11175_v15   ;;  %v14795_v20 = vpack.c.bf16 %v65_v19, %v64_v18  ;;  %v11165_v21 = vld [vmem:[%s16371_s5 + $0x20] sm:$0xff]  ;;  %v11166_v22 = vld [vmem:[%s16371_s5 + $0x28] sm:$0xff]  ;;  %v66_v24 = vld [vmem:[%s16371_s5 + $0x10] sm:$0xff]  ;;  %vm569_vm2 = vcmask 1045504   ;;  %s16392_s19 = sld [smem:[#allocation8_spill]]  ;;  %vm565_vm3 = vcmask 48128  }
  0x13   :  { %13616 = vmatpush3.bf16.msra.mxu0 %v14769_v13  ;;  %v14803_v23 = vpack.c.bf16 %v11166_v22, %v11165_v21  ;;  %v67_v25 = vld [vmem:[%s16371_s5 + $0x18] sm:$0xff]  ;;  %v11167_v27 = vld [vmem:[%s16371_s5 + $0x30] sm:$0xff]  ;;  %v14832_v31 = vld [vmem:[%s16374_s8] ss:$0 sm:$0xff]  ;;  %s14633_s24 = smov 64   ;;  %s14634_s1 = smov 96  }
  0x14   :  { %13623 = vmatprep.subr.bf16.mxu0 %v14629_v4  ;;  %v14814_v26 = vpack.c.bf16 %v67_v25, %v66_v24  ;;  %v11168_v28 = vld [vmem:[%s16371_s5 + $0x38] sm:$0xff]  ;;  %v105_v36 = vld [vmem:[%s16369_s3] sm:$0xff]  ;;  %v11170_v39 = vld [vmem:[%s16371_s5 + $0x48] sm:$0xff]  ;;  %vm11141_vm4 = vcmask 0  }
  0x15   :  { %13622 = vmatpush3.bf16.msra.mxu1 %v14773_v16  ;;  %v14823_v29 = vpack.c.bf16 %v11168_v28, %v11167_v27  ;;  %v11169_v38 = vld [vmem:[%s16371_s5 + $0x40] sm:$0xff]  ;;  %v11171_v44 = vld [vmem:[%s16371_s5 + $0x50] sm:$0xff]  ;;  %v11172_v45 = vld [vmem:[%s16371_s5 + $0x58] sm:$0xff] }
  0x16   :  { %13629 = vmatprep.subr.bf16.mxu1 %v14629_v4  ;;  %v14849_v42 = vpack.c.bf16 %v11170_v39, %v11169_v38  ;;  %v14861_v46 = vpack.c.bf16 %v11172_v45, %v11171_v44  ;;  %v60_v47 = vld [vmem:[%s16370_s4] sm:$0xff]  ;;  %v61_v48 = vld [vmem:[%s16370_s4 + $0x8] sm:$0xff]  ;;  %v62_v49 = vld [vmem:[%s16370_s4 + $0x10] sm:$0xff] }
  0x17   :  { %v103_v17 = vld [vmem:[%s16391_s0] sm:$0xff]  ;;  %v14882_v50 = vpack.c.bf16 %v61_v48, %v60_v47  ;;  %v63_v51 = vld [vmem:[%s16370_s4 + $0x18] sm:$0xff]  ;;  %v94_v54 = vld [vmem:[%s16378_s12 + $0x8] sm:$0xff] }
  0x18   :  { %12084 = vmatmul.mubr.msk.f32.vlgmr.msra.gmra.mrb[0].mxu0 %vm106_vm1, %v103_v17  ;;  %12095 = vmatmul.mubr.f32.vlgmr.msra.gmra.mrb[0].mxu1 %v14631_v12  ;;  %v14888_v52 = vpack.c.bf16 %v63_v51, %v62_v49  ;;  %v93_v53 = vld [vmem:[%s16378_s12] sm:$0xff]  ;;  %v95_v55 = vld [vmem:[%s16378_s12 + $0x10] sm:$0xff]  ;;  %v96_v57 = vld [vmem:[%s16378_s12 + $0x18] sm:$0xff] }
  0x19   :  { %12105 = vmatprep.mubr.msk.f32.mxu0 %vm14630_vm0, %v14631_v12  ;;  %12116 = vmatprep.mubr.msk.f32.mxu1 %vm14630_vm0, %v14631_v12  ;;  %v14902_v56 = vpack.c.bf16 %v94_v54, %v93_v53  ;;  %v14908_v58 = vpack.c.bf16 %v96_v57, %v95_v55  ;;  %v14926_v10 = vld [vmem:[%s16376_s10] sm:$0x3f]  ;;  %v88_v14 = vld [vmem:[%s16375_s9 + $0x8] sm:$0xff]  ;;  %v89_v18 = vld [vmem:[%s16375_s9 + $0x10] sm:$0xff] }
  0x1a   :  { %13625 = vmatpush3.bf16.msra.mxu0 %v14795_v20  ;;  %13631 = vmatpush3.bf16.msra.mxu1 %v14803_v23  ;;  %v87_v11 = vld [vmem:[%s16375_s9] sm:$0xff]  ;;  %v90_v19 = vld [vmem:[%s16375_s9 + $0x18] sm:$0xff] }
  0x1b   :  { %13626 = vmatprep.subr.bf16.mxu0 %v14629_v4  ;;  %13632 = vmatprep.subr.bf16.mxu1 %v14629_v4  ;;  %v104_v15 = vld [vmem:[%s16392_s19] sm:$0xff]  ;;  %v14939_v17 = vpack.c.bf16 %v88_v14, %v87_v11  ;;  %v14953_v21 = vpack.c.bf16 %v90_v19, %v89_v18 }
  0x1c   :  { %v14960_v22 = vld [vmem:[%s16379_s13] ss:$0 sm:$0xff] }
  0x1d   :  { %v98_v57 = vld [vmem:[%s16380_s14] sm:$0xff] }
  0x1e   :  { %13628 = vmatpush3.bf16.msra.mxu0 %v14814_v26  ;;  %13634 = vmatpush3.bf16.msra.mxu1 %v14823_v29  ;;  %v15021_v11 = vld [vmem:[%s16381_s15] ss:$0 sm:$0xff] }
  0x1f   :  { %13635 = vmatprep.subr.bf16.mxu0 %v14629_v4  ;;  %13641 = vmatprep.subr.bf16.mxu1 %v14629_v4 }
  0x91   :  { %v14846_v40 = vpop.permute.xlu0 %267 }
  0xeb   :  { %v176_v30 = vpop.f32.mrb[0].mxu0  ;;  %v249_v32 = vpop.f32.mrb[0].mxu1 }
  0xec   :  { %v12085_v33 = vpop.f32.mrb[1].mxu0  ;;  %v250_v34 = vadd.f32 %v249_v32, %v176_v30  ;;  %v12096_v35 = vpop.f32.mrb[1].mxu1 }
  0xee   :  { %v14838_v37 = vadd.f32 %v14832_v31, %v250_v34 }
  0xf0   :  { %v260_v41 = vadd.f32 %v14838_v37, %v105_v36  ;;  %v14974_v36 = vld [vmem:[%s16377_s11] ss:$0 sm:$0xff] }
  0xf2   :  { %v270_v43 = vmul.f32 %v14846_v40, %v260_v41 }
  0xf4   :  { %12106 = vmatmul.mubr.msk.f32.vlgmr.msra.gmra.mrb[2].mxu0 %vm106_vm1, %v270_v43  ;;  %12117 = vmatmul.mubr.msk.f32.vlgmr.msra.gmra.mrb[2].mxu1 %vm106_vm1, %v270_v43 }
  0xf5   :  { %13637 = vmatpush3.bf16.msra.mxu0 %v14849_v42  ;;  %12127 = vmatprep.mubr.msk.f32.mxu0 %vm14630_vm0, %v14631_v12 }
  0xf6   :  { %13638 = vmatprep.subr.bf16.mxu0 %v14629_v4  ;;  %12138 = vmatprep.mubr.msk.f32.mxu1 %vm14630_vm0, %v14631_v12 }
  0xf7   :  { %13643 = vmatpush3.bf16.msra.mxu1 %v14882_v50 }
  0xf8   :  { %13644 = vmatprep.subr.bf16.mxu1 %v14629_v4 }
  0xf9   :  { %13640 = vmatpush3.bf16.msra.mxu0 %v14861_v46 }
  0xfa   :  { %13653 = vmatprep.subr.bf16.mxu0 %v14629_v4 }
  0xfb   :  { %13646 = vmatpush3.bf16.msra.mxu1 %v14888_v52 }
  0xfc   :  { %12128 = vmatmul.mubr.msk.f32.vlgmr.msra.gmra.mrb[4].mxu0 %vm106_vm1, %v270_v43  ;;  %12141 = vmatprep.subr.mxu1 %v14631_v12 }
  0xfd   :  { %12165 = vmatprep.mubr.msk.f32.mxu0 %vm14630_vm0, %v14631_v12  ;;  %13655 = vmatpush3.bf16.msra.mxu0 %v14902_v56 }
  0xfe   :  { %13656 = vmatprep.subr.bf16.mxu0 %v14629_v4 }
 0x101   :  { %13658 = vmatpush3.bf16.msra.mxu0 %v14908_v58 }
 0x102   :  { %13665 = vmatprep.subr.bf16.mxu0 %v14629_v4 }
 0x104   :  { %12166 = vmatmul.mubr.f32.vlgmr.msra.gmra.mrb[6].mxu0 %v14631_v12 }
 0x105   :  { %13667 = vmatpush3.bf16.msra.mxu0 %v14795_v20  ;;  %12187 = vmatprep.mubr.msk.f32.mxu0 %vm14630_vm0, %v14631_v12 }
 0x106   :  { %13668 = vmatprep.subr.bf16.mxu0 %v14629_v4 }
 0x109   :  { %13670 = vmatpush3.bf16.msra.mxu0 %v14814_v26 }
 0x10a   :  { %13677 = vmatprep.subr.bf16.mxu0 %v14629_v4 }
 0x1c7   :  { %v340_v59 = vpop.f32.mrb[2].mxu0  ;;  %v411_v60 = vpop.f32.mrb[2].mxu1 }
 0x1c8   :  { %v344_v61 = vmax.f32 %v270_v43, %v340_v59  ;;  %v12107_v62 = vpop.f32.mrb[3].mxu0  ;;  %v12118_v63 = vpop.f32.mrb[3].mxu1  ;;  %v99_v59 = vld [vmem:[%s16380_s14 + $0x8] sm:$0xff] }
 0x1c9   :  { %v101_v62 = vld [vmem:[%s16380_s14 + $0x18] sm:$0xff] }
 0x1ca   :  { %v415_v0 = vmax.f32 %v344_v61, %v411_v60  ;;  %v100_v60 = vld [vmem:[%s16380_s14 + $0x10] sm:$0xff]  ;;  %v14987_v61 = vpack.c.bf16 %v99_v59, %v98_v57 }
 0x1cb   :  { %v14993_v63 = vpack.c.bf16 %v101_v62, %v100_v60 }
 0x1cf   :  { %v482_v1 = vpop.f32.mrb[4].mxu0 }
 0x1d0   :  { %v486_v2 = vmax.f32 %v415_v0, %v482_v1  ;;  %v12129_v3 = vpop.f32.mrb[5].mxu0 }
 0x1d2   :  { %v487_v6 = vsub.f32 %v270_v43, %v486_v2 }
 0x1d4   :  { %v488_v7 = vmul.f32 1.442695, %v487_v6 }
 0x1d6   :  { %14435 = vpow2.f32 %v488_v7 }
 0x1d7   :  { %v795_v24 = vpop.f32.mrb[6].mxu0 }
 0x1d8   :  { %v796_v25 = vadd.f32 %v14960_v22, %v795_v24  ;;  %v12167_v27 = vpop.f32.mrb[7].mxu0 }
 0x1da   :  { %807 = vrot.lane.b32.xlu0 %v796_v25, %s14633_s24 }
 0x1e0   :  { %v14436_v8 = vpop.eup %14435 }
 0x1e1   :  { %12139 = vmatmul.mubr.msk.f32.vlgmr.msra.gmra.mrb[4].mxu1 %vm106_vm1, %v14436_v8 }
 0x1e2   :  { %12143 = vmatprep.mubr.msk.f32.mxu1 %vm14630_vm0, %v14631_v12  ;;  %12142 = vmatpush3.msk.msra.mxu1 %vm569_vm2, %v14926_v10 }
 0x1e3   :  { %13647 = vmatprep.subr.bf16.mxu1 %v14629_v4 }
 0x1e5   :  { %12144 = vmatmul.mubr.msk.f32.vlgmr.msra.gmra.mrb[6].mxu1 %vm565_vm3, %v104_v15 }
 0x1e6   :  { %13649 = vmatpush3.bf16.msra.mxu1 %v14939_v17  ;;  %12154 = vmatprep.mubr.msk.f32.mxu1 %vm14630_vm0, %v14631_v12 }
 0x1e7   :  { %13650 = vmatprep.subr.bf16.mxu1 %v14629_v4 }
 0x1ea   :  { %13652 = vmatpush3.bf16.msra.mxu1 %v14953_v21 }
 0x1eb   :  { %13659 = vmatprep.subr.bf16.mxu1 %v14629_v4 }
 0x24c   :  { %v808_v49 = vpop.permute.xlu0 %807 }
 0x2b4   :  { %v559_v28 = vpop.f32.mrb[4].mxu1 }
 0x2b5   :  { %14437 = vrcp.f32 %v559_v28  ;;  %v12140_v30 = vpop.f32.mrb[5].mxu1 }
 0x2b8   :  { %v639_v34 = vpop.f32.mrb[6].mxu1 }
 0x2b9   :  { %v12145_v35 = vpop.f32.mrb[7].mxu1 }
 0x2bf   :  { %v14438_v32 = vpop.eup %14437 }
 0x2c0   :  { %v564_v33 = vmul.f32 %v14438_v32, %v14436_v8 }
 0x2c2   :  { %1512 = vst.msk [vmem:[%s16382_s16] sm:$0xff] %vm106_vm1, %v564_v33  ;;  %12155 = vmatmul.mubr.msk.f32.vlgmr.msra.gmra.mrb[8].mxu1 %vm106_vm1, %v564_v33 }
 0x2c3   :  { %12176 = vmatprep.mubr.msk.f32.mxu1 %vm14630_vm0, %v14631_v12  ;;  %13661 = vmatpush3.bf16.msra.mxu1 %v14987_v61 }
 0x2c4   :  { %13662 = vmatprep.subr.bf16.mxu1 %v14629_v4 }
 0x2c7   :  { %13664 = vmatpush3.bf16.msra.mxu1 %v14993_v63 }
 0x2c8   :  { %13671 = vmatprep.subr.bf16.mxu1 %v14629_v4 }
 0x395   :  { %v712_v38 = vpop.f32.mrb[8].mxu1 }
 0x396   :  { %v713_v39 = vadd.f32 %v712_v38, %v639_v34  ;;  %v12156_v41 = vpop.f32.mrb[9].mxu1 }
 0x398   :  { %v722_v43 = vadd.f32 %v14974_v36, %v713_v39 }
 0x39a   :  { %v799_v44 = vadd.f32 %v796_v25, %v722_v43 }
 0x39c   :  { %v11185_v45 = vmul.f32 -1.442695, %v799_v44 }
 0x39e   :  { %14439 = vpow2.f32 %v11185_v45 }
 0x3a8   :  { %v14440_v47 = vpop.eup %14439 }
 0x3a9   :  { %v803_v48 = vadd.f32 1.0, %v14440_v47  ;;  %v11197_v47 = vld [vmem:[%s16391_s0 + $0x8] sm:$0xff] }
 0x3ab   :  { %14441 = vrcp.f32 %v803_v48 }
 0x3b5   :  { %v14442_v51 = vpop.eup %14441 }
 0x3b6   :  { %v810_v53 = vmul.f32 %v14442_v51, %v808_v49  ;;  %v817_v1 = vsub.f32 1.0, %v14442_v51  ;;  %v823_v3 = vmul.f32 0.0, %v14442_v51 }
 0x3b8   :  { %812 = vrot.lane.b32.xlu1 %v810_v53, %s14633_s24 }
 0x42a   :  { %v813_v54 = vpop.permute.xlu1 %812 }
 0x42b   :  { %v815_v55 = vadd.f32 %v813_v54, %v722_v43 }
 0x42d   :  { %14443 = vtanh.f32 %v815_v55 }
 0x437   :  { %v14444_v0 = vpop.eup %14443 }
 0x438   :  { %819 = vrot.lane.b32.xlu1 %v14444_v0, %s14634_s1 }
 0x4aa   :  { %v820_v2 = vpop.permute.xlu1 %819 }
 0x4ab   :  { %v822_v6 = vmul.f32 %v820_v2, %v817_v1 }
 0x4ad   :  { %v14999_v7 = vadd.f32 %v823_v3, %v822_v6 }
 0x4af   :  { %832 = vrot.lane.b32.xlu0 %v14999_v7, %s14634_s1 }
 0x521   :  { %v15003_v8 = vpop.permute.xlu0 %832 }
 0x522   :  { %1514 = vst.msk [vmem:[%s16383_s17] sm:$0xff] %vm106_vm1, %v15003_v8  ;;  %12177 = vmatmul.mubr.msk.f32.vlgmr.msra.gmra.mrb[10].mxu1 %vm106_vm1, %v15003_v8 }
 0x523   :  { %13673 = vmatpush3.bf16.msra.mxu1 %v14803_v23  ;;  %12198 = vmatprep.mubr.msk.f32.mxu1 %vm14630_vm0, %v14631_v12 }
 0x524   :  { %13674 = vmatprep.subr.bf16.mxu1 %v14629_v4 }
 0x527   :  { %13676 = vmatpush3.bf16.msra.mxu1 %v14823_v29 }
 0x528   :  { %13683 = vmatprep.subr.bf16.mxu1 %v14629_v4 }
 0x5f5   :  { %v902_v14 = vpop.f32.mrb[10].mxu1 }
 0x5f6   :  { %v903_v15 = vadd.f32 %v15021_v11, %v902_v14  ;;  %v12178_v18 = vpop.f32.mrb[11].mxu1 }
 0x5f8   :  { %12188 = vmatmul.mubr.msk.f32.vlgmr.msra.gmra.mrb[8].mxu0 %vm106_vm1, %v903_v15  ;;  %12199 = vmatmul.mubr.msk.f32.vlgmr.msra.gmra.mrb[12].mxu1 %vm106_vm1, %v903_v15 }
 0x5f9   :  { %13679 = vmatpush3.bf16.msra.mxu0 %v14849_v42  ;;  %12209 = vmatprep.mubr.msk.f32.mxu0 %vm14630_vm0, %v14631_v12 }
 0x5fa   :  { %13680 = vmatprep.subr.bf16.mxu0 %v14629_v4  ;;  %13685 = vmatpush3.bf16.msra.mxu1 %v14882_v50 }
 0x5fb   :  { %13686 = vmatprep.subr.bf16.mxu1 %v14629_v4  ;;  %12220 = vmatprep.mubr.msk.f32.mxu1 %vm14630_vm0, %v14631_v12 }
 0x5fd   :  { %13682 = vmatpush3.bf16.msra.mxu0 %v14861_v46 }
 0x5fe   :  { %13689 = vmatprep.subr.bf16.mxu0 %v14629_v4  ;;  %13688 = vmatpush3.bf16.msra.mxu1 %v14888_v52 }
 0x5ff   :  { %13695 = vmatprep.subr.bf16.mxu1 %v14629_v4 }
 0x600   :  { %12210 = vmatmul.mubr.msk.f32.vlgmr.msra.gmra.mrb[10].mxu0 %vm106_vm1, %v903_v15 }
 0x601   :  { %13691 = vmatpush3.bf16.msra.mxu0 %v14795_v20  ;;  %12231 = vmatprep.mubr.msk.f32.mxu0 %vm14630_vm0, %v14631_v12 }
 0x602   :  { %13692 = vmatprep.subr.bf16.mxu0 %v14629_v4 }
 0x605   :  { %13694 = vmatpush3.bf16.msra.mxu0 %v14814_v26 }
 0x606   :  { %13701 = vmatprep.subr.bf16.mxu0 %v14629_v4 }
 0x608   :  { %12232 = vmatmul.mubr.msk.f32.vlgmr.msra.gmra.mrb[12].mxu0 %vm106_vm1, %v14838_v37 }
 0x609   :  { %13703 = vmatpush3.bf16.msra.mxu0 %v14849_v42  ;;  %12253 = vmatprep.mubr.msk.f32.mxu0 %vm14630_vm0, %v14631_v12 }
 0x60a   :  { %13704 = vmatprep.subr.bf16.mxu0 %v14629_v4 }
 0x60d   :  { %13706 = vmatpush3.bf16.msra.mxu0 %v14861_v46 }
 0x60e   :  { %13713 = vmatprep.subr.bf16.mxu0 %v14629_v4 }
 0x610   :  { %12254 = vmatmul.mubr.msk.f32.vlgmr.msra.gmra.mrb[14].mxu0 %vm106_vm1, %v14838_v37 }
 0x611   :  { %13715 = vmatpush3.bf16.msra.mxu0 %v14745_v5  ;;  %12275 = vmatprep.mubr.msk.f32.mxu0 %vm14630_vm0, %v14631_v12 }
 0x612   :  { %13716 = vmatprep.subr.bf16.mxu0 %v14629_v4 }
 0x615   :  { %13718 = vmatpush3.bf16.msra.mxu0 %v14769_v13 }
 0x616   :  { %13725 = vmatprep.subr.bf16.mxu0 %v14629_v4 }
 0x618   :  { %12276 = vmatmul.mubr.msk.f32.vlgmr.msra.gmra.mrb[16].mxu0 %vm106_vm1, %v11197_v47 }
 0x619   :  { %13727 = vmatpush3.bf16.msra.mxu0 %v14795_v20  ;;  %12297 = vmatprep.mubr.msk.f32.mxu0 %vm14630_vm0, %v14631_v12 }
 0x61a   :  { %13728 = vmatprep.subr.bf16.mxu0 %v14629_v4 }
 0x61d   :  { %13730 = vmatpush3.bf16.msra.mxu0 %v14814_v26 }
 0x61e   :  { %13737 = vmatprep.subr.bf16.mxu0 %v14629_v4 }
 0x6cb   :  { %v975_v19 = vpop.f32.mrb[8].mxu0  ;;  %v1046_v24 = vpop.f32.mrb[12].mxu1 }
 0x6cc   :  { %v979_v25 = vmax.f32 %v903_v15, %v975_v19  ;;  %v12189_v27 = vpop.f32.mrb[9].mxu0  ;;  %v12200_v28 = vpop.f32.mrb[13].mxu1  ;;  %v11199_v19 = vld [vmem:[%s16369_s3 + $0x8] sm:$0xff] }
 0x6ce   :  { %v1050_v30 = vmax.f32 %v979_v25, %v1046_v24 }
 0x6d3   :  { %v1117_v32 = vpop.f32.mrb[10].mxu0 }
 0x6d4   :  { %v1121_v33 = vmax.f32 %v1050_v30, %v1117_v32  ;;  %v12211_v34 = vpop.f32.mrb[11].mxu0 }
 0x6d6   :  { %v15061_v35 = vsub.f32 %v903_v15, %v1121_v33 }
 0x6d8   :  { %v1123_v38 = vmul.f32 1.442695, %v15061_v35 }
 0x6da   :  { %14445 = vpow2.f32 %v1123_v38 }
 0x6db   :  { %v1270_v39 = vpop.f32.mrb[12].mxu0 }
 0x6dc   :  { %v12233_v41 = vpop.f32.mrb[13].mxu0  ;;  %v1274_v51 = vmax.f32 %v14838_v37, %v1270_v39 }
 0x6e3   :  { %v1412_v43 = vpop.f32.mrb[14].mxu0 }
 0x6e4   :  { %v14446_v44 = vpop.eup %14445  ;;  %v12255_v45 = vpop.f32.mrb[15].mxu0 }
 0x6e5   :  { %12221 = vmatmul.mubr.msk.f32.vlgmr.msra.gmra.mrb[14].mxu1 %vm106_vm1, %v14446_v44 }
 0x6e6   :  { %13697 = vmatpush3.bf16.msra.mxu1 %v14803_v23  ;;  %12242 = vmatprep.mubr.msk.f32.mxu1 %vm14630_vm0, %v14631_v12 }
 0x6e7   :  { %13698 = vmatprep.subr.bf16.mxu1 %v14629_v4 }
 0x6ea   :  { %13700 = vmatpush3.bf16.msra.mxu1 %v14823_v29 }
 0x6eb   :  { %13707 = vmatprep.subr.bf16.mxu1 %v14629_v4 }
 0x6ed   :  { %12243 = vmatmul.mubr.msk.f32.vlgmr.msra.gmra.mrb[16].mxu1 %vm106_vm1, %v14838_v37 }
 0x6ee   :  { %13709 = vmatpush3.bf16.msra.mxu1 %v14882_v50  ;;  %12264 = vmatprep.mubr.msk.f32.mxu1 %vm14630_vm0, %v14631_v12 }
 0x6ef   :  { %13710 = vmatprep.subr.bf16.mxu1 %v14629_v4 }
 0x6f2   :  { %13712 = vmatpush3.bf16.msra.mxu1 %v14888_v52 }
 0x6f3   :  { %13719 = vmatprep.subr.bf16.mxu1 %v14629_v4 }
 0x7b8   :  { %v1194_v48 = vpop.f32.mrb[14].mxu1 }
 0x7b9   :  { %v12222_v49 = vpop.f32.mrb[15].mxu1 }
 0x7c0   :  { %v1341_v53 = vpop.f32.mrb[16].mxu1 }
 0x7c1   :  { %v1345_v54 = vmax.f32 %v1274_v51, %v1341_v53  ;;  %v12244_v55 = vpop.f32.mrb[17].mxu1 }
 0x7c3   :  { %v1416_v57 = vmax.f32 %v1345_v54, %v1412_v43 }
 0x7c5   :  { %v1417_v59 = vsub.f32 %v14838_v37, %v1416_v57  ;;  %v1590_v37 = vpop.f32.mrb[16].mxu0 }
 0x7c6   :  { %v12277_v0 = vpop.f32.mrb[17].mxu0 }
 0x7c7   :  { %v1418_v60 = vmul.f32 1.442695, %v1417_v59 }
 0x7c9   :  { %14447 = vpow2.f32 %v1418_v60 }
 0x7ca   :  { %14449 = vlog2.f32 %v1194_v48 }
 0x7d3   :  { %v14448_v62 = vpop.eup %14447 }
 0x7d4   :  { %12265 = vmatmul.mubr.msk.f32.vlgmr.msra.gmra.mrb[18].mxu1 %vm106_vm1, %v14448_v62  ;;  %v14450_v3 = vpop.eup %14449 }
 0x7d5   :  { %13721 = vmatpush3.bf16.msra.mxu1 %v14756_v9  ;;  %12286 = vmatprep.mubr.msk.f32.mxu1 %vm14630_vm0, %v14631_v12  ;;  %v1199_v18 = vmul.f32 0.6931472, %v14450_v3 }
 0x7d6   :  { %13722 = vmatprep.subr.bf16.mxu1 %v14629_v4 }
 0x7d7   :  { %v1200_v30 = vsub.f32 %v15061_v35, %v1199_v18 }
 0x7d9   :  { %13724 = vmatpush3.bf16.msra.mxu1 %v14773_v16 }
 0x7da   :  { %13731 = vmatprep.subr.bf16.mxu1 %v14629_v4 }
 0x7dc   :  { %12287 = vmatmul.mubr.msk.f32.vlgmr.msra.gmra.mrb[20].mxu1 %vm106_vm1, %v15003_v8 }
 0x7dd   :  { %13733 = vmatpush3.bf16.msra.mxu1 %v14803_v23  ;;  %12308 = vmatprep.mubr.msk.f32.mxu1 %vm14630_vm0, %v14631_v12 }
 0x7de   :  { %13734 = vmatprep.subr.bf16.mxu1 %v14629_v4 }
 0x7e1   :  { %13736 = vmatpush3.bf16.msra.mxu1 %v14823_v29 }
 0x7e2   :  { %13743 = vmatprep.subr.bf16.mxu1 %v14629_v4 }
 0x8a7   :  { %v1489_v1 = vpop.f32.mrb[18].mxu1 }
 0x8a8   :  { %14451 = vlog2.f32 %v1489_v1  ;;  %v12266_v2 = vpop.f32.mrb[19].mxu1 }
 0x8af   :  { %v1660_v6 = vpop.f32.mrb[20].mxu1 }
 0x8b0   :  { %v1661_v14 = vadd.f32 %v1660_v6, %v1590_v37  ;;  %v12288_v15 = vpop.f32.mrb[21].mxu1 }
 0x8b2   :  { %v14452_v24 = vpop.eup %14451  ;;  %v15110_v25 = vadd.f32 %v14832_v31, %v1661_v14 }
 0x8b3   :  { %v1494_v27 = vmul.f32 0.6931472, %v14452_v24 }
 0x8b4   :  { %v1665_v28 = vadd.f32 %v11199_v19, %v15110_v25 }
 0x8b5   :  { %v1495_v32 = vsub.f32 %v1417_v59, %v1494_v27  ;;  %v11198_v59 = vld [vmem:[%s16392_s19 + $0x8] sm:$0xff] }
 0x8b6   :  { %v1666_v33 = vmul.f32 %v1665_v28, %v14846_v40 }
 0x8b7   :  { %v1496_v34 = vmul.f32 1.442695, %v1495_v32  ;;  %v1498_v38 = vsub.f32 %v1495_v32, %v1200_v30 }
 0x8b8   :  { %12298 = vmatmul.mubr.msk.f32.vlgmr.msra.gmra.mrb[18].mxu0 %vm106_vm1, %v1666_v33  ;;  %12309 = vmatmul.mubr.msk.f32.vlgmr.msra.gmra.mrb[22].mxu1 %vm106_vm1, %v1666_v33 }
 0x8b9   :  { %14453 = vpow2.f32 %v1496_v34  ;;  %13739 = vmatpush3.bf16.msra.mxu0 %v14849_v42  ;;  %12319 = vmatprep.mubr.msk.f32.mxu0 %vm14630_vm0, %v14631_v12 }
 0x8ba   :  { %13740 = vmatprep.subr.bf16.mxu0 %v14629_v4  ;;  %13745 = vmatpush3.bf16.msra.mxu1 %v14882_v50 }
 0x8bb   :  { %13746 = vmatprep.subr.bf16.mxu1 %v14629_v4  ;;  %12330 = vmatprep.mubr.msk.f32.mxu1 %vm14630_vm0, %v14631_v12 }
 0x8bd   :  { %13742 = vmatpush3.bf16.msra.mxu0 %v14861_v46 }
 0x8be   :  { %13748 = vmatpush3.bf16.msra.mxu1 %v14888_v52  ;;  %12333 = vmatprep.subr.mxu0 %v14631_v12 }
 0x8bf   :  { %13755 = vmatprep.subr.bf16.mxu1 %v14629_v4 }
 0x8c0   :  { %12320 = vmatmul.mubr.msk.f32.vlgmr.msra.gmra.mrb[20].mxu0 %vm106_vm1, %v1666_v33 }
 0x8c1   :  { %12334 = vmatpush3.msk.msra.mxu0 %vm569_vm2, %v14926_v10  ;;  %12335 = vmatprep.mubr.msk.f32.mxu0 %vm14630_vm0, %v14631_v12 }
 0x8c2   :  { %13749 = vmatprep.subr.bf16.mxu0 %v14629_v4 }
 0x8c3   :  { %v14454_v35 = vpop.eup %14453 }
 0x8c4   :  { %v15135_v39 = vmul.f32 %v14454_v35, %v1498_v38  ;;  %12336 = vmatmul.mubr.msk.f32.vlgmr.msra.gmra.mrb[22].mxu0 %vm565_vm3, %v11198_v59 }
 0x8c5   :  { %13751 = vmatpush3.bf16.msra.mxu0 %v14939_v17  ;;  %12346 = vmatprep.mubr.msk.f32.mxu0 %vm14630_vm0, %v14631_v12 }
 0x8c6   :  { %13752 = vmatprep.subr.bf16.mxu0 %v14629_v4 }
 0x8c9   :  { %13754 = vmatpush3.bf16.msra.mxu0 %v14953_v21 }
 0x8ca   :  { %13761 = vmatprep.subr.bf16.mxu0 %v14629_v4 }
 0x98b   :  { %v1736_v41 = vpop.f32.mrb[18].mxu0  ;;  %v1807_v43 = vpop.f32.mrb[22].mxu1 }
 0x98c   :  { %v1740_v44 = vmax.f32 %v1666_v33, %v1736_v41  ;;  %v12299_v45 = vpop.f32.mrb[19].mxu0  ;;  %v12310_v47 = vpop.f32.mrb[23].mxu1 }
 0x98e   :  { %v1811_v48 = vmax.f32 %v1740_v44, %v1807_v43 }
 0x993   :  { %v1878_v49 = vpop.f32.mrb[20].mxu0 }
 0x994   :  { %v1882_v51 = vmax.f32 %v1811_v48, %v1878_v49  ;;  %v12321_v53 = vpop.f32.mrb[21].mxu0 }
 0x996   :  { %v1883_v54 = vsub.f32 %v1666_v33, %v1882_v51 }
 0x997   :  { %v2030_v3 = vpop.f32.mrb[22].mxu0 }
 0x998   :  { %v1884_v55 = vmul.f32 1.442695, %v1883_v54  ;;  %v12337_v6 = vpop.f32.mrb[23].mxu0 }
 0x99a   :  { %14455 = vpow2.f32 %v1884_v55 }
 0x9a4   :  { %v14456_v57 = vpop.eup %14455 }
 0x9a5   :  { %12331 = vmatmul.mubr.msk.f32.vlgmr.msra.gmra.mrb[24].mxu1 %vm106_vm1, %v14456_v57 }
 0x9a6   :  { %13757 = vmatpush3.bf16.msra.mxu1 %v14902_v56  ;;  %12357 = vmatprep.mubr.msk.f32.mxu1 %vm14630_vm0, %v14631_v12 }
 0x9a7   :  { %13758 = vmatprep.subr.bf16.mxu1 %v14629_v4 }
 0x9aa   :  { %13760 = vmatpush3.bf16.msra.mxu1 %v14908_v58 }
 0x9ab   :  { %13767 = vmatprep.subr.bf16.mxu1 %v14629_v4 }
 0x9ad   :  { %12358 = vmatmul.mubr.msk.f32.vlgmr.msra.gmra.mrb[26].mxu1 %vm106_vm1, %v15003_v8 }
 0x9ae   :  { %13769 = vmatpush3.bf16.msra.mxu1 %v14795_v20  ;;  %12379 = vmatprep.mubr.msk.f32.mxu1 %vm14630_vm0, %v14631_v12 }
 0x9af   :  { %13770 = vmatprep.subr.bf16.mxu1 %v14629_v4 }
 0x9b2   :  { %13772 = vmatpush3.bf16.msra.mxu1 %v14814_v26 }
 0x9b3   :  { %13779 = vmatprep.subr.bf16.mxu1 %v14629_v4 }
 0xa78   :  { %v1955_v8 = vpop.f32.mrb[24].mxu1 }
 0xa79   :  { %14457 = vrcp.f32 %v1955_v8  ;;  %v12332_v60 = vpop.f32.mrb[25].mxu1 }
 0xa80   :  { %v2174_v62 = vpop.f32.mrb[26].mxu1 }
 0xa81   :  { %v2175_v37 = vadd.f32 %v14960_v22, %v2174_v62  ;;  %v12359_v0 = vpop.f32.mrb[27].mxu1 }
 0xa83   :  { %v14458_v1 = vpop.eup %14457  ;;  %2186 = vrot.lane.b32.xlu1 %v2175_v37, %s14633_s24 }
 0xa84   :  { %v1960_v2 = vmul.f32 %v14458_v1, %v14456_v57 }
 0xa86   :  { %11221 = vst.msk [vmem:[%s16382_s16 + $0x8] sm:$0xff] %vm106_vm1, %v1960_v2  ;;  %12347 = vmatmul.mubr.msk.f32.vlgmr.msra.gmra.mrb[24].mxu0 %vm106_vm1, %v1960_v2 }
 0xa87   :  { %13763 = vmatpush3.bf16.msra.mxu0 %v14987_v61  ;;  %12368 = vmatprep.mubr.msk.f32.mxu0 %vm14630_vm0, %v14631_v12 }
 0xa88   :  { %13764 = vmatprep.subr.bf16.mxu0 %v14629_v4 }
 0xa8b   :  { %13766 = vmatpush3.bf16.msra.mxu0 %v14993_v63 }
 0xa8c   :  { %13773 = vmatprep.subr.bf16.mxu0 %v14629_v4 }
 0xaf5   :  { %v2187_v33 = vpop.permute.xlu1 %2186 }
 0xb59   :  { %v2103_v14 = vpop.f32.mrb[24].mxu0 }
 0xb5a   :  { %v2104_v15 = vadd.f32 %v2103_v14, %v2030_v3  ;;  %v12348_v18 = vpop.f32.mrb[25].mxu0 }
 0xb5c   :  { %v2107_v19 = vadd.f32 %v14974_v36, %v2104_v15 }
 0xb5e   :  { %v2178_v24 = vadd.f32 %v2175_v37, %v2107_v19 }
 0xb60   :  { %v11210_v27 = vmul.f32 -1.442695, %v2178_v24 }
 0xb62   :  { %14459 = vpow2.f32 %v11210_v27 }
 0xb6c   :  { %v14460_v28 = vpop.eup %14459 }
 0xb6d   :  { %v2182_v30 = vadd.f32 1.0, %v14460_v28 }
 0xb6f   :  { %14461 = vrcp.f32 %v2182_v30 }
 0xb79   :  { %v14462_v32 = vpop.eup %14461 }
 0xb7a   :  { %v2189_v34 = vmul.f32 %v14462_v32, %v2187_v33  ;;  %v2196_v43 = vsub.f32 1.0, %v14462_v32  ;;  %v2202_v45 = vmul.f32 %v14462_v32, %v14999_v7 }
 0xb7c   :  { %2191 = vrot.lane.b32.xlu0 %v2189_v34, %s14633_s24 }
 0xbee   :  { %v2192_v38 = vpop.permute.xlu0 %2191 }
 0xbef   :  { %v2194_v35 = vadd.f32 %v2192_v38, %v2107_v19  ;;  %v11223_v19 = vld [vmem:[%s16391_s0 + $0x10] sm:$0xff] }
 0xbf1   :  { %14463 = vtanh.f32 %v2194_v35 }
 0xbfb   :  { %v14464_v41 = vpop.eup %14463 }
 0xbfc   :  { %2198 = vrot.lane.b32.xlu1 %v14464_v41, %s14634_s1 }
 0xc6e   :  { %v2199_v44 = vpop.permute.xlu1 %2198 }
 0xc6f   :  { %v2201_v47 = vmul.f32 %v2199_v44, %v2196_v43 }
 0xc71   :  { %v15179_v48 = vadd.f32 %v2202_v45, %v2201_v47 }
 0xc73   :  { %2205 = vrot.lane.b32.xlu0 %v15179_v48, %s14634_s1 }
 0xce5   :  { %v15183_v49 = vpop.permute.xlu0 %2205 }
 0xce6   :  { %11222 = vst.msk [vmem:[%s16383_s17 + $0x8] sm:$0xff] %vm106_vm1, %v15183_v49  ;;  %12369 = vmatmul.mubr.msk.f32.vlgmr.msra.gmra.mrb[26].mxu0 %vm106_vm1, %v15183_v49 }
 0xce7   :  { %13775 = vmatpush3.bf16.msra.mxu0 %v14803_v23  ;;  %12390 = vmatprep.mubr.msk.f32.mxu0 %vm14630_vm0, %v14631_v12 }
 0xce8   :  { %13776 = vmatprep.subr.bf16.mxu0 %v14629_v4 }
 0xceb   :  { %13778 = vmatpush3.bf16.msra.mxu0 %v14823_v29 }
 0xcec   :  { %13785 = vmatprep.subr.bf16.mxu0 %v14629_v4 }
 0xdb9   :  { %v2275_v7 = vpop.f32.mrb[26].mxu0 }
 0xdba   :  { %v2276_v51 = vadd.f32 %v15021_v11, %v2275_v7  ;;  %v12370_v53 = vpop.f32.mrb[27].mxu0 }
 0xdbc   :  { %12380 = vmatmul.mubr.msk.f32.vlgmr.msra.gmra.mrb[28].mxu1 %vm106_vm1, %v2276_v51  ;;  %12391 = vmatmul.mubr.msk.f32.vlgmr.msra.gmra.mrb[28].mxu0 %vm106_vm1, %v2276_v51 }
 0xdbd   :  { %13781 = vmatpush3.bf16.msra.mxu1 %v14849_v42  ;;  %12401 = vmatprep.mubr.msk.f32.mxu1 %vm14630_vm0, %v14631_v12 }
 0xdbe   :  { %13782 = vmatprep.subr.bf16.mxu1 %v14629_v4  ;;  %13787 = vmatpush3.bf16.msra.mxu0 %v14882_v50 }
 0xdbf   :  { %13788 = vmatprep.subr.bf16.mxu0 %v14629_v4  ;;  %12412 = vmatprep.mubr.msk.f32.mxu0 %vm14630_vm0, %v14631_v12 }
 0xdc1   :  { %13784 = vmatpush3.bf16.msra.mxu1 %v14861_v46 }
 0xdc2   :  { %13791 = vmatprep.subr.bf16.mxu1 %v14629_v4  ;;  %13790 = vmatpush3.bf16.msra.mxu0 %v14888_v52 }
 0xdc3   :  { %13797 = vmatprep.subr.bf16.mxu0 %v14629_v4 }
 0xdc4   :  { %12402 = vmatmul.mubr.msk.f32.vlgmr.msra.gmra.mrb[30].mxu1 %vm106_vm1, %v2276_v51 }
 0xdc5   :  { %13793 = vmatpush3.bf16.msra.mxu1 %v14795_v20  ;;  %12423 = vmatprep.mubr.msk.f32.mxu1 %vm14630_vm0, %v14631_v12 }
 0xdc6   :  { %13794 = vmatprep.subr.bf16.mxu1 %v14629_v4 }
 0xdc9   :  { %13796 = vmatpush3.bf16.msra.mxu1 %v14814_v26 }
 0xdca   :  { %13803 = vmatprep.subr.bf16.mxu1 %v14629_v4 }
 0xdcc   :  { %12424 = vmatmul.mubr.msk.f32.vlgmr.msra.gmra.mrb[32].mxu1 %vm106_vm1, %v15110_v25 }
 0xdcd   :  { %13805 = vmatpush3.bf16.msra.mxu1 %v14849_v42  ;;  %12445 = vmatprep.mubr.msk.f32.mxu1 %vm14630_vm0, %v14631_v12 }
 0xdce   :  { %13806 = vmatprep.subr.bf16.mxu1 %v14629_v4 }
 0xdd1   :  { %13808 = vmatpush3.bf16.msra.mxu1 %v14861_v46 }
 0xdd2   :  { %13815 = vmatprep.subr.bf16.mxu1 %v14629_v4 }
 0xdd4   :  { %12446 = vmatmul.mubr.msk.f32.vlgmr.msra.gmra.mrb[34].mxu1 %vm106_vm1, %v15110_v25 }
 0xdd5   :  { %13817 = vmatpush3.bf16.msra.mxu1 %v14745_v5  ;;  %12467 = vmatprep.mubr.msk.f32.mxu1 %vm14630_vm0, %v14631_v12 }
 0xdd6   :  { %13818 = vmatprep.subr.bf16.mxu1 %v14629_v4 }
 0xdd9   :  { %13820 = vmatpush3.bf16.msra.mxu1 %v14769_v13 }
 0xdda   :  { %13827 = vmatprep.subr.bf16.mxu1 %v14629_v4 }
 0xddc   :  { %12468 = vmatmul.mubr.msk.f32.vlgmr.msra.gmra.mrb[36].mxu1 %vm106_vm1, %v11223_v19 }
 0xddd   :  { %13829 = vmatpush3.bf16.msra.mxu1 %v14795_v20  ;;  %12489 = vmatprep.mubr.msk.f32.mxu1 %vm14630_vm0, %v14631_v12 }
 0xdde   :  { %13830 = vmatprep.subr.bf16.mxu1 %v14629_v4 }
 0xde1   :  { %13832 = vmatpush3.bf16.msra.mxu1 %v14814_v26 }
 0xde2   :  { %13839 = vmatprep.subr.bf16.mxu1 %v14629_v4 }
 0xe8f   :  { %v2348_v54 = vpop.f32.mrb[28].mxu1  ;;  %v2419_v55 = vpop.f32.mrb[28].mxu0 }
 0xe90   :  { %v2352_v57 = vmax.f32 %v2276_v51, %v2348_v54  ;;  %v12381_v59 = vpop.f32.mrb[29].mxu1  ;;  %v12392_v8 = vpop.f32.mrb[29].mxu0 }
 0xe92   :  { %v2423_v60 = vmax.f32 %v2352_v57, %v2419_v55  ;;  %v11225_v55 = vld [vmem:[%s16369_s3 + $0x10] sm:$0xff] }
 0xe97   :  { %v2490_v62 = vpop.f32.mrb[30].mxu1 }
 0xe98   :  { %v2494_v37 = vmax.f32 %v2423_v60, %v2490_v62  ;;  %v12403_v0 = vpop.f32.mrb[31].mxu1 }
 0xe9a   :  { %v15236_v1 = vsub.f32 %v2276_v51, %v2494_v37 }
 0xe9c   :  { %v2496_v2 = vmul.f32 1.442695, %v15236_v1 }
 0xe9e   :  { %14465 = vpow2.f32 %v2496_v2 }
 0xe9f   :  { %v2643_v3 = vpop.f32.mrb[32].mxu1 }
 0xea0   :  { %v12425_v6 = vpop.f32.mrb[33].mxu1  ;;  %v2647_v28 = vmax.f32 %v15110_v25, %v2643_v3 }
 0xea7   :  { %v2785_v14 = vpop.f32.mrb[34].mxu1 }
 0xea8   :  { %v14466_v15 = vpop.eup %14465  ;;  %v12447_v18 = vpop.f32.mrb[35].mxu1 }
 0xea9   :  { %12413 = vmatmul.mubr.msk.f32.vlgmr.msra.gmra.mrb[30].mxu0 %vm106_vm1, %v14466_v15 }
 0xeaa   :  { %13799 = vmatpush3.bf16.msra.mxu0 %v14803_v23  ;;  %12434 = vmatprep.mubr.msk.f32.mxu0 %vm14630_vm0, %v14631_v12 }
 0xeab   :  { %13800 = vmatprep.subr.bf16.mxu0 %v14629_v4 }
 0xeae   :  { %13802 = vmatpush3.bf16.msra.mxu0 %v14823_v29 }
 0xeaf   :  { %13809 = vmatprep.subr.bf16.mxu0 %v14629_v4 }
 0xeb1   :  { %12435 = vmatmul.mubr.msk.f32.vlgmr.msra.gmra.mrb[32].mxu0 %vm106_vm1, %v15110_v25 }
 0xeb2   :  { %13811 = vmatpush3.bf16.msra.mxu0 %v14882_v50  ;;  %12456 = vmatprep.mubr.msk.f32.mxu0 %vm14630_vm0, %v14631_v12 }
 0xeb3   :  { %13812 = vmatprep.subr.bf16.mxu0 %v14629_v4 }
 0xeb6   :  { %13814 = vmatpush3.bf16.msra.mxu0 %v14888_v52 }
 0xeb7   :  { %13821 = vmatprep.subr.bf16.mxu0 %v14629_v4 }
 0xf7c   :  { %v2567_v24 = vpop.f32.mrb[30].mxu0 }
 0xf7d   :  { %v12414_v27 = vpop.f32.mrb[31].mxu0 }
 0xf84   :  { %v2714_v30 = vpop.f32.mrb[32].mxu0 }
 0xf85   :  { %v2718_v32 = vmax.f32 %v2647_v28, %v2714_v30  ;;  %v12436_v33 = vpop.f32.mrb[33].mxu0 }
 0xf87   :  { %v2789_v34 = vmax.f32 %v2718_v32, %v2785_v14 }
 0xf89   :  { %v2790_v38 = vsub.f32 %v15110_v25, %v2789_v34  ;;  %v2965_v25 = vpop.f32.mrb[36].mxu1  ;;  %v11224_v34 = vld [vmem:[%s16392_s19 + $0x10] sm:$0xff] }
 0xf8a   :  { %v12469_v43 = vpop.f32.mrb[37].mxu1 }
 0xf8b   :  { %v2791_v35 = vmul.f32 1.442695, %v2790_v38 }
 0xf8d   :  { %14467 = vpow2.f32 %v2791_v35 }
 0xf8e   :  { %14469 = vlog2.f32 %v2567_v24 }
 0xf97   :  { %v14468_v41 = vpop.eup %14467 }
 0xf98   :  { %12457 = vmatmul.mubr.msk.f32.vlgmr.msra.gmra.mrb[34].mxu0 %vm106_vm1, %v14468_v41  ;;  %v14470_v47 = vpop.eup %14469 }
 0xf99   :  { %13823 = vmatpush3.bf16.msra.mxu0 %v14756_v9  ;;  %12478 = vmatprep.mubr.msk.f32.mxu0 %vm14630_vm0, %v14631_v12  ;;  %v2572_v54 = vmul.f32 0.6931472, %v14470_v47 }
 0xf9a   :  { %13824 = vmatprep.subr.bf16.mxu0 %v14629_v4 }
 0xf9b   :  { %v2573_v62 = vsub.f32 %v15236_v1, %v2572_v54 }
 0xf9d   :  { %13826 = vmatpush3.bf16.msra.mxu0 %v14773_v16 }
 0xf9e   :  { %13833 = vmatprep.subr.bf16.mxu0 %v14629_v4 }
 0xfa0   :  { %12479 = vmatmul.mubr.msk.f32.vlgmr.msra.gmra.mrb[36].mxu0 %vm106_vm1, %v15183_v49 }
 0xfa1   :  { %13835 = vmatpush3.bf16.msra.mxu0 %v14803_v23  ;;  %12500 = vmatprep.mubr.msk.f32.mxu0 %vm14630_vm0, %v14631_v12 }
 0xfa2   :  { %13836 = vmatprep.subr.bf16.mxu0 %v14629_v4 }
 0xfa5   :  { %13838 = vmatpush3.bf16.msra.mxu0 %v14823_v29 }
 0xfa6   :  { %13845 = vmatprep.subr.bf16.mxu0 %v14629_v4 }
0x106b   :  { %v2862_v44 = vpop.f32.mrb[34].mxu0 }
0x106c   :  { %14471 = vlog2.f32 %v2862_v44  ;;  %v12458_v45 = vpop.f32.mrb[35].mxu0 }
0x1073   :  { %v3035_v7 = vpop.f32.mrb[36].mxu0 }
0x1074   :  { %v3036_v51 = vadd.f32 %v3035_v7, %v2965_v25  ;;  %v12480_v53 = vpop.f32.mrb[37].mxu0 }
0x1076   :  { %v14472_v57 = vpop.eup %14471  ;;  %v15285_v59 = vadd.f32 %v14832_v31, %v3036_v51 }
0x1077   :  { %v2867_v8 = vmul.f32 0.6931472, %v14472_v57 }
0x1078   :  { %v3040_v60 = vadd.f32 %v11225_v55, %v15285_v59 }
0x1079   :  { %v2868_v37 = vsub.f32 %v2790_v38, %v2867_v8 }
0x107a   :  { %v3041_v0 = vmul.f32 %v3040_v60, %v14846_v40 }
0x107b   :  { %v2869_v2 = vmul.f32 1.442695, %v2868_v37  ;;  %v2871_v3 = vsub.f32 %v2868_v37, %v2573_v62 }
0x107c   :  { %12490 = vmatmul.mubr.msk.f32.vlgmr.msra.gmra.mrb[38].mxu1 %vm106_vm1, %v3041_v0  ;;  %12501 = vmatmul.mubr.msk.f32.vlgmr.msra.gmra.mrb[38].mxu0 %vm106_vm1, %v3041_v0 }
0x107d   :  { %14473 = vpow2.f32 %v2869_v2  ;;  %13841 = vmatpush3.bf16.msra.mxu1 %v14849_v42  ;;  %12511 = vmatprep.mubr.msk.f32.mxu1 %vm14630_vm0, %v14631_v12 }
0x107e   :  { %13842 = vmatprep.subr.bf16.mxu1 %v14629_v4  ;;  %13847 = vmatpush3.bf16.msra.mxu0 %v14882_v50 }
0x107f   :  { %13848 = vmatprep.subr.bf16.mxu0 %v14629_v4  ;;  %12522 = vmatprep.mubr.msk.f32.mxu0 %vm14630_vm0, %v14631_v12 }
0x1081   :  { %13844 = vmatpush3.bf16.msra.mxu1 %v14861_v46 }
0x1082   :  { %13850 = vmatpush3.bf16.msra.mxu0 %v14888_v52  ;;  %12525 = vmatprep.subr.mxu1 %v14631_v12 }
0x1083   :  { %13857 = vmatprep.subr.bf16.mxu0 %v14629_v4 }
0x1084   :  { %12512 = vmatmul.mubr.msk.f32.vlgmr.msra.gmra.mrb[40].mxu1 %vm106_vm1, %v3041_v0 }
0x1085   :  { %12526 = vmatpush3.msk.msra.mxu1 %vm569_vm2, %v14926_v10  ;;  %12527 = vmatprep.mubr.msk.f32.mxu1 %vm14630_vm0, %v14631_v12 }
0x1086   :  { %13851 = vmatprep.subr.bf16.mxu1 %v14629_v4 }
0x1087   :  { %v14474_v31 = vpop.eup %14473 }
0x1088   :  { %v15310_v1 = vmul.f32 %v14474_v31, %v2871_v3  ;;  %12528 = vmatmul.mubr.msk.f32.vlgmr.msra.gmra.mrb[42].mxu1 %vm565_vm3, %v11224_v34 }
0x1089   :  { %13853 = vmatpush3.bf16.msra.mxu1 %v14939_v17  ;;  %12538 = vmatprep.mubr.msk.f32.mxu1 %vm14630_vm0, %v14631_v12 }
0x108a   :  { %13854 = vmatprep.subr.bf16.mxu1 %v14629_v4 }
0x108d   :  { %13856 = vmatpush3.bf16.msra.mxu1 %v14953_v21 }
0x108e   :  { %13863 = vmatprep.subr.bf16.mxu1 %v14629_v4 }
0x114f   :  { %v3111_v6 = vpop.f32.mrb[38].mxu1  ;;  %v3182_v14 = vpop.f32.mrb[38].mxu0 }
0x1150   :  { %v3115_v15 = vmax.f32 %v3041_v0, %v3111_v6  ;;  %v12491_v18 = vpop.f32.mrb[39].mxu1  ;;  %v12502_v19 = vpop.f32.mrb[39].mxu0 }
0x1152   :  { %v3186_v24 = vmax.f32 %v3115_v15, %v3182_v14 }
0x1157   :  { %v3253_v27 = vpop.f32.mrb[40].mxu1 }
0x1158   :  { %v3257_v28 = vmax.f32 %v3186_v24, %v3253_v27  ;;  %v12513_v30 = vpop.f32.mrb[41].mxu1 }
0x115a   :  { %v3258_v32 = vsub.f32 %v3041_v0, %v3257_v28 }
0x115c   :  { %v3259_v33 = vmul.f32 1.442695, %v3258_v32 }
0x115e   :  { %14475 = vpow2.f32 %v3259_v33 }
0x1168   :  { %v14476_v10 = vpop.eup %14475 }
0x1169   :  { %12523 = vmatmul.mubr.msk.f32.vlgmr.msra.gmra.mrb[40].mxu0 %vm106_vm1, %v14476_v10 }
0x116a   :  { %13859 = vmatpush3.bf16.msra.mxu0 %v14902_v56  ;;  %12549 = vmatprep.mubr.msk.f32.mxu0 %vm14630_vm0, %v14631_v12 }
0x116b   :  { %13860 = vmatprep.subr.bf16.mxu0 %v14629_v4 }
0x116e   :  { %13862 = vmatpush3.bf16.msra.mxu0 %v14908_v58 }
0x116f   :  { %13869 = vmatprep.subr.bf16.mxu0 %v14629_v4 }
0x1171   :  { %12550 = vmatmul.mubr.msk.f32.vlgmr.msra.gmra.mrb[42].mxu0 %vm106_vm1, %v15183_v49 }
0x1172   :  { %13871 = vmatpush3.bf16.msra.mxu0 %v14795_v20  ;;  %12571 = vmatprep.mubr.msk.f32.mxu0 %vm14630_vm0, %v14631_v12 }
0x1173   :  { %13872 = vmatprep.subr.bf16.mxu0 %v14629_v4 }
0x1176   :  { %13874 = vmatpush3.bf16.msra.mxu0 %v14814_v26 }
0x1177   :  { %13881 = vmatprep.subr.bf16.mxu0 %v14629_v4 }
0x123c   :  { %v3330_v49 = vpop.f32.mrb[40].mxu0 }
0x123d   :  { %14477 = vrcp.f32 %v3330_v49  ;;  %v12524_v38 = vpop.f32.mrb[41].mxu0 }
0x1244   :  { %v3549_v35 = vpop.f32.mrb[42].mxu0 }
0x1245   :  { %v3550_v41 = vadd.f32 %v14960_v22, %v3549_v35  ;;  %v12551_v25 = vpop.f32.mrb[43].mxu0  ;;  %v3405_v22 = vpop.f32.mrb[42].mxu1 }
0x1246   :  { %v12529_v45 = vpop.f32.mrb[43].mxu1 }
0x1247   :  { %v14478_v43 = vpop.eup %14477  ;;  %3561 = vrot.lane.b32.xlu1 %v3550_v41, %s14633_s24  ;;  %v11249_v45 = vld [vmem:[%s16391_s0 + $0x18] sm:$0xff] }
0x1248   :  { %v3335_v44 = vmul.f32 %v14478_v43, %v14476_v10 }
0x124a   :  { %11247 = vst.msk [vmem:[%s16382_s16 + $0x10] sm:$0xff] %vm106_vm1, %v3335_v44  ;;  %12539 = vmatmul.mubr.msk.f32.vlgmr.msra.gmra.mrb[44].mxu1 %vm106_vm1, %v3335_v44 }
0x124b   :  { %13865 = vmatpush3.bf16.msra.mxu1 %v14987_v61  ;;  %12560 = vmatprep.mubr.msk.f32.mxu1 %vm14630_vm0, %v14631_v12 }
0x124c   :  { %13866 = vmatprep.subr.bf16.mxu1 %v14629_v4 }
0x124f   :  { %13868 = vmatpush3.bf16.msra.mxu1 %v14993_v63 }
0x1250   :  { %13875 = vmatprep.subr.bf16.mxu1 %v14629_v4 }
0x12b9   :  { %v3562_v62 = vpop.permute.xlu1 %3561 }
0x131d   :  { %v3478_v47 = vpop.f32.mrb[44].mxu1 }
0x131e   :  { %v3479_v7 = vadd.f32 %v3478_v47, %v3405_v22  ;;  %v12540_v51 = vpop.f32.mrb[45].mxu1 }
0x1320   :  { %v3482_v53 = vadd.f32 %v14974_v36, %v3479_v7 }
0x1322   :  { %v3553_v54 = vadd.f32 %v3550_v41, %v3482_v53 }
0x1324   :  { %v11236_v55 = vmul.f32 -1.442695, %v3553_v54 }
0x1326   :  { %14479 = vpow2.f32 %v11236_v55 }
0x1330   :  { %v14480_v57 = vpop.eup %14479 }
0x1331   :  { %v3557_v8 = vadd.f32 1.0, %v14480_v57 }
0x1333   :  { %14481 = vrcp.f32 %v3557_v8 }
0x133d   :  { %v14482_v60 = vpop.eup %14481 }
0x133e   :  { %v3564_v37 = vmul.f32 %v14482_v60, %v3562_v62  ;;  %v3571_v31 = vsub.f32 1.0, %v14482_v60  ;;  %v3577_v36 = vmul.f32 %v14482_v60, %v15179_v48 }
0x1340   :  { %3566 = vrot.lane.b32.xlu0 %v3564_v37, %s14633_s24 }
0x13b2   :  { %v3567_v0 = vpop.permute.xlu0 %3566 }
0x13b3   :  { %v3569_v2 = vadd.f32 %v3567_v0, %v3482_v53 }
0x13b5   :  { %14483 = vtanh.f32 %v3569_v2 }
0x13bf   :  { %v14484_v3 = vpop.eup %14483 }
0x13c0   :  { %3573 = vrot.lane.b32.xlu1 %v14484_v3, %s14634_s1 }
0x1432   :  { %v3574_v6 = vpop.permute.xlu1 %3573 }
0x1433   :  { %v3576_v14 = vmul.f32 %v3574_v6, %v3571_v31 }
0x1435   :  { %v15354_v15 = vadd.f32 %v3577_v36, %v3576_v14 }
0x1437   :  { %3580 = vrot.lane.b32.xlu0 %v15354_v15, %s14634_s1 }
0x14a9   :  { %v15358_v18 = vpop.permute.xlu0 %3580 }
0x14aa   :  { %11248 = vst.msk [vmem:[%s16383_s17 + $0x10] sm:$0xff] %vm106_vm1, %v15358_v18  ;;  %12561 = vmatmul.mubr.msk.f32.vlgmr.msra.gmra.mrb[46].mxu1 %vm106_vm1, %v15358_v18 }
0x14ab   :  { %13877 = vmatpush3.bf16.msra.mxu1 %v14803_v23  ;;  %12582 = vmatprep.mubr.msk.f32.mxu1 %vm14630_vm0, %v14631_v12 }
0x14ac   :  { %13878 = vmatprep.subr.bf16.mxu1 %v14629_v4 }
0x14af   :  { %13880 = vmatpush3.bf16.msra.mxu1 %v14823_v29 }
0x14b0   :  { %13887 = vmatprep.subr.bf16.mxu1 %v14629_v4 }
0x157d   :  { %v3650_v48 = vpop.f32.mrb[46].mxu1 }
0x157e   :  { %v3651_v19 = vadd.f32 %v15021_v11, %v3650_v48  ;;  %v12562_v24 = vpop.f32.mrb[47].mxu1  ;;  %v11251_v48 = vld [vmem:[%s16369_s3 + $0x18] sm:$0xff] }
0x157f   :  { %v15462_v24 = vld [vmem:[%s16374_s8] ss:$0 sm:$0xff] }
0x1580   :  { %12572 = vmatmul.mubr.msk.f32.vlgmr.msra.gmra.mrb[44].mxu0 %vm106_vm1, %v3651_v19  ;;  %12583 = vmatmul.mubr.msk.f32.vlgmr.msra.gmra.mrb[48].mxu1 %vm106_vm1, %v3651_v19 }
0x1581   :  { %13883 = vmatpush3.bf16.msra.mxu0 %v14849_v42  ;;  %12593 = vmatprep.mubr.msk.f32.mxu0 %vm14630_vm0, %v14631_v12 }
0x1582   :  { %13884 = vmatprep.subr.bf16.mxu0 %v14629_v4  ;;  %13889 = vmatpush3.bf16.msra.mxu1 %v14882_v50 }
0x1583   :  { %13890 = vmatprep.subr.bf16.mxu1 %v14629_v4  ;;  %12604 = vmatprep.mubr.msk.f32.mxu1 %vm14630_vm0, %v14631_v12 }
0x1585   :  { %13886 = vmatpush3.bf16.msra.mxu0 %v14861_v46 }
0x1586   :  { %13893 = vmatprep.subr.bf16.mxu0 %v14629_v4  ;;  %13892 = vmatpush3.bf16.msra.mxu1 %v14888_v52 }
0x1587   :  { %13899 = vmatprep.subr.bf16.mxu1 %v14629_v4 }
0x1588   :  { %12594 = vmatmul.mubr.msk.f32.vlgmr.msra.gmra.mrb[46].mxu0 %vm106_vm1, %v3651_v19 }
0x1589   :  { %13895 = vmatpush3.bf16.msra.mxu0 %v14795_v20  ;;  %12615 = vmatprep.mubr.msk.f32.mxu0 %vm14630_vm0, %v14631_v12 }
0x158a   :  { %13896 = vmatprep.subr.bf16.mxu0 %v14629_v4 }
0x158d   :  { %13898 = vmatpush3.bf16.msra.mxu0 %v14814_v26 }
0x158e   :  { %13905 = vmatprep.subr.bf16.mxu0 %v14629_v4 }
0x1590   :  { %12616 = vmatmul.mubr.msk.f32.vlgmr.msra.gmra.mrb[48].mxu0 %vm106_vm1, %v15285_v59 }
0x1591   :  { %13907 = vmatpush3.bf16.msra.mxu0 %v14849_v42  ;;  %12637 = vmatprep.mubr.msk.f32.mxu0 %vm14630_vm0, %v14631_v12 }
0x1592   :  { %13908 = vmatprep.subr.bf16.mxu0 %v14629_v4 }
0x1595   :  { %13910 = vmatpush3.bf16.msra.mxu0 %v14861_v46 }
0x1596   :  { %13917 = vmatprep.subr.bf16.mxu0 %v14629_v4 }
0x1598   :  { %12638 = vmatmul.mubr.msk.f32.vlgmr.msra.gmra.mrb[50].mxu0 %vm106_vm1, %v15285_v59 }
0x1599   :  { %13919 = vmatpush3.bf16.msra.mxu0 %v14745_v5  ;;  %12659 = vmatprep.mubr.msk.f32.mxu0 %vm14630_vm0, %v14631_v12 }
0x159a   :  { %13920 = vmatprep.subr.bf16.mxu0 %v14629_v4 }
0x159d   :  { %13922 = vmatpush3.bf16.msra.mxu0 %v14769_v13 }
0x159e   :  { %13929 = vmatprep.subr.bf16.mxu0 %v14629_v4 }
0x15a0   :  { %12660 = vmatmul.mubr.msk.f32.vlgmr.msra.gmra.mrb[52].mxu0 %vm106_vm1, %v11249_v45 }
0x15a1   :  { %13931 = vmatpush3.bf16.msra.mxu0 %v14795_v20  ;;  %12681 = vmatprep.mubr.msk.f32.mxu0 %vm14630_vm0, %v14631_v12 }
0x15a2   :  { %13932 = vmatprep.subr.bf16.mxu0 %v14629_v4 }
0x15a5   :  { %13934 = vmatpush3.bf16.msra.mxu0 %v14814_v26 }
0x15a6   :  { %13941 = vmatprep.subr.bf16.mxu0 %v14629_v4 }
0x1653   :  { %v3723_v11 = vpop.f32.mrb[44].mxu0  ;;  %v3794_v27 = vpop.f32.mrb[48].mxu1 }
0x1654   :  { %v3727_v28 = vmax.f32 %v3651_v19, %v3723_v11  ;;  %v12573_v30 = vpop.f32.mrb[45].mxu0  ;;  %v12584_v32 = vpop.f32.mrb[49].mxu1 }
0x1656   :  { %v3798_v33 = vmax.f32 %v3727_v28, %v3794_v27 }
0x165b   :  { %v3865_v10 = vpop.f32.mrb[46].mxu0 }
0x165c   :  { %v3869_v34 = vmax.f32 %v3798_v33, %v3865_v10  ;;  %v12595_v49 = vpop.f32.mrb[47].mxu0 }
0x165d   :  { %v15488_v49 = vld [vmem:[%s16376_s10] sm:$0x3f] }
0x165e   :  { %v15411_v38 = vsub.f32 %v3651_v19, %v3869_v34 }
0x1660   :  { %v3871_v35 = vmul.f32 1.442695, %v15411_v38 }
0x1662   :  { %14485 = vpow2.f32 %v3871_v35 }
0x1663   :  { %v4018_v41 = vpop.f32.mrb[48].mxu0 }
0x1664   :  { %v12617_v25 = vpop.f32.mrb[49].mxu0  ;;  %v4022_v51 = vmax.f32 %v15285_v59, %v4018_v41 }
0x166b   :  { %v4160_v43 = vpop.f32.mrb[50].mxu0 }
0x166c   :  { %v14486_v44 = vpop.eup %14485  ;;  %v12639_v22 = vpop.f32.mrb[51].mxu0 }
0x166d   :  { %12605 = vmatmul.mubr.msk.f32.vlgmr.msra.gmra.mrb[50].mxu1 %vm106_vm1, %v14486_v44 }
0x166e   :  { %13901 = vmatpush3.bf16.msra.mxu1 %v14803_v23  ;;  %12626 = vmatprep.mubr.msk.f32.mxu1 %vm14630_vm0, %v14631_v12 }
0x166f   :  { %13902 = vmatprep.subr.bf16.mxu1 %v14629_v4 }
0x1672   :  { %13904 = vmatpush3.bf16.msra.mxu1 %v14823_v29 }
0x1673   :  { %13911 = vmatprep.subr.bf16.mxu1 %v14629_v4 }
0x1675   :  { %12627 = vmatmul.mubr.msk.f32.vlgmr.msra.gmra.mrb[52].mxu1 %vm106_vm1, %v15285_v59 }
0x1676   :  { %13913 = vmatpush3.bf16.msra.mxu1 %v14882_v50  ;;  %12648 = vmatprep.mubr.msk.f32.mxu1 %vm14630_vm0, %v14631_v12 }
0x1677   :  { %13914 = vmatprep.subr.bf16.mxu1 %v14629_v4 }
0x167a   :  { %13916 = vmatpush3.bf16.msra.mxu1 %v14888_v52 }
0x167b   :  { %13923 = vmatprep.subr.bf16.mxu1 %v14629_v4 }
0x1740   :  { %v3942_v47 = vpop.f32.mrb[50].mxu1 }
0x1741   :  { %v12606_v7 = vpop.f32.mrb[51].mxu1 }
0x1748   :  { %v4089_v53 = vpop.f32.mrb[52].mxu1 }
0x1749   :  { %v4093_v54 = vmax.f32 %v4022_v51, %v4089_v53  ;;  %v12628_v55 = vpop.f32.mrb[53].mxu1 }
0x174b   :  { %v4164_v57 = vmax.f32 %v4093_v54, %v4160_v43 }
0x174d   :  { %v4165_v8 = vsub.f32 %v15285_v59, %v4164_v57  ;;  %v4340_v59 = vpop.f32.mrb[52].mxu0  ;;  %v11250_v57 = vld [vmem:[%s16392_s19 + $0x18] sm:$0xff] }
0x174e   :  { %v12661_v37 = vpop.f32.mrb[53].mxu0 }
0x174f   :  { %v4166_v60 = vmul.f32 1.442695, %v4165_v8 }
0x1751   :  { %14487 = vpow2.f32 %v4166_v60 }
0x1752   :  { %14489 = vlog2.f32 %v3942_v47 }
0x175b   :  { %v14488_v62 = vpop.eup %14487 }
0x175c   :  { %12649 = vmatmul.mubr.msk.f32.vlgmr.msra.gmra.mrb[54].mxu1 %vm106_vm1, %v14488_v62  ;;  %v14490_v3 = vpop.eup %14489  ;;  %v15525_v62 = vld [vmem:[%s16379_s13] ss:$0 sm:$0xff] }
0x175d   :  { %13925 = vmatpush3.bf16.msra.mxu1 %v14756_v9  ;;  %12670 = vmatprep.mubr.msk.f32.mxu1 %vm14630_vm0, %v14631_v12  ;;  %v3947_v14 = vmul.f32 0.6931472, %v14490_v3 }
0x175e   :  { %13926 = vmatprep.subr.bf16.mxu1 %v14629_v4 }
0x175f   :  { %v3948_v30 = vsub.f32 %v15411_v38, %v3947_v14 }
0x1761   :  { %13928 = vmatpush3.bf16.msra.mxu1 %v14773_v16 }
0x1762   :  { %13935 = vmatprep.subr.bf16.mxu1 %v14629_v4 }
0x1764   :  { %12671 = vmatmul.mubr.msk.f32.vlgmr.msra.gmra.mrb[56].mxu1 %vm106_vm1, %v15358_v18 }
0x1765   :  { %13937 = vmatpush3.bf16.msra.mxu1 %v14803_v23  ;;  %12692 = vmatprep.mubr.msk.f32.mxu1 %vm14630_vm0, %v14631_v12 }
0x1766   :  { %13938 = vmatprep.subr.bf16.mxu1 %v14629_v4 }
0x1769   :  { %13940 = vmatpush3.bf16.msra.mxu1 %v14823_v29 }
0x176a   :  { %13947 = vmatprep.subr.bf16.mxu1 %v14629_v4 }
0x182f   :  { %v4237_v0 = vpop.f32.mrb[54].mxu1 }
0x1830   :  { %14491 = vlog2.f32 %v4237_v0  ;;  %v12650_v2 = vpop.f32.mrb[55].mxu1 }
0x1837   :  { %v4410_v31 = vpop.f32.mrb[56].mxu1 }
0x1838   :  { %v4411_v6 = vadd.f32 %v4410_v31, %v4340_v59  ;;  %v12672_v36 = vpop.f32.mrb[57].mxu1 }
0x183a   :  { %v14492_v19 = vpop.eup %14491  ;;  %v15465_v11 = vadd.f32 %v15462_v24, %v4411_v6 }
0x183b   :  { %v4242_v27 = vmul.f32 0.6931472, %v14492_v19 }
0x183c   :  { %v4415_v28 = vadd.f32 %v11251_v48, %v15465_v11  ;;  %v15543_v48 = vld [vmem:[%s16377_s11] ss:$0 sm:$0xff] }
0x183d   :  { %v4243_v32 = vsub.f32 %v4165_v8, %v4242_v27 }
0x183e   :  { %v4416_v33 = vmul.f32 %v4415_v28, %v14846_v40 }
0x183f   :  { %v4244_v10 = vmul.f32 1.442695, %v4243_v32  ;;  %v4246_v34 = vsub.f32 %v4243_v32, %v3948_v30 }
0x1840   :  { %12682 = vmatmul.mubr.msk.f32.vlgmr.msra.gmra.mrb[54].mxu0 %vm106_vm1, %v4416_v33  ;;  %12693 = vmatmul.mubr.msk.f32.vlgmr.msra.gmra.mrb[58].mxu1 %vm106_vm1, %v4416_v33 }
0x1841   :  { %14493 = vpow2.f32 %v4244_v10  ;;  %13943 = vmatpush3.bf16.msra.mxu0 %v14849_v42  ;;  %12703 = vmatprep.mubr.msk.f32.mxu0 %vm14630_vm0, %v14631_v12 }
0x1842   :  { %13944 = vmatprep.subr.bf16.mxu0 %v14629_v4  ;;  %13949 = vmatpush3.bf16.msra.mxu1 %v14882_v50 }
0x1843   :  { %13950 = vmatprep.subr.bf16.mxu1 %v14629_v4  ;;  %12714 = vmatprep.mubr.msk.f32.mxu1 %vm14630_vm0, %v14631_v12 }
0x1845   :  { %13946 = vmatpush3.bf16.msra.mxu0 %v14861_v46 }
0x1846   :  { %13952 = vmatpush3.bf16.msra.mxu1 %v14888_v52  ;;  %12717 = vmatprep.subr.mxu0 %v14631_v12 }
0x1847   :  { %13959 = vmatprep.subr.bf16.mxu1 %v14629_v4 }
0x1848   :  { %12704 = vmatmul.mubr.msk.f32.vlgmr.msra.gmra.mrb[56].mxu0 %vm106_vm1, %v4416_v33 }
0x1849   :  { %12718 = vmatpush3.msk.msra.mxu0 %vm569_vm2, %v15488_v49  ;;  %12719 = vmatprep.mubr.msk.f32.mxu0 %vm14630_vm0, %v14631_v12 }
0x184a   :  { %13953 = vmatprep.subr.bf16.mxu0 %v14629_v4 }
0x184b   :  { %v14494_v38 = vpop.eup %14493 }
0x184c   :  { %v15495_v35 = vmul.f32 %v14494_v38, %v4246_v34  ;;  %12720 = vmatmul.mubr.msk.f32.vlgmr.msra.gmra.mrb[58].mxu0 %vm565_vm3, %v11250_v57 }
0x184d   :  { %13955 = vmatpush3.bf16.msra.mxu0 %v14939_v17  ;;  %12730 = vmatprep.mubr.msk.f32.mxu0 %vm14630_vm0, %v14631_v12 }
0x184e   :  { %13956 = vmatprep.subr.bf16.mxu0 %v14629_v4 }
0x1851   :  { %13958 = vmatpush3.bf16.msra.mxu0 %v14953_v21 }
0x1852   :  { %13965 = vmatprep.subr.bf16.mxu0 %v14629_v4 }
0x1913   :  { %v4486_v41 = vpop.f32.mrb[54].mxu0  ;;  %v4557_v25 = vpop.f32.mrb[58].mxu1 }
0x1914   :  { %v4490_v43 = vmax.f32 %v4416_v33, %v4486_v41  ;;  %v12683_v44 = vpop.f32.mrb[55].mxu0  ;;  %v12694_v22 = vpop.f32.mrb[59].mxu1 }
0x1916   :  { %v4561_v45 = vmax.f32 %v4490_v43, %v4557_v25 }
0x191b   :  { %v4628_v47 = vpop.f32.mrb[56].mxu0 }
0x191c   :  { %v4632_v7 = vmax.f32 %v4561_v45, %v4628_v47  ;;  %v12705_v51 = vpop.f32.mrb[57].mxu0 }
0x191d   :  { %v15571_v51 = vld [vmem:[%s16381_s15] ss:$0 sm:$0xff] }
0x191e   :  { %v4633_v53 = vsub.f32 %v4416_v33, %v4632_v7 }
0x191f   :  { %v4780_v3 = vpop.f32.mrb[58].mxu0 }
0x1920   :  { %v4634_v54 = vmul.f32 1.442695, %v4633_v53  ;;  %v12721_v31 = vpop.f32.mrb[59].mxu0 }
0x1922   :  { %14495 = vpow2.f32 %v4634_v54 }
0x192c   :  { %v14496_v55 = vpop.eup %14495 }
0x192d   :  { %12715 = vmatmul.mubr.msk.f32.vlgmr.msra.gmra.mrb[60].mxu1 %vm106_vm1, %v14496_v55 }
0x192e   :  { %13961 = vmatpush3.bf16.msra.mxu1 %v14902_v56  ;;  %12741 = vmatprep.mubr.msk.f32.mxu1 %vm14630_vm0, %v14631_v12 }
0x192f   :  { %13962 = vmatprep.subr.bf16.mxu1 %v14629_v4 }
0x1932   :  { %13964 = vmatpush3.bf16.msra.mxu1 %v14908_v58 }
0x1933   :  { %13971 = vmatprep.subr.bf16.mxu1 %v14629_v4 }
0x1935   :  { %12742 = vmatmul.mubr.msk.f32.vlgmr.msra.gmra.mrb[62].mxu1 %vm106_vm1, %v15358_v18 }
0x1936   :  { %13973 = vmatpush3.bf16.msra.mxu1 %v14795_v20  ;;  %12763 = vmatprep.mubr.msk.f32.mxu1 %vm14630_vm0, %v14631_v12 }
0x1937   :  { %13974 = vmatprep.subr.bf16.mxu1 %v14629_v4 }
0x193a   :  { %13976 = vmatpush3.bf16.msra.mxu1 %v14814_v26 }
0x193b   :  { %13983 = vmatprep.subr.bf16.mxu1 %v14629_v4 }
0x1a00   :  { %v4705_v18 = vpop.f32.mrb[60].mxu1 }
0x1a01   :  { %14497 = vrcp.f32 %v4705_v18  ;;  %v12716_v8 = vpop.f32.mrb[61].mxu1 }
0x1a08   :  { %v4924_v60 = vpop.f32.mrb[62].mxu1 }
0x1a09   :  { %v4925_v59 = vadd.f32 %v15525_v62, %v4924_v60  ;;  %v12743_v37 = vpop.f32.mrb[63].mxu1 }
0x1a0b   :  { %v14498_v0 = vpop.eup %14497  ;;  %4936 = vrot.lane.b32.xlu1 %v4925_v59, %s14633_s24 }
0x1a0c   :  { %v4710_v2 = vmul.f32 %v14498_v0, %v14496_v55 }
0x1a0e   :  { %11273 = vst.msk [vmem:[%s16382_s16 + $0x18] sm:$0xff] %vm106_vm1, %v4710_v2  ;;  %12731 = vmatmul.mubr.msk.f32.vlgmr.msra.gmra.mrb[60].mxu0 %vm106_vm1, %v4710_v2 }
0x1a0f   :  { %13967 = vmatpush3.bf16.msra.mxu0 %v14987_v61  ;;  %12752 = vmatprep.mubr.msk.f32.mxu0 %vm14630_vm0, %v14631_v12 }
0x1a10   :  { %13968 = vmatprep.subr.bf16.mxu0 %v14629_v4 }
0x1a13   :  { %13970 = vmatpush3.bf16.msra.mxu0 %v14993_v63 }
0x1a14   :  { %13977 = vmatprep.subr.bf16.mxu0 %v14629_v4 }
0x1a7d   :  { %v4937_v10 = vpop.permute.xlu1 %4936 }
0x1ae1   :  { %v4853_v6 = vpop.f32.mrb[60].mxu0 }
0x1ae2   :  { %v4854_v36 = vadd.f32 %v4853_v6, %v4780_v3  ;;  %v12732_v14 = vpop.f32.mrb[61].mxu0 }
0x1ae4   :  { %v4857_v19 = vadd.f32 %v15543_v48, %v4854_v36 }
0x1ae6   :  { %v4928_v27 = vadd.f32 %v4925_v59, %v4857_v19 }
0x1ae8   :  { %v11262_v28 = vmul.f32 -1.442695, %v4928_v27 }
0x1aea   :  { %14499 = vpow2.f32 %v11262_v28  ;;  %v11275_v28 = vld [vmem:[%s16391_s0 + $0x20] sm:$0xff] }
0x1af4   :  { %v14500_v30 = vpop.eup %14499 }
0x1af5   :  { %v4932_v32 = vadd.f32 1.0, %v14500_v30 }
0x1af7   :  { %14501 = vrcp.f32 %v4932_v32 }
0x1b01   :  { %v14502_v33 = vpop.eup %14501 }
0x1b02   :  { %v4939_v34 = vmul.f32 %v14502_v33, %v4937_v10  ;;  %v4946_v43 = vsub.f32 1.0, %v14502_v33  ;;  %v4952_v22 = vmul.f32 %v14502_v33, %v15354_v15 }
0x1b04   :  { %4941 = vrot.lane.b32.xlu0 %v4939_v34, %s14633_s24 }
0x1b76   :  { %v4942_v38 = vpop.permute.xlu0 %4941 }
0x1b77   :  { %v4944_v41 = vadd.f32 %v4942_v38, %v4857_v19 }
0x1b79   :  { %14503 = vtanh.f32 %v4944_v41 }
0x1b83   :  { %v14504_v25 = vpop.eup %14503 }
0x1b84   :  { %4948 = vrot.lane.b32.xlu1 %v14504_v25, %s14634_s1 }
0x1bf6   :  { %v4949_v44 = vpop.permute.xlu1 %4948 }
0x1bf7   :  { %v4951_v45 = vmul.f32 %v4949_v44, %v4946_v43 }
0x1bf9   :  { %v15549_v47 = vadd.f32 %v4952_v22, %v4951_v45 }
0x1bfb   :  { %4955 = vrot.lane.b32.xlu0 %v15549_v47, %s14634_s1 }
0x1c6d   :  { %v15553_v7 = vpop.permute.xlu0 %4955 }
0x1c6e   :  { %11274 = vst.msk [vmem:[%s16383_s17 + $0x18] sm:$0xff] %vm106_vm1, %v15553_v7  ;;  %12753 = vmatmul.mubr.msk.f32.vlgmr.msra.gmra.mrb[62].mxu0 %vm106_vm1, %v15553_v7 }
0x1c6f   :  { %13979 = vmatpush3.bf16.msra.mxu0 %v14803_v23  ;;  %12774 = vmatprep.mubr.msk.f32.mxu0 %vm14630_vm0, %v14631_v12 }
0x1c70   :  { %13980 = vmatprep.subr.bf16.mxu0 %v14629_v4 }
0x1c73   :  { %13982 = vmatpush3.bf16.msra.mxu0 %v14823_v29 }
0x1c74   :  { %13989 = vmatprep.subr.bf16.mxu0 %v14629_v4 }
0x1d41   :  { %v5025_v15 = vpop.f32.mrb[62].mxu0 }
0x1d42   :  { %v5026_v53 = vadd.f32 %v15571_v51, %v5025_v15  ;;  %v12754_v54 = vpop.f32.mrb[63].mxu0 }
0x1d44   :  { %12764 = vmatmul.mubr.msk.f32.vlgmr.msra.gmra.mrb[64].mxu1 %vm106_vm1, %v5026_v53  ;;  %12775 = vmatmul.mubr.msk.f32.vlgmr.msra.gmra.mrb[64].mxu0 %vm106_vm1, %v5026_v53 }
0x1d45   :  { %13985 = vmatpush3.bf16.msra.mxu1 %v14849_v42  ;;  %12785 = vmatprep.mubr.msk.f32.mxu1 %vm14630_vm0, %v14631_v12 }
0x1d46   :  { %13986 = vmatprep.subr.bf16.mxu1 %v14629_v4  ;;  %13991 = vmatpush3.bf16.msra.mxu0 %v14882_v50 }
0x1d47   :  { %13992 = vmatprep.subr.bf16.mxu0 %v14629_v4  ;;  %12796 = vmatprep.mubr.msk.f32.mxu0 %vm14630_vm0, %v14631_v12 }
0x1d49   :  { %13988 = vmatpush3.bf16.msra.mxu1 %v14861_v46 }
0x1d4a   :  { %13995 = vmatprep.subr.bf16.mxu1 %v14629_v4  ;;  %13994 = vmatpush3.bf16.msra.mxu0 %v14888_v52 }
0x1d4b   :  { %14001 = vmatprep.subr.bf16.mxu0 %v14629_v4 }
0x1d4c   :  { %12786 = vmatmul.mubr.msk.f32.vlgmr.msra.gmra.mrb[66].mxu1 %vm106_vm1, %v5026_v53 }
0x1d4d   :  { %13997 = vmatpush3.bf16.msra.mxu1 %v14795_v20  ;;  %12807 = vmatprep.mubr.msk.f32.mxu1 %vm14630_vm0, %v14631_v12 }
0x1d4e   :  { %13998 = vmatprep.subr.bf16.mxu1 %v14629_v4 }
0x1d51   :  { %14000 = vmatpush3.bf16.msra.mxu1 %v14814_v26 }
0x1d52   :  { %14007 = vmatprep.subr.bf16.mxu1 %v14629_v4 }
0x1d54   :  { %12808 = vmatmul.mubr.msk.f32.vlgmr.msra.gmra.mrb[68].mxu1 %vm106_vm1, %v15465_v11 }
0x1d55   :  { %14009 = vmatpush3.bf16.msra.mxu1 %v14849_v42  ;;  %12829 = vmatprep.mubr.msk.f32.mxu1 %vm14630_vm0, %v14631_v12 }
0x1d56   :  { %14010 = vmatprep.subr.bf16.mxu1 %v14629_v4 }
0x1d59   :  { %14012 = vmatpush3.bf16.msra.mxu1 %v14861_v46 }
0x1d5a   :  { %14019 = vmatprep.subr.bf16.mxu1 %v14629_v4 }
0x1d5c   :  { %12830 = vmatmul.mubr.msk.f32.vlgmr.msra.gmra.mrb[70].mxu1 %vm106_vm1, %v15465_v11 }
0x1d5d   :  { %14021 = vmatpush3.bf16.msra.mxu1 %v14745_v5  ;;  %12851 = vmatprep.mubr.msk.f32.mxu1 %vm14630_vm0, %v14631_v12 }
0x1d5e   :  { %14022 = vmatprep.subr.bf16.mxu1 %v14629_v4 }
0x1d61   :  { %14024 = vmatpush3.bf16.msra.mxu1 %v14769_v13 }
0x1d62   :  { %14031 = vmatprep.subr.bf16.mxu1 %v14629_v4 }
0x1d64   :  { %12852 = vmatmul.mubr.msk.f32.vlgmr.msra.gmra.mrb[72].mxu1 %vm106_vm1, %v11275_v28 }
0x1d65   :  { %14033 = vmatpush3.bf16.msra.mxu1 %v14795_v20  ;;  %12873 = vmatprep.mubr.msk.f32.mxu1 %vm14630_vm0, %v14631_v12 }
0x1d66   :  { %14034 = vmatprep.subr.bf16.mxu1 %v14629_v4 }
0x1d69   :  { %14036 = vmatpush3.bf16.msra.mxu1 %v14814_v26 }
0x1d6a   :  { %14043 = vmatprep.subr.bf16.mxu1 %v14629_v4 }
0x1e17   :  { %v5098_v55 = vpop.f32.mrb[64].mxu1  ;;  %v5169_v57 = vpop.f32.mrb[64].mxu0 }
0x1e18   :  { %v5102_v18 = vmax.f32 %v5026_v53, %v5098_v55  ;;  %v12765_v8 = vpop.f32.mrb[65].mxu1  ;;  %v12776_v60 = vpop.f32.mrb[65].mxu0 }
0x1e19   :  { %v11277_v8 = vld [vmem:[%s16369_s3 + $0x20] sm:$0xff] }
0x1e1a   :  { %v5173_v59 = vmax.f32 %v5102_v18, %v5169_v57 }
0x1e1f   :  { %v5240_v37 = vpop.f32.mrb[66].mxu1 }
0x1e20   :  { %v5244_v0 = vmax.f32 %v5173_v59, %v5240_v37  ;;  %v12787_v2 = vpop.f32.mrb[67].mxu1 }
0x1e22   :  { %v15611_v3 = vsub.f32 %v5026_v53, %v5244_v0 }
0x1e24   :  { %v5246_v31 = vmul.f32 1.442695, %v15611_v3 }
0x1e26   :  { %14505 = vpow2.f32 %v5246_v31 }
0x1e27   :  { %v5393_v6 = vpop.f32.mrb[68].mxu1 }
0x1e28   :  { %v12809_v36 = vpop.f32.mrb[69].mxu1  ;;  %v5397_v33 = vmax.f32 %v15465_v11, %v5393_v6 }
0x1e2f   :  { %v5535_v14 = vpop.f32.mrb[70].mxu1 }
0x1e30   :  { %v14506_v19 = vpop.eup %14505  ;;  %v12831_v27 = vpop.f32.mrb[71].mxu1 }
0x1e31   :  { %12797 = vmatmul.mubr.msk.f32.vlgmr.msra.gmra.mrb[66].mxu0 %vm106_vm1, %v14506_v19 }
0x1e32   :  { %14003 = vmatpush3.bf16.msra.mxu0 %v14803_v23  ;;  %12818 = vmatprep.mubr.msk.f32.mxu0 %vm14630_vm0, %v14631_v12 }
0x1e33   :  { %14004 = vmatprep.subr.bf16.mxu0 %v14629_v4 }
0x1e36   :  { %14006 = vmatpush3.bf16.msra.mxu0 %v14823_v29 }
0x1e37   :  { %14013 = vmatprep.subr.bf16.mxu0 %v14629_v4 }
0x1e39   :  { %12819 = vmatmul.mubr.msk.f32.vlgmr.msra.gmra.mrb[68].mxu0 %vm106_vm1, %v15465_v11 }
0x1e3a   :  { %14015 = vmatpush3.bf16.msra.mxu0 %v14882_v50  ;;  %12840 = vmatprep.mubr.msk.f32.mxu0 %vm14630_vm0, %v14631_v12 }
0x1e3b   :  { %14016 = vmatprep.subr.bf16.mxu0 %v14629_v4 }
0x1e3e   :  { %14018 = vmatpush3.bf16.msra.mxu0 %v14888_v52 }
0x1e3f   :  { %14025 = vmatprep.subr.bf16.mxu0 %v14629_v4 }
0x1f04   :  { %v5317_v30 = vpop.f32.mrb[66].mxu0 }
0x1f05   :  { %v12798_v32 = vpop.f32.mrb[67].mxu0 }
0x1f0c   :  { %v5464_v10 = vpop.f32.mrb[68].mxu0 }
0x1f0d   :  { %v5468_v34 = vmax.f32 %v5397_v33, %v5464_v10  ;;  %v12820_v38 = vpop.f32.mrb[69].mxu0 }
0x1f0f   :  { %v5539_v41 = vmax.f32 %v5468_v34, %v5535_v14 }
0x1f11   :  { %v5540_v25 = vsub.f32 %v15465_v11, %v5539_v41  ;;  %v5715_v11 = vpop.f32.mrb[72].mxu1 }
0x1f12   :  { %v12853_v22 = vpop.f32.mrb[73].mxu1 }
0x1f13   :  { %v5541_v43 = vmul.f32 1.442695, %v5540_v25 }
0x1f15   :  { %14507 = vpow2.f32 %v5541_v43 }
0x1f16   :  { %14509 = vlog2.f32 %v5317_v30 }
0x1f1f   :  { %v14508_v44 = vpop.eup %14507 }
0x1f20   :  { %12841 = vmatmul.mubr.msk.f32.vlgmr.msra.gmra.mrb[70].mxu0 %vm106_vm1, %v14508_v44  ;;  %v14510_v53 = vpop.eup %14509 }
0x1f21   :  { %14027 = vmatpush3.bf16.msra.mxu0 %v14756_v9  ;;  %12862 = vmatprep.mubr.msk.f32.mxu0 %vm14630_vm0, %v14631_v12  ;;  %v5322_v18 = vmul.f32 0.6931472, %v14510_v53 }
0x1f22   :  { %14028 = vmatprep.subr.bf16.mxu0 %v14629_v4 }
0x1f23   :  { %v5323_v2 = vsub.f32 %v15611_v3, %v5322_v18 }
0x1f25   :  { %14030 = vmatpush3.bf16.msra.mxu0 %v14773_v16 }
0x1f26   :  { %14037 = vmatprep.subr.bf16.mxu0 %v14629_v4 }
0x1f28   :  { %12863 = vmatmul.mubr.msk.f32.vlgmr.msra.gmra.mrb[72].mxu0 %vm106_vm1, %v15553_v7 }
0x1f29   :  { %14039 = vmatpush3.bf16.msra.mxu0 %v14803_v23  ;;  %12884 = vmatprep.mubr.msk.f32.mxu0 %vm14630_vm0, %v14631_v12 }
0x1f2a   :  { %14040 = vmatprep.subr.bf16.mxu0 %v14629_v4 }
0x1f2d   :  { %14042 = vmatpush3.bf16.msra.mxu0 %v14823_v29 }
0x1f2e   :  { %14049 = vmatprep.subr.bf16.mxu0 %v14629_v4 }
0x1ff3   :  { %v5612_v45 = vpop.f32.mrb[70].mxu0 }
0x1ff4   :  { %14511 = vlog2.f32 %v5612_v45  ;;  %v12842_v15 = vpop.f32.mrb[71].mxu0 }
0x1ffb   :  { %v5785_v54 = vpop.f32.mrb[72].mxu0 }
0x1ffc   :  { %v5786_v55 = vadd.f32 %v5785_v54, %v5715_v11  ;;  %v12864_v57 = vpop.f32.mrb[73].mxu0  ;;  %v11276_v11 = vld [vmem:[%s16392_s19 + $0x20] sm:$0xff] }
0x1ffe   :  { %v14512_v60 = vpop.eup %14511  ;;  %v15660_v59 = vadd.f32 %v15462_v24, %v5786_v55 }
0x1fff   :  { %v5617_v37 = vmul.f32 0.6931472, %v14512_v60 }
0x2000   :  { %v5790_v0 = vadd.f32 %v11277_v8, %v15660_v59 }
0x2001   :  { %v5618_v31 = vsub.f32 %v5540_v25, %v5617_v37 }
0x2002   :  { %v5791_v6 = vmul.f32 %v5790_v0, %v14846_v40 }
0x2003   :  { %v5619_v36 = vmul.f32 1.442695, %v5618_v31  ;;  %v5621_v14 = vsub.f32 %v5618_v31, %v5323_v2 }
0x2004   :  { %12874 = vmatmul.mubr.msk.f32.vlgmr.msra.gmra.mrb[74].mxu1 %vm106_vm1, %v5791_v6  ;;  %12885 = vmatmul.mubr.msk.f32.vlgmr.msra.gmra.mrb[74].mxu0 %vm106_vm1, %v5791_v6 }
0x2005   :  { %14513 = vpow2.f32 %v5619_v36  ;;  %14045 = vmatpush3.bf16.msra.mxu1 %v14849_v42  ;;  %12895 = vmatprep.mubr.msk.f32.mxu1 %vm14630_vm0, %v14631_v12 }
0x2006   :  { %14046 = vmatprep.subr.bf16.mxu1 %v14629_v4  ;;  %14051 = vmatpush3.bf16.msra.mxu0 %v14882_v50 }
0x2007   :  { %14052 = vmatprep.subr.bf16.mxu0 %v14629_v4  ;;  %12906 = vmatprep.mubr.msk.f32.mxu0 %vm14630_vm0, %v14631_v12 }
0x2009   :  { %14048 = vmatpush3.bf16.msra.mxu1 %v14861_v46 }
0x200a   :  { %14054 = vmatpush3.bf16.msra.mxu0 %v14888_v52  ;;  %12909 = vmatprep.subr.mxu1 %v14631_v12 }
0x200b   :  { %14061 = vmatprep.subr.bf16.mxu0 %v14629_v4 }
0x200c   :  { %12896 = vmatmul.mubr.msk.f32.vlgmr.msra.gmra.mrb[76].mxu1 %vm106_vm1, %v5791_v6 }
0x200d   :  { %12910 = vmatpush3.msk.msra.mxu1 %vm569_vm2, %v15488_v49  ;;  %12911 = vmatprep.mubr.msk.f32.mxu1 %vm14630_vm0, %v14631_v12 }
0x200e   :  { %14055 = vmatprep.subr.bf16.mxu1 %v14629_v4 }
0x200f   :  { %v14514_v3 = vpop.eup %14513 }
0x2010   :  { %v15685_v19 = vmul.f32 %v14514_v3, %v5621_v14  ;;  %12912 = vmatmul.mubr.msk.f32.vlgmr.msra.gmra.mrb[78].mxu1 %vm565_vm3, %v11276_v11 }
0x2011   :  { %14057 = vmatpush3.bf16.msra.mxu1 %v14939_v17  ;;  %12922 = vmatprep.mubr.msk.f32.mxu1 %vm14630_vm0, %v14631_v12 }
0x2012   :  { %14058 = vmatprep.subr.bf16.mxu1 %v14629_v4 }
0x2015   :  { %14060 = vmatpush3.bf16.msra.mxu1 %v14953_v21 }
0x2016   :  { %14067 = vmatprep.subr.bf16.mxu1 %v14629_v4 }
0x20d7   :  { %v5861_v27 = vpop.f32.mrb[74].mxu1  ;;  %v5932_v28 = vpop.f32.mrb[74].mxu0 }
0x20d8   :  { %v5865_v30 = vmax.f32 %v5791_v6, %v5861_v27  ;;  %v12875_v32 = vpop.f32.mrb[75].mxu1  ;;  %v12886_v33 = vpop.f32.mrb[75].mxu0 }
0x20da   :  { %v5936_v10 = vmax.f32 %v5865_v30, %v5932_v28 }
0x20df   :  { %v6003_v34 = vpop.f32.mrb[76].mxu1 }
0x20e0   :  { %v6007_v38 = vmax.f32 %v5936_v10, %v6003_v34  ;;  %v12897_v41 = vpop.f32.mrb[77].mxu1 }
0x20e2   :  { %v6008_v25 = vsub.f32 %v5791_v6, %v6007_v38 }
0x20e3   :  { %v6155_v57 = vpop.f32.mrb[78].mxu1 }
0x20e4   :  { %v6009_v43 = vmul.f32 1.442695, %v6008_v25  ;;  %v12913_v18 = vpop.f32.mrb[79].mxu1 }
0x20e6   :  { %14515 = vpow2.f32 %v6009_v43 }
0x20f0   :  { %v14516_v44 = vpop.eup %14515 }
0x20f1   :  { %12907 = vmatmul.mubr.msk.f32.vlgmr.msra.gmra.mrb[76].mxu0 %vm106_vm1, %v14516_v44 }
0x20f2   :  { %14063 = vmatpush3.bf16.msra.mxu0 %v14902_v56  ;;  %12933 = vmatprep.mubr.msk.f32.mxu0 %vm14630_vm0, %v14631_v12 }
0x20f3   :  { %14064 = vmatprep.subr.bf16.mxu0 %v14629_v4 }
0x20f6   :  { %14066 = vmatpush3.bf16.msra.mxu0 %v14908_v58 }
0x20f7   :  { %14073 = vmatprep.subr.bf16.mxu0 %v14629_v4 }
0x20f9   :  { %12934 = vmatmul.mubr.msk.f32.vlgmr.msra.gmra.mrb[78].mxu0 %vm106_vm1, %v15553_v7 }
0x20fa   :  { %14075 = vmatpush3.bf16.msra.mxu0 %v14795_v20  ;;  %12955 = vmatprep.mubr.msk.f32.mxu0 %vm14630_vm0, %v14631_v12 }
0x20fb   :  { %14076 = vmatprep.subr.bf16.mxu0 %v14629_v4 }
0x20fe   :  { %14078 = vmatpush3.bf16.msra.mxu0 %v14814_v26 }
0x20ff   :  { %14085 = vmatprep.subr.bf16.mxu0 %v14629_v4 }
0x21c4   :  { %v6080_v7 = vpop.f32.mrb[76].mxu0 }
0x21c5   :  { %14517 = vrcp.f32 %v6080_v7  ;;  %v12908_v22 = vpop.f32.mrb[77].mxu0 }
0x21cc   :  { %v6299_v45 = vpop.f32.mrb[78].mxu0 }
0x21cd   :  { %v6300_v15 = vadd.f32 %v15525_v62, %v6299_v45  ;;  %v12935_v53 = vpop.f32.mrb[79].mxu0 }
0x21cf   :  { %v14518_v54 = vpop.eup %14517  ;;  %6311 = vrot.lane.b32.xlu1 %v6300_v15, %s14633_s24 }
0x21d0   :  { %v6085_v55 = vmul.f32 %v14518_v54, %v14516_v44 }
0x21d2   :  { %11299 = vst.msk [vmem:[%s16382_s16 + $0x20] sm:$0xff] %vm106_vm1, %v6085_v55  ;;  %12923 = vmatmul.mubr.msk.f32.vlgmr.msra.gmra.mrb[80].mxu1 %vm106_vm1, %v6085_v55 }
0x21d3   :  { %14069 = vmatpush3.bf16.msra.mxu1 %v14987_v61  ;;  %12944 = vmatprep.mubr.msk.f32.mxu1 %vm14630_vm0, %v14631_v12 }
0x21d4   :  { %14070 = vmatprep.subr.bf16.mxu1 %v14629_v4 }
0x21d7   :  { %14072 = vmatpush3.bf16.msra.mxu1 %v14993_v63 }
0x21d8   :  { %14079 = vmatprep.subr.bf16.mxu1 %v14629_v4 }
0x2241   :  { %v6312_v3 = vpop.permute.xlu1 %6311 }
0x22a5   :  { %v6228_v8 = vpop.f32.mrb[80].mxu1 }
0x22a6   :  { %v6229_v60 = vadd.f32 %v6228_v8, %v6155_v57  ;;  %v12924_v37 = vpop.f32.mrb[81].mxu1 }
0x22a8   :  { %v6232_v0 = vadd.f32 %v15543_v48, %v6229_v60 }
0x22aa   :  { %v6303_v2 = vadd.f32 %v6300_v15, %v6232_v0 }
0x22ac   :  { %v11288_v31 = vmul.f32 -1.442695, %v6303_v2 }
0x22ae   :  { %14519 = vpow2.f32 %v11288_v31 }
0x22b8   :  { %v14520_v6 = vpop.eup %14519 }
0x22b9   :  { %v6307_v36 = vadd.f32 1.0, %v14520_v6  ;;  %v11301_v6 = vld [vmem:[%s16391_s0 + $0x28] sm:$0xff] }
0x22bb   :  { %14521 = vrcp.f32 %v6307_v36 }
0x22c5   :  { %v14522_v14 = vpop.eup %14521 }
0x22c6   :  { %v6314_v27 = vmul.f32 %v14522_v14, %v6312_v3  ;;  %v6321_v33 = vsub.f32 1.0, %v14522_v14  ;;  %v6327_v34 = vmul.f32 %v14522_v14, %v15549_v47 }
0x22c8   :  { %6316 = vrot.lane.b32.xlu0 %v6314_v27, %s14633_s24 }
0x233a   :  { %v6317_v28 = vpop.permute.xlu0 %6316 }
0x233b   :  { %v6319_v30 = vadd.f32 %v6317_v28, %v6232_v0 }
0x233d   :  { %14523 = vtanh.f32 %v6319_v30 }
0x2347   :  { %v14524_v32 = vpop.eup %14523 }
0x2348   :  { %6323 = vrot.lane.b32.xlu1 %v14524_v32, %s14634_s1 }
0x23ba   :  { %v6324_v10 = vpop.permute.xlu1 %6323 }
0x23bb   :  { %v6326_v38 = vmul.f32 %v6324_v10, %v6321_v33 }
0x23bd   :  { %v15729_v41 = vadd.f32 %v6327_v34, %v6326_v38 }
0x23bf   :  { %6330 = vrot.lane.b32.xlu0 %v15729_v41, %s14634_s1 }
0x2431   :  { %v15733_v25 = vpop.permute.xlu0 %6330 }
0x2432   :  { %11300 = vst.msk [vmem:[%s16383_s17 + $0x20] sm:$0xff] %vm106_vm1, %v15733_v25  ;;  %12945 = vmatmul.mubr.msk.f32.vlgmr.msra.gmra.mrb[82].mxu1 %vm106_vm1, %v15733_v25 }
0x2433   :  { %14081 = vmatpush3.bf16.msra.mxu1 %v14803_v23  ;;  %12966 = vmatprep.mubr.msk.f32.mxu1 %vm14630_vm0, %v14631_v12 }
0x2434   :  { %14082 = vmatprep.subr.bf16.mxu1 %v14629_v4 }
0x2437   :  { %14084 = vmatpush3.bf16.msra.mxu1 %v14823_v29 }
0x2438   :  { %14091 = vmatprep.subr.bf16.mxu1 %v14629_v4 }
0x2505   :  { %v6400_v47 = vpop.f32.mrb[82].mxu1 }
0x2506   :  { %v6401_v43 = vadd.f32 %v15571_v51, %v6400_v47  ;;  %v12946_v44 = vpop.f32.mrb[83].mxu1 }
0x2508   :  { %12956 = vmatmul.mubr.msk.f32.vlgmr.msra.gmra.mrb[80].mxu0 %vm106_vm1, %v6401_v43  ;;  %12967 = vmatmul.mubr.msk.f32.vlgmr.msra.gmra.mrb[84].mxu1 %vm106_vm1, %v6401_v43 }
0x2509   :  { %14087 = vmatpush3.bf16.msra.mxu0 %v14849_v42  ;;  %12977 = vmatprep.mubr.msk.f32.mxu0 %vm14630_vm0, %v14631_v12 }
0x250a   :  { %14088 = vmatprep.subr.bf16.mxu0 %v14629_v4  ;;  %14093 = vmatpush3.bf16.msra.mxu1 %v14882_v50 }
0x250b   :  { %14094 = vmatprep.subr.bf16.mxu1 %v14629_v4  ;;  %12988 = vmatprep.mubr.msk.f32.mxu1 %vm14630_vm0, %v14631_v12 }
0x250d   :  { %14090 = vmatpush3.bf16.msra.mxu0 %v14861_v46 }
0x250e   :  { %14097 = vmatprep.subr.bf16.mxu0 %v14629_v4  ;;  %14096 = vmatpush3.bf16.msra.mxu1 %v14888_v52 }
0x250f   :  { %14103 = vmatprep.subr.bf16.mxu1 %v14629_v4 }
0x2510   :  { %12978 = vmatmul.mubr.msk.f32.vlgmr.msra.gmra.mrb[82].mxu0 %vm106_vm1, %v6401_v43 }
0x2511   :  { %14099 = vmatpush3.bf16.msra.mxu0 %v14795_v20  ;;  %12999 = vmatprep.mubr.msk.f32.mxu0 %vm14630_vm0, %v14631_v12 }
0x2512   :  { %14100 = vmatprep.subr.bf16.mxu0 %v14629_v4 }
0x2515   :  { %14102 = vmatpush3.bf16.msra.mxu0 %v14814_v26 }
0x2516   :  { %14109 = vmatprep.subr.bf16.mxu0 %v14629_v4 }
0x2518   :  { %13000 = vmatmul.mubr.msk.f32.vlgmr.msra.gmra.mrb[84].mxu0 %vm106_vm1, %v15660_v59 }
0x2519   :  { %14111 = vmatpush3.bf16.msra.mxu0 %v14849_v42  ;;  %13021 = vmatprep.mubr.msk.f32.mxu0 %vm14630_vm0, %v14631_v12 }
0x251a   :  { %14112 = vmatprep.subr.bf16.mxu0 %v14629_v4 }
0x251d   :  { %14114 = vmatpush3.bf16.msra.mxu0 %v14861_v46 }
0x251e   :  { %14121 = vmatprep.subr.bf16.mxu0 %v14629_v4 }
0x2520   :  { %13022 = vmatmul.mubr.msk.f32.vlgmr.msra.gmra.mrb[86].mxu0 %vm106_vm1, %v15660_v59 }
0x2521   :  { %14123 = vmatpush3.bf16.msra.mxu0 %v14745_v5  ;;  %13043 = vmatprep.mubr.msk.f32.mxu0 %vm14630_vm0, %v14631_v12 }
0x2522   :  { %14124 = vmatprep.subr.bf16.mxu0 %v14629_v4 }
0x2525   :  { %14126 = vmatpush3.bf16.msra.mxu0 %v14769_v13 }
0x2526   :  { %14133 = vmatprep.subr.bf16.mxu0 %v14629_v4 }
0x2528   :  { %13044 = vmatmul.mubr.msk.f32.vlgmr.msra.gmra.mrb[88].mxu0 %vm106_vm1, %v11301_v6 }
0x2529   :  { %14135 = vmatpush3.bf16.msra.mxu0 %v14795_v20  ;;  %13065 = vmatprep.mubr.msk.f32.mxu0 %vm14630_vm0, %v14631_v12 }
0x252a   :  { %14136 = vmatprep.subr.bf16.mxu0 %v14629_v4 }
0x252d   :  { %14138 = vmatpush3.bf16.msra.mxu0 %v14814_v26 }
0x252e   :  { %14145 = vmatprep.subr.bf16.mxu0 %v14629_v4 }
0x25db   :  { %v6473_v11 = vpop.f32.mrb[80].mxu0  ;;  %v6544_v7 = vpop.f32.mrb[84].mxu1 }
0x25dc   :  { %v6477_v22 = vmax.f32 %v6401_v43, %v6473_v11  ;;  %v12957_v45 = vpop.f32.mrb[81].mxu0  ;;  %v12968_v15 = vpop.f32.mrb[85].mxu1 }
0x25dd   :  { %v11303_v15 = vld [vmem:[%s16369_s3 + $0x28] sm:$0xff] }
0x25de   :  { %v6548_v53 = vmax.f32 %v6477_v22, %v6544_v7 }
0x25e3   :  { %v6615_v54 = vpop.f32.mrb[82].mxu0 }
0x25e4   :  { %v6619_v55 = vmax.f32 %v6548_v53, %v6615_v54  ;;  %v12979_v57 = vpop.f32.mrb[83].mxu0 }
0x25e6   :  { %v15786_v18 = vsub.f32 %v6401_v43, %v6619_v55 }
0x25e8   :  { %v6621_v8 = vmul.f32 1.442695, %v15786_v18 }
0x25ea   :  { %14525 = vpow2.f32 %v6621_v8 }
0x25eb   :  { %v6768_v60 = vpop.f32.mrb[84].mxu0 }
0x25ec   :  { %v13001_v37 = vpop.f32.mrb[85].mxu0  ;;  %v6772_v3 = vmax.f32 %v15660_v59, %v6768_v60 }
0x25f3   :  { %v6910_v0 = vpop.f32.mrb[86].mxu0 }
0x25f4   :  { %v14526_v2 = vpop.eup %14525  ;;  %v13023_v31 = vpop.f32.mrb[87].mxu0 }
0x25f5   :  { %12989 = vmatmul.mubr.msk.f32.vlgmr.msra.gmra.mrb[86].mxu1 %vm106_vm1, %v14526_v2 }
0x25f6   :  { %14105 = vmatpush3.bf16.msra.mxu1 %v14803_v23  ;;  %13010 = vmatprep.mubr.msk.f32.mxu1 %vm14630_vm0, %v14631_v12 }
0x25f7   :  { %14106 = vmatprep.subr.bf16.mxu1 %v14629_v4 }
0x25fa   :  { %14108 = vmatpush3.bf16.msra.mxu1 %v14823_v29 }
0x25fb   :  { %14115 = vmatprep.subr.bf16.mxu1 %v14629_v4 }
0x25fd   :  { %13011 = vmatmul.mubr.msk.f32.vlgmr.msra.gmra.mrb[88].mxu1 %vm106_vm1, %v15660_v59 }
0x25fe   :  { %14117 = vmatpush3.bf16.msra.mxu1 %v14882_v50  ;;  %13032 = vmatprep.mubr.msk.f32.mxu1 %vm14630_vm0, %v14631_v12 }
0x25ff   :  { %14118 = vmatprep.subr.bf16.mxu1 %v14629_v4 }
0x2602   :  { %14120 = vmatpush3.bf16.msra.mxu1 %v14888_v52 }
0x2603   :  { %14127 = vmatprep.subr.bf16.mxu1 %v14629_v4 }
0x26c8   :  { %v6692_v36 = vpop.f32.mrb[86].mxu1 }
0x26c9   :  { %v12990_v14 = vpop.f32.mrb[87].mxu1 }
0x26d0   :  { %v6839_v27 = vpop.f32.mrb[88].mxu1 }
0x26d1   :  { %v6843_v28 = vmax.f32 %v6772_v3, %v6839_v27  ;;  %v13012_v30 = vpop.f32.mrb[89].mxu1 }
0x26d3   :  { %v6914_v32 = vmax.f32 %v6843_v28, %v6910_v0 }
0x26d5   :  { %v6915_v33 = vsub.f32 %v15660_v59, %v6914_v32  ;;  %v7090_v59 = vpop.f32.mrb[88].mxu0 }
0x26d6   :  { %v13045_v38 = vpop.f32.mrb[89].mxu0 }
0x26d7   :  { %v6916_v10 = vmul.f32 1.442695, %v6915_v33 }
0x26d9   :  { %14527 = vpow2.f32 %v6916_v10 }
0x26da   :  { %14529 = vlog2.f32 %v6692_v36 }
0x26e3   :  { %v14528_v34 = vpop.eup %14527 }
0x26e4   :  { %13033 = vmatmul.mubr.msk.f32.vlgmr.msra.gmra.mrb[90].mxu1 %vm106_vm1, %v14528_v34  ;;  %v14530_v44 = vpop.eup %14529  ;;  %v11302_v34 = vld [vmem:[%s16392_s19 + $0x28] sm:$0xff] }
0x26e5   :  { %14129 = vmatpush3.bf16.msra.mxu1 %v14756_v9  ;;  %13054 = vmatprep.mubr.msk.f32.mxu1 %vm14630_vm0, %v14631_v12  ;;  %v6697_v45 = vmul.f32 0.6931472, %v14530_v44 }
0x26e6   :  { %14130 = vmatprep.subr.bf16.mxu1 %v14629_v4 }
0x26e7   :  { %v6698_v8 = vsub.f32 %v15786_v18, %v6697_v45 }
0x26e9   :  { %14132 = vmatpush3.bf16.msra.mxu1 %v14773_v16 }
0x26ea   :  { %14139 = vmatprep.subr.bf16.mxu1 %v14629_v4 }
0x26ec   :  { %13055 = vmatmul.mubr.msk.f32.vlgmr.msra.gmra.mrb[92].mxu1 %vm106_vm1, %v15733_v25 }
0x26ed   :  { %14141 = vmatpush3.bf16.msra.mxu1 %v14803_v23  ;;  %13076 = vmatprep.mubr.msk.f32.mxu1 %vm14630_vm0, %v14631_v12 }
0x26ee   :  { %14142 = vmatprep.subr.bf16.mxu1 %v14629_v4 }
0x26f1   :  { %14144 = vmatpush3.bf16.msra.mxu1 %v14823_v29 }
0x26f2   :  { %14151 = vmatprep.subr.bf16.mxu1 %v14629_v4 }
0x27b7   :  { %v6987_v47 = vpop.f32.mrb[90].mxu1 }
0x27b8   :  { %14531 = vlog2.f32 %v6987_v47  ;;  %v13034_v43 = vpop.f32.mrb[91].mxu1 }
0x27bf   :  { %v7160_v11 = vpop.f32.mrb[92].mxu1 }
0x27c0   :  { %v7161_v7 = vadd.f32 %v7160_v11, %v7090_v59  ;;  %v13056_v22 = vpop.f32.mrb[93].mxu1 }
0x27c2   :  { %v14532_v53 = vpop.eup %14531  ;;  %v15835_v54 = vadd.f32 %v15462_v24, %v7161_v7 }
0x27c3   :  { %v6992_v55 = vmul.f32 0.6931472, %v14532_v53 }
0x27c4   :  { %v7165_v57 = vadd.f32 %v11303_v15, %v15835_v54 }
0x27c5   :  { %v6993_v60 = vsub.f32 %v6915_v33, %v6992_v55 }
0x27c6   :  { %v7166_v37 = vmul.f32 %v7165_v57, %v14846_v40 }
0x27c7   :  { %v6994_v0 = vmul.f32 1.442695, %v6993_v60  ;;  %v6996_v2 = vsub.f32 %v6993_v60, %v6698_v8 }
0x27c8   :  { %13066 = vmatmul.mubr.msk.f32.vlgmr.msra.gmra.mrb[90].mxu0 %vm106_vm1, %v7166_v37  ;;  %13077 = vmatmul.mubr.msk.f32.vlgmr.msra.gmra.mrb[94].mxu1 %vm106_vm1, %v7166_v37 }
0x27c9   :  { %14533 = vpow2.f32 %v6994_v0  ;;  %14147 = vmatpush3.bf16.msra.mxu0 %v14849_v42  ;;  %13087 = vmatprep.mubr.msk.f32.mxu0 %vm14630_vm0, %v14631_v12 }
0x27ca   :  { %14148 = vmatprep.subr.bf16.mxu0 %v14629_v4  ;;  %14153 = vmatpush3.bf16.msra.mxu1 %v14882_v50 }
0x27cb   :  { %14154 = vmatprep.subr.bf16.mxu1 %v14629_v4  ;;  %13098 = vmatprep.mubr.msk.f32.mxu1 %vm14630_vm0, %v14631_v12 }
0x27cd   :  { %14150 = vmatpush3.bf16.msra.mxu0 %v14861_v46 }
0x27ce   :  { %14156 = vmatpush3.bf16.msra.mxu1 %v14888_v52  ;;  %13101 = vmatprep.subr.mxu0 %v14631_v12 }
0x27cf   :  { %14163 = vmatprep.subr.bf16.mxu1 %v14629_v4 }
0x27d0   :  { %13088 = vmatmul.mubr.msk.f32.vlgmr.msra.gmra.mrb[92].mxu0 %vm106_vm1, %v7166_v37 }
0x27d1   :  { %13102 = vmatpush3.msk.msra.mxu0 %vm569_vm2, %v15488_v49  ;;  %13103 = vmatprep.mubr.msk.f32.mxu0 %vm14630_vm0, %v14631_v12 }
0x27d2   :  { %14157 = vmatprep.subr.bf16.mxu0 %v14629_v4 }
0x27d3   :  { %v14534_v24 = vpop.eup %14533 }
0x27d4   :  { %v15860_v18 = vmul.f32 %v14534_v24, %v6996_v2  ;;  %13104 = vmatmul.mubr.msk.f32.vlgmr.msra.gmra.mrb[94].mxu0 %vm565_vm3, %v11302_v34 }
0x27d5   :  { %14159 = vmatpush3.bf16.msra.mxu0 %v14939_v17  ;;  %13114 = vmatprep.mubr.msk.f32.mxu0 %vm14630_vm0, %v14631_v12 }
0x27d6   :  { %14160 = vmatprep.subr.bf16.mxu0 %v14629_v4 }
0x27d9   :  { %14162 = vmatpush3.bf16.msra.mxu0 %v14953_v21 }
0x27da   :  { %14169 = vmatprep.subr.bf16.mxu0 %v14629_v4 }
0x289b   :  { %v7236_v31 = vpop.f32.mrb[90].mxu0  ;;  %v7307_v6 = vpop.f32.mrb[94].mxu1 }
0x289c   :  { %v7240_v36 = vmax.f32 %v7166_v37, %v7236_v31  ;;  %v13067_v14 = vpop.f32.mrb[91].mxu0  ;;  %v13078_v3 = vpop.f32.mrb[95].mxu1 }
0x289e   :  { %v7311_v27 = vmax.f32 %v7240_v36, %v7307_v6 }
0x28a3   :  { %v7378_v28 = vpop.f32.mrb[92].mxu0 }
0x28a4   :  { %v7382_v30 = vmax.f32 %v7311_v27, %v7378_v28  ;;  %v13089_v32 = vpop.f32.mrb[93].mxu0 }
0x28a6   :  { %v7383_v33 = vsub.f32 %v7166_v37, %v7382_v30 }
0x28a8   :  { %v7384_v10 = vmul.f32 1.442695, %v7383_v33 }
0x28aa   :  { %14535 = vpow2.f32 %v7384_v10 }
0x28b4   :  { %v14536_v49 = vpop.eup %14535 }
0x28b5   :  { %13099 = vmatmul.mubr.msk.f32.vlgmr.msra.gmra.mrb[96].mxu1 %vm106_vm1, %v14536_v49 }
0x28b6   :  { %14165 = vmatpush3.bf16.msra.mxu1 %v14902_v56  ;;  %13125 = vmatprep.mubr.msk.f32.mxu1 %vm14630_vm0, %v14631_v12 }
0x28b7   :  { %14166 = vmatprep.subr.bf16.mxu1 %v14629_v4 }
0x28ba   :  { %14168 = vmatpush3.bf16.msra.mxu1 %v14908_v58 }
0x28bb   :  { %14175 = vmatprep.subr.bf16.mxu1 %v14629_v4 }
0x28bd   :  { %13126 = vmatmul.mubr.msk.f32.vlgmr.msra.gmra.mrb[98].mxu1 %vm106_vm1, %v15733_v25 }
0x28be   :  { %14177 = vmatpush3.bf16.msra.mxu1 %v14795_v20  ;;  %13147 = vmatprep.mubr.msk.f32.mxu1 %vm14630_vm0, %v14631_v12 }
0x28bf   :  { %14178 = vmatprep.subr.bf16.mxu1 %v14629_v4 }
0x28c2   :  { %14180 = vmatpush3.bf16.msra.mxu1 %v14814_v26 }
0x28c3   :  { %14187 = vmatprep.subr.bf16.mxu1 %v14629_v4 }
0x2988   :  { %v7455_v25 = vpop.f32.mrb[96].mxu1 }
0x2989   :  { %14537 = vrcp.f32 %v7455_v25  ;;  %v13100_v59 = vpop.f32.mrb[97].mxu1 }
0x2990   :  { %v7674_v38 = vpop.f32.mrb[98].mxu1 }
0x2991   :  { %v7675_v47 = vadd.f32 %v15525_v62, %v7674_v38  ;;  %v13127_v43 = vpop.f32.mrb[99].mxu1  ;;  %v7530_v62 = vpop.f32.mrb[94].mxu0 }
0x2992   :  { %v13105_v7 = vpop.f32.mrb[95].mxu0 }
0x2993   :  { %v14538_v44 = vpop.eup %14537  ;;  %7686 = vrot.lane.b32.xlu1 %v7675_v47, %s14633_s24 }
0x2994   :  { %v7460_v11 = vmul.f32 %v14538_v44, %v14536_v49 }
0x2996   :  { %11325 = vst.msk [vmem:[%s16382_s16 + $0x28] sm:$0xff] %vm106_vm1, %v7460_v11  ;;  %13115 = vmatmul.mubr.msk.f32.vlgmr.msra.gmra.mrb[96].mxu0 %vm106_vm1, %v7460_v11 }
0x2997   :  { %14171 = vmatpush3.bf16.msra.mxu0 %v14987_v61  ;;  %13136 = vmatprep.mubr.msk.f32.mxu0 %vm14630_vm0, %v14631_v12 }
0x2998   :  { %14172 = vmatprep.subr.bf16.mxu0 %v14629_v4 }
0x299b   :  { %14174 = vmatpush3.bf16.msra.mxu0 %v14993_v63 }
0x299c   :  { %14181 = vmatprep.subr.bf16.mxu0 %v14629_v4 }
0x2a05   :  { %v7687_v0 = vpop.permute.xlu1 %7686 }
0x2a69   :  { %v7603_v22 = vpop.f32.mrb[96].mxu0 }
0x2a6a   :  { %v7604_v45 = vadd.f32 %v7603_v22, %v7530_v62  ;;  %v13116_v15 = vpop.f32.mrb[97].mxu0 }
0x2a6b   :  { %v11327_v15 = vld [vmem:[%s16391_s0 + $0x30] sm:$0xff] }
0x2a6c   :  { %v7607_v53 = vadd.f32 %v15543_v48, %v7604_v45 }
0x2a6e   :  { %v7678_v55 = vadd.f32 %v7675_v47, %v7607_v53 }
0x2a70   :  { %v11314_v57 = vmul.f32 -1.442695, %v7678_v55 }
0x2a72   :  { %14539 = vpow2.f32 %v11314_v57 }
0x2a7c   :  { %v14540_v8 = vpop.eup %14539 }
0x2a7d   :  { %v7682_v60 = vadd.f32 1.0, %v14540_v8 }
0x2a7f   :  { %14541 = vrcp.f32 %v7682_v60 }
0x2a89   :  { %v14542_v37 = vpop.eup %14541 }
0x2a8a   :  { %v7689_v2 = vmul.f32 %v14542_v37, %v7687_v0  ;;  %v7696_v36 = vsub.f32 1.0, %v14542_v37  ;;  %v7702_v48 = vmul.f32 %v14542_v37, %v15729_v41 }
0x2a8c   :  { %7691 = vrot.lane.b32.xlu0 %v7689_v2, %s14633_s24 }
0x2afe   :  { %v7692_v24 = vpop.permute.xlu0 %7691 }
0x2aff   :  { %v7694_v31 = vadd.f32 %v7692_v24, %v7607_v53 }
0x2b01   :  { %14543 = vtanh.f32 %v7694_v31 }
0x2b0b   :  { %v14544_v6 = vpop.eup %14543 }
0x2b0c   :  { %7698 = vrot.lane.b32.xlu1 %v14544_v6, %s14634_s1 }
0x2b7e   :  { %v7699_v14 = vpop.permute.xlu1 %7698 }
0x2b7f   :  { %v7701_v3 = vmul.f32 %v7699_v14, %v7696_v36 }
0x2b81   :  { %v15904_v27 = vadd.f32 %v7702_v48, %v7701_v3 }
0x2b83   :  { %7705 = vrot.lane.b32.xlu0 %v15904_v27, %s14634_s1 }
0x2bf5   :  { %v15908_v28 = vpop.permute.xlu0 %7705 }
0x2bf6   :  { %11326 = vst.msk [vmem:[%s16383_s17 + $0x28] sm:$0xff] %vm106_vm1, %v15908_v28  ;;  %13137 = vmatmul.mubr.msk.f32.vlgmr.msra.gmra.mrb[98].mxu0 %vm106_vm1, %v15908_v28 }
0x2bf7   :  { %14183 = vmatpush3.bf16.msra.mxu0 %v14803_v23  ;;  %13158 = vmatprep.mubr.msk.f32.mxu0 %vm14630_vm0, %v14631_v12 }
0x2bf8   :  { %14184 = vmatprep.subr.bf16.mxu0 %v14629_v4 }
0x2bfb   :  { %14186 = vmatpush3.bf16.msra.mxu0 %v14823_v29 }
0x2bfc   :  { %14193 = vmatprep.subr.bf16.mxu0 %v14629_v4 }
0x2cc9   :  { %v7775_v41 = vpop.f32.mrb[98].mxu0 }
0x2cca   :  { %v7776_v30 = vadd.f32 %v15571_v51, %v7775_v41  ;;  %v13138_v32 = vpop.f32.mrb[99].mxu0 }
0x2ccc   :  { %13148 = vmatmul.mubr.msk.f32.vlgmr.msra.gmra.mrb[100].mxu1 %vm106_vm1, %v7776_v30  ;;  %13159 = vmatmul.mubr.msk.f32.vlgmr.msra.gmra.mrb[100].mxu0 %vm106_vm1, %v7776_v30 }
0x2ccd   :  { %14189 = vmatpush3.bf16.msra.mxu1 %v14849_v42  ;;  %13169 = vmatprep.mubr.msk.f32.mxu1 %vm14630_vm0, %v14631_v12 }
0x2cce   :  { %14190 = vmatprep.subr.bf16.mxu1 %v14629_v4  ;;  %14195 = vmatpush3.bf16.msra.mxu0 %v14882_v50 }
0x2ccf   :  { %14196 = vmatprep.subr.bf16.mxu0 %v14629_v4  ;;  %13180 = vmatprep.mubr.msk.f32.mxu0 %vm14630_vm0, %v14631_v12 }
0x2cd1   :  { %14192 = vmatpush3.bf16.msra.mxu1 %v14861_v46 }
0x2cd2   :  { %14199 = vmatprep.subr.bf16.mxu1 %v14629_v4  ;;  %14198 = vmatpush3.bf16.msra.mxu0 %v14888_v52 }
0x2cd3   :  { %14205 = vmatprep.subr.bf16.mxu0 %v14629_v4 }
0x2cd4   :  { %13170 = vmatmul.mubr.msk.f32.vlgmr.msra.gmra.mrb[102].mxu1 %vm106_vm1, %v7776_v30 }
0x2cd5   :  { %14201 = vmatpush3.bf16.msra.mxu1 %v14795_v20  ;;  %13191 = vmatprep.mubr.msk.f32.mxu1 %vm14630_vm0, %v14631_v12 }
0x2cd6   :  { %14202 = vmatprep.subr.bf16.mxu1 %v14629_v4 }
0x2cd9   :  { %14204 = vmatpush3.bf16.msra.mxu1 %v14814_v26 }
0x2cda   :  { %14211 = vmatprep.subr.bf16.mxu1 %v14629_v4 }
0x2cdc   :  { %13192 = vmatmul.mubr.msk.f32.vlgmr.msra.gmra.mrb[104].mxu1 %vm106_vm1, %v15835_v54 }
0x2cdd   :  { %14213 = vmatpush3.bf16.msra.mxu1 %v14849_v42  ;;  %13213 = vmatprep.mubr.msk.f32.mxu1 %vm14630_vm0, %v14631_v12 }
0x2cde   :  { %14214 = vmatprep.subr.bf16.mxu1 %v14629_v4 }
0x2ce1   :  { %14216 = vmatpush3.bf16.msra.mxu1 %v14861_v46 }
0x2ce2   :  { %14223 = vmatprep.subr.bf16.mxu1 %v14629_v4 }
0x2ce4   :  { %13214 = vmatmul.mubr.msk.f32.vlgmr.msra.gmra.mrb[106].mxu1 %vm106_vm1, %v15835_v54 }
0x2ce5   :  { %14225 = vmatpush3.bf16.msra.mxu1 %v14745_v5  ;;  %13235 = vmatprep.mubr.msk.f32.mxu1 %vm14630_vm0, %v14631_v12 }
0x2ce6   :  { %14226 = vmatprep.subr.bf16.mxu1 %v14629_v4 }
0x2ce9   :  { %14228 = vmatpush3.bf16.msra.mxu1 %v14769_v13 }
0x2cea   :  { %14235 = vmatprep.subr.bf16.mxu1 %v14629_v4 }
0x2cec   :  { %13236 = vmatmul.mubr.msk.f32.vlgmr.msra.gmra.mrb[108].mxu1 %vm106_vm1, %v11327_v15 }
0x2ced   :  { %14237 = vmatpush3.bf16.msra.mxu1 %v14795_v20  ;;  %13257 = vmatprep.mubr.msk.f32.mxu1 %vm14630_vm0, %v14631_v12 }
0x2cee   :  { %14238 = vmatprep.subr.bf16.mxu1 %v14629_v4 }
0x2cf1   :  { %14240 = vmatpush3.bf16.msra.mxu1 %v14814_v26 }
0x2cf2   :  { %14247 = vmatprep.subr.bf16.mxu1 %v14629_v4 }
0x2d9f   :  { %v7848_v51 = vpop.f32.mrb[100].mxu1  ;;  %v7919_v33 = vpop.f32.mrb[100].mxu0 }
0x2da0   :  { %v7852_v10 = vmax.f32 %v7776_v30, %v7848_v51  ;;  %v13149_v49 = vpop.f32.mrb[101].mxu1  ;;  %v13160_v34 = vpop.f32.mrb[101].mxu0  ;;  %v11329_v51 = vld [vmem:[%s16369_s3 + $0x30] sm:$0xff] }
0x2da2   :  { %v7923_v25 = vmax.f32 %v7852_v10, %v7919_v33  ;;  %v16012_v10 = vld [vmem:[%s16374_s8] ss:$0 sm:$0xff] }
0x2da7   :  { %v7990_v59 = vpop.f32.mrb[102].mxu1 }
0x2da8   :  { %v7994_v38 = vmax.f32 %v7923_v25, %v7990_v59  ;;  %v13171_v47 = vpop.f32.mrb[103].mxu1 }
0x2daa   :  { %v15961_v43 = vsub.f32 %v7776_v30, %v7994_v38 }
0x2dac   :  { %v7996_v44 = vmul.f32 1.442695, %v15961_v43 }
0x2dae   :  { %14545 = vpow2.f32 %v7996_v44 }
0x2daf   :  { %v8143_v11 = vpop.f32.mrb[104].mxu1 }
0x2db0   :  { %v13193_v62 = vpop.f32.mrb[105].mxu1  ;;  %v8147_v57 = vmax.f32 %v15835_v54, %v8143_v11 }
0x2db7   :  { %v8285_v7 = vpop.f32.mrb[106].mxu1 }
0x2db8   :  { %v14546_v22 = vpop.eup %14545  ;;  %v13215_v45 = vpop.f32.mrb[107].mxu1 }
0x2db9   :  { %13181 = vmatmul.mubr.msk.f32.vlgmr.msra.gmra.mrb[102].mxu0 %vm106_vm1, %v14546_v22 }
0x2dba   :  { %14207 = vmatpush3.bf16.msra.mxu0 %v14803_v23  ;;  %13202 = vmatprep.mubr.msk.f32.mxu0 %vm14630_vm0, %v14631_v12 }
0x2dbb   :  { %14208 = vmatprep.subr.bf16.mxu0 %v14629_v4 }
0x2dbe   :  { %14210 = vmatpush3.bf16.msra.mxu0 %v14823_v29 }
0x2dbf   :  { %14217 = vmatprep.subr.bf16.mxu0 %v14629_v4 }
0x2dc1   :  { %13203 = vmatmul.mubr.msk.f32.vlgmr.msra.gmra.mrb[104].mxu0 %vm106_vm1, %v15835_v54 }
0x2dc2   :  { %14219 = vmatpush3.bf16.msra.mxu0 %v14882_v50  ;;  %13224 = vmatprep.mubr.msk.f32.mxu0 %vm14630_vm0, %v14631_v12 }
0x2dc3   :  { %14220 = vmatprep.subr.bf16.mxu0 %v14629_v4 }
0x2dc6   :  { %14222 = vmatpush3.bf16.msra.mxu0 %v14888_v52 }
0x2dc7   :  { %14229 = vmatprep.subr.bf16.mxu0 %v14629_v4 }
0x2e8c   :  { %v8067_v53 = vpop.f32.mrb[102].mxu0 }
0x2e8d   :  { %v13182_v55 = vpop.f32.mrb[103].mxu0 }
0x2e94   :  { %v8214_v8 = vpop.f32.mrb[104].mxu0 }
0x2e95   :  { %v8218_v60 = vmax.f32 %v8147_v57, %v8214_v8  ;;  %v13204_v37 = vpop.f32.mrb[105].mxu0 }
0x2e97   :  { %v8289_v0 = vmax.f32 %v8218_v60, %v8285_v7 }
0x2e99   :  { %v8290_v2 = vsub.f32 %v15835_v54, %v8289_v0  ;;  %v8465_v54 = vpop.f32.mrb[108].mxu1 }
0x2e9a   :  { %v13237_v6 = vpop.f32.mrb[109].mxu1 }
0x2e9b   :  { %v8291_v24 = vmul.f32 1.442695, %v8290_v2 }
0x2e9d   :  { %14547 = vpow2.f32 %v8291_v24 }
0x2e9e   :  { %14549 = vlog2.f32 %v8067_v53 }
0x2ea7   :  { %v14548_v31 = vpop.eup %14547 }
0x2ea8   :  { %13225 = vmatmul.mubr.msk.f32.vlgmr.msra.gmra.mrb[106].mxu0 %vm106_vm1, %v14548_v31  ;;  %v14550_v48 = vpop.eup %14549  ;;  %v11328_v31 = vld [vmem:[%s16392_s19 + $0x30] sm:$0xff] }
0x2ea9   :  { %14231 = vmatpush3.bf16.msra.mxu0 %v14756_v9  ;;  %13246 = vmatprep.mubr.msk.f32.mxu0 %vm14630_vm0, %v14631_v12  ;;  %v8072_v32 = vmul.f32 0.6931472, %v14550_v48 }
0x2eaa   :  { %14232 = vmatprep.subr.bf16.mxu0 %v14629_v4 }
0x2eab   :  { %v8073_v59 = vsub.f32 %v15961_v43, %v8072_v32  ;;  %v16038_v43 = vld [vmem:[%s16376_s10] sm:$0x3f] }
0x2ead   :  { %14234 = vmatpush3.bf16.msra.mxu0 %v14773_v16 }
0x2eae   :  { %14241 = vmatprep.subr.bf16.mxu0 %v14629_v4 }
0x2eb0   :  { %13247 = vmatmul.mubr.msk.f32.vlgmr.msra.gmra.mrb[108].mxu0 %vm106_vm1, %v15908_v28 }
0x2eb1   :  { %14243 = vmatpush3.bf16.msra.mxu0 %v14803_v23  ;;  %13268 = vmatprep.mubr.msk.f32.mxu0 %vm14630_vm0, %v14631_v12 }
0x2eb2   :  { %14244 = vmatprep.subr.bf16.mxu0 %v14629_v4 }
0x2eb5   :  { %14246 = vmatpush3.bf16.msra.mxu0 %v14823_v29 }
0x2eb6   :  { %14253 = vmatprep.subr.bf16.mxu0 %v14629_v4 }
0x2f7b   :  { %v8362_v36 = vpop.f32.mrb[106].mxu0 }
0x2f7c   :  { %14551 = vlog2.f32 %v8362_v36  ;;  %v13226_v14 = vpop.f32.mrb[107].mxu0  ;;  %v16075_v36 = vld [vmem:[%s16379_s13] ss:$0 sm:$0xff] }
0x2f83   :  { %v8535_v3 = vpop.f32.mrb[108].mxu0 }
0x2f84   :  { %v8536_v41 = vadd.f32 %v8535_v3, %v8465_v54  ;;  %v13248_v30 = vpop.f32.mrb[109].mxu0 }
0x2f86   :  { %v14552_v33 = vpop.eup %14551  ;;  %v16015_v49 = vadd.f32 %v16012_v10, %v8536_v41 }
0x2f87   :  { %v8367_v34 = vmul.f32 0.6931472, %v14552_v33 }
0x2f88   :  { %v8540_v25 = vadd.f32 %v11329_v51, %v16015_v49 }
0x2f89   :  { %v8368_v38 = vsub.f32 %v8290_v2, %v8367_v34 }
0x2f8a   :  { %v8541_v47 = vmul.f32 %v8540_v25, %v14846_v40  ;;  %v16093_v25 = vld [vmem:[%s16377_s11] ss:$0 sm:$0xff] }
0x2f8b   :  { %v8369_v44 = vmul.f32 1.442695, %v8368_v38  ;;  %v8371_v11 = vsub.f32 %v8368_v38, %v8073_v59 }
0x2f8c   :  { %13258 = vmatmul.mubr.msk.f32.vlgmr.msra.gmra.mrb[110].mxu1 %vm106_vm1, %v8541_v47  ;;  %13269 = vmatmul.mubr.msk.f32.vlgmr.msra.gmra.mrb[110].mxu0 %vm106_vm1, %v8541_v47 }
0x2f8d   :  { %14553 = vpow2.f32 %v8369_v44  ;;  %14249 = vmatpush3.bf16.msra.mxu1 %v14849_v42  ;;  %13279 = vmatprep.mubr.msk.f32.mxu1 %vm14630_vm0, %v14631_v12 }
0x2f8e   :  { %14250 = vmatprep.subr.bf16.mxu1 %v14629_v4  ;;  %14255 = vmatpush3.bf16.msra.mxu0 %v14882_v50 }
0x2f8f   :  { %14256 = vmatprep.subr.bf16.mxu0 %v14629_v4  ;;  %13290 = vmatprep.mubr.msk.f32.mxu0 %vm14630_vm0, %v14631_v12 }
0x2f91   :  { %14252 = vmatpush3.bf16.msra.mxu1 %v14861_v46 }
0x2f92   :  { %14258 = vmatpush3.bf16.msra.mxu0 %v14888_v52  ;;  %13293 = vmatprep.subr.mxu1 %v14631_v12 }
0x2f93   :  { %14265 = vmatprep.subr.bf16.mxu0 %v14629_v4 }
0x2f94   :  { %13280 = vmatmul.mubr.msk.f32.vlgmr.msra.gmra.mrb[112].mxu1 %vm106_vm1, %v8541_v47 }
0x2f95   :  { %13294 = vmatpush3.msk.msra.mxu1 %vm569_vm2, %v16038_v43  ;;  %13295 = vmatprep.mubr.msk.f32.mxu1 %vm14630_vm0, %v14631_v12 }
0x2f96   :  { %14259 = vmatprep.subr.bf16.mxu1 %v14629_v4 }
0x2f97   :  { %v14554_v62 = vpop.eup %14553 }
0x2f98   :  { %v16045_v7 = vmul.f32 %v14554_v62, %v8371_v11  ;;  %13296 = vmatmul.mubr.msk.f32.vlgmr.msra.gmra.mrb[114].mxu1 %vm565_vm3, %v11328_v31 }
0x2f99   :  { %14261 = vmatpush3.bf16.msra.mxu1 %v14939_v17  ;;  %13306 = vmatprep.mubr.msk.f32.mxu1 %vm14630_vm0, %v14631_v12 }
0x2f9a   :  { %14262 = vmatprep.subr.bf16.mxu1 %v14629_v4 }
0x2f9d   :  { %14264 = vmatpush3.bf16.msra.mxu1 %v14953_v21 }
0x2f9e   :  { %14271 = vmatprep.subr.bf16.mxu1 %v14629_v4 }
0x305f   :  { %v8611_v22 = vpop.f32.mrb[110].mxu1  ;;  %v8682_v45 = vpop.f32.mrb[110].mxu0 }
0x3060   :  { %v8615_v15 = vmax.f32 %v8541_v47, %v8611_v22  ;;  %v13259_v53 = vpop.f32.mrb[111].mxu1  ;;  %v13270_v55 = vpop.f32.mrb[111].mxu0 }
0x3062   :  { %v8686_v57 = vmax.f32 %v8615_v15, %v8682_v45 }
0x3067   :  { %v8753_v8 = vpop.f32.mrb[112].mxu1 }
0x3068   :  { %v8757_v60 = vmax.f32 %v8686_v57, %v8753_v8  ;;  %v13281_v37 = vpop.f32.mrb[113].mxu1 }
0x306a   :  { %v8758_v0 = vsub.f32 %v8541_v47, %v8757_v60 }
0x306b   :  { %v8905_v30 = vpop.f32.mrb[114].mxu1 }
0x306c   :  { %v8759_v2 = vmul.f32 1.442695, %v8758_v0  ;;  %v13297_v32 = vpop.f32.mrb[115].mxu1 }
0x306e   :  { %14555 = vpow2.f32 %v8759_v2 }
0x3078   :  { %v14556_v24 = vpop.eup %14555 }
0x3079   :  { %13291 = vmatmul.mubr.msk.f32.vlgmr.msra.gmra.mrb[112].mxu0 %vm106_vm1, %v14556_v24 }
0x307a   :  { %14267 = vmatpush3.bf16.msra.mxu0 %v14902_v56  ;;  %13317 = vmatprep.mubr.msk.f32.mxu0 %vm14630_vm0, %v14631_v12 }
0x307b   :  { %14268 = vmatprep.subr.bf16.mxu0 %v14629_v4 }
0x307e   :  { %14270 = vmatpush3.bf16.msra.mxu0 %v14908_v58 }
0x307f   :  { %14277 = vmatprep.subr.bf16.mxu0 %v14629_v4 }
0x3081   :  { %13318 = vmatmul.mubr.msk.f32.vlgmr.msra.gmra.mrb[114].mxu0 %vm106_vm1, %v15908_v28 }
0x3082   :  { %14279 = vmatpush3.bf16.msra.mxu0 %v14795_v20  ;;  %13339 = vmatprep.mubr.msk.f32.mxu0 %vm14630_vm0, %v14631_v12 }
0x3083   :  { %14280 = vmatprep.subr.bf16.mxu0 %v14629_v4 }
0x3086   :  { %14282 = vmatpush3.bf16.msra.mxu0 %v14814_v26 }
0x3087   :  { %14289 = vmatprep.subr.bf16.mxu0 %v14629_v4 }
0x314c   :  { %v8830_v28 = vpop.f32.mrb[112].mxu0 }
0x314d   :  { %14557 = vrcp.f32 %v8830_v28  ;;  %v13292_v54 = vpop.f32.mrb[113].mxu0 }
0x3154   :  { %v9049_v6 = vpop.f32.mrb[114].mxu0 }
0x3155   :  { %v9050_v14 = vadd.f32 %v16075_v36, %v9049_v6  ;;  %v13319_v48 = vpop.f32.mrb[115].mxu0 }
0x3157   :  { %v14558_v3 = vpop.eup %14557  ;;  %9061 = vrot.lane.b32.xlu1 %v9050_v14, %s14633_s24 }
0x3158   :  { %v8835_v41 = vmul.f32 %v14558_v3, %v14556_v24  ;;  %v16121_v24 = vld [vmem:[%s16381_s15] ss:$0 sm:$0xff] }
0x315a   :  { %11351 = vst.msk [vmem:[%s16382_s16 + $0x30] sm:$0xff] %vm106_vm1, %v8835_v41  ;;  %13307 = vmatmul.mubr.msk.f32.vlgmr.msra.gmra.mrb[116].mxu1 %vm106_vm1, %v8835_v41 }
0x315b   :  { %14273 = vmatpush3.bf16.msra.mxu1 %v14987_v61  ;;  %13328 = vmatprep.mubr.msk.f32.mxu1 %vm14630_vm0, %v14631_v12 }
0x315c   :  { %14274 = vmatprep.subr.bf16.mxu1 %v14629_v4 }
0x315f   :  { %14276 = vmatpush3.bf16.msra.mxu1 %v14993_v63 }
0x3160   :  { %14283 = vmatprep.subr.bf16.mxu1 %v14629_v4 }
0x31c9   :  { %v9062_v22 = vpop.permute.xlu1 %9061 }
0x322d   :  { %v8978_v51 = vpop.f32.mrb[116].mxu1 }
0x322e   :  { %v8979_v33 = vadd.f32 %v8978_v51, %v8905_v30  ;;  %v13308_v34 = vpop.f32.mrb[117].mxu1 }
0x3230   :  { %v8982_v59 = vadd.f32 %v16093_v25, %v8979_v33 }
0x3232   :  { %v9053_v38 = vadd.f32 %v9050_v14, %v8982_v59 }
0x3234   :  { %v11340_v47 = vmul.f32 -1.442695, %v9053_v38 }
0x3236   :  { %14559 = vpow2.f32 %v11340_v47 }
0x3240   :  { %v14560_v44 = vpop.eup %14559 }
0x3241   :  { %v9057_v11 = vadd.f32 1.0, %v14560_v44  ;;  %v11353_v44 = vld [vmem:[%s16391_s0 + $0x38] sm:$0xff] }
0x3243   :  { %14561 = vrcp.f32 %v9057_v11 }
0x324d   :  { %v14562_v62 = vpop.eup %14561 }
0x324e   :  { %v9064_v45 = vmul.f32 %v14562_v62, %v9062_v22  ;;  %v9071_v57 = vsub.f32 1.0, %v14562_v62  ;;  %v9077_v60 = vmul.f32 %v14562_v62, %v15904_v27 }
0x3250   :  { %9066 = vrot.lane.b32.xlu0 %v9064_v45, %s14633_s24 }
0x32c2   :  { %v9067_v15 = vpop.permute.xlu0 %9066 }
0x32c3   :  { %v9069_v53 = vadd.f32 %v9067_v15, %v8982_v59 }
0x32c5   :  { %14563 = vtanh.f32 %v9069_v53 }
0x32cf   :  { %v14564_v55 = vpop.eup %14563 }
0x32d0   :  { %9073 = vrot.lane.b32.xlu1 %v14564_v55, %s14634_s1 }
0x3342   :  { %v9074_v8 = vpop.permute.xlu1 %9073 }
0x3343   :  { %v9076_v37 = vmul.f32 %v9074_v8, %v9071_v57 }
0x3345   :  { %v16099_v0 = vadd.f32 %v9077_v60, %v9076_v37 }
0x3347   :  { %9080 = vrot.lane.b32.xlu0 %v16099_v0, %s14634_s1 }
0x33b9   :  { %v16103_v2 = vpop.permute.xlu0 %9080 }
0x33ba   :  { %11352 = vst.msk [vmem:[%s16383_s17 + $0x30] sm:$0xff] %vm106_vm1, %v16103_v2  ;;  %13329 = vmatmul.mubr.msk.f32.vlgmr.msra.gmra.mrb[118].mxu1 %vm106_vm1, %v16103_v2 }
0x33bb   :  { %14285 = vmatpush3.bf16.msra.mxu1 %v14803_v23  ;;  %13350 = vmatprep.mubr.msk.f32.mxu1 %vm14630_vm0, %v14631_v12 }
0x33bc   :  { %14286 = vmatprep.subr.bf16.mxu1 %v14629_v4 }
0x33bf   :  { %14288 = vmatpush3.bf16.msra.mxu1 %v14823_v29 }
0x33c0   :  { %14295 = vmatprep.subr.bf16.mxu1 %v14629_v4 }
0x348d   :  { %v9150_v27 = vpop.f32.mrb[118].mxu1 }
0x348e   :  { %v9151_v31 = vadd.f32 %v16121_v24, %v9150_v27  ;;  %v13330_v28 = vpop.f32.mrb[119].mxu1 }
0x3490   :  { %13340 = vmatmul.mubr.msk.f32.vlgmr.msra.gmra.mrb[116].mxu0 %vm106_vm1, %v9151_v31  ;;  %13351 = vmatmul.mubr.msk.f32.vlgmr.msra.gmra.mrb[120].mxu1 %vm106_vm1, %v9151_v31 }
0x3491   :  { %14291 = vmatpush3.bf16.msra.mxu0 %v14849_v42  ;;  %13361 = vmatprep.mubr.msk.f32.mxu0 %vm14630_vm0, %v14631_v12 }
0x3492   :  { %14292 = vmatprep.subr.bf16.mxu0 %v14629_v4  ;;  %14297 = vmatpush3.bf16.msra.mxu1 %v14882_v50 }
0x3493   :  { %14298 = vmatprep.subr.bf16.mxu1 %v14629_v4  ;;  %13372 = vmatprep.mubr.msk.f32.mxu1 %vm14630_vm0, %v14631_v12 }
0x3495   :  { %14294 = vmatpush3.bf16.msra.mxu0 %v14861_v46 }
0x3496   :  { %14301 = vmatprep.subr.bf16.mxu0 %v14629_v4  ;;  %14300 = vmatpush3.bf16.msra.mxu1 %v14888_v52 }
0x3497   :  { %14307 = vmatprep.subr.bf16.mxu1 %v14629_v4 }
0x3498   :  { %13362 = vmatmul.mubr.msk.f32.vlgmr.msra.gmra.mrb[118].mxu0 %vm106_vm1, %v9151_v31 }
0x3499   :  { %14303 = vmatpush3.bf16.msra.mxu0 %v14795_v20  ;;  %13383 = vmatprep.mubr.msk.f32.mxu0 %vm14630_vm0, %v14631_v12 }
0x349a   :  { %14304 = vmatprep.subr.bf16.mxu0 %v14629_v4 }
0x349d   :  { %14306 = vmatpush3.bf16.msra.mxu0 %v14814_v26 }
0x349e   :  { %14313 = vmatprep.subr.bf16.mxu0 %v14629_v4 }
0x34a0   :  { %13384 = vmatmul.mubr.msk.f32.vlgmr.msra.gmra.mrb[120].mxu0 %vm106_vm1, %v16015_v49 }
0x34a1   :  { %14315 = vmatpush3.bf16.msra.mxu0 %v14849_v42  ;;  %13405 = vmatprep.mubr.msk.f32.mxu0 %vm14630_vm0, %v14631_v12 }
0x34a2   :  { %14316 = vmatprep.subr.bf16.mxu0 %v14629_v4 }
0x34a5   :  { %14318 = vmatpush3.bf16.msra.mxu0 %v14861_v46 }
0x34a6   :  { %14325 = vmatprep.subr.bf16.mxu0 %v14629_v4 }
0x34a8   :  { %13406 = vmatmul.mubr.msk.f32.vlgmr.msra.gmra.mrb[122].mxu0 %vm106_vm1, %v16015_v49 }
0x34a9   :  { %14327 = vmatpush3.bf16.msra.mxu0 %v14745_v5  ;;  %13427 = vmatprep.mubr.msk.f32.mxu0 %vm14630_vm0, %v14631_v12 }
0x34aa   :  { %14328 = vmatprep.subr.bf16.mxu0 %v14629_v4 }
0x34ad   :  { %14330 = vmatpush3.bf16.msra.mxu0 %v14769_v13 }
0x34ae   :  { %14337 = vmatprep.subr.bf16.mxu0 %v14629_v4 }
0x34b0   :  { %13428 = vmatmul.mubr.msk.f32.vlgmr.msra.gmra.mrb[124].mxu0 %vm106_vm1, %v11353_v44 }
0x34b1   :  { %14339 = vmatpush3.bf16.msra.mxu0 %v14795_v20  ;;  %13449 = vmatprep.mubr.msk.f32.mxu0 %vm14630_vm0, %v14631_v12 }
0x34b2   :  { %14340 = vmatprep.subr.bf16.mxu0 %v14629_v4 }
0x34b5   :  { %14342 = vmatpush3.bf16.msra.mxu0 %v14814_v26 }
0x34b6   :  { %14349 = vmatprep.subr.bf16.mxu0 %v14629_v4 }
0x3563   :  { %v9223_v54 = vpop.f32.mrb[116].mxu0  ;;  %v9294_v6 = vpop.f32.mrb[120].mxu1 }
0x3564   :  { %v9227_v14 = vmax.f32 %v9151_v31, %v9223_v54  ;;  %v13341_v48 = vpop.f32.mrb[117].mxu0  ;;  %v13352_v3 = vpop.f32.mrb[121].mxu1 }
0x3566   :  { %v9298_v41 = vmax.f32 %v9227_v14, %v9294_v6  ;;  %v11355_v14 = vld [vmem:[%s16369_s3 + $0x38] sm:$0xff] }
0x356b   :  { %v9365_v30 = vpop.f32.mrb[118].mxu0 }
0x356c   :  { %v9369_v32 = vmax.f32 %v9298_v41, %v9365_v30  ;;  %v13363_v51 = vpop.f32.mrb[119].mxu0 }
0x356e   :  { %v16161_v33 = vsub.f32 %v9151_v31, %v9369_v32 }
0x3570   :  { %v9371_v5 = vmul.f32 1.442695, %v16161_v33 }
0x3572   :  { %14565 = vpow2.f32 %v9371_v5 }
0x3573   :  { %v9518_v34 = vpop.f32.mrb[120].mxu0 }
0x3574   :  { %v13385_v59 = vpop.f32.mrb[121].mxu0  ;;  %v9522_v22 = vmax.f32 %v16015_v49, %v9518_v34 }
0x357b   :  { %v9660_v38 = vpop.f32.mrb[122].mxu0 }
0x357c   :  { %v14566_v13 = vpop.eup %14565  ;;  %v13407_v47 = vpop.f32.mrb[123].mxu0 }
0x357d   :  { %13373 = vmatmul.mubr.msk.f32.vlgmr.msra.gmra.mrb[122].mxu1 %vm106_vm1, %v14566_v13 }
0x357e   :  { %14309 = vmatpush3.bf16.msra.mxu1 %v14803_v23  ;;  %13394 = vmatprep.mubr.msk.f32.mxu1 %vm14630_vm0, %v14631_v12 }
0x357f   :  { %14310 = vmatprep.subr.bf16.mxu1 %v14629_v4 }
0x3582   :  { %14312 = vmatpush3.bf16.msra.mxu1 %v14823_v29 }
0x3583   :  { %14319 = vmatprep.subr.bf16.mxu1 %v14629_v4 }
0x3585   :  { %13395 = vmatmul.mubr.msk.f32.vlgmr.msra.gmra.mrb[124].mxu1 %vm106_vm1, %v16015_v49 }
0x3586   :  { %14321 = vmatpush3.bf16.msra.mxu1 %v14882_v50  ;;  %13416 = vmatprep.mubr.msk.f32.mxu1 %vm14630_vm0, %v14631_v12 }
0x3587   :  { %14322 = vmatprep.subr.bf16.mxu1 %v14629_v4 }
0x358a   :  { %14324 = vmatpush3.bf16.msra.mxu1 %v14888_v52 }
0x358b   :  { %14331 = vmatprep.subr.bf16.mxu1 %v14629_v4 }
0x3650   :  { %v9442_v11 = vpop.f32.mrb[122].mxu1 }
0x3651   :  { %v13374_v62 = vpop.f32.mrb[123].mxu1 }
0x3658   :  { %v9589_v45 = vpop.f32.mrb[124].mxu1 }
0x3659   :  { %v9593_v15 = vmax.f32 %v9522_v22, %v9589_v45  ;;  %v13396_v53 = vpop.f32.mrb[125].mxu1 }
0x365b   :  { %v9664_v55 = vmax.f32 %v9593_v15, %v9660_v38 }
0x365d   :  { %v9665_v57 = vsub.f32 %v16015_v49, %v9664_v55 }
0x365f   :  { %v9666_v8 = vmul.f32 1.442695, %v9665_v57 }
0x3661   :  { %14567 = vpow2.f32 %v9666_v8 }
0x3662   :  { %14569 = vlog2.f32 %v9442_v11 }
0x366b   :  { %v14568_v60 = vpop.eup %14567 }
0x366c   :  { %13417 = vmatmul.mubr.msk.f32.vlgmr.msra.gmra.mrb[126].mxu1 %vm106_vm1, %v14568_v60  ;;  %v14570_v27 = vpop.eup %14569 }
0x366d   :  { %14333 = vmatpush3.bf16.msra.mxu1 %v14756_v9  ;;  %13438 = vmatprep.mubr.msk.f32.mxu1 %vm14630_vm0, %v14631_v12  ;;  %v9840_v9 = vpop.f32.mrb[124].mxu0  ;;  %v9447_v6 = vmul.f32 0.6931472, %v14570_v27 }
0x366e   :  { %14334 = vmatprep.subr.bf16.mxu1 %v14629_v4  ;;  %v13429_v49 = vpop.f32.mrb[125].mxu0 }
0x366f   :  { %v9448_v32 = vsub.f32 %v16161_v33, %v9447_v6 }
0x3671   :  { %14336 = vmatpush3.bf16.msra.mxu1 %v14773_v16 }
0x3672   :  { %14343 = vmatprep.subr.bf16.mxu1 %v14629_v4 }
0x3674   :  { %13439 = vmatmul.mubr.msk.f32.vlgmr.msra.gmra.mrb[128].mxu1 %vm106_vm1, %v16103_v2 }
0x3675   :  { %14345 = vmatpush3.bf16.msra.mxu1 %v14803_v23  ;;  %13460 = vmatprep.mubr.msk.f32.mxu1 %vm14630_vm0, %v14631_v12 }
0x3676   :  { %14346 = vmatprep.subr.bf16.mxu1 %v14629_v4 }
0x3679   :  { %14348 = vmatpush3.bf16.msra.mxu1 %v14823_v29 }
0x367a   :  { %14355 = vmatprep.subr.bf16.mxu1 %v14629_v4 }
0x373f   :  { %v9737_v16 = vpop.f32.mrb[126].mxu1 }
0x3740   :  { %14571 = vlog2.f32 %v9737_v16  ;;  %v13418_v37 = vpop.f32.mrb[127].mxu1 }
0x3747   :  { %v9910_v31 = vpop.f32.mrb[128].mxu1 }
0x3748   :  { %v9911_v28 = vadd.f32 %v9910_v31, %v9840_v9  ;;  %v13440_v54 = vpop.f32.mrb[129].mxu1 }
0x374a   :  { %v14572_v48 = vpop.eup %14571  ;;  %v16210_v3 = vadd.f32 %v16012_v10, %v9911_v28 }
0x374b   :  { %v9742_v41 = vmul.f32 0.6931472, %v14572_v48 }
0x374c   :  { %v9915_v30 = vadd.f32 %v11355_v14, %v16210_v3 }
0x374d   :  { %v9743_v51 = vsub.f32 %v9665_v57, %v9742_v41 }
0x374e   :  { %v9916_v5 = vmul.f32 %v9915_v30, %v14846_v40  ;;  %v5623_v30 = vsel %vm106_vm1, %v15685_v19, 0.0  ;;  %v4248_v19 = vsel %vm106_vm1, %v15495_v35, 0.0 }
0x374f   :  { %v9744_v34 = vmul.f32 1.442695, %v9743_v51  ;;  %v9746_v59 = vsub.f32 %v9743_v51, %v9448_v32  ;;  %v8373_v32 = vsel %vm106_vm1, %v16045_v7, 0.0  ;;  %v6998_v7 = vsel %vm106_vm1, %v15860_v18, 0.0 }
0x3750   :  { %13450 = vmatmul.mubr.msk.f32.vlgmr.msra.gmra.mrb[126].mxu0 %vm106_vm1, %v9916_v5  ;;  %13461 = vmatmul.mubr.msk.f32.vlgmr.msra.gmra.mrb[130].mxu1 %vm106_vm1, %v9916_v5 }
0x3751   :  { %14573 = vpow2.f32 %v9744_v34  ;;  %14351 = vmatpush3.bf16.msra.mxu0 %v14849_v42  ;;  %13471 = vmatprep.mubr.msk.f32.mxu0 %vm14630_vm0, %v14631_v12 }
0x3752   :  { %14352 = vmatprep.subr.bf16.mxu0 %v14629_v4  ;;  %14357 = vmatpush3.bf16.msra.mxu1 %v14882_v50 }
0x3753   :  { %14358 = vmatprep.subr.bf16.mxu1 %v14629_v4  ;;  %13482 = vmatprep.mubr.msk.f32.mxu1 %vm14630_vm0, %v14631_v12 }
0x3755   :  { %14354 = vmatpush3.bf16.msra.mxu0 %v14861_v46 }
0x3756   :  { %14360 = vmatpush3.bf16.msra.mxu1 %v14888_v52  ;;  %13485 = vmatprep.subr.mxu0 %v14631_v12 }
0x3757   :  { %14367 = vmatprep.subr.bf16.mxu1 %v14629_v4 }
0x3758   :  { %13472 = vmatmul.mubr.msk.f32.vlgmr.msra.gmra.mrb[128].mxu0 %vm106_vm1, %v9916_v5 }
0x3759   :  { %13486 = vmatpush3.msk.msra.mxu0 %vm569_vm2, %v16038_v43  ;;  %13487 = vmatprep.mubr.msk.f32.mxu0 %vm14630_vm0, %v14631_v12 }
0x375a   :  { %14361 = vmatprep.subr.bf16.mxu0 %v14629_v4 }
0x375b   :  { %v14574_v40 = vpop.eup %14573 }
0x375c   :  { %v16235_v10 = vmul.f32 %v14574_v40, %v9746_v59 }
0x3823   :  { %v9986_v33 = vpop.f32.mrb[126].mxu0  ;;  %v10057_v38 = vpop.f32.mrb[130].mxu1 }
0x3824   :  { %v9990_v13 = vmax.f32 %v9916_v5, %v9986_v33  ;;  %v13451_v47 = vpop.f32.mrb[127].mxu0  ;;  %v13462_v44 = vpop.f32.mrb[131].mxu1  ;;  %v9748_v33 = vsel %vm106_vm1, %v16235_v10, 0.0 }
0x3826   :  { %v10061_v11 = vmax.f32 %v9990_v13, %v10057_v38 }
0x382b   :  { %v10128_v62 = vpop.f32.mrb[128].mxu0 }
0x382c   :  { %v10132_v22 = vmax.f32 %v10061_v11, %v10128_v62  ;;  %v13473_v45 = vpop.f32.mrb[129].mxu0 }
0x382e   :  { %v10133_v15 = vsub.f32 %v9916_v5, %v10132_v22 }
0x3830   :  { %v10134_v53 = vmul.f32 1.442695, %v10133_v15 }
0x3832   :  { %14575 = vpow2.f32 %v10134_v53 }
0x383c   :  { %v14576_v43 = vpop.eup %14575 }
0x383d   :  { %13483 = vmatmul.mubr.msk.f32.vlgmr.msra.gmra.mrb[132].mxu1 %vm106_vm1, %v14576_v43 }
0x383e   :  { %14369 = vmatpush3.bf16.msra.mxu1 %v14902_v56  ;;  %13509 = vmatprep.mubr.msk.f32.mxu1 %vm14630_vm0, %v14631_v12  ;;  %v11354_v56 = vld [vmem:[%s16392_s19 + $0x38] sm:$0xff] }
0x383f   :  { %14370 = vmatprep.subr.bf16.mxu1 %v14629_v4  ;;  %13488 = vmatmul.mubr.msk.f32.vlgmr.msra.gmra.mrb[130].mxu0 %vm565_vm3, %v11354_v56 }
0x3840   :  { %14363 = vmatpush3.bf16.msra.mxu0 %v14939_v17  ;;  %13498 = vmatprep.mubr.msk.f32.mxu0 %vm14630_vm0, %v14631_v12 }
0x3841   :  { %14364 = vmatprep.subr.bf16.mxu0 %v14629_v4 }
0x3842   :  { %14372 = vmatpush3.bf16.msra.mxu1 %v14908_v58 }
0x3843   :  { %14379 = vmatprep.subr.bf16.mxu1 %v14629_v4 }
0x3844   :  { %14366 = vmatpush3.bf16.msra.mxu0 %v14953_v21 }
0x3845   :  { %13510 = vmatmul.mubr.msk.f32.vlgmr.msra.gmra.mrb[134].mxu1 %vm106_vm1, %v16103_v2  ;;  %14373 = vmatprep.subr.bf16.mxu0 %v14629_v4 }
0x3846   :  { %14381 = vmatpush3.bf16.msra.mxu1 %v14795_v20  ;;  %13531 = vmatprep.mubr.msk.f32.mxu1 %vm14630_vm0, %v14631_v12 }
0x3847   :  { %14382 = vmatprep.subr.bf16.mxu1 %v14629_v4 }
0x384a   :  { %14384 = vmatpush3.bf16.msra.mxu1 %v14814_v26 }
0x384b   :  { %14391 = vmatprep.subr.bf16.mxu1 %v14629_v4 }
0x3910   :  { %v10205_v58 = vpop.f32.mrb[132].mxu1 }
0x3911   :  { %14577 = vrcp.f32 %v10205_v58  ;;  %v13484_v2 = vpop.f32.mrb[133].mxu1 }
0x3912   :  { %v10280_v21 = vpop.f32.mrb[130].mxu0 }
0x3918   :  { %v10424_v55 = vpop.f32.mrb[134].mxu1 }
0x3919   :  { %v10425_v57 = vadd.f32 %v16075_v36, %v10424_v55  ;;  %v13511_v8 = vpop.f32.mrb[135].mxu1  ;;  %v13489_v36 = vpop.f32.mrb[131].mxu0 }
0x391b   :  { %v14578_v60 = vpop.eup %14577  ;;  %10436 = vrot.lane.b32.xlu1 %v10425_v57, %s14633_s24 }
0x391c   :  { %v10210_v17 = vmul.f32 %v14578_v60, %v14576_v43 }
0x391e   :  { %11377 = vst.msk [vmem:[%s16382_s16 + $0x38] sm:$0xff] %vm106_vm1, %v10210_v17  ;;  %13499 = vmatmul.mubr.msk.f32.vlgmr.msra.gmra.mrb[132].mxu0 %vm106_vm1, %v10210_v17 }
0x391f   :  { %14375 = vmatpush3.bf16.msra.mxu0 %v14987_v61  ;;  %13520 = vmatprep.mubr.msk.f32.mxu0 %vm14630_vm0, %v14631_v12 }
0x3920   :  { %14376 = vmatprep.subr.bf16.mxu0 %v14629_v4 }
0x3923   :  { %14378 = vmatpush3.bf16.msra.mxu0 %v14993_v63 }
0x3924   :  { %14385 = vmatprep.subr.bf16.mxu0 %v14629_v4 }
0x398d   :  { %v10437_v6 = vpop.permute.xlu1 %10436 }
0x39f1   :  { %v10353_v9 = vpop.f32.mrb[132].mxu0 }
0x39f2   :  { %v10354_v49 = vadd.f32 %v10353_v9, %v10280_v21  ;;  %v13500_v16 = vpop.f32.mrb[133].mxu0 }
0x39f4   :  { %v10357_v37 = vadd.f32 %v16093_v25, %v10354_v49  ;;  %v1500_v25 = vsel %vm106_vm1, %v15135_v39, 0.0  ;;  %v2873_v39 = vsel %vm106_vm1, %v15310_v1, 0.0 }
0x39f6   :  { %v10428_v27 = vadd.f32 %v10425_v57, %v10357_v37 }
0x39f8   :  { %v11366_v31 = vmul.f32 -1.442695, %v10428_v27 }
0x39fa   :  { %14579 = vpow2.f32 %v11366_v31 }
0x3a04   :  { %v14580_v61 = vpop.eup %14579 }
0x3a05   :  { %v10432_v28 = vadd.f32 1.0, %v14580_v61 }
0x3a07   :  { %14581 = vrcp.f32 %v10432_v28 }
0x3a11   :  { %v14582_v54 = vpop.eup %14581 }
0x3a12   :  { %v10439_v14 = vmul.f32 %v14582_v54, %v10437_v6  ;;  %v10446_v51 = vsub.f32 1.0, %v14582_v54  ;;  %v10452_v34 = vmul.f32 %v14582_v54, %v16099_v0 }
0x3a14   :  { %10441 = vrot.lane.b32.xlu0 %v10439_v14, %s14633_s24 }
0x3a86   :  { %v10442_v63 = vpop.permute.xlu0 %10441 }
0x3a87   :  { %v10444_v48 = vadd.f32 %v10442_v63, %v10357_v37 }
0x3a89   :  { %14583 = vtanh.f32 %v10444_v48 }
0x3a93   :  { %v14584_v41 = vpop.eup %14583 }
0x3a94   :  { %10448 = vrot.lane.b32.xlu1 %v14584_v41, %s14634_s1 }
0x3ab8   :  { %1501 = vadd.xlane.f32.xlu1 %v1500_v25 }
0x3abc   :  { %5624 = vadd.xlane.f32.xlu1 %v5623_v30 }
0x3ac0   :  { %8374 = vadd.xlane.f32.xlu1 %v8373_v32 }
0x3b06   :  { %v10449_v5 = vpop.permute.xlu1 %10448 }
0x3b07   :  { %v10451_v59 = vmul.f32 %v10449_v5, %v10446_v51 }
0x3b09   :  { %v10453_v40 = vadd.f32 %v10452_v34, %v10451_v59 }
0x3b0b   :  { %10455 = vrot.lane.b32.xlu0 %v10453_v40, %s14634_s1 }
0x3b2a   :  { %2874 = vadd.xlane.f32.xlu0 %v2873_v39 }
0x3b2e   :  { %4249 = vadd.xlane.f32.xlu0 %v4248_v19 }
0x3b32   :  { %6999 = vadd.xlane.f32.xlu0 %v6998_v7 }
0x3b36   :  { %9749 = vadd.xlane.f32.xlu0 %v9748_v33 }
0x3b45   :  { %v1502_v61 = vpop.xlane.xlu1 %1501 }
0x3b46   :  { %v11196_v6 = vadd.f32 -1.0, %v1502_v61 }
0x3b48   :  { %v1504_v41 = vmax.f32 %v11196_v6, 0.0 }
0x3b49   :  { %v5625_v48 = vpop.xlane.xlu1 %5624 }
0x3b4a   :  { %v11272_v32 = vadd.f32 -1.0, %v5625_v48  ;;  %v1505_v5 = vrot.slane %v1504_v41, 4 }
0x3b4c   :  { %v5627_v40 = vmax.f32 %v11272_v32, 0.0  ;;  %v1506_v7 = vadd.f32 %v1505_v5, %v1504_v41 }
0x3b4d   :  { %v8375_v19 = vpop.xlane.xlu1 %8374 }
0x3b7d   :  { %v10456_v0 = vpop.permute.xlu0 %10455 }
0x3b7e   :  { %11378 = vst.msk [vmem:[%s16383_s17 + $0x38] sm:$0xff] %vm106_vm1, %v10456_v0  ;;  %13521 = vmatmul.mubr.msk.f32.vlgmr.msra.gmra.mrb[134].mxu0 %vm106_vm1, %v10456_v0  ;;  %s14635_s17 = smov [#allocation3]  }
0x3b7f   :  { %14387 = vmatpush3.bf16.msra.mxu0 %v14803_v23  ;;  %13542 = vmatprep.mubr.msk.f32.mxu0 %vm14630_vm0, %v14631_v12  ;;  %s11153_s1 = sshll.u32 %s14635_s17, 4  ;;  %s11154_s1 = int_to_ptr.vmem [resolvable:$true] %s11153_s1 }
0x3b80   :  { %14388 = vmatprep.subr.bf16.mxu0 %v14629_v4  ;;  %s14605_s28 = scalar_lea.vmem %s11154_s1, 16  ;;  %s14609_s5 = scalar_lea.vmem %s11154_s1, 32 }
0x3b81   :  { %p14606_p0 = scmp.ne.s32.totalorder %s11154_s1, %s14605_s28  ;;  %p14610_p1 = scmp.lt.s32.totalorder %s11154_s1, %s11154_s1 }
0x3b82   :  { %p14611_p2 = scmp.lt.s32.totalorder %s14609_s5, %s14605_s28 }
0x3b83   :  { %14390 = vmatpush3.bf16.msra.mxu0 %v14823_v29 }
0x3b84   :  { %14397 = vmatprep.subr.bf16.mxu0 %v14629_v4  ;;  %p14612_p3 = por %p14611_p2, %p14610_p1 }
0x3b86   :  { %p14613_p4 = pnand %p14612_p3, %p14606_p0 }
0x3bb7   :  { %v2875_v31 = vpop.xlane.xlu0 %2874 }
0x3bb8   :  { %v11220_v54 = vadd.f32 -1.0, %v2875_v31 }
0x3bba   :  { %v2877_v63 = vmax.f32 %v11220_v54, 0.0 }
0x3bbb   :  { %v4250_v28 = vpop.xlane.xlu0 %4249 }
0x3bbc   :  { %v11246_v14 = vadd.f32 -1.0, %v4250_v28  ;;  %v2878_v51 = vrot.slane %v2877_v63, 4 }
0x3bbe   :  { %v4252_v25 = vmax.f32 %v11246_v14, 0.0  ;;  %v2879_v39 = vadd.f32 %v2878_v51, %v2877_v63 }
0x3bbf   :  { %v7000_v30 = vpop.xlane.xlu0 %6999 }
0x3bc0   :  { %v4253_v34 = vrot.slane %v4252_v25, 4  ;;  %v11298_v59 = vadd.f32 -1.0, %v7000_v30 }
0x3bc2   :  { %v4254_v33 = vadd.f32 %v4253_v34, %v4252_v25  ;;  %v7002_v0 = vmax.f32 %v11298_v59, 0.0 }
0x3c51   :  { %v10525_v1 = vpop.f32.mrb[134].mxu0 }
0x3c52   :  { %v10526_v35 = vadd.f32 %v16121_v24, %v10525_v1  ;;  %v13522_v18 = vpop.f32.mrb[135].mxu0  ;;  %v9750_v1 = vpop.xlane.xlu0 %9749 }
0x3c53   :  { %v11324_v18 = vadd.f32 -1.0, %v8375_v19 }
0x3c54   :  { %13532 = vmatmul.mubr.msk.f32.vlgmr.msra.gmra.mrb[136].mxu1 %vm106_vm1, %v10526_v35  ;;  %13543 = vmatmul.mubr.msk.f32.vlgmr.msra.gmra.mrb[136].mxu0 %vm106_vm1, %v10526_v35 }
0x3c55   :  { %14393 = vmatpush3.bf16.msra.mxu1 %v14849_v42  ;;  %13553 = vmatprep.mubr.msk.f32.mxu1 %vm14630_vm0, %v14631_v12 }
0x3c56   :  { %14394 = vmatprep.subr.bf16.mxu1 %v14629_v4  ;;  %14399 = vmatpush3.bf16.msra.mxu0 %v14882_v50 }
0x3c57   :  { %14400 = vmatprep.subr.bf16.mxu0 %v14629_v4  ;;  %13564 = vmatprep.mubr.msk.f32.mxu0 %vm14630_vm0, %v14631_v12 }
0x3c59   :  { %14396 = vmatpush3.bf16.msra.mxu1 %v14861_v46 }
0x3c5a   :  { %14403 = vmatprep.subr.bf16.mxu1 %v14629_v4  ;;  %14402 = vmatpush3.bf16.msra.mxu0 %v14888_v52 }
0x3c5b   :  { %14409 = vmatprep.subr.bf16.mxu0 %v14629_v4 }
0x3c5c   :  { %13554 = vmatmul.mubr.msk.f32.vlgmr.msra.gmra.mrb[138].mxu1 %vm106_vm1, %v10526_v35 }
0x3c5d   :  { %14405 = vmatpush3.bf16.msra.mxu1 %v14795_v20  ;;  %13575 = vmatprep.mubr.msk.f32.mxu1 %vm14630_vm0, %v14631_v12 }
0x3c5e   :  { %14406 = vmatprep.subr.bf16.mxu1 %v14629_v4 }
0x3c61   :  { %14408 = vmatpush3.bf16.msra.mxu1 %v14814_v26 }
0x3c62   :  { %14415 = vmatprep.subr.bf16.mxu1 %v14629_v4 }
0x3c64   :  { %13576 = vmatmul.mubr.msk.f32.vlgmr.msra.gmra.mrb[140].mxu1 %vm106_vm1, %v16210_v3 }
0x3c65   :  { %14417 = vmatpush3.bf16.msra.mxu1 %v14849_v42  ;;  %13597 = vmatprep.mubr.msk.f32.mxu1 %vm14630_vm0, %v14631_v12 }
0x3c66   :  { %14418 = vmatprep.subr.bf16.mxu1 %v14629_v4 }
0x3c69   :  { %14420 = vmatpush3.bf16.msra.mxu1 %v14861_v46 }
0x3c6c   :  { %13598 = vmatmul.mubr.msk.f32.vlgmr.msra.gmra.mrb[142].mxu1 %vm106_vm1, %v16210_v3 }
0x3d27   :  { %v10598_v20 = vpop.f32.mrb[136].mxu1  ;;  %v10669_v24 = vpop.f32.mrb[136].mxu0 }
0x3d28   :  { %v10602_v26 = vmax.f32 %v10526_v35, %v10598_v20  ;;  %v13533_v10 = vpop.f32.mrb[137].mxu1  ;;  %v13544_v38 = vpop.f32.mrb[137].mxu0  ;;  %v2880_v20 = vrot.slane %v2879_v39, 2 }
0x3d29   :  { %v7003_v10 = vrot.slane %v7002_v0, 4  ;;  %v11350_v38 = vadd.f32 -1.0, %v9750_v1 }
0x3d2a   :  { %v10673_v13 = vmax.f32 %v10602_v26, %v10669_v24  ;;  %v1507_v24 = vrot.slane %v1506_v7, 2  ;;  %v4255_v26 = vrot.slane %v4254_v33, 2 }
0x3d2f   :  { %v10740_v47 = vpop.f32.mrb[138].mxu1 }
0x3d30   :  { %v10744_v44 = vmax.f32 %v10673_v13, %v10740_v47  ;;  %v13555_v11 = vpop.f32.mrb[139].mxu1  ;;  %v8377_v47 = vmax.f32 %v11324_v18, 0.0 }
0x3d31   :  { %v1508_v11 = vadd.f32 %v1507_v24, %v1506_v7 }
0x3d32   :  { %v10745_v42 = vsub.f32 %v10526_v35, %v10744_v44  ;;  %v5628_v35 = vrot.slane %v5627_v40, 4  ;;  %v2881_v44 = vadd.f32 %v2880_v20, %v2879_v39 }
0x3d34   :  { %v10746_v62 = vmul.f32 1.442695, %v10745_v42  ;;  %v5629_v13 = vadd.f32 %v5628_v35, %v5627_v40 }
0x3d36   :  { %14585 = vpow2.f32 %v10746_v62  ;;  %v7004_v62 = vadd.f32 %v7003_v10, %v7002_v0 }
0x3d37   :  { %v10893_v22 = vpop.f32.mrb[140].mxu1 }
0x3d38   :  { %v13577_v45 = vpop.f32.mrb[141].mxu1  ;;  %v10897_v56 = vmax.f32 %v16210_v3, %v10893_v22  ;;  %v9752_v22 = vmax.f32 %v11350_v38, 0.0 }
0x3d39   :  { %v5630_v45 = vrot.slane %v5629_v13, 2 }
0x3d3f   :  { %v11035_v15 = vpop.f32.mrb[142].mxu1 }
0x3d40   :  { %v14586_v53 = vpop.eup %14585  ;;  %v13599_v46 = vpop.f32.mrb[143].mxu1 }
0x3d41   :  { %13565 = vmatmul.mubr.msk.f32.vlgmr.msra.gmra.mrb[138].mxu0 %vm106_vm1, %v14586_v53  ;;  %v2882_v53 = vrot.slane %v2881_v44, 1  ;;  %v1509_v46 = vrot.slane %v1508_v11, 1 }
0x3d42   :  { %14411 = vmatpush3.bf16.msra.mxu0 %v14803_v23  ;;  %13586 = vmatprep.mubr.msk.f32.mxu0 %vm14630_vm0, %v14631_v12 }
0x3d43   :  { %14412 = vmatprep.subr.bf16.mxu0 %v14629_v4 }
0x3d46   :  { %14414 = vmatpush3.bf16.msra.mxu0 %v14823_v29 }
0x3d47   :  { %14421 = vmatprep.subr.bf16.mxu0 %v14629_v4 }
0x3d49   :  { %13587 = vmatmul.mubr.msk.f32.vlgmr.msra.gmra.mrb[140].mxu0 %vm106_vm1, %v16210_v3 }
0x3d4a   :  { %14423 = vmatpush3.bf16.msra.mxu0 %v14882_v50  ;;  %13608 = vmatprep.mubr.msk.f32.mxu0 %vm14630_vm0, %v14631_v12 }
0x3d4b   :  { %14424 = vmatprep.subr.bf16.mxu0 %v14629_v4 }
0x3d4e   :  { %14426 = vmatpush3.bf16.msra.mxu0 %v14888_v52 }
0x3e14   :  { %v10817_v23 = vpop.f32.mrb[138].mxu0 }
0x3e15   :  { %v13566_v43 = vpop.f32.mrb[139].mxu0 }
0x3e16   :  { %v7005_v43 = vrot.slane %v7004_v62, 2 }
0x3e1c   :  { %v10964_v58 = vpop.f32.mrb[140].mxu0 }
0x3e1d   :  { %v10968_v29 = vmax.f32 %v10897_v56, %v10964_v58  ;;  %v13588_v2 = vpop.f32.mrb[141].mxu0  ;;  %v9753_v56 = vrot.slane %v9752_v22, 4  ;;  %v5631_v58 = vadd.f32 %v5630_v45, %v5629_v13 }
0x3e1e   :  { %v2883_v2 = vadd.f32 %v2882_v53, %v2881_v44 }
0x3e1f   :  { %v11039_v55 = vmax.f32 %v10968_v29, %v11035_v15  ;;  %v8378_v15 = vrot.slane %v8377_v47, 4 }
0x3e21   :  { %v11040_v57 = vsub.f32 %v16210_v3, %v11039_v55  ;;  %v8379_v29 = vadd.f32 %v8378_v15, %v8377_v47  ;;  %v1510_v55 = vadd.f32 %v1509_v46, %v1508_v11 }
0x3e23   :  { %v11041_v8 = vmul.f32 1.442695, %v11040_v57 }
0x3e25   :  { %14587 = vpow2.f32 %v11041_v8  ;;  %v7006_v8 = vadd.f32 %v7005_v43, %v7004_v62 }
0x3e26   :  { %14589 = vlog2.f32 %v10817_v23 }
0x3e2f   :  { %v14588_v50 = vpop.eup %14587 }
0x3e30   :  { %13609 = vmatmul.mubr.msk.f32.vlgmr.msra.gmra.mrb[142].mxu0 %vm106_vm1, %v14588_v50  ;;  %v14590_v52 = vpop.eup %14589  ;;  %v9754_v50 = vadd.f32 %v9753_v56, %v9752_v22 }
0x3e31   :  { %v10822_v60 = vmul.f32 0.6931472, %v14590_v52  ;;  %v2884_v52 = vadd.f32 %v2883_v2, %v1510_v55 }
0x3e33   :  { %v10823_v36 = vsub.f32 %v10745_v42, %v10822_v60  ;;  %v4256_v42 = vadd.f32 %v4255_v26, %v4254_v33 }
0x3e35   :  { %v4257_v23 = vrot.slane %v4256_v42, 1 }
0x3f03   :  { %v11112_v12 = vpop.f32.mrb[142].mxu0 }
0x3f04   :  { %14591 = vlog2.f32 %v11112_v12  ;;  %v13610_v4 = vpop.f32.mrb[143].mxu0  ;;  %v5632_v12 = vrot.slane %v5631_v58, 1 }
0x3f05   :  { %v8380_v4 = vrot.slane %v8379_v29, 2 }
0x3f0e   :  { %v14592_v17 = vpop.eup %14591 }
0x3f0f   :  { %v11117_v21 = vmul.f32 0.6931472, %v14592_v17  ;;  %v7007_v17 = vrot.slane %v7006_v8, 1 }
0x3f11   :  { %v11118_v9 = vsub.f32 %v11040_v57, %v11117_v21  ;;  %v4258_v57 = vadd.f32 %v4257_v23, %v4256_v42  ;;  %v9755_v21 = vrot.slane %v9754_v50, 2 }
0x3f13   :  { %v11119_v49 = vmul.f32 1.442695, %v11118_v9  ;;  %v11121_v16 = vsub.f32 %v11118_v9, %v10823_v36  ;;  %v4259_v60 = vadd.f32 %v4258_v57, %v2884_v52  ;;  %v5633_v9 = vadd.f32 %v5632_v12, %v5631_v58 }
0x3f15   :  { %14593 = vpow2.f32 %v11119_v49  ;;  %v8381_v49 = vadd.f32 %v8380_v4, %v8379_v29 }
0x3f17   :  { %v8382_v61 = vrot.slane %v8381_v49, 1 }
0x3f19   :  { %v8383_v63 = vadd.f32 %v8382_v61, %v8381_v49 }
0x3f1f   :  { %v14594_v37 = vpop.eup %14593 }
0x3f20   :  { %v11122_v3 = vmul.f32 %v14594_v37, %v11121_v16  ;;  %v5634_v37 = vadd.f32 %v5633_v9, %v4259_v60 }
0x3f22   :  { %v11123_v27 = vsel %vm106_vm1, %v11122_v3, 0.0  ;;  %v7008_v3 = vadd.f32 %v7007_v17, %v7006_v8 }
0x3f23   :  { %11124 = vadd.xlane.f32.xlu1 %v11123_v27  ;;  %v9756_v27 = vadd.f32 %v9755_v21, %v9754_v50 }
0x3f24   :  { %v7009_v54 = vadd.f32 %v7008_v3, %v5634_v37 }
0x3f25   :  { %v9757_v6 = vrot.slane %v9756_v27, 1 }
0x3f26   :  { %v8384_v30 = vadd.f32 %v8383_v63, %v7009_v54 }
0x3f27   :  { %v9758_v41 = vadd.f32 %v9757_v6, %v9756_v27 }
0x3f29   :  { %v9759_v51 = vadd.f32 %v9758_v41, %v8384_v30 }
0x3fb0   :  { %v11125_v36 = vpop.xlane.xlu1 %11124 }
0x3fb1   :  { %v11376_v16 = vadd.f32 -1.0, %v11125_v36 }
0x3fb3   :  { %v11127_v31 = vmax.f32 %v11376_v16, 0.0 }
0x3fb5   :  { %v11128_v28 = vrot.slane %v11127_v31, 4 }
0x3fb7   :  { %v11129_v14 = vadd.f32 %v11128_v28, %v11127_v31 }
0x3fb9   :  { %v11130_v48 = vrot.slane %v11129_v14, 2 }
0x3fbb   :  { %v11131_v25 = vadd.f32 %v11130_v48, %v11129_v14 }
0x3fbd   :  { %v11132_v32 = vrot.slane %v11131_v25, 1 }
0x3fbf   :  { %v11133_v5 = vadd.f32 %v11132_v32, %v11131_v25 }
0x3fc1   :  { %v11134_v34 = vadd.f32 %v11133_v5, %v9759_v51 }
0x3fc3   :  { %v11140_v59 = vmul.f32 0.015625, %v11134_v34 }
0x3fc5   :  { %11142 = vst.msk [vmem:[#allocation3] sm:$0x1] %vm11141_vm4, %v11140_v59 }
0x3fc6   :  { %14616 = shalt.err (!%p14613_p4)
}
0x3fc7   :  { %s14617_s8 = scalar_lea.hbm %s16384_s18, 16 }
0x3fc8   :  { %p14618_p5 = scmp.ne.s32.totalorder %s16384_s18, %s14617_s8  ;;  %p14621_p6 = scmp.lt.u32.totalorder %s14617_s8, %s16384_s18 }
0x3fca   :  { %p14623_p7 = pnand %p14621_p6, %p14618_p5 }
0x3fcc   :  { %14626 = shalt.err (!%p14623_p7)
}
0x3fcd   :  { %11156 = dma.vmem_to_hbm [thread:$0]  %s11154_s1, 16, %s16384_s18, [#allocation4]  }
0x3fce   :  { %14627 = dma.done.wait [#allocation4], 16  }
0x3fcf   :  { %14628 = vsyncadd [#allocation4], 4294967280 }
0x3fd0   :  { %11164 = vsyncpa [#allocation4], 1 }

</bundles_post_ra>
